<compile_context>
chip_gen: v6e
topology: v6e:2x2x1
jax: 0.10.0
libtpu: 0.0.40
codegen_flags: <defaults>
</compile_context>

<pallas_src>
import jax
import jax.numpy as jnp
from jax.experimental import pallas as pl
from jax.experimental.pallas import tpu as pltpu

LATENT_DIM = 512
EPS = 1e-5          # BatchNorm2d default eps
K = 5               # conv kernel size
PAD = 2             # conv padding
CPAD = 128          # lane-dense channel padding for the early conv layers
HPAD = 128          # padded hidden width of the MLP head (real width 30)
APAD = 128          # padded action width for the u @ W1u matmul

_ENC_STRIDES = (2, 2, 2)   # strides of the three im2col conv layers

# Small, explicit VMEM budget: actual footprint is a few MiB; 32 MiB is safe on
# v5e/v6e (128 MiB) and v7x (64 MiB) alike.
_COMPILER_PARAMS = pltpu.CompilerParams(vmem_limit_bytes=32 * 1024 * 1024)


def _round_up(x, m):
    return (x + m - 1) // m * m


# ----------------------------- Pallas kernels ------------------------------ #

def _conv_block_kernel(p_ref, w_ref, b_ref, g_ref, bt_ref, o_ref):
    """Fused conv-as-matmul (bf16 operands, f32 acc) + bias + ReLU + BatchNorm."""
    y = jnp.dot(p_ref[...], w_ref[...], preferred_element_type=jnp.float32)
    y = jnp.maximum(y + b_ref[...], 0.0)
    # BatchNorm2d training mode: per-channel stats over all N*H*W rows, biased
    # variance, then affine.  Pad channels are exactly zero (zero weights,
    # gamma=0, beta=0) so they stay zero.
    mean = jnp.mean(y, axis=0, keepdims=True)
    var = jnp.mean(jnp.square(y - mean), axis=0, keepdims=True)
    y = (y - mean) * jax.lax.rsqrt(var + EPS) * g_ref[...] + bt_ref[...]
    o_ref[...] = y.astype(o_ref.dtype)


def _tail_kernel(x3_ref, u_ref,
                 w3_ref, b3_ref, g3_ref, bt3_ref,
                 w4_ref, b4_ref, g4_ref, bt4_ref,
                 w5_ref, b5_ref,
                 w1x_ref, w1u_ref, b1_ref, w2_ref, b2_ref,
                 o_ref):
    """convs 4-6 (dead taps removed) + Flatten + fused MLP head, all in VMEM."""
    def bn(y, g, bt):
        mean = jnp.mean(y, axis=0, keepdims=True)
        var = jnp.mean(jnp.square(y - mean), axis=0, keepdims=True)
        return (y - mean) * jax.lax.rsqrt(var + EPS) * g + bt

    # conv4 (64->128, stride 4, 4x4 input): only the 3x3 taps over real pixels.
    y = jnp.dot(x3_ref[...], w3_ref[...], preferred_element_type=jnp.float32)
    y = bn(jnp.maximum(y + b3_ref[...], 0.0), g3_ref[...], bt3_ref[...])
    # conv5 (128->256, 1x1 input): center tap only.
    y = jnp.dot(y.astype(jnp.bfloat16), w4_ref[...], preferred_element_type=jnp.float32)
    y = bn(jnp.maximum(y + b4_ref[...], 0.0), g4_ref[...], bt4_ref[...])
    # conv6 (256->512, 1x1 input): center tap only, no ReLU / BN; Flatten == id.
    y = jnp.dot(y.astype(jnp.bfloat16), w5_ref[...], preferred_element_type=jnp.float32)
    y = y + b5_ref[...]
    # head: cat([x, u]) @ W1 == x @ W1x + u @ W1u  (hidden padded to 128 lanes)
    h = (jnp.dot(y.astype(jnp.bfloat16), w1x_ref[...], preferred_element_type=jnp.float32)
         + jnp.dot(u_ref[...], w1u_ref[...], preferred_element_type=jnp.float32)
         + b1_ref[...])
    h = jnp.maximum(h, 0.0)
    o_ref[...] = (jnp.dot(h.astype(jnp.bfloat16), w2_ref[...],
                          preferred_element_type=jnp.float32) + b2_ref[...])


# ------------------------------- wrappers ---------------------------------- #

def conv_block(patches, w, b, g, bt):
    # Gridless single block: M <= 512 here.  For large batch, add a grid over M
    # with dimension_semantics=("parallel",) and a two-pass BN accumulator.
    m = patches.shape[0]
    return pl.pallas_call(
        _conv_block_kernel,
        out_shape=jax.ShapeDtypeStruct((m, CPAD), jnp.bfloat16),
        compiler_params=_COMPILER_PARAMS,
    )(patches, w, b, g, bt)


def im2col_nhwc(x, stride):
    """x: [N, H, W, C] (NHWC). Returns patches [N*Ho*Wo, K*K*C], Ho, Wo.

    Column order is (kh, kw, c), matching the packed weight layout."""
    n, h, w, c = x.shape
    ho = (h + 2 * PAD - K) // stride + 1
    wo = (w + 2 * PAD - K) // stride + 1
    xp = jnp.pad(x, ((0, 0), (PAD, PAD), (PAD, PAD), (0, 0)))
    cols = []
    for i in range(K):
        for j in range(K):
            cols.append(xp[:, i:i + stride * (ho - 1) + 1:stride,
                           j:j + stride * (wo - 1) + 1:stride, :])
    p = jnp.stack(cols, axis=3)                 # [N, Ho, Wo, K*K, C]
    return p.reshape(n * ho * wo, K * K * c), ho, wo


# ------------------------------ parameters --------------------------------- #

def init_params(key, action_dim, img_stack):
    ks = jax.random.split(key, 16)
    p = {"conv": [], "tail": {}}

    # --- convs 1-3: Conv(k=5, s=2, p=2) -> ReLU -> BN, via im2col matmul ---
    # (cin_real, cout_real, cin_packed): inputs of layers 2-3 carry CPAD lanes.
    head_cfg = [(img_stack, 16, img_stack), (16, 32, CPAD), (32, 64, CPAD)]
    for i, (cin, cout, cin_packed) in enumerate(head_cfg):
        scale = 1.0 / (cin * K * K) ** 0.5
        w = jax.random.uniform(ks[2 * i], (cout, cin, K, K), jnp.float32, -scale, scale)
        b = jax.random.uniform(ks[2 * i + 1], (cout,), jnp.float32, -scale, scale)
        wp = jnp.zeros((CPAD, cin_packed, K, K), jnp.float32).at[:cout, :cin].set(w)
        wmat = wp.transpose(2, 3, 1, 0).reshape(K * K * cin_packed, CPAD)  # (kh,kw,cin) rows
        kdim = _round_up(wmat.shape[0], 128)
        wmat = jnp.pad(wmat, ((0, kdim - wmat.shape[0]), (0, 0)))
        p["conv"].append((
            wmat.astype(jnp.bfloat16),
            jnp.zeros((1, CPAD), jnp.float32).at[0, :cout].set(b),
            jnp.zeros((1, CPAD), jnp.float32).at[0, :cout].set(1.0),   # gamma (0 on pad)
            jnp.zeros((1, CPAD), jnp.float32),                          # beta
        ))

    t = p["tail"]
    # conv4: 64 -> 128, stride 4; 4x4 input => only taps kh,kw in {2,3,4} live.
    scale = 1.0 / (64 * K * K) ** 0.5
    w = jax.random.uniform(ks[6], (128, 64, K, K), jnp.float32, -scale, scale)
    b = jax.random.uniform(ks[7], (128,), jnp.float32, -scale, scale)
    wp = jnp.zeros((128, CPAD, 3, 3), jnp.float32).at[:, :64].set(w[:, :, 2:5, 2:5])
    t["w3"] = wp.transpose(2, 3, 1, 0).reshape(9 * CPAD, 128).astype(jnp.bfloat16)
    t["b3"] = b.reshape(1, 128)
    t["g3"] = jnp.ones((1, 128), jnp.float32)
    t["bt3"] = jnp.zeros((1, 128), jnp.float32)

    # conv5: 128 -> 256, stride 2; 1x1 input => center tap only.
    scale = 1.0 / (128 * K * K) ** 0.5
    w = jax.random.uniform(ks[8], (256, 128, K, K), jnp.float32, -scale, scale)
    b = jax.random.uniform(ks[9], (256,), jnp.float32, -scale, scale)
    t["w4"] = w[:, :, 2, 2].T.astype(jnp.bfloat16)            # [128, 256]
    t["b4"] = b.reshape(1, 256)
    t["g4"] = jnp.ones((1, 256), jnp.float32)
    t["bt4"] = jnp.zeros((1, 256), jnp.float32)

    # conv6: 256 -> 512, stride 2; center tap only; no ReLU / BN.
    scale = 1.0 / (256 * K * K) ** 0.5
    w = jax.random.uniform(ks[10], (512, 256, K, K), jnp.float32, -scale, scale)
    b = jax.random.uniform(ks[11], (512,), jnp.float32, -scale, scale)
    t["w5"] = w[:, :, 2, 2].T.astype(jnp.bfloat16)            # [256, 512]
    t["b5"] = b.reshape(1, 512)

    # head: Linear(512 + action_dim, 30) -> ReLU -> Linear(30, 1), split & padded.
    d_in = LATENT_DIM + action_dim
    s1, s2 = 1.0 / d_in ** 0.5, 1.0 / 30.0 ** 0.5
    w1 = jax.random.uniform(ks[12], (d_in, 30), jnp.float32, -s1, s1)
    b1 = jax.random.uniform(ks[13], (30,), jnp.float32, -s1, s1)
    w2 = jax.random.uniform(ks[14], (30, 1), jnp.float32, -s2, s2)
    b2 = jax.random.uniform(ks[15], (1,), jnp.float32, -s2, s2)
    t["w1x"] = (jnp.zeros((LATENT_DIM, HPAD), jnp.float32)
                .at[:, :30].set(w1[:LATENT_DIM])).astype(jnp.bfloat16)
    t["w1u"] = (jnp.zeros((APAD, HPAD), jnp.float32)
                .at[:action_dim, :30].set(w1[LATENT_DIM:])).astype(jnp.bfloat16)
    t["b1"] = jnp.zeros((1, HPAD), jnp.float32).at[0, :30].set(b1)
    t["w2"] = (jnp.zeros((HPAD, 1), jnp.float32).at[:30, 0].set(w2[:, 0])).astype(jnp.bfloat16)
    t["b2"] = b2.reshape(1, 1)
    return p


# ------------------------------- forward ----------------------------------- #

def critic_forward(params, x, u):
    """x: [N, img_stack, 32, 32] (NCHW), u: [N, action_dim] -> [N, 1] f32."""
    n = x.shape[0]
    x = jnp.transpose(x, (0, 2, 3, 1)).astype(jnp.bfloat16)       # NHWC, bf16
    for (wmat, b, g, bt), stride in zip(params["conv"], _ENC_STRIDES):
        patches, ho, wo = im2col_nhwc(x, stride)
        kdim = wmat.shape[0]
        if patches.shape[1] < kdim:                                # lane-align contraction
            patches = jnp.pad(patches, ((0, 0), (0, kdim - patches.shape[1])))
        y = conv_block(patches, wmat, b, g, bt)                    # [N*Ho*Wo, 128] bf16
        x = y.reshape(n, ho, wo, CPAD)

    # Spatial extents collapse 4x4 -> 1x1 -> 1x1 -> 1x1: drop the all-zero
    # padding taps exactly and run convs 4-6 + the head in one fused kernel.
    assert x.shape[1:3] == (4, 4), "tail kernel is specialised to 32x32 inputs"
    x3 = x[:, 0:3, 0:3, :].reshape(n, 9 * CPAD)                    # live 3x3 window of conv4
    u_p = jnp.pad(u.astype(jnp.bfloat16), ((0, 0), (0, APAD - u.shape[1])))
    t = params["tail"]
    return pl.pallas_call(
        _tail_kernel,
        out_shape=jax.ShapeDtypeStruct((n, 1), jnp.float32),
        compiler_params=_COMPILER_PARAMS,
    )(x3, u_p,
      t["w3"], t["b3"], t["g3"], t["bt3"],
      t["w4"], t["b4"], t["g4"], t["bt4"],
      t["w5"], t["b5"],
      t["w1x"], t["w1u"], t["b1"], t["w2"], t["b2"])


# TODO(synk): BatchNorm running-stat (momentum) updates are a training-mode side
# effect that does not change the forward output; they are not tracked here.


if __name__ == "__main__":
    action_dim, img_stack = 3, 4
    key = jax.random.PRNGKey(0)
    kp, kx, ku = jax.random.split(key, 3)
    params = init_params(kp, action_dim, img_stack)
    # 32x32 reduces to 1x1 through strides (2,2,2,4,2,2) => latent_dim = 512.
    x = jax.random.normal(kx, (2, img_stack, 32, 32), jnp.float32)
    u = jax.random.normal(ku, (2, action_dim), jnp.float32)
    q = jax.jit(critic_forward)(params, x, u)
    jax.block_until_ready(q)
    assert q.shape == (2, 1) and q.dtype == jnp.float32
    print("KERNEL_OK")
</pallas_src>

<mosaic_0001>
module attributes {stable_mosaic.version = 11 : i64} {
  func.func @_conv_block_kernel(%arg0: memref<512x128xbf16, #tpu.memory_space<vmem>>, %arg1: memref<128x128xbf16, #tpu.memory_space<vmem>>, %arg2: memref<1x128xf32, #tpu.memory_space<vmem>>, %arg3: memref<1x128xf32, #tpu.memory_space<vmem>>, %arg4: memref<1x128xf32, #tpu.memory_space<vmem>>, %arg5: memref<512x128xbf16, #tpu.memory_space<vmem>>) attributes {dimension_semantics = [], scalar_prefetch = 0 : i64, scratch_operands = 0 : i64, tpu.core_type = #tpu.core_type<tc>} {
    %c0 = arith.constant 0 : index
    %c0_0 = arith.constant 0 : index
    %0 = vector.load %arg0[%c0, %c0_0] : memref<512x128xbf16, #tpu.memory_space<vmem>>, vector<512x128xbf16>
    %c0_1 = arith.constant 0 : index
    %c0_2 = arith.constant 0 : index
    %1 = vector.load %arg1[%c0_1, %c0_2] : memref<128x128xbf16, #tpu.memory_space<vmem>>, vector<128x128xbf16>
    %cst = arith.constant dense<0.000000e+00> : vector<512x128xf32>
    %2 = tpu.matmul %0, %1, %cst {dimension_numbers = #tpu.dot_dimension_numbers<[1], [0], [0], [1], [0, 0, 1, 1], [], []>} : vector<512x128xbf16>, vector<128x128xbf16>, vector<512x128xf32> -> vector<512x128xf32>
    %c0_3 = arith.constant 0 : index
    %c0_4 = arith.constant 0 : index
    %3 = vector.load %arg2[%c0_3, %c0_4] : memref<1x128xf32, #tpu.memory_space<vmem>>, vector<1x128xf32>
    %4 = vector.broadcast %3 : vector<1x128xf32> to vector<512x128xf32>
    %5 = arith.addf %2, %4 : vector<512x128xf32>
    %cst_5 = arith.constant 0.000000e+00 : f32
    %6 = vector.broadcast %cst_5 : f32 to vector<512x128xf32>
    %7 = arith.maximumf %5, %6 : vector<512x128xf32>
    %cst_6 = arith.constant dense<0.000000e+00> : vector<128xf32>
    %8 = vector.multi_reduction <add>, %7, %cst_6 [0] : vector<512x128xf32> to vector<128xf32>
    %9 = vector.shape_cast %8 : vector<128xf32> to vector<1x128xf32>
    %cst_7 = arith.constant 5.120000e+02 : f32
    %10 = vector.broadcast %cst_7 : f32 to vector<1x128xf32>
    %11 = arith.divf %9, %10 : vector<1x128xf32>
    %12 = vector.broadcast %11 : vector<1x128xf32> to vector<512x128xf32>
    %13 = arith.subf %7, %12 : vector<512x128xf32>
    %14 = arith.mulf %13, %13 : vector<512x128xf32>
    %cst_8 = arith.constant dense<0.000000e+00> : vector<128xf32>
    %15 = vector.multi_reduction <add>, %14, %cst_8 [0] : vector<512x128xf32> to vector<128xf32>
    %16 = vector.shape_cast %15 : vector<128xf32> to vector<1x128xf32>
    %cst_9 = arith.constant 5.120000e+02 : f32
    %17 = vector.broadcast %cst_9 : f32 to vector<1x128xf32>
    %18 = arith.divf %16, %17 : vector<1x128xf32>
    %19 = vector.broadcast %11 : vector<1x128xf32> to vector<512x128xf32>
    %20 = arith.subf %7, %19 : vector<512x128xf32>
    %cst_10 = arith.constant 9.99999974E-6 : f32
    %21 = vector.broadcast %cst_10 : f32 to vector<1x128xf32>
    %22 = arith.addf %18, %21 : vector<1x128xf32>
    %23 = math.rsqrt %22 : vector<1x128xf32>
    %24 = vector.broadcast %23 : vector<1x128xf32> to vector<512x128xf32>
    %25 = arith.mulf %20, %24 : vector<512x128xf32>
    %c0_11 = arith.constant 0 : index
    %c0_12 = arith.constant 0 : index
    %26 = vector.load %arg3[%c0_11, %c0_12] : memref<1x128xf32, #tpu.memory_space<vmem>>, vector<1x128xf32>
    %27 = vector.broadcast %26 : vector<1x128xf32> to vector<512x128xf32>
    %28 = arith.mulf %25, %27 : vector<512x128xf32>
    %c0_13 = arith.constant 0 : index
    %c0_14 = arith.constant 0 : index
    %29 = vector.load %arg4[%c0_13, %c0_14] : memref<1x128xf32, #tpu.memory_space<vmem>>, vector<1x128xf32>
    %30 = vector.broadcast %29 : vector<1x128xf32> to vector<512x128xf32>
    %31 = arith.addf %28, %30 : vector<512x128xf32>
    %32 = arith.truncf %31 : vector<512x128xf32> to vector<512x128xbf16>
    %c0_15 = arith.constant 0 : index
    %c0_16 = arith.constant 0 : index
    %33 = vector.load %arg5[%c0_15, %c0_16] : memref<512x128xbf16, #tpu.memory_space<vmem>>, vector<512x128xbf16>
    tpu.vector_store %arg5[%c0_15, %c0_16], %32 {strides = array<i32>} : memref<512x128xbf16, #tpu.memory_space<vmem>>, vector<512x128xbf16>,
    return
  }
}

module attributes {stable_mosaic.version = 11 : i64} {
  func.func @_conv_block_kernel(%arg0: memref<128x3200xbf16, #tpu.memory_space<vmem>>, %arg1: memref<3200x128xbf16, #tpu.memory_space<vmem>>, %arg2: memref<1x128xf32, #tpu.memory_space<vmem>>, %arg3: memref<1x128xf32, #tpu.memory_space<vmem>>, %arg4: memref<1x128xf32, #tpu.memory_space<vmem>>, %arg5: memref<128x128xbf16, #tpu.memory_space<vmem>>) attributes {dimension_semantics = [], scalar_prefetch = 0 : i64, scratch_operands = 0 : i64, tpu.core_type = #tpu.core_type<tc>} {
    %c0 = arith.constant 0 : index
    %c0_0 = arith.constant 0 : index
    %0 = vector.load %arg0[%c0, %c0_0] : memref<128x3200xbf16, #tpu.memory_space<vmem>>, vector<128x3200xbf16>
    %c0_1 = arith.constant 0 : index
    %c0_2 = arith.constant 0 : index
    %1 = vector.load %arg1[%c0_1, %c0_2] : memref<3200x128xbf16, #tpu.memory_space<vmem>>, vector<3200x128xbf16>
    %cst = arith.constant dense<0.000000e+00> : vector<128x128xf32>
    %2 = tpu.matmul %0, %1, %cst {dimension_numbers = #tpu.dot_dimension_numbers<[1], [0], [0], [1], [0, 0, 1, 1], [], []>} : vector<128x3200xbf16>, vector<3200x128xbf16>, vector<128x128xf32> -> vector<128x128xf32>
    %c0_3 = arith.constant 0 : index
    %c0_4 = arith.constant 0 : index
    %3 = vector.load %arg2[%c0_3, %c0_4] : memref<1x128xf32, #tpu.memory_space<vmem>>, vector<1x128xf32>
    %4 = vector.broadcast %3 : vector<1x128xf32> to vector<128x128xf32>
    %5 = arith.addf %2, %4 : vector<128x128xf32>
    %cst_5 = arith.constant 0.000000e+00 : f32
    %6 = vector.broadcast %cst_5 : f32 to vector<128x128xf32>
    %7 = arith.maximumf %5, %6 : vector<128x128xf32>
    %cst_6 = arith.constant dense<0.000000e+00> : vector<128xf32>
    %8 = vector.multi_reduction <add>, %7, %cst_6 [0] : vector<128x128xf32> to vector<128xf32>
    %9 = vector.shape_cast %8 : vector<128xf32> to vector<1x128xf32>
    %cst_7 = arith.constant 1.280000e+02 : f32
    %10 = vector.broadcast %cst_7 : f32 to vector<1x128xf32>
    %11 = arith.divf %9, %10 : vector<1x128xf32>
    %12 = vector.broadcast %11 : vector<1x128xf32> to vector<128x128xf32>
    %13 = arith.subf %7, %12 : vector<128x128xf32>
    %14 = arith.mulf %13, %13 : vector<128x128xf32>
    %cst_8 = arith.constant dense<0.000000e+00> : vector<128xf32>
    %15 = vector.multi_reduction <add>, %14, %cst_8 [0] : vector<128x128xf32> to vector<128xf32>
    %16 = vector.shape_cast %15 : vector<128xf32> to vector<1x128xf32>
    %cst_9 = arith.constant 1.280000e+02 : f32
    %17 = vector.broadcast %cst_9 : f32 to vector<1x128xf32>
    %18 = arith.divf %16, %17 : vector<1x128xf32>
    %19 = vector.broadcast %11 : vector<1x128xf32> to vector<128x128xf32>
    %20 = arith.subf %7, %19 : vector<128x128xf32>
    %cst_10 = arith.constant 9.99999974E-6 : f32
    %21 = vector.broadcast %cst_10 : f32 to vector<1x128xf32>
    %22 = arith.addf %18, %21 : vector<1x128xf32>
    %23 = math.rsqrt %22 : vector<1x128xf32>
    %24 = vector.broadcast %23 : vector<1x128xf32> to vector<128x128xf32>
    %25 = arith.mulf %20, %24 : vector<128x128xf32>
    %c0_11 = arith.constant 0 : index
    %c0_12 = arith.constant 0 : index
    %26 = vector.load %arg3[%c0_11, %c0_12] : memref<1x128xf32, #tpu.memory_space<vmem>>, vector<1x128xf32>
    %27 = vector.broadcast %26 : vector<1x128xf32> to vector<128x128xf32>
    %28 = arith.mulf %25, %27 : vector<128x128xf32>
    %c0_13 = arith.constant 0 : index
    %c0_14 = arith.constant 0 : index
    %29 = vector.load %arg4[%c0_13, %c0_14] : memref<1x128xf32, #tpu.memory_space<vmem>>, vector<1x128xf32>
    %30 = vector.broadcast %29 : vector<1x128xf32> to vector<128x128xf32>
    %31 = arith.addf %28, %30 : vector<128x128xf32>
    %32 = arith.truncf %31 : vector<128x128xf32> to vector<128x128xbf16>
    %c0_15 = arith.constant 0 : index
    %c0_16 = arith.constant 0 : index
    %33 = vector.load %arg5[%c0_15, %c0_16] : memref<128x128xbf16, #tpu.memory_space<vmem>>, vector<128x128xbf16>
    tpu.vector_store %arg5[%c0_15, %c0_16], %32 {strides = array<i32>} : memref<128x128xbf16, #tpu.memory_space<vmem>>, vector<128x128xbf16>,
    return
  }
}

module attributes {stable_mosaic.version = 11 : i64} {
  func.func @_conv_block_kernel(%arg0: memref<32x3200xbf16, #tpu.memory_space<vmem>>, %arg1: memref<3200x128xbf16, #tpu.memory_space<vmem>>, %arg2: memref<1x128xf32, #tpu.memory_space<vmem>>, %arg3: memref<1x128xf32, #tpu.memory_space<vmem>>, %arg4: memref<1x128xf32, #tpu.memory_space<vmem>>, %arg5: memref<32x128xbf16, #tpu.memory_space<vmem>>) attributes {dimension_semantics = [], scalar_prefetch = 0 : i64, scratch_operands = 0 : i64, tpu.core_type = #tpu.core_type<tc>} {
    %c0 = arith.constant 0 : index
    %c0_0 = arith.constant 0 : index
    %0 = vector.load %arg0[%c0, %c0_0] : memref<32x3200xbf16, #tpu.memory_space<vmem>>, vector<32x3200xbf16>
    %c0_1 = arith.constant 0 : index
    %c0_2 = arith.constant 0 : index
    %1 = vector.load %arg1[%c0_1, %c0_2] : memref<3200x128xbf16, #tpu.memory_space<vmem>>, vector<3200x128xbf16>
    %cst = arith.constant dense<0.000000e+00> : vector<32x128xf32>
    %2 = tpu.matmul %0, %1, %cst {dimension_numbers = #tpu.dot_dimension_numbers<[1], [0], [0], [1], [0, 0, 1, 1], [], []>} : vector<32x3200xbf16>, vector<3200x128xbf16>, vector<32x128xf32> -> vector<32x128xf32>
    %c0_3 = arith.constant 0 : index
    %c0_4 = arith.constant 0 : index
    %3 = vector.load %arg2[%c0_3, %c0_4] : memref<1x128xf32, #tpu.memory_space<vmem>>, vector<1x128xf32>
    %4 = vector.broadcast %3 : vector<1x128xf32> to vector<32x128xf32>
    %5 = arith.addf %2, %4 : vector<32x128xf32>
    %cst_5 = arith.constant 0.000000e+00 : f32
    %6 = vector.broadcast %cst_5 : f32 to vector<32x128xf32>
    %7 = arith.maximumf %5, %6 : vector<32x128xf32>
    %cst_6 = arith.constant dense<0.000000e+00> : vector<128xf32>
    %8 = vector.multi_reduction <add>, %7, %cst_6 [0] : vector<32x128xf32> to vector<128xf32>
    %9 = vector.shape_cast %8 : vector<128xf32> to vector<1x128xf32>
    %cst_7 = arith.constant 3.200000e+01 : f32
    %10 = vector.broadcast %cst_7 : f32 to vector<1x128xf32>
    %11 = arith.divf %9, %10 : vector<1x128xf32>
    %12 = vector.broadcast %11 : vector<1x128xf32> to vector<32x128xf32>
    %13 = arith.subf %7, %12 : vector<32x128xf32>
    %14 = arith.mulf %13, %13 : vector<32x128xf32>
    %cst_8 = arith.constant dense<0.000000e+00> : vector<128xf32>
    %15 = vector.multi_reduction <add>, %14, %cst_8 [0] : vector<32x128xf32> to vector<128xf32>
    %16 = vector.shape_cast %15 : vector<128xf32> to vector<1x128xf32>
    %cst_9 = arith.constant 3.200000e+01 : f32
    %17 = vector.broadcast %cst_9 : f32 to vector<1x128xf32>
    %18 = arith.divf %16, %17 : vector<1x128xf32>
    %19 = vector.broadcast %11 : vector<1x128xf32> to vector<32x128xf32>
    %20 = arith.subf %7, %19 : vector<32x128xf32>
    %cst_10 = arith.constant 9.99999974E-6 : f32
    %21 = vector.broadcast %cst_10 : f32 to vector<1x128xf32>
    %22 = arith.addf %18, %21 : vector<1x128xf32>
    %23 = math.rsqrt %22 : vector<1x128xf32>
    %24 = vector.broadcast %23 : vector<1x128xf32> to vector<32x128xf32>
    %25 = arith.mulf %20, %24 : vector<32x128xf32>
    %c0_11 = arith.constant 0 : index
    %c0_12 = arith.constant 0 : index
    %26 = vector.load %arg3[%c0_11, %c0_12] : memref<1x128xf32, #tpu.memory_space<vmem>>, vector<1x128xf32>
    %27 = vector.broadcast %26 : vector<1x128xf32> to vector<32x128xf32>
    %28 = arith.mulf %25, %27 : vector<32x128xf32>
    %c0_13 = arith.constant 0 : index
    %c0_14 = arith.constant 0 : index
    %29 = vector.load %arg4[%c0_13, %c0_14] : memref<1x128xf32, #tpu.memory_space<vmem>>, vector<1x128xf32>
    %30 = vector.broadcast %29 : vector<1x128xf32> to vector<32x128xf32>
    %31 = arith.addf %28, %30 : vector<32x128xf32>
    %32 = arith.truncf %31 : vector<32x128xf32> to vector<32x128xbf16>
    %c0_15 = arith.constant 0 : index
    %c0_16 = arith.constant 0 : index
    %33 = vector.load %arg5[%c0_15, %c0_16] : memref<32x128xbf16, #tpu.memory_space<vmem>>, vector<32x128xbf16>
    tpu.vector_store %arg5[%c0_15, %c0_16], %32 {strides = array<i32>} : memref<32x128xbf16, #tpu.memory_space<vmem>>, vector<32x128xbf16>,
    return
  }
}

module attributes {stable_mosaic.version = 11 : i64} {
  func.func @_tail_kernel(%arg0: memref<2x1152xbf16, #tpu.memory_space<vmem>>, %arg1: memref<2x128xbf16, #tpu.memory_space<vmem>>, %arg2: memref<1152x128xbf16, #tpu.memory_space<vmem>>, %arg3: memref<1x128xf32, #tpu.memory_space<vmem>>, %arg4: memref<1x128xf32, #tpu.memory_space<vmem>>, %arg5: memref<1x128xf32, #tpu.memory_space<vmem>>, %arg6: memref<128x256xbf16, #tpu.memory_space<vmem>>, %arg7: memref<1x256xf32, #tpu.memory_space<vmem>>, %arg8: memref<1x256xf32, #tpu.memory_space<vmem>>, %arg9: memref<1x256xf32, #tpu.memory_space<vmem>>, %arg10: memref<256x512xbf16, #tpu.memory_space<vmem>>, %arg11: memref<1x512xf32, #tpu.memory_space<vmem>>, %arg12: memref<512x128xbf16, #tpu.memory_space<vmem>>, %arg13: memref<128x128xbf16, #tpu.memory_space<vmem>>, %arg14: memref<1x128xf32, #tpu.memory_space<vmem>>, %arg15: memref<128x1xbf16, #tpu.memory_space<vmem>>, %arg16: memref<1x1xf32, #tpu.memory_space<vmem>>, %arg17: memref<2x1xf32, #tpu.memory_space<vmem>>) attributes {dimension_semantics = [], scalar_prefetch = 0 : i64, scratch_operands = 0 : i64, tpu.core_type = #tpu.core_type<tc>} {
    %c0 = arith.constant 0 : index
    %c0_0 = arith.constant 0 : index
    %0 = vector.load %arg0[%c0, %c0_0] : memref<2x1152xbf16, #tpu.memory_space<vmem>>, vector<2x1152xbf16>
    %c0_1 = arith.constant 0 : index
    %c0_2 = arith.constant 0 : index
    %1 = vector.load %arg2[%c0_1, %c0_2] : memref<1152x128xbf16, #tpu.memory_space<vmem>>, vector<1152x128xbf16>
    %cst = arith.constant dense<0.000000e+00> : vector<2x128xf32>
    %2 = tpu.matmul %0, %1, %cst {dimension_numbers = #tpu.dot_dimension_numbers<[1], [0], [0], [1], [0, 0, 1, 1], [], []>} : vector<2x1152xbf16>, vector<1152x128xbf16>, vector<2x128xf32> -> vector<2x128xf32>
    %c0_3 = arith.constant 0 : index
    %c0_4 = arith.constant 0 : index
    %3 = vector.load %arg3[%c0_3, %c0_4] : memref<1x128xf32, #tpu.memory_space<vmem>>, vector<1x128xf32>
    %4 = vector.broadcast %3 : vector<1x128xf32> to vector<2x128xf32>
    %5 = arith.addf %2, %4 : vector<2x128xf32>
    %cst_5 = arith.constant 0.000000e+00 : f32
    %6 = vector.broadcast %cst_5 : f32 to vector<2x128xf32>
    %7 = arith.maximumf %5, %6 : vector<2x128xf32>
    %c0_6 = arith.constant 0 : index
    %c0_7 = arith.constant 0 : index
    %8 = vector.load %arg4[%c0_6, %c0_7] : memref<1x128xf32, #tpu.memory_space<vmem>>, vector<1x128xf32>
    %c0_8 = arith.constant 0 : index
    %c0_9 = arith.constant 0 : index
    %9 = vector.load %arg5[%c0_8, %c0_9] : memref<1x128xf32, #tpu.memory_space<vmem>>, vector<1x128xf32>
    %cst_10 = arith.constant dense<0.000000e+00> : vector<128xf32>
    %10 = vector.multi_reduction <add>, %7, %cst_10 [0] : vector<2x128xf32> to vector<128xf32>
    %11 = vector.shape_cast %10 : vector<128xf32> to vector<1x128xf32>
    %cst_11 = arith.constant 2.000000e+00 : f32
    %12 = vector.broadcast %cst_11 : f32 to vector<1x128xf32>
    %13 = arith.divf %11, %12 : vector<1x128xf32>
    %14 = vector.broadcast %13 : vector<1x128xf32> to vector<2x128xf32>
    %15 = arith.subf %7, %14 : vector<2x128xf32>
    %16 = arith.mulf %15, %15 : vector<2x128xf32>
    %cst_12 = arith.constant dense<0.000000e+00> : vector<128xf32>
    %17 = vector.multi_reduction <add>, %16, %cst_12 [0] : vector<2x128xf32> to vector<128xf32>
    %18 = vector.shape_cast %17 : vector<128xf32> to vector<1x128xf32>
    %cst_13 = arith.constant 2.000000e+00 : f32
    %19 = vector.broadcast %cst_13 : f32 to vector<1x128xf32>
    %20 = arith.divf %18, %19 : vector<1x128xf32>
    %21 = vector.broadcast %13 : vector<1x128xf32> to vector<2x128xf32>
    %22 = arith.subf %7, %21 : vector<2x128xf32>
    %cst_14 = arith.constant 9.99999974E-6 : f32
    %23 = vector.broadcast %cst_14 : f32 to vector<1x128xf32>
    %24 = arith.addf %20, %23 : vector<1x128xf32>
    %25 = math.rsqrt %24 : vector<1x128xf32>
    %26 = vector.broadcast %25 : vector<1x128xf32> to vector<2x128xf32>
    %27 = arith.mulf %22, %26 : vector<2x128xf32>
    %28 = vector.broadcast %8 : vector<1x128xf32> to vector<2x128xf32>
    %29 = arith.mulf %27, %28 : vector<2x128xf32>
    %30 = vector.broadcast %9 : vector<1x128xf32> to vector<2x128xf32>
    %31 = arith.addf %29, %30 : vector<2x128xf32>
    %32 = arith.truncf %31 : vector<2x128xf32> to vector<2x128xbf16>
    %c0_15 = arith.constant 0 : index
    %c0_16 = arith.constant 0 : index
    %33 = vector.load %arg6[%c0_15, %c0_16] : memref<128x256xbf16, #tpu.memory_space<vmem>>, vector<128x256xbf16>
    %cst_17 = arith.constant dense<0.000000e+00> : vector<2x256xf32>
    %34 = tpu.matmul %32, %33, %cst_17 {dimension_numbers = #tpu.dot_dimension_numbers<[1], [0], [0], [1], [0, 0, 1, 1], [], []>} : vector<2x128xbf16>, vector<128x256xbf16>, vector<2x256xf32> -> vector<2x256xf32>
    %c0_18 = arith.constant 0 : index
    %c0_19 = arith.constant 0 : index
    %35 = vector.load %arg7[%c0_18, %c0_19] : memref<1x256xf32, #tpu.memory_space<vmem>>, vector<1x256xf32>
    %36 = vector.broadcast %35 : vector<1x256xf32> to vector<2x256xf32>
    %37 = arith.addf %34, %36 : vector<2x256xf32>
    %cst_20 = arith.constant 0.000000e+00 : f32
    %38 = vector.broadcast %cst_20 : f32 to vector<2x256xf32>
    %39 = arith.maximumf %37, %38 : vector<2x256xf32>
    %c0_21 = arith.constant 0 : index
    %c0_22 = arith.constant 0 : index
    %40 = vector.load %arg8[%c0_21, %c0_22] : memref<1x256xf32, #tpu.memory_space<vmem>>, vector<1x256xf32>
    %c0_23 = arith.constant 0 : index
    %c0_24 = arith.constant 0 : index
    %41 = vector.load %arg9[%c0_23, %c0_24] : memref<1x256xf32, #tpu.memory_space<vmem>>, vector<1x256xf32>
    %cst_25 = arith.constant dense<0.000000e+00> : vector<256xf32>
    %42 = vector.multi_reduction <add>, %39, %cst_25 [0] : vector<2x256xf32> to vector<256xf32>
    %43 = vector.shape_cast %42 : vector<256xf32> to vector<1x256xf32>
    %cst_26 = arith.constant 2.000000e+00 : f32
    %44 = vector.broadcast %cst_26 : f32 to vector<1x256xf32>
    %45 = arith.divf %43, %44 : vector<1x256xf32>
    %46 = vector.broadcast %45 : vector<1x256xf32> to vector<2x256xf32>
    %47 = arith.subf %39, %46 : vector<2x256xf32>
    %48 = arith.mulf %47, %47 : vector<2x256xf32>
    %cst_27 = arith.constant dense<0.000000e+00> : vector<256xf32>
    %49 = vector.multi_reduction <add>, %48, %cst_27 [0] : vector<2x256xf32> to vector<256xf32>
    %50 = vector.shape_cast %49 : vector<256xf32> to vector<1x256xf32>
    %cst_28 = arith.constant 2.000000e+00 : f32
    %51 = vector.broadcast %cst_28 : f32 to vector<1x256xf32>
    %52 = arith.divf %50, %51 : vector<1x256xf32>
    %53 = vector.broadcast %45 : vector<1x256xf32> to vector<2x256xf32>
    %54 = arith.subf %39, %53 : vector<2x256xf32>
    %cst_29 = arith.constant 9.99999974E-6 : f32
    %55 = vector.broadcast %cst_29 : f32 to vector<1x256xf32>
    %56 = arith.addf %52, %55 : vector<1x256xf32>
    %57 = math.rsqrt %56 : vector<1x256xf32>
    %58 = vector.broadcast %57 : vector<1x256xf32> to vector<2x256xf32>
    %59 = arith.mulf %54, %58 : vector<2x256xf32>
    %60 = vector.broadcast %40 : vector<1x256xf32> to vector<2x256xf32>
    %61 = arith.mulf %59, %60 : vector<2x256xf32>
    %62 = vector.broadcast %41 : vector<1x256xf32> to vector<2x256xf32>
    %63 = arith.addf %61, %62 : vector<2x256xf32>
    %64 = arith.truncf %63 : vector<2x256xf32> to vector<2x256xbf16>
    %c0_30 = arith.constant 0 : index
    %c0_31 = arith.constant 0 : index
    %65 = vector.load %arg10[%c0_30, %c0_31] : memref<256x512xbf16, #tpu.memory_space<vmem>>, vector<256x512xbf16>
    %cst_32 = arith.constant dense<0.000000e+00> : vector<2x512xf32>
    %66 = tpu.matmul %64, %65, %cst_32 {dimension_numbers = #tpu.dot_dimension_numbers<[1], [0], [0], [1], [0, 0, 1, 1], [], []>} : vector<2x256xbf16>, vector<256x512xbf16>, vector<2x512xf32> -> vector<2x512xf32>
    %c0_33 = arith.constant 0 : index
    %c0_34 = arith.constant 0 : index
    %67 = vector.load %arg11[%c0_33, %c0_34] : memref<1x512xf32, #tpu.memory_space<vmem>>, vector<1x512xf32>
    %68 = vector.broadcast %67 : vector<1x512xf32> to vector<2x512xf32>
    %69 = arith.addf %66, %68 : vector<2x512xf32>
    %70 = arith.truncf %69 : vector<2x512xf32> to vector<2x512xbf16>
    %c0_35 = arith.constant 0 : index
    %c0_36 = arith.constant 0 : index
    %71 = vector.load %arg12[%c0_35, %c0_36] : memref<512x128xbf16, #tpu.memory_space<vmem>>, vector<512x128xbf16>
    %cst_37 = arith.constant dense<0.000000e+00> : vector<2x128xf32>
    %72 = tpu.matmul %70, %71, %cst_37 {dimension_numbers = #tpu.dot_dimension_numbers<[1], [0], [0], [1], [0, 0, 1, 1], [], []>} : vector<2x512xbf16>, vector<512x128xbf16>, vector<2x128xf32> -> vector<2x128xf32>
    %c0_38 = arith.constant 0 : index
    %c0_39 = arith.constant 0 : index
    %73 = vector.load %arg1[%c0_38, %c0_39] : memref<2x128xbf16, #tpu.memory_space<vmem>>, vector<2x128xbf16>
    %c0_40 = arith.constant 0 : index
    %c0_41 = arith.constant 0 : index
    %74 = vector.load %arg13[%c0_40, %c0_41] : memref<128x128xbf16, #tpu.memory_space<vmem>>, vector<128x128xbf16>
    %cst_42 = arith.constant dense<0.000000e+00> : vector<2x128xf32>
    %75 = tpu.matmul %73, %74, %cst_42 {dimension_numbers = #tpu.dot_dimension_numbers<[1], [0], [0], [1], [0, 0, 1, 1], [], []>} : vector<2x128xbf16>, vector<128x128xbf16>, vector<2x128xf32> -> vector<2x128xf32>
    %76 = arith.addf %72, %75 : vector<2x128xf32>
    %c0_43 = arith.constant 0 : index
    %c0_44 = arith.constant 0 : index
    %77 = vector.load %arg14[%c0_43, %c0_44] : memref<1x128xf32, #tpu.memory_space<vmem>>, vector<1x128xf32>
    %78 = vector.broadcast %77 : vector<1x128xf32> to vector<2x128xf32>
    %79 = arith.addf %76, %78 : vector<2x128xf32>
    %cst_45 = arith.constant 0.000000e+00 : f32
    %80 = vector.broadcast %cst_45 : f32 to vector<2x128xf32>
    %81 = arith.maximumf %79, %80 : vector<2x128xf32>
    %82 = arith.truncf %81 : vector<2x128xf32> to vector<2x128xbf16>
    %c0_46 = arith.constant 0 : index
    %c0_47 = arith.constant 0 : index
    %83 = vector.load %arg15[%c0_46, %c0_47] : memref<128x1xbf16, #tpu.memory_space<vmem>>, vector<128x1xbf16>
    %cst_48 = arith.constant dense<0.000000e+00> : vector<2x1xf32>
    %84 = tpu.matmul %82, %83, %cst_48 {dimension_numbers = #tpu.dot_dimension_numbers<[1], [0], [0], [1], [0, 0, 1, 1], [], []>} : vector<2x128xbf16>, vector<128x1xbf16>, vector<2x1xf32> -> vector<2x1xf32>
    %c0_49 = arith.constant 0 : index
    %c0_50 = arith.constant 0 : index
    %85 = vector.load %arg16[%c0_49, %c0_50] : memref<1x1xf32, #tpu.memory_space<vmem>>, vector<1x1xf32>
    %86 = vector.broadcast %85 : vector<1x1xf32> to vector<2x1xf32>
    %87 = arith.addf %84, %86 : vector<2x1xf32>
    %c0_51 = arith.constant 0 : index
    %c0_52 = arith.constant 0 : index
    %88 = vector.load %arg17[%c0_51, %c0_52] : memref<2x1xf32, #tpu.memory_space<vmem>>, vector<2x1xf32>
    tpu.vector_store %arg17[%c0_51, %c0_52], %87 {strides = array<i32>} : memref<2x1xf32, #tpu.memory_space<vmem>>, vector<2x1xf32>,
    return
  }
}

</mosaic_0001>

<bundles_post_ra>
// kernel: critic_forward.4
= control target key start
LH: loop header
LB: loop body
LE: loop exit
PB: predicated region body
PF: predicated region fallthrough
CT: control target
= control target key end

     0   :  { %s3919_s1 = inlined_call_operand.vmem [shape: bf16[128,128], index: 1, kind: input, shape index: {}]   ;;  %s3920_s0 = inlined_call_operand.vmem [shape: bf16[512,128], index: 0, kind: input, shape index: {}]   ;;  %s3921_s2 = inlined_call_operand.vmem [shape: f32[1,128], index: 2, kind: input, shape index: {}]   ;;  %s3922_s3 = inlined_call_operand.vmem [shape: f32[1,128], index: 3, kind: input, shape index: {}]   ;;  %s3923_s4 = inlined_call_operand.vmem [shape: f32[1,128], index: 4, kind: input, shape index: {}]   ;;  %s3924_s5 = inlined_call_operand.vmem [shape: bf16[512,128], index: 5, kind: output, shape index: {}]  }
   0x1   :  { %v2000_v0 = vld [vmem:[%s3919_s1 + $0x38] sm:$0xff]   ;;  %v2001_v1 = vld [vmem:[%s3919_s1 + $0x30] sm:$0xff]   ;;  %v2002_v2 = vld [vmem:[%s3919_s1 + $0x28] sm:$0xff]  }
   0x2   :  { %1904 = vmatprep.subr.bf16.mxu0 %v2000_v0  ;;  %1984 = vmatprep.subr.bf16.mxu1 %v2000_v0  ;;  %v2003_v3 = vld [vmem:[%s3919_s1 + $0x20] sm:$0xff]   ;;  %v2004_v5 = vld [vmem:[%s3919_s1 + $0x18] sm:$0xff]   ;;  %v2005_v6 = vld [vmem:[%s3919_s1 + $0x10] sm:$0xff]  }
   0x3   :  { %1905 = vmatpush3.bf16.msra.mxu0 %v2000_v0  ;;  %1992 = vmatpush3.bf16.msra.mxu1 %v2000_v0  ;;  %v2008_v4 = vld [vmem:[%s3920_s0] sm:$0xff]   ;;  %v2006_v7 = vld [vmem:[%s3919_s1 + $0x8] sm:$0xff]   ;;  %v2010_v11 = vld [vmem:[%s3920_s0 + $0x10] sm:$0xff]  }
   0x4   :  { %1906 = vmatprep.subr.bf16.mxu0 %v2001_v1  ;;  %1985 = vmatprep.subr.bf16.mxu1 %v2001_v1  ;;  %v2007_v8 = vld [vmem:[%s3919_s1] sm:$0xff]   ;;  %v2009_v10 = vld [vmem:[%s3920_s0 + $0x8] sm:$0xff]   ;;  %v2026_v13 = vld [vmem:[%s3920_s0 + $0x90] sm:$0xff]  }
   0x5   :  { %1920 = vmatprep.mubr.bf16.mxu0 %v2008_v4  ;;  %v2024_v9 = vld [vmem:[%s3920_s0 + $0x80] sm:$0xff]   ;;  %v2025_v12 = vld [vmem:[%s3920_s0 + $0x88] sm:$0xff]   ;;  %v2011_v14 = vld [vmem:[%s3920_s0 + $0x18] sm:$0xff]  }
   0x6   :  { %1952 = vmatprep.mubr.bf16.mxu1 %v2024_v9  ;;  %v2012_v15 = vld [vmem:[%s3920_s0 + $0x20] sm:$0xff]   ;;  %v2027_v16 = vld [vmem:[%s3920_s0 + $0x98] sm:$0xff]   ;;  %v2013_v18 = vld [vmem:[%s3920_s0 + $0x28] sm:$0xff]  }
   0x7   :  { %1907 = vmatpush3.bf16.msra.mxu0 %v2001_v1  ;;  %1993 = vmatpush3.bf16.msra.mxu1 %v2001_v1  ;;  %v2028_v17 = vld [vmem:[%s3920_s0 + $0xa0] sm:$0xff]   ;;  %v2029_v19 = vld [vmem:[%s3920_s0 + $0xa8] sm:$0xff]   ;;  %v2014_v20 = vld [vmem:[%s3920_s0 + $0x30] sm:$0xff]  }
   0x8   :  { %1908 = vmatprep.subr.bf16.mxu0 %v2002_v2  ;;  %1986 = vmatprep.subr.bf16.mxu1 %v2002_v2  ;;  %v2030_v21 = vld [vmem:[%s3920_s0 + $0xb0] sm:$0xff]   ;;  %v2015_v22 = vld [vmem:[%s3920_s0 + $0x38] sm:$0xff]   ;;  %v2016_v24 = vld [vmem:[%s3920_s0 + $0x40] sm:$0xff]  }
   0x9   :  { %v2031_v23 = vld [vmem:[%s3920_s0 + $0xb8] sm:$0xff]   ;;  %v2032_v25 = vld [vmem:[%s3920_s0 + $0xc0] sm:$0xff]   ;;  %v2017_v26 = vld [vmem:[%s3920_s0 + $0x48] sm:$0xff]  }
   0xa   :  { %v2033_v27 = vld [vmem:[%s3920_s0 + $0xc8] sm:$0xff]   ;;  %v2018_v28 = vld [vmem:[%s3920_s0 + $0x50] sm:$0xff]   ;;  %v2019_v30 = vld [vmem:[%s3920_s0 + $0x58] sm:$0xff]  }
   0xb   :  { %1909 = vmatpush3.bf16.msra.mxu0 %v2002_v2  ;;  %1994 = vmatpush3.bf16.msra.mxu1 %v2002_v2  ;;  %v2034_v29 = vld [vmem:[%s3920_s0 + $0xd0] sm:$0xff]   ;;  %v2035_v31 = vld [vmem:[%s3920_s0 + $0xd8] sm:$0xff]   ;;  %v2020_v32 = vld [vmem:[%s3920_s0 + $0x60] sm:$0xff]  }
   0xc   :  { %1910 = vmatprep.subr.bf16.mxu0 %v2003_v3  ;;  %1987 = vmatprep.subr.bf16.mxu1 %v2003_v3  ;;  %v2036_v33 = vld [vmem:[%s3920_s0 + $0xe0] sm:$0xff]   ;;  %v2021_v34 = vld [vmem:[%s3920_s0 + $0x68] sm:$0xff]   ;;  %v2022_v36 = vld [vmem:[%s3920_s0 + $0x70] sm:$0xff]  }
   0xd   :  { %v2037_v35 = vld [vmem:[%s3920_s0 + $0xe8] sm:$0xff]   ;;  %v2038_v37 = vld [vmem:[%s3920_s0 + $0xf0] sm:$0xff]   ;;  %v2023_v38 = vld [vmem:[%s3920_s0 + $0x78] sm:$0xff]  }
   0xe   :  { %v2039_v39 = vld [vmem:[%s3920_s0 + $0xf8] sm:$0xff]   ;;  %v2199_v44 = vld [vmem:[%s3921_s2] ss:$0 sm:$0xff] }
   0xf   :  { %1911 = vmatpush3.bf16.msra.mxu0 %v2003_v3  ;;  %1995 = vmatpush3.bf16.msra.mxu1 %v2003_v3 }
  0x10   :  { %1912 = vmatprep.subr.bf16.mxu0 %v2004_v5  ;;  %1988 = vmatprep.subr.bf16.mxu1 %v2004_v5 }
  0x13   :  { %1913 = vmatpush3.bf16.msra.mxu0 %v2004_v5  ;;  %1996 = vmatpush3.bf16.msra.mxu1 %v2004_v5 }
  0x14   :  { %1914 = vmatprep.subr.bf16.mxu0 %v2005_v6  ;;  %1989 = vmatprep.subr.bf16.mxu1 %v2005_v6 }
  0x17   :  { %1915 = vmatpush3.bf16.msra.mxu0 %v2005_v6  ;;  %1997 = vmatpush3.bf16.msra.mxu1 %v2005_v6 }
  0x18   :  { %1916 = vmatprep.subr.bf16.mxu0 %v2006_v7  ;;  %1990 = vmatprep.subr.bf16.mxu1 %v2006_v7 }
  0x1b   :  { %1917 = vmatpush3.bf16.msra.mxu0 %v2006_v7  ;;  %1998 = vmatpush3.bf16.msra.mxu1 %v2006_v7 }
  0x1c   :  { %1918 = vmatprep.subr.bf16.mxu0 %v2007_v8  ;;  %1991 = vmatprep.subr.bf16.mxu1 %v2007_v8 }
  0x1f   :  { %1919 = vmatpush3.bf16.msra.mxu0 %v2007_v8  ;;  %1999 = vmatpush3.bf16.msra.mxu1 %v2007_v8 }
  0x22   :  { %1921 = vmatmul.mubr.bf16.vlgmr.msra.gmra.mxu0 %v2009_v10  ;;  %1953 = vmatmul.mubr.bf16.vlgmr.msra.gmra.mxu1 %v2025_v12 }
  0x23   :  { %1924 = vmatprep.mubr.bf16.mxu0 %v2010_v11  ;;  %1956 = vmatprep.mubr.bf16.mxu1 %v2026_v13 }
  0x2a   :  { %1925 = vmatmul.mubr.bf16.gmra.mxu0 %v2011_v14  ;;  %1957 = vmatmul.mubr.bf16.gmra.mxu1 %v2027_v16 }
  0x2b   :  { %1928 = vmatprep.mubr.bf16.mxu0 %v2012_v15  ;;  %1960 = vmatprep.mubr.bf16.mxu1 %v2028_v17 }
  0x32   :  { %1929 = vmatmul.mubr.bf16.gmra.mxu0 %v2013_v18  ;;  %1961 = vmatmul.mubr.bf16.gmra.mxu1 %v2029_v19 }
  0x33   :  { %1932 = vmatprep.mubr.bf16.mxu0 %v2014_v20  ;;  %1964 = vmatprep.mubr.bf16.mxu1 %v2030_v21 }
  0x3a   :  { %1933 = vmatmul.mubr.bf16.gmra.mxu0 %v2015_v22  ;;  %1965 = vmatmul.mubr.bf16.gmra.mxu1 %v2031_v23 }
  0x3b   :  { %1936 = vmatprep.mubr.bf16.mxu0 %v2016_v24  ;;  %1968 = vmatprep.mubr.bf16.mxu1 %v2032_v25 }
  0x42   :  { %1937 = vmatmul.mubr.bf16.gmra.mxu0 %v2017_v26  ;;  %1969 = vmatmul.mubr.bf16.gmra.mxu1 %v2033_v27 }
  0x43   :  { %1940 = vmatprep.mubr.bf16.mxu0 %v2018_v28  ;;  %1972 = vmatprep.mubr.bf16.mxu1 %v2034_v29 }
  0x4a   :  { %1941 = vmatmul.mubr.bf16.gmra.mxu0 %v2019_v30  ;;  %1973 = vmatmul.mubr.bf16.gmra.mxu1 %v2035_v31 }
  0x4b   :  { %1944 = vmatprep.mubr.bf16.mxu0 %v2020_v32  ;;  %1976 = vmatprep.mubr.bf16.mxu1 %v2036_v33 }
  0x52   :  { %1945 = vmatmul.mubr.bf16.gmra.mxu0 %v2021_v34  ;;  %1977 = vmatmul.mubr.bf16.gmra.mxu1 %v2037_v35 }
  0x53   :  { %1948 = vmatprep.mubr.bf16.mxu0 %v2022_v36  ;;  %1980 = vmatprep.mubr.bf16.mxu1 %v2038_v37 }
  0x5a   :  { %1949 = vmatmul.mubr.bf16.gmra.mxu0 %v2023_v38  ;;  %1981 = vmatmul.mubr.bf16.gmra.mxu1 %v2039_v39 }
  0xe2   :  { %v1922_v40 = vpop.f32.mrf.mxu0  ;;  %v2192_v41 = vpop.f32.mrf.mxu1 }
  0xe3   :  { %v2207_v49 = vadd.f32 %v1922_v40, %v2199_v44 }
  0xe4   :  { %v382_v42 = vpop.f32.mrf.mxu0  ;;  %v2194_v43 = vpop.f32.mrf.mxu1 }
  0xe5   :  { %v2202_v46 = vadd.f32 %v2199_v44, %v382_v42  ;;  %v3951_v57 = vmax.f32 %v2207_v49, 0.0 }
  0xe6   :  { %v1923_v45 = vpop.f32.mrf.mxu0  ;;  %v2204_v48 = vpop.f32.mrf.mxu1 }
  0xe7   :  { %v3959_v52 = vmax.f32 %v2202_v46, 0.0  ;;  %v2214_v53 = vadd.f32 %v1923_v45, %v2199_v44 }
  0xe8   :  { %v385_v47 = vpop.f32.mrf.mxu0  ;;  %v2217_v56 = vpop.f32.mrf.mxu1 }
  0xe9   :  { %v2210_v50 = vadd.f32 %v2199_v44, %v385_v47  ;;  %v3948_v61 = vmax.f32 %v2214_v53, 0.0 }
  0xea   :  { %v1926_v51 = vpop.f32.mrf.mxu0  ;;  %v2230_v0 = vpop.f32.mrf.mxu1 }
  0xeb   :  { %v3954_v54 = vmax.f32 %v2210_v50, 0.0  ;;  %v2233_v1 = vadd.f32 %v1926_v51, %v2199_v44 }
  0xec   :  { %v398_v55 = vpop.f32.mrf.mxu0  ;;  %v2247_v10 = vpop.f32.mrf.mxu1 }
  0xed   :  { %v701_v58 = vadd.f32 %v3954_v54, %v3959_v52  ;;  %v2225_v59 = vadd.f32 %v2199_v44, %v398_v55  ;;  %v3943_v11 = vmax.f32 %v2233_v1, 0.0  ;;  %v2448_v54 = vadd.f32 %v2199_v44, %v2247_v10 }
  0xee   :  { %v1927_v60 = vpop.f32.mrf.mxu0  ;;  %v2258_v18 = vpop.f32.mrf.mxu1 }
  0xef   :  { %v702_v62 = vadd.f32 %v701_v58, %v3951_v57  ;;  %v3946_v2 = vmax.f32 %v2225_v59, 0.0  ;;  %v2244_v7 = vadd.f32 %v1927_v60, %v2199_v44  ;;  %4022 = vst [vmem:[#allocation13_spill] sm:$0xff] %v2448_v54 }
  0xf0   :  { %v401_v63 = vpop.f32.mrf.mxu0  ;;  %v2275_v28 = vpop.f32.mrf.mxu1 }
  0xf1   :  { %v703_v3 = vadd.f32 %v702_v62, %v3948_v61  ;;  %v2239_v4 = vadd.f32 %v2199_v44, %v401_v63  ;;  %v3941_v15 = vmax.f32 %v2244_v7, 0.0  ;;  %v2418_v61 = vadd.f32 %v2199_v44, %v2194_v43 }
  0xf2   :  { %v1930_v5 = vpop.f32.mrf.mxu0  ;;  %v2286_v36 = vpop.f32.mrf.mxu1 }
  0xf3   :  { %v704_v6 = vadd.f32 %v703_v3, %v3946_v2  ;;  %v3944_v8 = vmax.f32 %v2239_v4, 0.0  ;;  %v2261_v19 = vadd.f32 %v1930_v5, %v2199_v44  ;;  %4018 = vst [vmem:[#allocation9_spill] sm:$0xff] %v2418_v61  ;;  %v3956_v43 = vmax.f32 %v2418_v61, 0.0 }
  0xf4   :  { %v414_v9 = vpop.f32.mrf.mxu0  ;;  %v2303_v58 = vpop.f32.mrf.mxu1 }
  0xf5   :  { %v705_v12 = vadd.f32 %v704_v6, %v3944_v8  ;;  %v2253_v13 = vadd.f32 %v2199_v44, %v414_v9  ;;  %v3936_v29 = vmax.f32 %v2261_v19, 0.0 }
  0xf6   :  { %v1931_v14 = vpop.f32.mrf.mxu0 }
  0xf7   :  { %v706_v16 = vadd.f32 %v705_v12, %v3943_v11  ;;  %v3939_v20 = vmax.f32 %v2253_v13, 0.0  ;;  %v2272_v25 = vadd.f32 %v1931_v14, %v2199_v44  ;;  %v2314_v12 = vpop.f32.mrf.mxu1 }
  0xf8   :  { %v417_v17 = vpop.f32.mrf.mxu0 }
  0xf9   :  { %v707_v21 = vadd.f32 %v706_v16, %v3941_v15  ;;  %v2267_v22 = vadd.f32 %v2199_v44, %v417_v17  ;;  %v3934_v33 = vmax.f32 %v2272_v25, 0.0 }
  0xfa   :  { %v1934_v23 = vpop.f32.mrf.mxu0 }
  0xfb   :  { %v708_v24 = vadd.f32 %v707_v21, %v3939_v20  ;;  %v3938_v26 = vmax.f32 %v2267_v22, 0.0  ;;  %v2289_v37 = vadd.f32 %v1934_v23, %v2199_v44 }
  0xfc   :  { %v430_v27 = vpop.f32.mrf.mxu0 }
  0xfd   :  { %v709_v30 = vadd.f32 %v708_v24, %v3938_v26  ;;  %v2281_v31 = vadd.f32 %v2199_v44, %v430_v27  ;;  %v3929_v60 = vmax.f32 %v2289_v37, 0.0 }
  0xfe   :  { %v1935_v32 = vpop.f32.mrf.mxu0 }
  0xff   :  { %v710_v34 = vadd.f32 %v709_v30, %v3936_v29  ;;  %v3933_v38 = vmax.f32 %v2281_v31, 0.0  ;;  %v2300_v47 = vadd.f32 %v1935_v32, %v2199_v44 }
 0x100   :  { %v433_v35 = vpop.f32.mrf.mxu0 }
 0x101   :  { %v711_v39 = vadd.f32 %v710_v34, %v3934_v33  ;;  %v2295_v40 = vadd.f32 %v2199_v44, %v433_v35  ;;  %v3928_v5 = vmax.f32 %v2300_v47, 0.0  ;;  %v2331_v34 = vpop.f32.mrf.mxu1 }
 0x102   :  { %v1938_v42 = vpop.f32.mrf.mxu0 }
 0x103   :  { %v712_v45 = vadd.f32 %v711_v39, %v3933_v38  ;;  %v3931_v51 = vmax.f32 %v2295_v40, 0.0  ;;  %v2317_v14 = vadd.f32 %v1938_v42, %v2199_v44 }
 0x104   :  { %v446_v55 = vpop.f32.mrf.mxu0 }
 0x105   :  { %v713_v62 = vadd.f32 %v712_v45, %v3931_v51  ;;  %v2309_v63 = vadd.f32 %v2199_v44, %v446_v55  ;;  %v3927_v35 = vmax.f32 %v2317_v14, 0.0 }
 0x106   :  { %v1939_v3 = vpop.f32.mrf.mxu0 }
 0x107   :  { %v714_v6 = vadd.f32 %v713_v62, %v3929_v60  ;;  %v3926_v16 = vmax.f32 %v2309_v63, 0.0  ;;  %v2328_v27 = vadd.f32 %v1939_v3, %v2199_v44 }
 0x108   :  { %v449_v9 = vpop.f32.mrf.mxu0 }
 0x109   :  { %v715_v17 = vadd.f32 %v714_v6, %v3928_v5  ;;  %v2323_v21 = vadd.f32 %v2199_v44, %v449_v9  ;;  %v3930_v55 = vmax.f32 %v2328_v27, 0.0  ;;  %v2342_v6 = vpop.f32.mrf.mxu1 }
 0x10a   :  { %v1942_v23 = vpop.f32.mrf.mxu0 }
 0x10b   :  { %v716_v24 = vadd.f32 %v715_v17, %v3926_v16  ;;  %v3925_v30 = vmax.f32 %v2323_v21, 0.0  ;;  %v2345_v9 = vadd.f32 %v1942_v23, %v2199_v44  ;;  %v2359_v23 = vpop.f32.mrf.mxu1 }
 0x10c   :  { %v462_v32 = vpop.f32.mrf.mxu0 }
 0x10d   :  { %v717_v39 = vadd.f32 %v716_v24, %v3925_v30  ;;  %v2337_v42 = vadd.f32 %v2199_v44, %v462_v32  ;;  %v3937_v60 = vmax.f32 %v2345_v9, 0.0 }
 0x10e   :  { %v1943_v45 = vpop.f32.mrf.mxu0 }
 0x10f   :  { %v718_v62 = vadd.f32 %v717_v39, %v3927_v35  ;;  %v3932_v17 = vmax.f32 %v2337_v42, 0.0  ;;  %v2356_v39 = vadd.f32 %v1943_v45, %v2199_v44 }
 0x110   :  { %v465_v3 = vpop.f32.mrf.mxu0 }
 0x111   :  { %v719_v24 = vadd.f32 %v718_v62, %v3930_v55  ;;  %v2351_v32 = vadd.f32 %v2199_v44, %v465_v3  ;;  %v3940_v51 = vmax.f32 %v2356_v39, 0.0 }
 0x112   :  { %v1946_v30 = vpop.f32.mrf.mxu0 }
 0x113   :  { %v720_v16 = vadd.f32 %v719_v24, %v3932_v17  ;;  %v3935_v35 = vmax.f32 %v2351_v32, 0.0  ;;  %v2370_v17 = vpop.f32.mrf.mxu1  ;;  %v2373_v38 = vadd.f32 %v1946_v30, %v2199_v44 }
 0x114   :  { %v478_v5 = vpop.f32.mrf.mxu0 }
 0x115   :  { %v721_v62 = vadd.f32 %v720_v16, %v3935_v35  ;;  %v2365_v3 = vadd.f32 %v2199_v44, %v478_v5  ;;  %4011 = vst [vmem:[#allocation2_spill] sm:$0xff] %v2373_v38  ;;  %v2387_v30 = vpop.f32.mrf.mxu1  ;;  %v3947_v20 = vmax.f32 %v2373_v38, 0.0 }
 0x116   :  { %v1947_v55 = vpop.f32.mrf.mxu0 }
 0x117   :  { %v722_v45 = vadd.f32 %v721_v62, %v3937_v60  ;;  %v3942_v33 = vmax.f32 %v2365_v3, 0.0  ;;  %v2384_v62 = vadd.f32 %v1947_v55, %v2199_v44 }
 0x118   :  { %v481_v24 = vpop.f32.mrf.mxu0 }
 0x119   :  { %v723_v16 = vadd.f32 %v722_v45, %v3940_v51  ;;  %v2379_v5 = vadd.f32 %v2199_v44, %v481_v24  ;;  %4013 = vst [vmem:[#allocation4_spill] sm:$0xff] %v2384_v62  ;;  %v3950_v15 = vmax.f32 %v2384_v62, 0.0 }
 0x11a   :  { %v1950_v35 = vpop.f32.mrf.mxu0 }
 0x11b   :  { %4012 = vst [vmem:[#allocation3_spill] sm:$0xff] %v2379_v5  ;;  %v724_v29 = vadd.f32 %v723_v16, %v3942_v33  ;;  %v3945_v60 = vmax.f32 %v2379_v5, 0.0  ;;  %v2398_v33 = vpop.f32.mrf.mxu1  ;;  %v2401_v11 = vadd.f32 %v1950_v35, %v2199_v44 }
 0x11c   :  { %v494_v26 = vpop.f32.mrf.mxu0 }
 0x11d   :  { %v725_v45 = vadd.f32 %v724_v29, %v3945_v60  ;;  %v2393_v24 = vadd.f32 %v2199_v44, %v494_v26  ;;  %4015 = vst [vmem:[#allocation6_spill] sm:$0xff] %v2401_v11  ;;  %v3952_v35 = vmax.f32 %v2401_v11, 0.0 }
 0x11e   :  { %v1951_v51 = vpop.f32.mrf.mxu0 }
 0x11f   :  { %4014 = vst [vmem:[#allocation5_spill] sm:$0xff] %v2393_v24  ;;  %v726_v55 = vadd.f32 %v725_v45, %v3947_v20  ;;  %v3949_v8 = vmax.f32 %v2393_v24, 0.0  ;;  %v2412_v2 = vadd.f32 %v1951_v51, %v2199_v44  ;;  %v574_v20 = vpop.f32.mrf.mxu1  ;;  %v2427_v51 = vadd.f32 %v2199_v44, %v2217_v56 }
 0x120   :  { %v497_v16 = vpop.f32.mrf.mxu0 }
 0x121   :  { %v727_v29 = vadd.f32 %v726_v55, %v3950_v15  ;;  %v2407_v26 = vadd.f32 %v2199_v44, %v497_v16  ;;  %4017 = vst [vmem:[#allocation8_spill] sm:$0xff] %v2412_v2  ;;  %v3955_v16 = vmax.f32 %v2412_v2, 0.0  ;;  %4019 = vst [vmem:[#allocation10_spill] sm:$0xff] %v2427_v51  ;;  %v2431_v15 = vadd.f32 %v2192_v41, %v2199_v44 }
 0x123   :  { %4016 = vst [vmem:[#allocation7_spill] sm:$0xff] %v2407_v26  ;;  %v728_v60 = vadd.f32 %v727_v29, %v3949_v8  ;;  %v3953_v45 = vmax.f32 %v2407_v26, 0.0  ;;  %v1971_v8 = vpop.f32.mrf.mxu1  ;;  %4020 = vst [vmem:[#allocation11_spill] sm:$0xff] %v2431_v15 }
 0x125   :  { %v729_v55 = vadd.f32 %v728_v60, %v3953_v45  ;;  %v2438_v60 = vadd.f32 %v2204_v48, %v2199_v44  ;;  %v3958_v45 = vmax.f32 %v2431_v15, 0.0  ;;  %v2476_v15 = vadd.f32 %v2199_v44, %v2303_v58 }
 0x127   :  { %v730_v29 = vadd.f32 %v729_v55, %v3952_v35  ;;  %4021 = vst [vmem:[#allocation12_spill] sm:$0xff] %v2438_v60  ;;  %v3957_v55 = vmax.f32 %v2427_v51, 0.0  ;;  %v577_v35 = vpop.f32.mrf.mxu1  ;;  %4026 = vst [vmem:[#allocation17_spill] sm:$0xff] %v2476_v15 }
 0x129   :  { %v731_v57 = vadd.f32 %v730_v29, %v3955_v16  ;;  %v3962_v29 = vmax.f32 %v2438_v60, 0.0  ;;  %v2455_v16 = vadd.f32 %v2199_v44, %v2275_v28 }
 0x12b   :  { %v732_v56 = vadd.f32 %v731_v57, %v3956_v43  ;;  %4023 = vst [vmem:[#allocation14_spill] sm:$0xff] %v2455_v16  ;;  %v1974_v57 = vpop.f32.mrf.mxu1  ;;  %v2459_v43 = vadd.f32 %v2230_v0, %v2199_v44  ;;  %v3963_v28 = vmax.f32 %v2455_v16, 0.0  ;;  %v2504_v16 = vadd.f32 %v2199_v44, %v2359_v23 }
 0x12d   :  { %v733_v41 = vadd.f32 %v732_v56, %v3957_v55  ;;  %4024 = vst [vmem:[#allocation15_spill] sm:$0xff] %v2459_v43  ;;  %v3961_v56 = vmax.f32 %v2448_v54, 0.0  ;;  %v3964_v52 = vmax.f32 %v2459_v43, 0.0  ;;  %4030 = vst [vmem:[#allocation21_spill] sm:$0xff] %v2504_v16 }
 0x12f   :  { %v734_v48 = vadd.f32 %v733_v41, %v3958_v45  ;;  %v2468_v41 = vadd.f32 %v2258_v18, %v2199_v44  ;;  %v590_v45 = vpop.f32.mrf.mxu1  ;;  %v2483_v18 = vadd.f32 %v2199_v44, %v2331_v34 }
 0x131   :  { %v735_v10 = vadd.f32 %v734_v48, %v3962_v29  ;;  %4025 = vst [vmem:[#allocation16_spill] sm:$0xff] %v2468_v41  ;;  %v3968_v48 = vmax.f32 %v2468_v41, 0.0  ;;  %4027 = vst [vmem:[#allocation18_spill] sm:$0xff] %v2483_v18  ;;  %v2487_v29 = vadd.f32 %v2286_v36, %v2199_v44  ;;  %v3969_v34 = vmax.f32 %v2483_v18, 0.0 }
 0x132   :  { %v2531_v18 = vadd.f32 %v2199_v44, %v574_v20 }
 0x133   :  { %v736_v55 = vadd.f32 %v735_v10, %v3961_v56  ;;  %v1975_v56 = vpop.f32.mrf.mxu1  ;;  %4028 = vst [vmem:[#allocation19_spill] sm:$0xff] %v2487_v29  ;;  %v3970_v43 = vmax.f32 %v2487_v29, 0.0 }
 0x135   :  { %v737_v0 = vadd.f32 %v736_v55, %v3963_v28  ;;  %v3967_v55 = vmax.f32 %v2476_v15, 0.0 }
 0x137   :  { %v738_v10 = vadd.f32 %v737_v0, %v3964_v52  ;;  %v2496_v0 = vadd.f32 %v2314_v12, %v2199_v44  ;;  %v593_v52 = vpop.f32.mrf.mxu1  ;;  %v2511_v12 = vadd.f32 %v2199_v44, %v2387_v30 }
 0x139   :  { %v739_v58 = vadd.f32 %v738_v10, %v3968_v48  ;;  %4029 = vst [vmem:[#allocation20_spill] sm:$0xff] %v2496_v0  ;;  %v3974_v10 = vmax.f32 %v2496_v0, 0.0  ;;  %v2515_v48 = vadd.f32 %v2342_v6, %v2199_v44  ;;  %v3976_v30 = vmax.f32 %v2511_v12, 0.0 }
 0x13b   :  { %v740_v28 = vadd.f32 %v739_v58, %v3967_v55  ;;  %v1978_v55 = vpop.f32.mrf.mxu1  ;;  %v3979_v29 = vmax.f32 %v2515_v48, 0.0 }
 0x13d   :  { %v741_v36 = vadd.f32 %v740_v28, %v3969_v34  ;;  %v3973_v28 = vmax.f32 %v2504_v16, 0.0  ;;  %v685_v16 = vmax.f32 %v2531_v18, 0.0  ;;  %v599_v18 = vadd.f32 %v1974_v57, %v2199_v44 }
 0x13f   :  { %v742_v58 = vadd.f32 %v741_v36, %v3970_v43  ;;  %v2524_v36 = vadd.f32 %v2370_v17, %v2199_v44  ;;  %v606_v43 = vpop.f32.mrf.mxu1  ;;  %v691_v61 = vmax.f32 %v599_v18, 0.0 }
 0x141   :  { %v743_v23 = vadd.f32 %v742_v58, %v3974_v10  ;;  %v3984_v58 = vmax.f32 %v2524_v36, 0.0  ;;  %v1979_v17 = vpop.f32.mrf.mxu1  ;;  %v2541_v10 = vadd.f32 %v2398_v33, %v2199_v44  ;;  %v594_v33 = vadd.f32 %v2199_v44, %v593_v52 }
 0x142   :  { %v615_v52 = vadd.f32 %v1978_v55, %v2199_v44 }
 0x143   :  { %v744_v34 = vadd.f32 %v743_v23, %v3973_v28  ;;  %v2537_v28 = vadd.f32 %v2199_v44, %v577_v35  ;;  %v609_v15 = vpop.f32.mrf.mxu1 }
 0x145   :  { %v745_v6 = vadd.f32 %v744_v34, %v3976_v30  ;;  %v586_v30 = vadd.f32 %v1971_v8, %v2199_v44  ;;  %v686_v0 = vmax.f32 %v2537_v28, 0.0  ;;  %v1982_v60 = vpop.f32.mrf.mxu1  ;;  %v602_v8 = vadd.f32 %v1975_v56, %v2199_v44 }
 0x147   :  { %v746_v23 = vadd.f32 %v745_v6, %v3979_v29  ;;  %v687_v6 = vmax.f32 %v2541_v10, 0.0  ;;  %v591_v29 = vadd.f32 %v2199_v44, %v590_v45  ;;  %v688_v41 = vmax.f32 %v586_v30, 0.0  ;;  %v622_v28 = vpop.f32.mrf.mxu1 }
 0x148   :  { %v607_v10 = vadd.f32 %v2199_v44, %v606_v43  ;;  %v610_v30 = vadd.f32 %v2199_v44, %v609_v15  ;;  %v623_v18 = vadd.f32 %v2199_v44, %v622_v28  ;;  %v631_v15 = vadd.f32 %v1982_v60, %v2199_v44 }
 0x149   :  { %v747_v34 = vadd.f32 %v746_v23, %v3984_v58  ;;  %v689_v51 = vmax.f32 %v591_v29, 0.0  ;;  %v690_v58 = vmax.f32 %v594_v33, 0.0  ;;  %v695_v33 = vmax.f32 %v615_v52, 0.0 }
 0x14a   :  { %v693_v11 = vmax.f32 %v607_v10, 0.0  ;;  %v4031_v60 = vmax.f32 %v2511_v12, 0.0 }
 0x14b   :  { %v748_v20 = vadd.f32 %v747_v34, %v685_v16 }
 0x14d   :  { %v749_v35 = vadd.f32 %v748_v20, %v686_v0  ;;  %v692_v20 = vmax.f32 %v602_v8, 0.0  ;;  %v697_v8 = vmax.f32 %v623_v18, 0.0 }
 0x14f   :  { %v750_v54 = vadd.f32 %v749_v35, %v687_v6  ;;  %v1983_v35 = vpop.f32.mrf.mxu1 }
 0x150   :  { %v634_v10 = vadd.f32 %v1983_v35, %v2199_v44 }
 0x151   :  { %v751_v23 = vadd.f32 %v750_v54, %v688_v41  ;;  %v618_v54 = vadd.f32 %v1979_v17, %v2199_v44  ;;  %v625_v56 = vpop.f32.mrf.mxu1 }
 0x153   :  { %v752_v34 = vadd.f32 %v751_v23, %v689_v51  ;;  %v694_v23 = vmax.f32 %v610_v30, 0.0  ;;  %v700_v30 = vmax.f32 %v634_v10, 0.0 }
 0x155   :  { %v753_v2 = vadd.f32 %v752_v34, %v690_v58  ;;  %v696_v34 = vmax.f32 %v618_v54, 0.0 }
 0x157   :  { %v754_v45 = vadd.f32 %v753_v2, %v691_v61  ;;  %v626_v2 = vadd.f32 %v2199_v44, %v625_v56  ;;  %v4032_v44 = vmax.f32 %v2515_v48, 0.0 }
 0x159   :  { %v755_v57 = vadd.f32 %v754_v45, %v692_v20  ;;  %v698_v45 = vmax.f32 %v626_v2, 0.0 }
 0x15b   :  { %v756_v29 = vadd.f32 %v755_v57, %v693_v11  ;;  %v699_v57 = vmax.f32 %v631_v15, 0.0 }
 0x15d   :  { %v757_v26 = vadd.f32 %v756_v29, %v694_v23 }
 0x15f   :  { %v758_v43 = vadd.f32 %v757_v26, %v695_v33 }
 0x161   :  { %v759_v24 = vadd.f32 %v758_v43, %v696_v34 }
 0x163   :  { %v760_v55 = vadd.f32 %v759_v24, %v697_v8 }
 0x165   :  { %v761_v17 = vadd.f32 %v760_v55, %v698_v45 }
 0x167   :  { %v762_v62 = vadd.f32 %v761_v17, %v699_v57 }
 0x169   :  { %v763_v52 = vadd.f32 %v762_v62, %v700_v30  ;;  %v4033_v62 = vmax.f32 %v2524_v36, 0.0 }
 0x16b   :  { %v764_v29 = vrot.slane %v763_v52, 4 }
 0x16d   :  { %v765_v38 = vadd.f32 %v764_v29, %v763_v52  ;;  %v4044_v52 = vmax.f32 %v2239_v4, 0.0 }
 0x16f   :  { %v766_v28 = vrot.slane %v765_v38, 2 }
 0x171   :  { %v767_v54 = vadd.f32 %v766_v28, %v765_v38 }
 0x173   :  { %v768_v26 = vrot.slane %v767_v54, 1 }
 0x175   :  { %v769_v5 = vadd.f32 %v768_v26, %v767_v54  ;;  %v4045_v54 = vmax.f32 %v2233_v1, 0.0 }
 0x177   :  { %v2561_v56 = vmul.f32 0.001953125, %v769_v5 }
 0x179   :  { %v2566_v24 = vsub.f32 %v4031_v60, %v2561_v56  ;;  %v2571_v35 = vsub.f32 %v4032_v44, %v2561_v56  ;;  %v2576_v18 = vsub.f32 %v4033_v62, %v2561_v56  ;;  %v2579_v38 = vsub.f32 %v685_v16, %v2561_v56 }
 0x17a   :  { %v2582_v5 = vsub.f32 %v686_v0, %v2561_v56  ;;  %v2585_v12 = vsub.f32 %v687_v6, %v2561_v56  ;;  %v2588_v43 = vsub.f32 %v688_v41, %v2561_v56  ;;  %v2591_v48 = vsub.f32 %v689_v51, %v2561_v56 }
 0x17b   :  { %v2594_v2 = vsub.f32 %v690_v58, %v2561_v56  ;;  %v2597_v36 = vsub.f32 %v691_v61, %v2561_v56  ;;  %v2600_v16 = vsub.f32 %v692_v20, %v2561_v56  ;;  %v2603_v0 = vsub.f32 %v693_v11, %v2561_v56 }
 0x17c   :  { %v2606_v6 = vsub.f32 %v694_v23, %v2561_v56  ;;  %v2609_v41 = vsub.f32 %v695_v33, %v2561_v56  ;;  %v2612_v51 = vsub.f32 %v696_v34, %v2561_v56  ;;  %v2615_v58 = vsub.f32 %v697_v8, %v2561_v56 }
 0x17d   :  { %v2618_v61 = vsub.f32 %v698_v45, %v2561_v56  ;;  %v2621_v20 = vsub.f32 %v699_v57, %v2561_v56  ;;  %v2624_v11 = vsub.f32 %v700_v30, %v2561_v56  ;;  %v4039_v23 = vmax.f32 %v2202_v46, 0.0 }
 0x17e   :  { %4034 = vst [vmem:[#allocation22_spill] sm:$0xff] %v2606_v6  ;;  %4035 = vst [vmem:[#allocation23_spill] sm:$0xff] %v2609_v41  ;;  %v4040_v34 = vmax.f32 %v2210_v50, 0.0  ;;  %v4041_v8 = vmax.f32 %v2207_v49, 0.0  ;;  %v4042_v46 = vmax.f32 %v2214_v53, 0.0  ;;  %v4043_v50 = vmax.f32 %v2225_v59, 0.0 }
 0x17f   :  { %4036 = vst [vmem:[#allocation24_spill] sm:$0xff] %v2612_v51  ;;  %4037 = vst [vmem:[#allocation25_spill] sm:$0xff] %v2615_v58  ;;  %v2629_v33 = vsub.f32 %v4039_v23, %v2561_v56  ;;  %v2660_v29 = vsub.f32 %v4044_v52, %v2561_v56  ;;  %v2667_v26 = vsub.f32 %v4045_v54, %v2561_v56  ;;  %v4046_v44 = vmax.f32 %v2244_v7, 0.0 }
 0x180   :  { %4038 = vst [vmem:[#allocation26_spill] sm:$0xff] %v2618_v61  ;;  %v2634_v15 = vsub.f32 %v4040_v34, %v2561_v56  ;;  %v2639_v55 = vsub.f32 %v4041_v8, %v2561_v56  ;;  %v2648_v57 = vsub.f32 %v4042_v46, %v2561_v56  ;;  %v2653_v17 = vsub.f32 %v4043_v50, %v2561_v56 }
 0x181   :  { %v836_v10 = vmul.f32 %v2629_v33, %v2629_v33  ;;  %v2674_v62 = vsub.f32 %v4046_v44, %v2561_v56  ;;  %v841_v4 = vmul.f32 %v2660_v29, %v2660_v29  ;;  %v4047_v34 = vmax.f32 %v2253_v13, 0.0 }
 0x182   :  { %v837_v45 = vmul.f32 %v2634_v15, %v2634_v15  ;;  %v838_v49 = vmul.f32 %v2639_v55, %v2639_v55  ;;  %v839_v28 = vmul.f32 %v2648_v57, %v2648_v57  ;;  %v840_v59 = vmul.f32 %v2653_v17, %v2653_v17 }
 0x183   :  { %v2681_v8 = vsub.f32 %v4047_v34, %v2561_v56  ;;  %v842_v1 = vmul.f32 %v2667_v26, %v2667_v26  ;;  %v843_v7 = vmul.f32 %v2674_v62, %v2674_v62 }
 0x184   :  { %v900_v30 = vadd.f32 %v837_v45, %v836_v10  ;;  %v4048_v45 = vmax.f32 %v2267_v22, 0.0 }
 0x185   :  { %v844_v13 = vmul.f32 %v2681_v8, %v2681_v8 }
 0x186   :  { %v901_v53 = vadd.f32 %v900_v30, %v838_v49  ;;  %v2688_v46 = vsub.f32 %v4048_v45, %v2561_v56  ;;  %v4049_v49 = vmax.f32 %v2261_v19, 0.0 }
 0x188   :  { %v902_v60 = vadd.f32 %v901_v53, %v839_v28  ;;  %v2695_v30 = vsub.f32 %v4049_v49, %v2561_v56  ;;  %v4050_v28 = vmax.f32 %v2272_v25, 0.0  ;;  %v845_v22 = vmul.f32 %v2688_v46, %v2688_v46 }
 0x18a   :  { %v903_v23 = vadd.f32 %v902_v60, %v840_v59  ;;  %v2702_v53 = vsub.f32 %v4050_v28, %v2561_v56  ;;  %v4051_v59 = vmax.f32 %v2281_v31, 0.0  ;;  %v846_v19 = vmul.f32 %v2695_v30, %v2695_v30 }
 0x18c   :  { %v904_v10 = vadd.f32 %v903_v23, %v841_v4  ;;  %v2709_v60 = vsub.f32 %v4051_v59, %v2561_v56  ;;  %v4052_v4 = vmax.f32 %v2295_v40, 0.0  ;;  %v847_v25 = vmul.f32 %v2702_v53, %v2702_v53 }
 0x18e   :  { %v905_v50 = vadd.f32 %v904_v10, %v842_v1  ;;  %v2716_v23 = vsub.f32 %v4052_v4, %v2561_v56  ;;  %v4053_v1 = vmax.f32 %v2289_v37, 0.0  ;;  %v848_v31 = vmul.f32 %v2709_v60, %v2709_v60 }
 0x190   :  { %v906_v52 = vadd.f32 %v905_v50, %v843_v7  ;;  %v2723_v10 = vsub.f32 %v4053_v1, %v2561_v56  ;;  %v4054_v7 = vmax.f32 %v2300_v47, 0.0  ;;  %v849_v40 = vmul.f32 %v2716_v23, %v2716_v23 }
 0x192   :  { %v907_v54 = vadd.f32 %v906_v52, %v844_v13  ;;  %v2730_v50 = vsub.f32 %v4054_v7, %v2561_v56  ;;  %v4055_v13 = vmax.f32 %v2309_v63, 0.0  ;;  %v850_v37 = vmul.f32 %v2723_v10, %v2723_v10 }
 0x194   :  { %v908_v44 = vadd.f32 %v907_v54, %v845_v22  ;;  %v2737_v52 = vsub.f32 %v4055_v13, %v2561_v56  ;;  %v4056_v22 = vmax.f32 %v2323_v21, 0.0  ;;  %v851_v47 = vmul.f32 %v2730_v50, %v2730_v50 }
 0x196   :  { %v909_v34 = vadd.f32 %v908_v44, %v846_v19  ;;  %v2744_v54 = vsub.f32 %v4056_v22, %v2561_v56  ;;  %v4057_v19 = vmax.f32 %v2317_v14, 0.0  ;;  %v852_v63 = vmul.f32 %v2737_v52, %v2737_v52 }
 0x198   :  { %v910_v45 = vadd.f32 %v909_v34, %v847_v25  ;;  %v2751_v44 = vsub.f32 %v4057_v19, %v2561_v56  ;;  %v4058_v25 = vmax.f32 %v2328_v27, 0.0  ;;  %v853_v21 = vmul.f32 %v2744_v54, %v2744_v54 }
 0x19a   :  { %v911_v49 = vadd.f32 %v910_v45, %v848_v31  ;;  %v2758_v34 = vsub.f32 %v4058_v25, %v2561_v56  ;;  %v4059_v31 = vmax.f32 %v2337_v42, 0.0  ;;  %v854_v14 = vmul.f32 %v2751_v44, %v2751_v44 }
 0x19c   :  { %v912_v28 = vadd.f32 %v911_v49, %v849_v40  ;;  %v2765_v45 = vsub.f32 %v4059_v31, %v2561_v56  ;;  %v4060_v40 = vmax.f32 %v2351_v32, 0.0  ;;  %v855_v27 = vmul.f32 %v2758_v34, %v2758_v34 }
 0x19e   :  { %v913_v59 = vadd.f32 %v912_v28, %v850_v37  ;;  %v2772_v49 = vsub.f32 %v4060_v40, %v2561_v56  ;;  %v4061_v37 = vmax.f32 %v2345_v9, 0.0  ;;  %v856_v42 = vmul.f32 %v2765_v45, %v2765_v45 }
 0x1a0   :  { %v914_v4 = vadd.f32 %v913_v59, %v851_v47  ;;  %v2779_v28 = vsub.f32 %v4061_v37, %v2561_v56  ;;  %v4062_v47 = vmax.f32 %v2356_v39, 0.0  ;;  %v857_v32 = vmul.f32 %v2772_v49, %v2772_v49  ;;  %v4068_v37 = vld [vmem:[#allocation4_spill] sm:$0xff] }
 0x1a2   :  { %v915_v1 = vadd.f32 %v914_v4, %v852_v63  ;;  %v2786_v59 = vsub.f32 %v4062_v47, %v2561_v56  ;;  %v4063_v63 = vmax.f32 %v2365_v3, 0.0  ;;  %v858_v9 = vmul.f32 %v2779_v28, %v2779_v28 }
 0x1a4   :  { %v916_v7 = vadd.f32 %v915_v1, %v853_v21  ;;  %v2793_v4 = vsub.f32 %v4063_v63, %v2561_v56  ;;  %v4064_v21 = vld [vmem:[#allocation3_spill] sm:$0xff]  ;;  %v859_v39 = vmul.f32 %v2786_v59, %v2786_v59 }
 0x1a5   :  { %v4065_v1 = vmax.f32 %v4064_v21, 0.0 }
 0x1a6   :  { %v917_v13 = vadd.f32 %v916_v7, %v854_v14  ;;  %v4066_v7 = vld [vmem:[#allocation2_spill] sm:$0xff]  ;;  %v860_v3 = vmul.f32 %v2793_v4, %v2793_v4 }
 0x1a7   :  { %v2800_v31 = vsub.f32 %v4065_v1, %v2561_v56  ;;  %v4067_v40 = vmax.f32 %v4066_v7, 0.0  ;;  %v4074_v1 = vld [vmem:[#allocation7_spill] sm:$0xff] }
 0x1a8   :  { %v918_v22 = vadd.f32 %v917_v13, %v855_v27 }
 0x1a9   :  { %v2807_v27 = vsub.f32 %v4067_v40, %v2561_v56  ;;  %v861_v47 = vmul.f32 %v2800_v31, %v2800_v31 }
 0x1aa   :  { %v919_v19 = vadd.f32 %v918_v22, %v856_v42  ;;  %v4069_v42 = vmax.f32 %v4068_v37, 0.0 }
 0x1ac   :  { %v920_v25 = vadd.f32 %v919_v19, %v857_v32  ;;  %v2814_v22 = vsub.f32 %v4069_v42, %v2561_v56  ;;  %v4071_v19 = vld [vmem:[#allocation5_spill] sm:$0xff] }
 0x1ad   :  { %v4072_v63 = vmax.f32 %v4071_v19, 0.0 }
 0x1ae   :  { %v921_v14 = vadd.f32 %v920_v25, %v858_v9  ;;  %4070 = vst [vmem:[#allocation3_spill] sm:$0xff] %v2814_v22  ;;  %v862_v25 = vmul.f32 %v2807_v27, %v2807_v27  ;;  %v863_v7 = vmul.f32 %v2814_v22, %v2814_v22 }
 0x1af   :  { %v2821_v9 = vsub.f32 %v4072_v63, %v2561_v56 }
 0x1b0   :  { %v922_v13 = vadd.f32 %v921_v14, %v859_v39  ;;  %v4075_v39 = vmax.f32 %v4074_v1, 0.0 }
 0x1b1   :  { %4073 = vst [vmem:[#allocation2_spill] sm:$0xff] %v2821_v9  ;;  %v864_v42 = vmul.f32 %v2821_v9, %v2821_v9 }
 0x1b2   :  { %v923_v32 = vadd.f32 %v922_v13, %v860_v3  ;;  %v2828_v14 = vsub.f32 %v4075_v39, %v2561_v56  ;;  %v4077_v3 = vld [vmem:[#allocation6_spill] sm:$0xff] }
 0x1b3   :  { %v4078_v13 = vmax.f32 %v4077_v3, 0.0 }
 0x1b4   :  { %v924_v21 = vadd.f32 %v923_v32, %v861_v47  ;;  %4076 = vst [vmem:[#allocation4_spill] sm:$0xff] %v2828_v14  ;;  %v4080_v47 = vld [vmem:[#allocation8_spill] sm:$0xff]  ;;  %v865_v1 = vmul.f32 %v2828_v14, %v2828_v14 }
 0x1b5   :  { %v2835_v37 = vsub.f32 %v4078_v13, %v2561_v56  ;;  %v4081_v32 = vmax.f32 %v4080_v47, 0.0 }
 0x1b6   :  { %v925_v40 = vadd.f32 %v924_v21, %v862_v25  ;;  %v4083_v25 = vld [vmem:[#allocation9_spill] sm:$0xff] }
 0x1b7   :  { %4079 = vst [vmem:[#allocation5_spill] sm:$0xff] %v2835_v37  ;;  %v2842_v63 = vsub.f32 %v4081_v32, %v2561_v56  ;;  %v4084_v21 = vmax.f32 %v4083_v25, 0.0  ;;  %v866_v3 = vmul.f32 %v2835_v37, %v2835_v37 }
 0x1b8   :  { %v926_v19 = vadd.f32 %v925_v40, %v863_v7  ;;  %v4086_v7 = vld [vmem:[#allocation10_spill] sm:$0xff] }
 0x1b9   :  { %4082 = vst [vmem:[#allocation7_spill] sm:$0xff] %v2842_v63  ;;  %v2849_v22 = vsub.f32 %v4084_v21, %v2561_v56  ;;  %v4087_v40 = vmax.f32 %v4086_v7, 0.0  ;;  %v867_v47 = vmul.f32 %v2842_v63, %v2842_v63 }
 0x1ba   :  { %v927_v39 = vadd.f32 %v926_v19, %v864_v42  ;;  %v4089_v42 = vld [vmem:[#allocation11_spill] sm:$0xff] }
 0x1bb   :  { %4085 = vst [vmem:[#allocation6_spill] sm:$0xff] %v2849_v22  ;;  %v2856_v9 = vsub.f32 %v4087_v40, %v2561_v56  ;;  %v4090_v19 = vmax.f32 %v4089_v42, 0.0  ;;  %v868_v25 = vmul.f32 %v2849_v22, %v2849_v22 }
 0x1bc   :  { %v928_v13 = vadd.f32 %v927_v39, %v865_v1  ;;  %v4092_v1 = vld [vmem:[#allocation12_spill] sm:$0xff] }
 0x1bd   :  { %4088 = vst [vmem:[#allocation8_spill] sm:$0xff] %v2856_v9  ;;  %v2863_v14 = vsub.f32 %v4090_v19, %v2561_v56  ;;  %v4093_v39 = vmax.f32 %v4092_v1, 0.0  ;;  %v869_v7 = vmul.f32 %v2856_v9, %v2856_v9 }
 0x1be   :  { %v929_v32 = vadd.f32 %v928_v13, %v866_v3  ;;  %v4095_v3 = vld [vmem:[#allocation13_spill] sm:$0xff] }
 0x1bf   :  { %4091 = vst [vmem:[#allocation9_spill] sm:$0xff] %v2863_v14  ;;  %v2870_v37 = vsub.f32 %v4093_v39, %v2561_v56  ;;  %v4096_v13 = vmax.f32 %v4095_v3, 0.0  ;;  %v870_v42 = vmul.f32 %v2863_v14, %v2863_v14 }
 0x1c0   :  { %v930_v21 = vadd.f32 %v929_v32, %v867_v47  ;;  %v4098_v47 = vld [vmem:[#allocation14_spill] sm:$0xff] }
 0x1c1   :  { %4094 = vst [vmem:[#allocation10_spill] sm:$0xff] %v2870_v37  ;;  %v2877_v63 = vsub.f32 %v4096_v13, %v2561_v56  ;;  %v4099_v32 = vmax.f32 %v4098_v47, 0.0  ;;  %v871_v1 = vmul.f32 %v2870_v37, %v2870_v37 }
 0x1c2   :  { %v931_v40 = vadd.f32 %v930_v21, %v868_v25  ;;  %v4101_v25 = vld [vmem:[#allocation15_spill] sm:$0xff] }
 0x1c3   :  { %4097 = vst [vmem:[#allocation11_spill] sm:$0xff] %v2877_v63  ;;  %v2884_v22 = vsub.f32 %v4099_v32, %v2561_v56  ;;  %v4102_v21 = vmax.f32 %v4101_v25, 0.0  ;;  %v872_v3 = vmul.f32 %v2877_v63, %v2877_v63 }
 0x1c4   :  { %v932_v19 = vadd.f32 %v931_v40, %v869_v7  ;;  %v4104_v7 = vld [vmem:[#allocation16_spill] sm:$0xff] }
 0x1c5   :  { %4100 = vst [vmem:[#allocation12_spill] sm:$0xff] %v2884_v22  ;;  %v2891_v9 = vsub.f32 %v4102_v21, %v2561_v56  ;;  %v4105_v40 = vmax.f32 %v4104_v7, 0.0  ;;  %v873_v47 = vmul.f32 %v2884_v22, %v2884_v22 }
 0x1c6   :  { %v933_v39 = vadd.f32 %v932_v19, %v870_v42  ;;  %v4107_v42 = vld [vmem:[#allocation17_spill] sm:$0xff] }
 0x1c7   :  { %4103 = vst [vmem:[#allocation13_spill] sm:$0xff] %v2891_v9  ;;  %v2898_v14 = vsub.f32 %v4105_v40, %v2561_v56  ;;  %v4108_v19 = vmax.f32 %v4107_v42, 0.0  ;;  %v874_v25 = vmul.f32 %v2891_v9, %v2891_v9 }
 0x1c8   :  { %v934_v13 = vadd.f32 %v933_v39, %v871_v1  ;;  %v4109_v1 = vld [vmem:[#allocation18_spill] sm:$0xff] }
 0x1c9   :  { %4106 = vst [vmem:[#allocation14_spill] sm:$0xff] %v2898_v14  ;;  %v2905_v37 = vsub.f32 %v4108_v19, %v2561_v56  ;;  %v4110_v39 = vmax.f32 %v4109_v1, 0.0  ;;  %v875_v7 = vmul.f32 %v2898_v14, %v2898_v14 }
 0x1ca   :  { %v935_v32 = vadd.f32 %v934_v13, %v872_v3  ;;  %v4111_v3 = vld [vmem:[#allocation19_spill] sm:$0xff] }
 0x1cb   :  { %v2912_v63 = vsub.f32 %v4110_v39, %v2561_v56  ;;  %v4112_v13 = vmax.f32 %v4111_v3, 0.0  ;;  %v876_v42 = vmul.f32 %v2905_v37, %v2905_v37 }
 0x1cc   :  { %v936_v21 = vadd.f32 %v935_v32, %v873_v47  ;;  %v4113_v47 = vld [vmem:[#allocation20_spill] sm:$0xff] }
 0x1cd   :  { %v2919_v22 = vsub.f32 %v4112_v13, %v2561_v56  ;;  %v4114_v32 = vmax.f32 %v4113_v47, 0.0  ;;  %v877_v1 = vmul.f32 %v2912_v63, %v2912_v63 }
 0x1ce   :  { %v937_v40 = vadd.f32 %v936_v21, %v874_v25  ;;  %v4115_v25 = vld [vmem:[#allocation21_spill] sm:$0xff] }
 0x1cf   :  { %v2926_v9 = vsub.f32 %v4114_v32, %v2561_v56  ;;  %v4116_v21 = vmax.f32 %v4115_v25, 0.0  ;;  %v878_v3 = vmul.f32 %v2919_v22, %v2919_v22 }
 0x1d0   :  { %v938_v19 = vadd.f32 %v937_v40, %v875_v7 }
 0x1d1   :  { %v2933_v14 = vsub.f32 %v4116_v21, %v2561_v56  ;;  %v879_v7 = vmul.f32 %v2926_v9, %v2926_v9  ;;  %v882_v56 = vmul.f32 %v2571_v35, %v2571_v35  ;;  %v883_v21 = vmul.f32 %v2576_v18, %v2576_v18 }
 0x1d2   :  { %v939_v39 = vadd.f32 %v938_v19, %v876_v42  ;;  %v881_v42 = vmul.f32 %v2566_v24, %v2566_v24 }
 0x1d3   :  { %v880_v47 = vmul.f32 %v2933_v14, %v2933_v14 }
 0x1d4   :  { %v940_v13 = vadd.f32 %v939_v39, %v877_v1  ;;  %v884_v39 = vmul.f32 %v2579_v38, %v2579_v38 }
 0x1d6   :  { %v941_v40 = vadd.f32 %v940_v13, %v878_v3  ;;  %v885_v13 = vmul.f32 %v2582_v5, %v2582_v5 }
 0x1d8   :  { %v942_v32 = vadd.f32 %v941_v40, %v879_v7  ;;  %v886_v40 = vmul.f32 %v2585_v12, %v2585_v12 }
 0x1da   :  { %v943_v19 = vadd.f32 %v942_v32, %v880_v47  ;;  %v887_v32 = vmul.f32 %v2588_v43, %v2588_v43 }
 0x1dc   :  { %v944_v25 = vadd.f32 %v943_v19, %v881_v42  ;;  %v888_v19 = vmul.f32 %v2591_v48, %v2591_v48 }
 0x1de   :  { %v945_v1 = vadd.f32 %v944_v25, %v882_v56  ;;  %v889_v25 = vmul.f32 %v2594_v2, %v2594_v2 }
 0x1e0   :  { %v946_v3 = vadd.f32 %v945_v1, %v883_v21  ;;  %v890_v1 = vmul.f32 %v2597_v36, %v2597_v36 }
 0x1e2   :  { %v947_v7 = vadd.f32 %v946_v3, %v884_v39  ;;  %v891_v3 = vmul.f32 %v2600_v16, %v2600_v16 }
 0x1e4   :  { %v948_v47 = vadd.f32 %v947_v7, %v885_v13  ;;  %v892_v7 = vmul.f32 %v2603_v0, %v2603_v0 }
 0x1e6   :  { %v949_v42 = vadd.f32 %v948_v47, %v886_v40  ;;  %v893_v47 = vmul.f32 %v2606_v6, %v2606_v6 }
 0x1e8   :  { %v950_v56 = vadd.f32 %v949_v42, %v887_v32  ;;  %v894_v42 = vmul.f32 %v2609_v41, %v2609_v41 }
 0x1ea   :  { %v951_v21 = vadd.f32 %v950_v56, %v888_v19  ;;  %v895_v56 = vmul.f32 %v2612_v51, %v2612_v51 }
 0x1ec   :  { %v952_v39 = vadd.f32 %v951_v21, %v889_v25  ;;  %v896_v21 = vmul.f32 %v2615_v58, %v2615_v58 }
 0x1ee   :  { %v953_v13 = vadd.f32 %v952_v39, %v890_v1  ;;  %v897_v39 = vmul.f32 %v2618_v61, %v2618_v61 }
 0x1f0   :  { %v954_v40 = vadd.f32 %v953_v13, %v891_v3  ;;  %v898_v13 = vmul.f32 %v2621_v20, %v2621_v20 }
 0x1f2   :  { %v955_v32 = vadd.f32 %v954_v40, %v892_v7  ;;  %v899_v40 = vmul.f32 %v2624_v11, %v2624_v11 }
 0x1f4   :  { %v956_v19 = vadd.f32 %v955_v32, %v893_v47 }
 0x1f6   :  { %v957_v25 = vadd.f32 %v956_v19, %v894_v42 }
 0x1f8   :  { %v958_v1 = vadd.f32 %v957_v25, %v895_v56 }
 0x1fa   :  { %v959_v3 = vadd.f32 %v958_v1, %v896_v21 }
 0x1fc   :  { %v960_v7 = vadd.f32 %v959_v3, %v897_v39  ;;  %v4118_v39 = vld [vmem:[#allocation2_spill] sm:$0xff]  ;;  %v4119_v3 = vld [vmem:[#allocation4_spill] sm:$0xff] }
 0x1fe   :  { %v961_v47 = vadd.f32 %v960_v7, %v898_v13  ;;  %v4120_v13 = vld [vmem:[#allocation5_spill] sm:$0xff]  ;;  %v4121_v7 = vld [vmem:[#allocation7_spill] sm:$0xff] }
 0x200   :  { %v962_v32 = vadd.f32 %v961_v47, %v899_v40  ;;  %v4122_v40 = vld [vmem:[#allocation6_spill] sm:$0xff] }
 0x202   :  { %v963_v41 = vrot.slane %v962_v32, 4 }
 0x204   :  { %v964_v51 = vadd.f32 %v963_v41, %v962_v32  ;;  %v4123_v32 = vld [vmem:[#allocation8_spill] sm:$0xff] }
 0x206   :  { %v965_v42 = vrot.slane %v964_v51, 2 }
 0x208   :  { %v966_v19 = vadd.f32 %v965_v42, %v964_v51 }
 0x20a   :  { %v967_v6 = vrot.slane %v966_v19, 1 }
 0x20c   :  { %v968_v58 = vadd.f32 %v967_v6, %v966_v19  ;;  %v4125_v19 = vld [vmem:[#allocation9_spill] sm:$0xff] }
 0x20e   :  { %v969_v56 = vmul.f32 0.001953125, %v968_v58 }
 0x210   :  { %v970_v25 = vadd.f32 1e-05, %v969_v56 }
 0x212   :  { %2040 = vrsqrt.f32 %v970_v25  ;;  %v4126_v25 = vld [vmem:[#allocation10_spill] sm:$0xff] }
 0x21f   :  { %v2979_v61 = vpop.eup %2040 }
 0x220   :  { %v2983_v21 = vmul.f32 %v2979_v61, %v2629_v33  ;;  %v2987_v1 = vmul.f32 %v2979_v61, %v2634_v15  ;;  %v2991_v41 = vmul.f32 %v2979_v61, %v2639_v55  ;;  %v2995_v6 = vmul.f32 %v2979_v61, %v2648_v57 }
 0x221   :  { %v2999_v51 = vmul.f32 %v2979_v61, %v2653_v17  ;;  %v3003_v58 = vmul.f32 %v2979_v61, %v2660_v29  ;;  %v3007_v33 = vmul.f32 %v2979_v61, %v2667_v26  ;;  %v3011_v15 = vmul.f32 %v2979_v61, %v2674_v62 }
 0x222   :  { %v3015_v55 = vmul.f32 %v2979_v61, %v2681_v8  ;;  %v3019_v57 = vmul.f32 %v2979_v61, %v2688_v46  ;;  %v3023_v17 = vmul.f32 %v2979_v61, %v2695_v30  ;;  %v3027_v29 = vmul.f32 %v2979_v61, %v2702_v53 }
 0x223   :  { %v3031_v26 = vmul.f32 %v2979_v61, %v2709_v60  ;;  %v3035_v62 = vmul.f32 %v2979_v61, %v2716_v23  ;;  %v3039_v8 = vmul.f32 %v2979_v61, %v2723_v10  ;;  %v3043_v46 = vmul.f32 %v2979_v61, %v2730_v50 }
 0x224   :  { %v3047_v30 = vmul.f32 %v2979_v61, %v2737_v52  ;;  %v3051_v53 = vmul.f32 %v2979_v61, %v2744_v54  ;;  %v3055_v60 = vmul.f32 %v2979_v61, %v2751_v44  ;;  %v3059_v23 = vmul.f32 %v2979_v61, %v2758_v34 }
 0x225   :  { %v3063_v10 = vmul.f32 %v2979_v61, %v2765_v45  ;;  %v3067_v50 = vmul.f32 %v2979_v61, %v2772_v49  ;;  %v3071_v52 = vmul.f32 %v2979_v61, %v2779_v28  ;;  %v3075_v54 = vmul.f32 %v2979_v61, %v2786_v59  ;;  %v4117_v49 = vld [vmem:[#allocation3_spill] sm:$0xff] }
 0x226   :  { %v3079_v44 = vmul.f32 %v2979_v61, %v2793_v4  ;;  %v3083_v34 = vmul.f32 %v2979_v61, %v2800_v31  ;;  %v3087_v45 = vmul.f32 %v2979_v61, %v2807_v27  ;;  %v3091_v28 = vmul.f32 %v2979_v61, %v4117_v49 }
 0x227   :  { %v3095_v59 = vmul.f32 %v2979_v61, %v4118_v39  ;;  %v3099_v4 = vmul.f32 %v2979_v61, %v4119_v3  ;;  %v3103_v31 = vmul.f32 %v2979_v61, %v4120_v13  ;;  %v3107_v27 = vmul.f32 %v2979_v61, %v4121_v7  ;;  %v4127_v39 = vld [vmem:[#allocation11_spill] sm:$0xff]  ;;  %v4128_v13 = vld [vmem:[#allocation12_spill] sm:$0xff] }
 0x228   :  { %v3111_v47 = vmul.f32 %v2979_v61, %v4122_v40  ;;  %v3115_v42 = vmul.f32 %v2979_v61, %v4123_v32  ;;  %v3119_v56 = vmul.f32 %v2979_v61, %v4125_v19  ;;  %v3123_v49 = vmul.f32 %v2979_v61, %v4126_v25  ;;  %v4129_v40 = vld [vmem:[#allocation13_spill] sm:$0xff] }
 0x229   :  { %v3127_v3 = vmul.f32 %v2979_v61, %v4127_v39  ;;  %v3131_v7 = vmul.f32 %v2979_v61, %v4128_v13  ;;  %v3135_v32 = vmul.f32 %v2979_v61, %v4129_v40  ;;  %v3143_v25 = vmul.f32 %v2979_v61, %v2905_v37 }
 0x22a   :  { %4124 = vst [vmem:[#allocation15_spill] sm:$0xff] %v3115_v42  ;;  %v4130_v42 = vld [vmem:[#allocation14_spill] sm:$0xff]  ;;  %v3147_v39 = vmul.f32 %v2979_v61, %v2912_v63  ;;  %v3151_v13 = vmul.f32 %v2979_v61, %v2919_v22  ;;  %v3155_v40 = vmul.f32 %v2979_v61, %v2926_v9  ;;  %v3163_v37 = vmul.f32 %v2979_v61, %v2566_v24 }
 0x22b   :  { %v3139_v19 = vmul.f32 %v2979_v61, %v4130_v42  ;;  %v3159_v42 = vmul.f32 %v2979_v61, %v2933_v14  ;;  %v3167_v63 = vmul.f32 %v2979_v61, %v2571_v35  ;;  %v3171_v22 = vmul.f32 %v2979_v61, %v2576_v18 }
 0x22c   :  { %v3175_v9 = vmul.f32 %v2979_v61, %v2579_v38  ;;  %v3179_v14 = vmul.f32 %v2979_v61, %v2582_v5  ;;  %v3183_v24 = vmul.f32 %v2979_v61, %v2585_v12  ;;  %v3187_v35 = vmul.f32 %v2979_v61, %v2588_v43  ;;  %v3208_v43 = vld [vmem:[%s3922_s3] ss:$0 sm:$0xff] }
 0x22d   :  { %v3191_v18 = vmul.f32 %v2979_v61, %v2591_v48  ;;  %v3195_v38 = vmul.f32 %v2979_v61, %v2594_v2  ;;  %v3199_v5 = vmul.f32 %v2979_v61, %v2597_v36  ;;  %v3203_v12 = vmul.f32 %v2979_v61, %v2600_v16 }
 0x22e   :  { %4131 = vst [vmem:[#allocation16_spill] sm:$0xff] %v3183_v24  ;;  %4132 = vst [vmem:[#allocation17_spill] sm:$0xff] %v3187_v35  ;;  %v3212_v48 = vmul.f32 %v2979_v61, %v2603_v0  ;;  %v4141_v24 = vld [vmem:[#allocation26_spill] sm:$0xff] }
 0x22f   :  { %4133 = vst [vmem:[#allocation18_spill] sm:$0xff] %v3191_v18  ;;  %4134 = vst [vmem:[#allocation19_spill] sm:$0xff] %v3195_v38  ;;  %v4137_v18 = vld [vmem:[#allocation22_spill] sm:$0xff]  ;;  %v4138_v38 = vld [vmem:[#allocation23_spill] sm:$0xff]  ;;  %v3232_v0 = vmul.f32 %v2979_v61, %v4141_v24  ;;  %v3252_v24 = vmul.f32 %v3208_v43, %v2991_v41  ;;  %v3276_v41 = vmul.f32 %v3208_v43, %v3015_v55 }
 0x230   :  { %4135 = vst [vmem:[#allocation20_spill] sm:$0xff] %v3199_v5  ;;  %4136 = vst [vmem:[#allocation21_spill] sm:$0xff] %v3203_v12  ;;  %v3216_v2 = vmul.f32 %v2979_v61, %v4137_v18  ;;  %v3220_v36 = vmul.f32 %v2979_v61, %v4138_v38  ;;  %v4139_v5 = vld [vmem:[#allocation24_spill] sm:$0xff]  ;;  %v4140_v12 = vld [vmem:[#allocation25_spill] sm:$0xff]  ;;  %v3236_v18 = vmul.f32 %v2979_v61, %v2621_v20 }
 0x231   :  { %v3224_v16 = vmul.f32 %v2979_v61, %v4139_v5  ;;  %v3228_v35 = vmul.f32 %v2979_v61, %v4140_v12  ;;  %v3240_v38 = vmul.f32 %v2979_v61, %v2624_v11  ;;  %v3244_v5 = vmul.f32 %v3208_v43, %v2983_v21 }
 0x232   :  { %v3248_v12 = vmul.f32 %v3208_v43, %v2987_v1  ;;  %v3256_v20 = vmul.f32 %v3208_v43, %v2995_v6  ;;  %v3260_v61 = vmul.f32 %v3208_v43, %v2999_v51  ;;  %v3264_v11 = vmul.f32 %v3208_v43, %v3003_v58 }
 0x233   :  { %v3268_v21 = vmul.f32 %v3208_v43, %v3007_v33  ;;  %v3272_v1 = vmul.f32 %v3208_v43, %v3011_v15  ;;  %v3280_v6 = vmul.f32 %v3208_v43, %v3019_v57  ;;  %v3284_v51 = vmul.f32 %v3208_v43, %v3023_v17 }
 0x234   :  { %v3288_v58 = vmul.f32 %v3208_v43, %v3027_v29  ;;  %v3292_v33 = vmul.f32 %v3208_v43, %v3031_v26  ;;  %v3296_v15 = vmul.f32 %v3208_v43, %v3035_v62  ;;  %v3300_v55 = vmul.f32 %v3208_v43, %v3039_v8 }
 0x235   :  { %v3304_v57 = vmul.f32 %v3208_v43, %v3043_v46  ;;  %v3308_v17 = vmul.f32 %v3208_v43, %v3047_v30  ;;  %v3312_v29 = vmul.f32 %v3208_v43, %v3051_v53  ;;  %v3316_v26 = vmul.f32 %v3208_v43, %v3055_v60 }
 0x236   :  { %v3320_v62 = vmul.f32 %v3208_v43, %v3059_v23  ;;  %v3324_v8 = vmul.f32 %v3208_v43, %v3063_v10  ;;  %v3328_v46 = vmul.f32 %v3208_v43, %v3067_v50  ;;  %v3332_v30 = vmul.f32 %v3208_v43, %v3071_v52 }
 0x237   :  { %v3336_v53 = vmul.f32 %v3208_v43, %v3075_v54  ;;  %v3340_v60 = vmul.f32 %v3208_v43, %v3079_v44  ;;  %v3344_v23 = vmul.f32 %v3208_v43, %v3083_v34  ;;  %v3348_v10 = vmul.f32 %v3208_v43, %v3087_v45 }
 0x238   :  { %v3352_v50 = vmul.f32 %v3208_v43, %v3091_v28  ;;  %v3356_v52 = vmul.f32 %v3208_v43, %v3095_v59  ;;  %v3360_v54 = vmul.f32 %v3208_v43, %v3099_v4  ;;  %v3364_v44 = vmul.f32 %v3208_v43, %v3103_v31  ;;  %v4142_v28 = vld [vmem:[#allocation15_spill] sm:$0xff] }
 0x239   :  { %v3368_v34 = vmul.f32 %v3208_v43, %v3107_v27  ;;  %v3372_v45 = vmul.f32 %v3208_v43, %v3111_v47  ;;  %v3376_v59 = vmul.f32 %v3208_v43, %v4142_v28  ;;  %v3380_v4 = vmul.f32 %v3208_v43, %v3119_v56 }
 0x23a   :  { %v3384_v31 = vmul.f32 %v3208_v43, %v3123_v49  ;;  %v3388_v27 = vmul.f32 %v3208_v43, %v3127_v3  ;;  %v3392_v47 = vmul.f32 %v3208_v43, %v3131_v7  ;;  %v3396_v28 = vmul.f32 %v3208_v43, %v3135_v32 }
 0x23b   :  { %v3400_v56 = vmul.f32 %v3208_v43, %v3139_v19  ;;  %v3404_v49 = vmul.f32 %v3208_v43, %v3143_v25  ;;  %v3408_v3 = vmul.f32 %v3208_v43, %v3147_v39  ;;  %v3412_v7 = vmul.f32 %v3208_v43, %v3151_v13 }
 0x23c   :  { %v3416_v32 = vmul.f32 %v3208_v43, %v3155_v40  ;;  %v3420_v19 = vmul.f32 %v3208_v43, %v3159_v42  ;;  %v3424_v25 = vmul.f32 %v3208_v43, %v3163_v37  ;;  %v3428_v39 = vmul.f32 %v3208_v43, %v3167_v63 }
 0x23d   :  { %v3432_v13 = vmul.f32 %v3208_v43, %v3171_v22  ;;  %v3436_v40 = vmul.f32 %v3208_v43, %v3175_v9  ;;  %v3440_v42 = vmul.f32 %v3208_v43, %v3179_v14 }
 0x23e   :  { %4143 = vst [vmem:[#allocation3_spill] sm:$0xff] %v3420_v19  ;;  %4144 = vst [vmem:[#allocation2_spill] sm:$0xff] %v3424_v25  ;;  %v4149_v19 = vld [vmem:[#allocation16_spill] sm:$0xff]  ;;  %v4150_v25 = vld [vmem:[#allocation17_spill] sm:$0xff] }
 0x23f   :  { %4145 = vst [vmem:[#allocation4_spill] sm:$0xff] %v3428_v39  ;;  %4146 = vst [vmem:[#allocation5_spill] sm:$0xff] %v3432_v13  ;;  %v3444_v37 = vmul.f32 %v3208_v43, %v4149_v19  ;;  %v3448_v63 = vmul.f32 %v3208_v43, %v4150_v25  ;;  %v4151_v39 = vld [vmem:[#allocation18_spill] sm:$0xff]  ;;  %v4152_v13 = vld [vmem:[#allocation19_spill] sm:$0xff] }
 0x240   :  { %4147 = vst [vmem:[#allocation7_spill] sm:$0xff] %v3436_v40  ;;  %4148 = vst [vmem:[#allocation6_spill] sm:$0xff] %v3440_v42  ;;  %v3452_v22 = vmul.f32 %v3208_v43, %v4151_v39  ;;  %v3456_v9 = vmul.f32 %v3208_v43, %v4152_v13  ;;  %v4153_v40 = vld [vmem:[#allocation20_spill] sm:$0xff]  ;;  %v4154_v42 = vld [vmem:[#allocation21_spill] sm:$0xff]  ;;  %v3473_v39 = vmul.f32 %v3208_v43, %v3212_v48 }
 0x241   :  { %v3460_v14 = vmul.f32 %v3208_v43, %v4153_v40  ;;  %v3464_v19 = vmul.f32 %v3208_v43, %v4154_v42  ;;  %v3469_v25 = vld [vmem:[%s3923_s4] ss:$0 sm:$0xff]  ;;  %v3477_v13 = vmul.f32 %v3208_v43, %v3216_v2  ;;  %v3481_v40 = vmul.f32 %v3208_v43, %v3220_v36 }
 0x242   :  { %v3485_v42 = vmul.f32 %v3208_v43, %v3224_v16  ;;  %v3493_v48 = vmul.f32 %v3208_v43, %v3232_v0  ;;  %v3497_v2 = vmul.f32 %v3208_v43, %v3236_v18  ;;  %v3501_v36 = vmul.f32 %v3208_v43, %v3240_v38 }
 0x243   :  { %4155 = vst [vmem:[#allocation8_spill] sm:$0xff] %v3464_v19  ;;  %v3489_v19 = vmul.f32 %v3208_v43, %v3228_v35  ;;  %v3505_v16 = vadd.f32 %v3469_v25, %v3244_v5  ;;  %v3509_v35 = vadd.f32 %v3469_v25, %v3248_v12  ;;  %v3513_v0 = vadd.f32 %v3469_v25, %v3252_v24 }
 0x244   :  { %v3517_v18 = vadd.f32 %v3469_v25, %v3256_v20  ;;  %v3521_v43 = vadd.f32 %v3469_v25, %v3260_v61  ;;  %v3525_v38 = vadd.f32 %v3469_v25, %v3264_v11  ;;  %v3529_v5 = vadd.f32 %v3469_v25, %v3268_v21 }
 0x245   :  { %v3533_v12 = vadd.f32 %v3469_v25, %v3272_v1  ;;  %v3537_v24 = vadd.f32 %v3469_v25, %v3276_v41  ;;  %v3541_v20 = vadd.f32 %v3469_v25, %v3280_v6  ;;  %v3545_v61 = vadd.f32 %v3469_v25, %v3284_v51 }
 0x246   :  { %v3549_v11 = vadd.f32 %v3469_v25, %v3288_v58  ;;  %v3553_v21 = vadd.f32 %v3469_v25, %v3292_v33  ;;  %v3557_v1 = vadd.f32 %v3469_v25, %v3296_v15  ;;  %v3561_v41 = vadd.f32 %v3469_v25, %v3300_v55 }
 0x247   :  { %v3565_v6 = vadd.f32 %v3469_v25, %v3304_v57  ;;  %v3569_v51 = vadd.f32 %v3469_v25, %v3308_v17  ;;  %v3573_v58 = vadd.f32 %v3469_v25, %v3312_v29  ;;  %v3577_v33 = vadd.f32 %v3469_v25, %v3316_v26 }
 0x248   :  { %v3581_v15 = vadd.f32 %v3469_v25, %v3320_v62  ;;  %v3585_v55 = vadd.f32 %v3469_v25, %v3324_v8  ;;  %v3589_v57 = vadd.f32 %v3469_v25, %v3328_v46  ;;  %v3593_v17 = vadd.f32 %v3469_v25, %v3332_v30 }
 0x249   :  { %v3597_v29 = vadd.f32 %v3469_v25, %v3336_v53  ;;  %v3601_v26 = vadd.f32 %v3469_v25, %v3340_v60  ;;  %v3605_v62 = vadd.f32 %v3469_v25, %v3344_v23  ;;  %v3609_v8 = vadd.f32 %v3469_v25, %v3348_v10 }
 0x24a   :  { %v3613_v46 = vadd.f32 %v3469_v25, %v3352_v50  ;;  %v3617_v30 = vadd.f32 %v3469_v25, %v3356_v52  ;;  %v3621_v53 = vadd.f32 %v3469_v25, %v3360_v54  ;;  %v3625_v60 = vadd.f32 %v3469_v25, %v3364_v44 }
 0x24b   :  { %v3629_v23 = vadd.f32 %v3469_v25, %v3368_v34  ;;  %v3633_v10 = vadd.f32 %v3469_v25, %v3372_v45  ;;  %v3637_v50 = vadd.f32 %v3469_v25, %v3376_v59  ;;  %v3641_v52 = vadd.f32 %v3469_v25, %v3380_v4 }
 0x24c   :  { %v3645_v54 = vadd.f32 %v3469_v25, %v3384_v31  ;;  %v3649_v44 = vadd.f32 %v3469_v25, %v3388_v27  ;;  %v3653_v34 = vadd.f32 %v3469_v25, %v3392_v47  ;;  %v3657_v45 = vadd.f32 %v3469_v25, %v3396_v28  ;;  %v4161_v28 = vld [vmem:[#allocation3_spill] sm:$0xff] }
 0x24d   :  { %v3661_v59 = vadd.f32 %v3469_v25, %v3400_v56  ;;  %v3665_v4 = vadd.f32 %v3469_v25, %v3404_v49  ;;  %v3669_v31 = vadd.f32 %v3469_v25, %v3408_v3  ;;  %v3673_v27 = vadd.f32 %v3469_v25, %v3412_v7 }
 0x24e   :  { %v3677_v47 = vadd.f32 %v3469_v25, %v3416_v32  ;;  %v3681_v56 = vadd.f32 %v3469_v25, %v4161_v28 }
 0x24f   :  { %4156 = vst [vmem:[#allocation9_spill] sm:$0xff] %v3661_v59  ;;  %4157 = vst [vmem:[#allocation10_spill] sm:$0xff] %v3665_v4  ;;  %v4162_v59 = vld [vmem:[#allocation2_spill] sm:$0xff]  ;;  %v4163_v4 = vld [vmem:[#allocation4_spill] sm:$0xff] }
 0x250   :  { %4158 = vst [vmem:[#allocation11_spill] sm:$0xff] %v3669_v31  ;;  %4159 = vst [vmem:[#allocation12_spill] sm:$0xff] %v3673_v27  ;;  %v3685_v49 = vadd.f32 %v3469_v25, %v4162_v59  ;;  %v3689_v3 = vadd.f32 %v3469_v25, %v4163_v4  ;;  %v4164_v31 = vld [vmem:[#allocation5_spill] sm:$0xff]  ;;  %v4165_v27 = vld [vmem:[#allocation7_spill] sm:$0xff]  ;;  %v3705_v59 = vadd.f32 %v3469_v25, %v3444_v37 }
 0x251   :  { %4160 = vst [vmem:[#allocation13_spill] sm:$0xff] %v3677_v47  ;;  %v3693_v7 = vadd.f32 %v3469_v25, %v4164_v31  ;;  %v3697_v32 = vadd.f32 %v3469_v25, %v4165_v27  ;;  %v4166_v47 = vld [vmem:[#allocation6_spill] sm:$0xff]  ;;  %v3709_v4 = vadd.f32 %v3469_v25, %v3448_v63  ;;  %v3713_v31 = vadd.f32 %v3469_v25, %v3452_v22 }
 0x252   :  { %v3701_v28 = vadd.f32 %v3469_v25, %v4166_v47  ;;  %v3717_v27 = vadd.f32 %v3469_v25, %v3456_v9  ;;  %v3721_v47 = vadd.f32 %v3469_v25, %v3460_v14  ;;  %v3729_v63 = vadd.f32 %v3469_v25, %v3473_v39 }
 0x253   :  { %v3733_v22 = vadd.f32 %v3469_v25, %v3477_v13  ;;  %v3737_v9 = vadd.f32 %v3469_v25, %v3481_v40  ;;  %v3741_v14 = vadd.f32 %v3469_v25, %v3485_v42  ;;  %v3749_v39 = vadd.f32 %v3469_v25, %v3493_v48 }
 0x254   :  { %4167 = vst [vmem:[#allocation14_spill] sm:$0xff] %v3701_v28  ;;  %v4168_v28 = vld [vmem:[#allocation8_spill] sm:$0xff]  ;;  %v3753_v13 = vadd.f32 %v3469_v25, %v3497_v2  ;;  %v3757_v40 = vadd.f32 %v3469_v25, %v3501_v36  ;;  %v1676_v42 = vpack.c.bf16 %v3509_v35, %v3505_v16  ;;  %v1691_v48 = vpack.c.bf16 %v3533_v12, %v3529_v5 }
 0x255   :  { %v3725_v37 = vadd.f32 %v3469_v25, %v4168_v28  ;;  %4169 = vst [vmem:[#allocation22_spill] sm:$0xff] %v3741_v14  ;;  %v3745_v28 = vadd.f32 %v3469_v25, %v3489_v19  ;;  %v1681_v14 = vpack.c.bf16 %v3517_v18, %v3513_v0  ;;  %v1686_v19 = vpack.c.bf16 %v3525_v38, %v3521_v43 }
 0x256   :  { %4170 = vst [vmem:[#allocation23_spill] sm:$0xff] %v3753_v13  ;;  %v1696_v2 = vpack.c.bf16 %v3541_v20, %v3537_v24  ;;  %v1701_v13 = vpack.c.bf16 %v3549_v11, %v3545_v61  ;;  %v1706_v25 = vpack.c.bf16 %v3557_v1, %v3553_v21  ;;  %v1711_v36 = vpack.c.bf16 %v3565_v6, %v3561_v41  ;;  %v4171_v11 = vld [vmem:[#allocation9_spill] sm:$0xff]  ;;  %v4172_v1 = vld [vmem:[#allocation10_spill] sm:$0xff] }
 0x257   :  { %1677 = vst [vmem:[%s3924_s5] sm:$0xff] %v1676_v42   ;;  %1833 = vst [vmem:[%s3924_s5 + $0x8] sm:$0xff] %v1681_v14   ;;  %v1716_v16 = vpack.c.bf16 %v3573_v58, %v3569_v51  ;;  %v1721_v35 = vpack.c.bf16 %v3581_v15, %v3577_v33  ;;  %v1726_v0 = vpack.c.bf16 %v3589_v57, %v3585_v55  ;;  %v4173_v41 = vld [vmem:[#allocation11_spill] sm:$0xff]  ;;  %v4174_v51 = vld [vmem:[#allocation12_spill] sm:$0xff] }
 0x258   :  { %1834 = vst [vmem:[%s3924_s5 + $0x10] sm:$0xff] %v1686_v19   ;;  %1835 = vst [vmem:[%s3924_s5 + $0x18] sm:$0xff] %v1691_v48   ;;  %v1731_v18 = vpack.c.bf16 %v3597_v29, %v3593_v17  ;;  %v1736_v43 = vpack.c.bf16 %v3605_v62, %v3601_v26  ;;  %v1741_v38 = vpack.c.bf16 %v3613_v46, %v3609_v8  ;;  %v4175_v58 = vld [vmem:[#allocation13_spill] sm:$0xff] }
 0x259   :  { %1836 = vst [vmem:[%s3924_s5 + $0x20] sm:$0xff] %v1696_v2   ;;  %1837 = vst [vmem:[%s3924_s5 + $0x28] sm:$0xff] %v1701_v13   ;;  %v1746_v5 = vpack.c.bf16 %v3621_v53, %v3617_v30  ;;  %v1751_v12 = vpack.c.bf16 %v3629_v23, %v3625_v60  ;;  %v1756_v24 = vpack.c.bf16 %v3637_v50, %v3633_v10 }
 0x25a   :  { %1838 = vst [vmem:[%s3924_s5 + $0x30] sm:$0xff] %v1706_v25   ;;  %1839 = vst [vmem:[%s3924_s5 + $0x38] sm:$0xff] %v1711_v36   ;;  %v1761_v20 = vpack.c.bf16 %v3645_v54, %v3641_v52  ;;  %v1766_v61 = vpack.c.bf16 %v3653_v34, %v3649_v44  ;;  %v1771_v21 = vpack.c.bf16 %v4171_v11, %v3657_v45 }
 0x25b   :  { %1840 = vst [vmem:[%s3924_s5 + $0x40] sm:$0xff] %v1716_v16   ;;  %1841 = vst [vmem:[%s3924_s5 + $0x48] sm:$0xff] %v1721_v35   ;;  %v1776_v6 = vpack.c.bf16 %v4173_v41, %v4172_v1  ;;  %v1781_v33 = vpack.c.bf16 %v4175_v58, %v4174_v51  ;;  %v1786_v15 = vpack.c.bf16 %v3685_v49, %v3681_v56  ;;  %v4176_v57 = vld [vmem:[#allocation14_spill] sm:$0xff] }
 0x25c   :  { %1842 = vst [vmem:[%s3924_s5 + $0x50] sm:$0xff] %v1726_v0   ;;  %1843 = vst [vmem:[%s3924_s5 + $0x58] sm:$0xff] %v1731_v18   ;;  %v1791_v55 = vpack.c.bf16 %v3693_v7, %v3689_v3  ;;  %v1796_v17 = vpack.c.bf16 %v4176_v57, %v3697_v32  ;;  %v1801_v29 = vpack.c.bf16 %v3709_v4, %v3705_v59  ;;  %v4177_v46 = vld [vmem:[#allocation22_spill] sm:$0xff] }
 0x25d   :  { %1844 = vst [vmem:[%s3924_s5 + $0x60] sm:$0xff] %v1736_v43   ;;  %1845 = vst [vmem:[%s3924_s5 + $0x68] sm:$0xff] %v1741_v38   ;;  %v1806_v26 = vpack.c.bf16 %v3717_v27, %v3713_v31  ;;  %v1811_v62 = vpack.c.bf16 %v3725_v37, %v3721_v47  ;;  %v1816_v8 = vpack.c.bf16 %v3733_v22, %v3729_v63  ;;  %v4178_v60 = vld [vmem:[#allocation23_spill] sm:$0xff] }
 0x25e   :  { %1846 = vst [vmem:[%s3924_s5 + $0x70] sm:$0xff] %v1746_v5   ;;  %1847 = vst [vmem:[%s3924_s5 + $0x78] sm:$0xff] %v1751_v12   ;;  %v1821_v30 = vpack.c.bf16 %v4177_v46, %v3737_v9  ;;  %v1826_v53 = vpack.c.bf16 %v3749_v39, %v3745_v28  ;;  %v1831_v23 = vpack.c.bf16 %v3757_v40, %v4178_v60 }
 0x25f   :  { %1848 = vst [vmem:[%s3924_s5 + $0x80] sm:$0xff] %v1756_v24   ;;  %1849 = vst [vmem:[%s3924_s5 + $0x88] sm:$0xff] %v1761_v20  }
 0x260   :  { %1850 = vst [vmem:[%s3924_s5 + $0x90] sm:$0xff] %v1766_v61   ;;  %1851 = vst [vmem:[%s3924_s5 + $0x98] sm:$0xff] %v1771_v21  }
 0x261   :  { %1852 = vst [vmem:[%s3924_s5 + $0xa0] sm:$0xff] %v1776_v6   ;;  %1853 = vst [vmem:[%s3924_s5 + $0xa8] sm:$0xff] %v1781_v33  }
 0x262   :  { %1854 = vst [vmem:[%s3924_s5 + $0xb0] sm:$0xff] %v1786_v15   ;;  %1855 = vst [vmem:[%s3924_s5 + $0xb8] sm:$0xff] %v1791_v55  }
 0x263   :  { %1856 = vst [vmem:[%s3924_s5 + $0xc0] sm:$0xff] %v1796_v17   ;;  %1857 = vst [vmem:[%s3924_s5 + $0xc8] sm:$0xff] %v1801_v29  }
 0x264   :  { %1858 = vst [vmem:[%s3924_s5 + $0xd0] sm:$0xff] %v1806_v26   ;;  %1859 = vst [vmem:[%s3924_s5 + $0xd8] sm:$0xff] %v1811_v62  }
 0x265   :  { %1860 = vst [vmem:[%s3924_s5 + $0xe0] sm:$0xff] %v1816_v8   ;;  %1861 = vst [vmem:[%s3924_s5 + $0xe8] sm:$0xff] %v1821_v30  }
 0x266   :  { %1862 = vst [vmem:[%s3924_s5 + $0xf0] sm:$0xff] %v1826_v53   ;;  %1863 = vst [vmem:[%s3924_s5 + $0xf8] sm:$0xff] %v1831_v23  }

// kernel: critic_forward.5
= control target key start
LH: loop header
LB: loop body
LE: loop exit
PB: predicated region body
PF: predicated region fallthrough
CT: control target
= control target key end

     0   :  { %s7880_s1 = inlined_call_operand.vmem [shape: bf16[3200,128], index: 1, kind: input, shape index: {}]   ;;  %s7881_s0 = inlined_call_operand.vmem [shape: bf16[128,3200], index: 0, kind: input, shape index: {}]   ;;  %s7882_s2 = inlined_call_operand.vmem [shape: f32[1,128], index: 2, kind: input, shape index: {}]   ;;  %s7883_s3 = inlined_call_operand.vmem [shape: f32[1,128], index: 3, kind: input, shape index: {}]   ;;  %s7884_s4 = inlined_call_operand.vmem [shape: f32[1,128], index: 4, kind: input, shape index: {}]   ;;  %s7885_s5 = inlined_call_operand.vmem [shape: bf16[128,128], index: 5, kind: output, shape index: {}]  }
   0x1   :  { %v5660_v0 = vld [vmem:[%s7880_s1 + $0x78] sm:$0xff]   ;;  %v5664_v4 = vld [vmem:[%s7880_s1 + $0x70] sm:$0xff]   ;;  %v5668_v8 = vld [vmem:[%s7880_s1 + $0x68] sm:$0xff]  }
   0x2   :  { %v5661_v1 = vld [vmem:[%s7880_s1 + $0xf8] sm:$0xff]   ;;  %4828 = vmatprep.subr.bf16.mxu0 %v5660_v0  ;;  %v5665_v5 = vld [vmem:[%s7880_s1 + $0xf0] sm:$0xff]   ;;  %v5669_v9 = vld [vmem:[%s7880_s1 + $0xe8] sm:$0xff]  }
   0x3   :  { %v5662_v2 = vld [vmem:[%s7880_s1 + $0x38] sm:$0xff]   ;;  %4892 = vmatprep.subr.bf16.mxu1 %v5661_v1  ;;  %v5666_v6 = vld [vmem:[%s7880_s1 + $0x30] sm:$0xff]   ;;  %v5670_v10 = vld [vmem:[%s7880_s1 + $0x28] sm:$0xff]  }
   0x4   :  { %v5663_v3 = vld [vmem:[%s7880_s1 + $0xb8] sm:$0xff]   ;;  %4829 = vmatpush3.bf16.msra.mxu0 %v5662_v2  ;;  %v5667_v7 = vld [vmem:[%s7880_s1 + $0xb0] sm:$0xff]   ;;  %v5671_v11 = vld [vmem:[%s7880_s1 + $0xa8] sm:$0xff]  }
   0x5   :  { %4893 = vmatpush3.bf16.msra.mxu1 %v5663_v3  ;;  %4830 = vmatprep.subr.bf16.mxu0 %v5664_v4  ;;  %v5672_v12 = vld [vmem:[%s7880_s1 + $0x60] sm:$0xff]   ;;  %v5676_v16 = vld [vmem:[%s7880_s1 + $0x58] sm:$0xff]   ;;  %v5680_v20 = vld [vmem:[%s7880_s1 + $0x50] sm:$0xff]  }
   0x6   :  { %4894 = vmatprep.subr.bf16.mxu1 %v5665_v5  ;;  %v5673_v13 = vld [vmem:[%s7880_s1 + $0xe0] sm:$0xff]   ;;  %v5677_v17 = vld [vmem:[%s7880_s1 + $0xd8] sm:$0xff]   ;;  %v5681_v21 = vld [vmem:[%s7880_s1 + $0xd0] sm:$0xff]  }
   0x7   :  { %v5674_v14 = vld [vmem:[%s7880_s1 + $0x20] sm:$0xff]   ;;  %v5678_v18 = vld [vmem:[%s7880_s1 + $0x18] sm:$0xff]   ;;  %v5682_v22 = vld [vmem:[%s7880_s1 + $0x10] sm:$0xff]  }
   0x8   :  { %4831 = vmatpush3.bf16.msra.mxu0 %v5666_v6  ;;  %v5675_v15 = vld [vmem:[%s7880_s1 + $0xa0] sm:$0xff]   ;;  %v5679_v19 = vld [vmem:[%s7880_s1 + $0x98] sm:$0xff]   ;;  %v5683_v23 = vld [vmem:[%s7880_s1 + $0x90] sm:$0xff]  }
   0x9   :  { %4895 = vmatpush3.bf16.msra.mxu1 %v5667_v7  ;;  %4832 = vmatprep.subr.bf16.mxu0 %v5668_v8  ;;  %v5684_v24 = vld [vmem:[%s7880_s1 + $0x48] sm:$0xff]   ;;  %v5688_v28 = vld [vmem:[%s7880_s1 + $0x40] sm:$0xff]   ;;  %v5698_v36 = vld [vmem:[%s7880_s1 + $0x178] sm:$0xff]  }
   0xa   :  { %4896 = vmatprep.subr.bf16.mxu1 %v5669_v9  ;;  %v5685_v25 = vld [vmem:[%s7880_s1 + $0xc8] sm:$0xff]   ;;  %v5689_v29 = vld [vmem:[%s7880_s1 + $0xc0] sm:$0xff]   ;;  %v5699_v37 = vld [vmem:[%s7880_s1 + $0x138] sm:$0xff]  }
   0xb   :  { %v5686_v26 = vld [vmem:[%s7880_s1 + $0x8] sm:$0xff]   ;;  %v5690_v30 = vld [vmem:[%s7880_s1] sm:$0xff]   ;;  %v5702_v39 = vld [vmem:[%s7881_s0 + $0xd4] ss:$100 sps:$4 sm:$0xff]  }
   0xc   :  { %4833 = vmatpush3.bf16.msra.mxu0 %v5670_v10  ;;  %v5687_v27 = vld [vmem:[%s7880_s1 + $0x88] sm:$0xff]   ;;  %v5691_v31 = vld [vmem:[%s7880_s1 + $0x80] sm:$0xff]   ;;  %v5705_v41 = vld [vmem:[%s7881_s0 + $0xd0] ss:$100 sps:$4 sm:$0xff]  }
   0xd   :  { %4897 = vmatpush3.bf16.msra.mxu1 %v5671_v11  ;;  %4834 = vmatprep.subr.bf16.mxu0 %v5672_v12  ;;  %v5692_v32 = vld [vmem:[%s7881_s0] ss:$100 sps:$4 sm:$0xff]   ;;  %v5695_v34 = vld [vmem:[%s7881_s0 + $0x8] ss:$100 sps:$4 sm:$0xff]   ;;  %v5706_v42 = vld [vmem:[%s7880_s1 + $0x170] sm:$0xff]  }
   0xe   :  { %4898 = vmatprep.subr.bf16.mxu1 %v5673_v13  ;;  %v5694_v33 = vld [vmem:[%s7881_s0 + $0x4] ss:$100 sps:$4 sm:$0xff]   ;;  %v5697_v35 = vld [vmem:[%s7881_s0 + $0xc] ss:$100 sps:$4 sm:$0xff]   ;;  %v5708_v44 = vld [vmem:[%s7881_s0 + $0x194] ss:$100 sps:$4 sm:$0xff]  }
   0xf   :  { %2876 = vmatprep.mubr.bf16.mxu0 %v5694_v33  ;;  %2973 = vmatprep.mubr.bf16.mxu1 %v5697_v35  ;;  %v5700_v38 = vld [vmem:[%s7881_s0 + $0xcc] ss:$100 sps:$4 sm:$0xff]   ;;  %v5710_v45 = vld [vmem:[%s7881_s0 + $0x19c] ss:$100 sps:$4 sm:$0xff]   ;;  %v5720_v53 = vld [vmem:[%s7881_s0 + $0x264] ss:$100 sps:$4 sm:$0xff]  }
  0x10   :  { %4835 = vmatpush3.bf16.msra.mxu0 %v5674_v14  ;;  %v5704_v40 = vld [vmem:[%s7881_s0 + $0xc8] ss:$100 sps:$4 sm:$0xff]   ;;  %v5707_v43 = vld [vmem:[%s7880_s1 + $0x130] sm:$0xff]   ;;  %v5715_v47 = vld [vmem:[%s7880_s1 + $0x1f8] sm:$0xff]  }
  0x11   :  { %4899 = vmatpush3.bf16.msra.mxu1 %v5675_v15  ;;  %4836 = vmatprep.subr.bf16.mxu0 %v5676_v16  ;;  %v5714_v46 = vld [vmem:[%s7880_s1 + $0x168] sm:$0xff]   ;;  %v5712_v48 = vld [vmem:[%s7881_s0 + $0x190] ss:$100 sps:$4 sm:$0xff]   ;;  %v5717_v50 = vld [vmem:[%s7880_s1 + $0x1b8] sm:$0xff]  }
  0x12   :  { %4900 = vmatprep.subr.bf16.mxu1 %v5677_v17  ;;  %v5716_v49 = vld [vmem:[%s7880_s1 + $0x128] sm:$0xff]   ;;  %v5713_v51 = vld [vmem:[%s7881_s0 + $0x198] ss:$100 sps:$4 sm:$0xff]   ;;  %v5724_v54 = vld [vmem:[%s7880_s1 + $0x160] sm:$0xff]  }
  0x13   :  { %v5718_v52 = vld [vmem:[%s7881_s0 + $0x25c] ss:$100 sps:$4 sm:$0xff]   ;;  %v5725_v55 = vld [vmem:[%s7880_s1 + $0x1f0] sm:$0xff]   ;;  %v5728_v60 = vld [vmem:[%s7881_s0 + $0x324] ss:$100 sps:$4 sm:$0xff]  }
  0x14   :  { %4837 = vmatpush3.bf16.msra.mxu0 %v5678_v18  ;;  %v5726_v56 = vld [vmem:[%s7880_s1 + $0x120] sm:$0xff]   ;;  %v5727_v57 = vld [vmem:[%s7880_s1 + $0x1b0] sm:$0xff]   ;;  %v5722_v58 = vld [vmem:[%s7881_s0 + $0x258] ss:$100 sps:$4 sm:$0xff]  }
  0x15   :  { %4901 = vmatpush3.bf16.msra.mxu1 %v5679_v19  ;;  %4838 = vmatprep.subr.bf16.mxu0 %v5680_v20  ;;  %v5723_v59 = vld [vmem:[%s7881_s0 + $0x260] ss:$100 sps:$4 sm:$0xff]   ;;  %v5730_v61 = vld [vmem:[%s7881_s0 + $0x32c] ss:$100 sps:$4 sm:$0xff]   ;;  %v5734_v62 = vld [vmem:[%s7880_s1 + $0x158] sm:$0xff]  }
  0x16   :  { %4902 = vmatprep.subr.bf16.mxu1 %v5681_v21  ;;  %v5735_v63 = vld [vmem:[%s7880_s1 + $0x1e8] sm:$0xff]   ;;  %v5736_v0 = vld [vmem:[%s7880_s1 + $0x118] sm:$0xff]   ;;  %v5732_v2 = vld [vmem:[%s7881_s0 + $0x320] ss:$100 sps:$4 sm:$0xff]  }
  0x17   :  { %v5737_v1 = vld [vmem:[%s7880_s1 + $0x1a8] sm:$0xff]   ;;  %v5740_v5 = vld [vmem:[%s7881_s0 + $0x3f4] ss:$100 sps:$4 sm:$0xff]   ;;  %v5745_v7 = vld [vmem:[%s7880_s1 + $0x1e0] sm:$0xff]  }
  0x18   :  { %4839 = vmatpush3.bf16.msra.mxu0 %v5682_v22  ;;  %v5733_v3 = vld [vmem:[%s7881_s0 + $0x328] ss:$100 sps:$4 sm:$0xff]   ;;  %v5744_v6 = vld [vmem:[%s7880_s1 + $0x150] sm:$0xff]   ;;  %v5747_v9 = vld [vmem:[%s7880_s1 + $0x1a0] sm:$0xff]  }
  0x19   :  { %4903 = vmatpush3.bf16.msra.mxu1 %v5683_v23  ;;  %4840 = vmatprep.subr.bf16.mxu0 %v5684_v24  ;;  %v5738_v4 = vld [vmem:[%s7881_s0 + $0x3ec] ss:$100 sps:$4 sm:$0xff]   ;;  %v5748_v12 = vld [vmem:[%s7881_s0 + $0x4b4] ss:$100 sps:$4 sm:$0xff]   ;;  %v5750_v14 = vld [vmem:[%s7881_s0 + $0x4bc] ss:$100 sps:$4 sm:$0xff]  }
  0x1a   :  { %4904 = vmatprep.subr.bf16.mxu1 %v5685_v25  ;;  %v5746_v8 = vld [vmem:[%s7880_s1 + $0x110] sm:$0xff]   ;;  %v5742_v10 = vld [vmem:[%s7881_s0 + $0x3e8] ss:$100 sps:$4 sm:$0xff]   ;;  %v5755_v15 = vld [vmem:[%s7880_s1 + $0x1d8] sm:$0xff]  }
  0x1b   :  { %v5743_v11 = vld [vmem:[%s7881_s0 + $0x3f0] ss:$100 sps:$4 sm:$0xff]   ;;  %v5754_v13 = vld [vmem:[%s7880_s1 + $0x148] sm:$0xff]   ;;  %v5757_v17 = vld [vmem:[%s7880_s1 + $0x198] sm:$0xff]  }
  0x1c   :  { %4841 = vmatpush3.bf16.msra.mxu0 %v5686_v26  ;;  %v5756_v16 = vld [vmem:[%s7880_s1 + $0x108] sm:$0xff]   ;;  %v5758_v18 = vld [vmem:[%s7880_s1 + $0x1d0] sm:$0xff]   ;;  %v5753_v21 = vld [vmem:[%s7881_s0 + $0x4b8] ss:$100 sps:$4 sm:$0xff]  }
  0x1d   :  { %4905 = vmatpush3.bf16.msra.mxu1 %v5687_v27  ;;  %4842 = vmatprep.subr.bf16.mxu0 %v5688_v28  ;;  %v5759_v19 = vld [vmem:[%s7880_s1 + $0x190] sm:$0xff]   ;;  %v5760_v22 = vld [vmem:[%s7881_s0 + $0x57c] ss:$100 sps:$4 sm:$0xff]   ;;  %v5762_v23 = vld [vmem:[%s7881_s0 + $0x584] ss:$100 sps:$4 sm:$0xff]  }
  0x1e   :  { %4906 = vmatprep.subr.bf16.mxu1 %v5689_v29  ;;  %v5752_v20 = vld [vmem:[%s7881_s0 + $0x4b0] ss:$100 sps:$4 sm:$0xff]   ;;  %v5766_v24 = vld [vmem:[%s7880_s1 + $0x140] sm:$0xff]   ;;  %v5767_v25 = vld [vmem:[%s7880_s1 + $0x1c8] sm:$0xff]  }
  0x1f   :  { %v5768_v26 = vld [vmem:[%s7880_s1 + $0x100] sm:$0xff]   ;;  %v5769_v27 = vld [vmem:[%s7880_s1 + $0x188] sm:$0xff]   ;;  %v5764_v29 = vld [vmem:[%s7881_s0 + $0x578] ss:$100 sps:$4 sm:$0xff]  }
  0x20   :  { %4843 = vmatpush3.bf16.msra.mxu0 %v5690_v30  ;;  %v5770_v28 = vld [vmem:[%s7880_s1 + $0x1c0] sm:$0xff]   ;;  %v5774_v33 = vld [vmem:[%s7881_s0 + $0x14] ss:$100 sps:$4 sm:$0xff]  }
  0x21   :  { %4907 = vmatpush3.bf16.msra.mxu1 %v5691_v31  ;;  %4956 = vmatprep.subr.bf16.mxu0 %v5698_v36  ;;  %v5765_v30 = vld [vmem:[%s7881_s0 + $0x580] ss:$100 sps:$4 sm:$0xff]   ;;  %v5772_v35 = vld [vmem:[%s7881_s0 + $0x10] ss:$100 sps:$4 sm:$0xff]   ;;  %v5775_v36 = vld [vmem:[%s7881_s0 + $0x18] ss:$100 sps:$4 sm:$0xff]  }
  0x22   :  { %5020 = vmatprep.subr.bf16.mxu1 %v5715_v47  ;;  %v5771_v31 = vld [vmem:[%s7880_s1 + $0x180] sm:$0xff]  }
  0x23   :  { %2877 = vmatmul.mubr.bf16.vlgmr.msra.gmra.mxu0 %v5692_v32  ;;  %v5778_v32 = vld [vmem:[%s7880_s1 + $0x278] sm:$0xff]   ;;  %v5788_v47 = vld [vmem:[%s7881_s0 + $0x1a4] ss:$100 sps:$4 sm:$0xff]  }
  0x24   :  { %2974 = vmatmul.mubr.bf16.vlgmr.msra.gmra.mxu1 %v5695_v34  ;;  %4957 = vmatpush3.bf16.msra.mxu0 %v5699_v37  ;;  %v5777_v34 = vld [vmem:[%s7881_s0 + $0x1c] ss:$100 sps:$4 sm:$0xff]  }
  0x25   :  { %2884 = vmatprep.mubr.bf16.mxu0 %v5700_v38  ;;  %2981 = vmatprep.mubr.bf16.mxu1 %v5702_v39  ;;  %v5779_v37 = vld [vmem:[%s7880_s1 + $0x238] sm:$0xff]   ;;  %v5782_v39 = vld [vmem:[%s7881_s0 + $0xe4] ss:$100 sps:$4 sm:$0xff]  }
  0x26   :  { %4958 = vmatprep.subr.bf16.mxu0 %v5706_v42  ;;  %5021 = vmatpush3.bf16.msra.mxu1 %v5717_v50  ;;  %v5780_v38 = vld [vmem:[%s7881_s0 + $0xdc] ss:$100 sps:$4 sm:$0xff]   ;;  %v5787_v42 = vld [vmem:[%s7880_s1 + $0x230] sm:$0xff]  }
  0x27   :  { %5022 = vmatprep.subr.bf16.mxu1 %v5725_v55  ;;  %v5805_v50 = vld [vmem:[%s7880_s1 + $0x2f0] sm:$0xff]   ;;  %v5793_v55 = vld [vmem:[%s7881_s0 + $0x1a8] ss:$100 sps:$4 sm:$0xff]  }
  0x28   :  { %4959 = vmatpush3.bf16.msra.mxu0 %v5707_v43  ;;  %v5797_v43 = vld [vmem:[%s7880_s1 + $0x2b8] sm:$0xff]  }
  0x29   :  { %4960 = vmatprep.subr.bf16.mxu0 %v5714_v46  ;;  %v5785_v46 = vld [vmem:[%s7881_s0 + $0xe0] ss:$100 sps:$4 sm:$0xff]  }
  0x2a   :  { %5023 = vmatpush3.bf16.msra.mxu1 %v5727_v57  ;;  %v5814_v57 = vld [vmem:[%s7880_s1 + $0x258] sm:$0xff]  }
  0x2b   :  { %2885 = vmatmul.mubr.bf16.gmra.mxu0 %v5704_v40  ;;  %5024 = vmatprep.subr.bf16.mxu1 %v5735_v63  ;;  %v5786_v40 = vld [vmem:[%s7880_s1 + $0x270] sm:$0xff]  }
  0x2c   :  { %2982 = vmatmul.mubr.bf16.gmra.mxu1 %v5705_v41  ;;  %2892 = vmatprep.mubr.bf16.mxu0 %v5708_v44  ;;  %v5795_v41 = vld [vmem:[%s7880_s1 + $0x2f8] sm:$0xff]   ;;  %v5794_v44 = vld [vmem:[%s7880_s1 + $0x268] sm:$0xff]   ;;  %v5824_v63 = vld [vmem:[%s7880_s1 + $0x250] sm:$0xff]  }
  0x2d   :  { %2989 = vmatprep.mubr.bf16.mxu1 %v5710_v45  ;;  %4961 = vmatpush3.bf16.msra.mxu0 %v5716_v49  ;;  %v5784_v45 = vld [vmem:[%s7881_s0 + $0xd8] ss:$100 sps:$4 sm:$0xff]   ;;  %v5796_v49 = vld [vmem:[%s7880_s1 + $0x228] sm:$0xff]  }
  0x2e   :  { %4962 = vmatprep.subr.bf16.mxu0 %v5724_v54  ;;  %5025 = vmatpush3.bf16.msra.mxu1 %v5737_v1  ;;  %v5806_v54 = vld [vmem:[%s7880_s1 + $0x220] sm:$0xff]   ;;  %v5808_v1 = vld [vmem:[%s7881_s0 + $0x334] ss:$100 sps:$4 sm:$0xff]  }
  0x2f   :  { %5026 = vmatprep.subr.bf16.mxu1 %v5745_v7  ;;  %v5835_v7 = vld [vmem:[%s7880_s1 + $0x2d8] sm:$0xff]  }
  0x31   :  { %4963 = vmatpush3.bf16.msra.mxu0 %v5726_v56  ;;  %v5798_v56 = vld [vmem:[%s7881_s0 + $0x26c] ss:$100 sps:$4 sm:$0xff]  }
  0x32   :  { %4964 = vmatprep.subr.bf16.mxu0 %v5734_v62  ;;  %5027 = vmatpush3.bf16.msra.mxu1 %v5747_v9  ;;  %v5802_v62 = vld [vmem:[%s7881_s0 + $0x268] ss:$100 sps:$4 sm:$0xff]  }
  0x33   :  { %2893 = vmatmul.mubr.bf16.gmra.mxu0 %v5712_v48  ;;  %5028 = vmatprep.subr.bf16.mxu1 %v5755_v15  ;;  %v5790_v48 = vld [vmem:[%s7881_s0 + $0x1ac] ss:$100 sps:$4 sm:$0xff]  }
  0x34   :  { %2990 = vmatmul.mubr.bf16.gmra.mxu1 %v5713_v51  ;;  %2900 = vmatprep.mubr.bf16.mxu0 %v5718_v52  ;;  %v5804_v51 = vld [vmem:[%s7880_s1 + $0x260] sm:$0xff]   ;;  %v5807_v52 = vld [vmem:[%s7880_s1 + $0x2b0] sm:$0xff]   ;;  %v5836_v9 = vld [vmem:[%s7880_s1 + $0x208] sm:$0xff]  }
  0x35   :  { %2997 = vmatprep.mubr.bf16.mxu1 %v5720_v53  ;;  %4965 = vmatpush3.bf16.msra.mxu0 %v5736_v0  ;;  %v5792_v53 = vld [vmem:[%s7881_s0 + $0x1a0] ss:$100 sps:$4 sm:$0xff]   ;;  %v5803_v0 = vld [vmem:[%s7881_s0 + $0x270] ss:$100 sps:$4 sm:$0xff]  }
  0x36   :  { %4966 = vmatprep.subr.bf16.mxu0 %v5744_v6  ;;  %5029 = vmatpush3.bf16.msra.mxu1 %v5757_v17  ;;  %v5834_v6 = vld [vmem:[%s7880_s1 + $0x248] sm:$0xff]   ;;  %v5839_v15 = vld [vmem:[%s7880_s1 + $0x290] sm:$0xff]   ;;  %v5822_v17 = vld [vmem:[%s7881_s0 + $0x3f8] ss:$100 sps:$4 sm:$0xff]  }
  0x37   :  { %5030 = vmatprep.subr.bf16.mxu1 %v5758_v18  ;;  %v5847_v18 = vld [vmem:[%s7880_s1 + $0x2c8] sm:$0xff]  }
  0x39   :  { %4967 = vmatpush3.bf16.msra.mxu0 %v5746_v8  ;;  %v5812_v8 = vld [vmem:[%s7881_s0 + $0x330] ss:$100 sps:$4 sm:$0xff]  }
  0x3a   :  { %4968 = vmatprep.subr.bf16.mxu0 %v5754_v13  ;;  %5031 = vmatpush3.bf16.msra.mxu1 %v5759_v19  ;;  %v5838_v13 = vld [vmem:[%s7880_s1 + $0x2d0] sm:$0xff]   ;;  %v5823_v19 = vld [vmem:[%s7881_s0 + $0x400] ss:$100 sps:$4 sm:$0xff]  }
  0x3b   :  { %2901 = vmatmul.mubr.bf16.gmra.mxu0 %v5722_v58  ;;  %5032 = vmatprep.subr.bf16.mxu1 %v5767_v25  ;;  %v5800_v58 = vld [vmem:[%s7881_s0 + $0x274] ss:$100 sps:$4 sm:$0xff]   ;;  %v5851_v25 = vld [vmem:[%s7880_s1 + $0x280] sm:$0xff]  }
  0x3c   :  { %2998 = vmatmul.mubr.bf16.gmra.mxu1 %v5723_v59  ;;  %2908 = vmatprep.mubr.bf16.mxu0 %v5728_v60  ;;  %v5815_v59 = vld [vmem:[%s7880_s1 + $0x2e8] sm:$0xff]   ;;  %v5816_v60 = vld [vmem:[%s7880_s1 + $0x218] sm:$0xff]  }
  0x3d   :  { %3005 = vmatprep.mubr.bf16.mxu1 %v5730_v61  ;;  %4969 = vmatpush3.bf16.msra.mxu0 %v5756_v16  ;;  %v5817_v61 = vld [vmem:[%s7880_s1 + $0x2a8] sm:$0xff]   ;;  %v5846_v16 = vld [vmem:[%s7880_s1 + $0x240] sm:$0xff]  }
  0x3e   :  { %4970 = vmatprep.subr.bf16.mxu0 %v5766_v24  ;;  %5033 = vmatpush3.bf16.msra.mxu1 %v5769_v27  ;;  %v5850_v24 = vld [vmem:[%s7880_s1 + $0x2c0] sm:$0xff]  }
  0x3f   :  { %5034 = vmatprep.subr.bf16.mxu1 %v5770_v28  ;;  %v5832_v27 = vld [vmem:[%s7881_s0 + $0x4c0] ss:$100 sps:$4 sm:$0xff]   ;;  %v5833_v28 = vld [vmem:[%s7881_s0 + $0x4c8] ss:$100 sps:$4 sm:$0xff]  }
  0x41   :  { %4971 = vmatpush3.bf16.msra.mxu0 %v5768_v26  ;;  %v5858_v26 = vld [vmem:[%s7880_s1 + $0x378] sm:$0xff]  }
  0x42   :  { %5084 = vmatprep.subr.bf16.mxu0 %v5778_v32  ;;  %5035 = vmatpush3.bf16.msra.mxu1 %v5771_v31  ;;  %v5844_v31 = vld [vmem:[%s7881_s0 + $0x588] ss:$100 sps:$4 sm:$0xff]   ;;  %v5845_v32 = vld [vmem:[%s7881_s0 + $0x590] ss:$100 sps:$4 sm:$0xff]  }
  0x43   :  { %2909 = vmatmul.mubr.bf16.gmra.mxu0 %v5732_v2  ;;  %5148 = vmatprep.subr.bf16.mxu1 %v5795_v41  ;;  %v5825_v2 = vld [vmem:[%s7880_s1 + $0x2e0] sm:$0xff]   ;;  %v5866_v41 = vld [vmem:[%s7880_s1 + $0x370] sm:$0xff]  }
  0x44   :  { %3006 = vmatmul.mubr.bf16.gmra.mxu1 %v5733_v3  ;;  %2916 = vmatprep.mubr.bf16.mxu0 %v5738_v4  ;;  %v5826_v3 = vld [vmem:[%s7880_s1 + $0x210] sm:$0xff]   ;;  %v5827_v4 = vld [vmem:[%s7880_s1 + $0x2a0] sm:$0xff]  }
  0x45   :  { %3013 = vmatprep.mubr.bf16.mxu1 %v5740_v5  ;;  %v5810_v5 = vld [vmem:[%s7881_s0 + $0x33c] ss:$100 sps:$4 sm:$0xff]  }
  0x4b   :  { %2917 = vmatmul.mubr.bf16.gmra.mxu0 %v5742_v10  ;;  %v5813_v10 = vld [vmem:[%s7881_s0 + $0x338] ss:$100 sps:$4 sm:$0xff]  }
  0x4c   :  { %3014 = vmatmul.mubr.bf16.gmra.mxu1 %v5743_v11  ;;  %2924 = vmatprep.mubr.bf16.mxu0 %v5748_v12  ;;  %v5818_v11 = vld [vmem:[%s7881_s0 + $0x3fc] ss:$100 sps:$4 sm:$0xff]  }
  0x4d   :  { %3021 = vmatprep.mubr.bf16.mxu1 %v5750_v14  ;;  %v5837_v12 = vld [vmem:[%s7880_s1 + $0x298] sm:$0xff]   ;;  %v5820_v14 = vld [vmem:[%s7881_s0 + $0x404] ss:$100 sps:$4 sm:$0xff]  }
  0x53   :  { %2925 = vmatmul.mubr.bf16.gmra.mxu0 %v5752_v20  ;;  %v5828_v20 = vld [vmem:[%s7881_s0 + $0x4c4] ss:$100 sps:$4 sm:$0xff]  }
  0x54   :  { %3022 = vmatmul.mubr.bf16.gmra.mxu1 %v5753_v21  ;;  %2932 = vmatprep.mubr.bf16.mxu0 %v5760_v22  ;;  %v5848_v21 = vld [vmem:[%s7880_s1 + $0x200] sm:$0xff]   ;;  %v5830_v22 = vld [vmem:[%s7881_s0 + $0x4cc] ss:$100 sps:$4 sm:$0xff]  }
  0x55   :  { %3029 = vmatprep.mubr.bf16.mxu1 %v5762_v23  ;;  %v5849_v23 = vld [vmem:[%s7880_s1 + $0x288] sm:$0xff]  }
  0x5b   :  { %2933 = vmatmul.mubr.bf16.gmra.mxu0 %v5764_v29  ;;  %v5840_v29 = vld [vmem:[%s7881_s0 + $0x58c] ss:$100 sps:$4 sm:$0xff]  }
  0x5c   :  { %3030 = vmatmul.mubr.bf16.gmra.mxu1 %v5765_v30  ;;  %3070 = vmatprep.mubr.bf16.mxu0 %v5774_v33  ;;  %v5842_v30 = vld [vmem:[%s7881_s0 + $0x594] ss:$100 sps:$4 sm:$0xff]  }
  0x5d   :  { %3167 = vmatprep.mubr.bf16.mxu1 %v5777_v34  ;;  %v5875_v33 = vld [vmem:[%s7880_s1 + $0x3f8] sm:$0xff]   ;;  %v5854_v34 = vld [vmem:[%s7881_s0 + $0x24] ss:$100 sps:$4 sm:$0xff]  }
  0x63   :  { %3071 = vmatmul.mubr.bf16.vlgmr.msra.gmra.mxu0 %v5772_v35  ;;  %v5857_v35 = vld [vmem:[%s7881_s0 + $0x2c] ss:$100 sps:$4 sm:$0xff]  }
  0x64   :  { %3168 = vmatmul.mubr.bf16.vlgmr.msra.gmra.mxu1 %v5775_v36  ;;  %5085 = vmatpush3.bf16.msra.mxu0 %v5779_v37  ;;  %v5852_v36 = vld [vmem:[%s7881_s0 + $0x20] ss:$100 sps:$4 sm:$0xff]   ;;  %v5855_v37 = vld [vmem:[%s7881_s0 + $0x28] ss:$100 sps:$4 sm:$0xff]  }
  0x65   :  { %3078 = vmatprep.mubr.bf16.mxu0 %v5780_v38  ;;  %3175 = vmatprep.mubr.bf16.mxu1 %v5782_v39  ;;  %v5859_v38 = vld [vmem:[%s7880_s1 + $0x338] sm:$0xff]   ;;  %v5860_v39 = vld [vmem:[%s7881_s0 + $0xec] ss:$100 sps:$4 sm:$0xff]  }
  0x66   :  { %5086 = vmatprep.subr.bf16.mxu0 %v5786_v40  ;;  %5149 = vmatpush3.bf16.msra.mxu1 %v5797_v43  ;;  %v5862_v40 = vld [vmem:[%s7881_s0 + $0xf4] ss:$100 sps:$4 sm:$0xff]  }
  0x67   :  { %5150 = vmatprep.subr.bf16.mxu1 %v5805_v50  ;;  %v5885_v43 = vld [vmem:[%s7880_s1 + $0x3f0] sm:$0xff]   ;;  %v5895_v50 = vld [vmem:[%s7880_s1 + $0x3e8] sm:$0xff]  }
  0x68   :  { %5087 = vmatpush3.bf16.msra.mxu0 %v5787_v42  ;;  %v5877_v42 = vld [vmem:[%s7880_s1 + $0x3b8] sm:$0xff]  }
  0x69   :  { %5088 = vmatprep.subr.bf16.mxu0 %v5794_v44  ;;  %v5867_v44 = vld [vmem:[%s7880_s1 + $0x330] sm:$0xff]  }
  0x6a   :  { %5151 = vmatpush3.bf16.msra.mxu1 %v5807_v52  ;;  %v5876_v52 = vld [vmem:[%s7880_s1 + $0x328] sm:$0xff]  }
  0x6b   :  { %3079 = vmatmul.mubr.bf16.gmra.mxu0 %v5784_v45  ;;  %5152 = vmatprep.subr.bf16.mxu1 %v5815_v59  ;;  %v5864_v45 = vld [vmem:[%s7881_s0 + $0xe8] ss:$100 sps:$4 sm:$0xff]   ;;  %v5873_v59 = vld [vmem:[%s7881_s0 + $0x1b8] ss:$100 sps:$4 sm:$0xff]  }
  0x6c   :  { %3176 = vmatmul.mubr.bf16.gmra.mxu1 %v5785_v46  ;;  %3086 = vmatprep.mubr.bf16.mxu0 %v5788_v47  ;;  %v5874_v46 = vld [vmem:[%s7880_s1 + $0x368] sm:$0xff]   ;;  %v5865_v47 = vld [vmem:[%s7881_s0 + $0xf0] ss:$100 sps:$4 sm:$0xff]  }
  0x6d   :  { %3183 = vmatprep.mubr.bf16.mxu1 %v5790_v48  ;;  %5089 = vmatpush3.bf16.msra.mxu0 %v5796_v49  ;;  %v5868_v48 = vld [vmem:[%s7881_s0 + $0x1b4] ss:$100 sps:$4 sm:$0xff]  }
  0x6e   :  { %5090 = vmatprep.subr.bf16.mxu0 %v5804_v51  ;;  %5153 = vmatpush3.bf16.msra.mxu1 %v5817_v61  ;;  %v5887_v49 = vld [vmem:[%s7880_s1 + $0x3b0] sm:$0xff]   ;;  %v5870_v51 = vld [vmem:[%s7881_s0 + $0x1bc] ss:$100 sps:$4 sm:$0xff]  }
  0x6f   :  { %5154 = vmatprep.subr.bf16.mxu1 %v5825_v2  ;;  %v5878_v61 = vld [vmem:[%s7881_s0 + $0x27c] ss:$100 sps:$4 sm:$0xff]   ;;  %v5906_v2 = vld [vmem:[%s7880_s1 + $0x310] sm:$0xff]  }
  0x71   :  { %5091 = vmatpush3.bf16.msra.mxu0 %v5806_v54  ;;  %v5897_v54 = vld [vmem:[%s7880_s1 + $0x3a8] sm:$0xff]  }
  0x72   :  { %5092 = vmatprep.subr.bf16.mxu0 %v5814_v57  ;;  %5155 = vmatpush3.bf16.msra.mxu1 %v5827_v4  ;;  %v5872_v57 = vld [vmem:[%s7881_s0 + $0x1b0] ss:$100 sps:$4 sm:$0xff]   ;;  %v5882_v4 = vld [vmem:[%s7881_s0 + $0x278] ss:$100 sps:$4 sm:$0xff]  }
  0x73   :  { %3087 = vmatmul.mubr.bf16.gmra.mxu0 %v5792_v53  ;;  %5156 = vmatprep.subr.bf16.mxu1 %v5835_v7  ;;  %v5884_v53 = vld [vmem:[%s7880_s1 + $0x360] sm:$0xff]   ;;  %v5914_v7 = vld [vmem:[%s7880_s1 + $0x348] sm:$0xff]  }
  0x74   :  { %3184 = vmatmul.mubr.bf16.gmra.mxu1 %v5793_v55  ;;  %3094 = vmatprep.mubr.bf16.mxu0 %v5798_v56  ;;  %v5905_v55 = vld [vmem:[%s7880_s1 + $0x3e0] sm:$0xff]  }
  0x75   :  { %3191 = vmatprep.mubr.bf16.mxu1 %v5800_v58  ;;  %5093 = vmatpush3.bf16.msra.mxu0 %v5816_v60  ;;  %v5886_v56 = vld [vmem:[%s7880_s1 + $0x320] sm:$0xff]   ;;  %v5894_v58 = vld [vmem:[%s7880_s1 + $0x358] sm:$0xff]  }
  0x76   :  { %5094 = vmatprep.subr.bf16.mxu0 %v5824_v63  ;;  %5157 = vmatpush3.bf16.msra.mxu1 %v5837_v12  ;;  %v5907_v60 = vld [vmem:[%s7880_s1 + $0x3a0] sm:$0xff]   ;;  %v5896_v63 = vld [vmem:[%s7880_s1 + $0x318] sm:$0xff]  }
  0x77   :  { %5158 = vmatprep.subr.bf16.mxu1 %v5838_v13  ;;  %v5926_v12 = vld [vmem:[%s7880_s1 + $0x340] sm:$0xff]   ;;  %v5927_v13 = vld [vmem:[%s7880_s1 + $0x3c8] sm:$0xff]  }
  0x79   :  { %5095 = vmatpush3.bf16.msra.mxu0 %v5826_v3  ;;  %v5917_v3 = vld [vmem:[%s7880_s1 + $0x398] sm:$0xff]  }
  0x7a   :  { %5096 = vmatprep.subr.bf16.mxu0 %v5834_v6  ;;  %5159 = vmatpush3.bf16.msra.mxu1 %v5839_v15  ;;  %v5883_v6 = vld [vmem:[%s7881_s0 + $0x280] ss:$100 sps:$4 sm:$0xff]   ;;  %v5929_v15 = vld [vmem:[%s7880_s1 + $0x388] sm:$0xff]  }
  0x7b   :  { %3095 = vmatmul.mubr.bf16.gmra.mxu0 %v5802_v62  ;;  %5160 = vmatprep.subr.bf16.mxu1 %v5847_v18  ;;  %v5880_v62 = vld [vmem:[%s7881_s0 + $0x284] ss:$100 sps:$4 sm:$0xff]  }
  0x7c   :  { %3192 = vmatmul.mubr.bf16.gmra.mxu1 %v5803_v0  ;;  %3102 = vmatprep.mubr.bf16.mxu0 %v5808_v1  ;;  %v5904_v0 = vld [vmem:[%s7880_s1 + $0x350] sm:$0xff]   ;;  %v5915_v1 = vld [vmem:[%s7880_s1 + $0x3d8] sm:$0xff]   ;;  %v5893_v18 = vld [vmem:[%s7881_s0 + $0x348] ss:$100 sps:$4 sm:$0xff]  }
  0x7d   :  { %3199 = vmatprep.mubr.bf16.mxu1 %v5810_v5  ;;  %5097 = vmatpush3.bf16.msra.mxu0 %v5836_v9  ;;  %v5918_v5 = vld [vmem:[%s7880_s1 + $0x3d0] sm:$0xff]   ;;  %v5888_v9 = vld [vmem:[%s7881_s0 + $0x344] ss:$100 sps:$4 sm:$0xff]  }
  0x7e   :  { %5098 = vmatprep.subr.bf16.mxu0 %v5846_v16  ;;  %5161 = vmatpush3.bf16.msra.mxu1 %v5849_v23  ;;  %v5892_v16 = vld [vmem:[%s7881_s0 + $0x340] ss:$100 sps:$4 sm:$0xff]   ;;  %v5902_v23 = vld [vmem:[%s7881_s0 + $0x408] ss:$100 sps:$4 sm:$0xff]  }
  0x7f   :  { %5162 = vmatprep.subr.bf16.mxu1 %v5850_v24  ;;  %v5903_v24 = vld [vmem:[%s7881_s0 + $0x410] ss:$100 sps:$4 sm:$0xff]  }
  0x81   :  { %5099 = vmatpush3.bf16.msra.mxu0 %v5848_v21  ;;  %v5900_v21 = vld [vmem:[%s7881_s0 + $0x414] ss:$100 sps:$4 sm:$0xff]  }
  0x82   :  { %5163 = vmatpush3.bf16.msra.mxu1 %v5851_v25  ;;  %5212 = vmatprep.subr.bf16.mxu0 %v5858_v26  ;;  %v5908_v25 = vld [vmem:[%s7881_s0 + $0x4d4] ss:$100 sps:$4 sm:$0xff]   ;;  %v5910_v26 = vld [vmem:[%s7881_s0 + $0x4dc] ss:$100 sps:$4 sm:$0xff]  }
  0x83   :  { %3103 = vmatmul.mubr.bf16.gmra.mxu0 %v5812_v8  ;;  %5276 = vmatprep.subr.bf16.mxu1 %v5875_v33  ;;  %v5919_v8 = vld [vmem:[%s7880_s1 + $0x390] sm:$0xff]   ;;  %v5925_v33 = vld [vmem:[%s7881_s0 + $0x5a0] ss:$100 sps:$4 sm:$0xff]  }
  0x84   :  { %3200 = vmatmul.mubr.bf16.gmra.mxu1 %v5813_v10  ;;  %3110 = vmatprep.mubr.bf16.mxu0 %v5818_v11  ;;  %v5890_v10 = vld [vmem:[%s7881_s0 + $0x34c] ss:$100 sps:$4 sm:$0xff]  }
  0x85   :  { %3207 = vmatprep.mubr.bf16.mxu1 %v5820_v14  ;;  %v5916_v11 = vld [vmem:[%s7880_s1 + $0x308] sm:$0xff]   ;;  %v5928_v14 = vld [vmem:[%s7880_s1 + $0x300] sm:$0xff]  }
  0x8b   :  { %3111 = vmatmul.mubr.bf16.gmra.mxu0 %v5822_v17  ;;  %v5930_v17 = vld [vmem:[%s7880_s1 + $0x3c0] sm:$0xff]  }
  0x8c   :  { %3208 = vmatmul.mubr.bf16.gmra.mxu1 %v5823_v19  ;;  %3118 = vmatprep.mubr.bf16.mxu0 %v5828_v20  ;;  %v5931_v19 = vld [vmem:[%s7880_s1 + $0x380] sm:$0xff]   ;;  %v5898_v20 = vld [vmem:[%s7881_s0 + $0x40c] ss:$100 sps:$4 sm:$0xff]  }
  0x8d   :  { %3215 = vmatprep.mubr.bf16.mxu1 %v5830_v22  ;;  %v5938_v22 = vld [vmem:[%s7880_s1 + $0x478] sm:$0xff]  }
  0x93   :  { %3119 = vmatmul.mubr.bf16.gmra.mxu0 %v5832_v27  ;;  %v5955_v27 = vld [vmem:[%s7880_s1 + $0x4f8] sm:$0xff]  }
  0x94   :  { %3216 = vmatmul.mubr.bf16.gmra.mxu1 %v5833_v28  ;;  %3126 = vmatprep.mubr.bf16.mxu0 %v5840_v29  ;;  %v5912_v28 = vld [vmem:[%s7881_s0 + $0x4d0] ss:$100 sps:$4 sm:$0xff]   ;;  %v5913_v29 = vld [vmem:[%s7881_s0 + $0x4d8] ss:$100 sps:$4 sm:$0xff]  }
  0x95   :  { %3223 = vmatprep.mubr.bf16.mxu1 %v5842_v30  ;;  %v5920_v30 = vld [vmem:[%s7881_s0 + $0x59c] ss:$100 sps:$4 sm:$0xff]  }
  0x9b   :  { %3127 = vmatmul.mubr.bf16.gmra.mxu0 %v5844_v31  ;;  %v5922_v31 = vld [vmem:[%s7881_s0 + $0x5a4] ss:$100 sps:$4 sm:$0xff]  }
  0x9c   :  { %3224 = vmatmul.mubr.bf16.gmra.mxu1 %v5845_v32  ;;  %3264 = vmatprep.mubr.bf16.mxu0 %v5854_v34  ;;  %v5924_v32 = vld [vmem:[%s7881_s0 + $0x598] ss:$100 sps:$4 sm:$0xff]  }
  0x9d   :  { %3361 = vmatprep.mubr.bf16.mxu1 %v5857_v35  ;;  %v5934_v34 = vld [vmem:[%s7881_s0 + $0x34] ss:$100 sps:$4 sm:$0xff]   ;;  %v5937_v35 = vld [vmem:[%s7881_s0 + $0x3c] ss:$100 sps:$4 sm:$0xff]  }
  0xa3   :  { %3265 = vmatmul.mubr.bf16.vlgmr.msra.gmra.mxu0 %v5852_v36  ;;  %v5932_v36 = vld [vmem:[%s7881_s0 + $0x30] ss:$100 sps:$4 sm:$0xff]  }
  0xa4   :  { %3362 = vmatmul.mubr.bf16.vlgmr.msra.gmra.mxu1 %v5855_v37  ;;  %5213 = vmatpush3.bf16.msra.mxu0 %v5859_v38  ;;  %v5935_v37 = vld [vmem:[%s7881_s0 + $0x38] ss:$100 sps:$4 sm:$0xff]  }
  0xa5   :  { %3272 = vmatprep.mubr.bf16.mxu0 %v5860_v39  ;;  %3369 = vmatprep.mubr.bf16.mxu1 %v5862_v40  ;;  %v5939_v38 = vld [vmem:[%s7880_s1 + $0x438] sm:$0xff]   ;;  %v5942_v40 = vld [vmem:[%s7881_s0 + $0x104] ss:$100 sps:$4 sm:$0xff]  }
  0xa6   :  { %5214 = vmatprep.subr.bf16.mxu0 %v5866_v41  ;;  %5277 = vmatpush3.bf16.msra.mxu1 %v5877_v42  ;;  %v5940_v39 = vld [vmem:[%s7881_s0 + $0xfc] ss:$100 sps:$4 sm:$0xff]   ;;  %v5946_v41 = vld [vmem:[%s7880_s1 + $0x470] sm:$0xff]  }
  0xa7   :  { %5278 = vmatprep.subr.bf16.mxu1 %v5885_v43  ;;  %v5957_v42 = vld [vmem:[%s7880_s1 + $0x4b8] sm:$0xff]  }
  0xa8   :  { %5215 = vmatpush3.bf16.msra.mxu0 %v5867_v44  ;;  %v5965_v44 = vld [vmem:[%s7880_s1 + $0x4f0] sm:$0xff]  }
  0xa9   :  { %5216 = vmatprep.subr.bf16.mxu0 %v5874_v46  ;;  %v6899_v46 = vld [vmem:[%s7882_s2] ss:$0 sm:$0xff] }
  0xaa   :  { %5279 = vmatpush3.bf16.msra.mxu1 %v5887_v49  ;;  %v5944_v49 = vld [vmem:[%s7881_s0 + $0xf8] ss:$100 sps:$4 sm:$0xff]  }
  0xab   :  { %3273 = vmatmul.mubr.bf16.gmra.mxu0 %v5864_v45  ;;  %5280 = vmatprep.subr.bf16.mxu1 %v5895_v50  ;;  %v5954_v50 = vld [vmem:[%s7880_s1 + $0x468] sm:$0xff]  }
  0xac   :  { %3370 = vmatmul.mubr.bf16.gmra.mxu1 %v5865_v47  ;;  %3280 = vmatprep.mubr.bf16.mxu0 %v5868_v48  ;;  %v5947_v47 = vld [vmem:[%s7880_s1 + $0x430] sm:$0xff]  }
  0xad   :  { %3377 = vmatprep.mubr.bf16.mxu1 %v5870_v51  ;;  %5217 = vmatpush3.bf16.msra.mxu0 %v5876_v52 }
  0xae   :  { %5218 = vmatprep.subr.bf16.mxu0 %v5884_v53  ;;  %5281 = vmatpush3.bf16.msra.mxu1 %v5897_v54  ;;  %v5945_v53 = vld [vmem:[%s7881_s0 + $0x100] ss:$100 sps:$4 sm:$0xff]  }
  0xaf   :  { %5282 = vmatprep.subr.bf16.mxu1 %v5905_v55  ;;  %v5948_v54 = vld [vmem:[%s7881_s0 + $0x1c4] ss:$100 sps:$4 sm:$0xff]   ;;  %v5967_v55 = vld [vmem:[%s7880_s1 + $0x4b0] sm:$0xff]  }
  0xb1   :  { %5219 = vmatpush3.bf16.msra.mxu0 %v5886_v56 }
  0xb2   :  { %5220 = vmatprep.subr.bf16.mxu0 %v5894_v58  ;;  %5283 = vmatpush3.bf16.msra.mxu1 %v5907_v60  ;;  %v5950_v58 = vld [vmem:[%s7881_s0 + $0x1cc] ss:$100 sps:$4 sm:$0xff]  }
  0xb3   :  { %3281 = vmatmul.mubr.bf16.gmra.mxu0 %v5872_v57  ;;  %5284 = vmatprep.subr.bf16.mxu1 %v5915_v1 }
  0xb4   :  { %3378 = vmatmul.mubr.bf16.gmra.mxu1 %v5873_v59  ;;  %3288 = vmatprep.mubr.bf16.mxu0 %v5878_v61  ;;  %v5975_v59 = vld [vmem:[%s7880_s1 + $0x4e8] sm:$0xff]  }
  0xb5   :  { %3385 = vmatprep.mubr.bf16.mxu1 %v5880_v62  ;;  %5221 = vmatpush3.bf16.msra.mxu0 %v5896_v63  ;;  %v5956_v62 = vld [vmem:[%s7880_s1 + $0x428] sm:$0xff]  }
  0xb6   :  { %5222 = vmatprep.subr.bf16.mxu0 %v5904_v0  ;;  %5285 = vmatpush3.bf16.msra.mxu1 %v5917_v3  ;;  %v5964_v0 = vld [vmem:[%s7880_s1 + $0x460] sm:$0xff]  }
  0xb7   :  { %5286 = vmatprep.subr.bf16.mxu1 %v5918_v5 }
  0xb9   :  { %5223 = vmatpush3.bf16.msra.mxu0 %v5906_v2 }
  0xba   :  { %5224 = vmatprep.subr.bf16.mxu0 %v5914_v7  ;;  %5287 = vmatpush3.bf16.msra.mxu1 %v5919_v8  ;;  %v5985_v7 = vld [vmem:[%s7880_s1 + $0x4e0] sm:$0xff]  }
  0xbb   :  { %3289 = vmatmul.mubr.bf16.gmra.mxu0 %v5882_v4  ;;  %5288 = vmatprep.subr.bf16.mxu1 %v5927_v13  ;;  %v5977_v4 = vld [vmem:[%s7880_s1 + $0x4a8] sm:$0xff]  }
  0xbc   :  { %3386 = vmatmul.mubr.bf16.gmra.mxu1 %v5883_v6  ;;  %3296 = vmatprep.mubr.bf16.mxu0 %v5888_v9 }
  0xbd   :  { %3393 = vmatprep.mubr.bf16.mxu1 %v5890_v10  ;;  %5225 = vmatpush3.bf16.msra.mxu0 %v5916_v11  ;;  %v5952_v11 = vld [vmem:[%s7881_s0 + $0x1c0] ss:$100 sps:$4 sm:$0xff]  }
  0xbe   :  { %5226 = vmatprep.subr.bf16.mxu0 %v5926_v12  ;;  %5289 = vmatpush3.bf16.msra.mxu1 %v5929_v15  ;;  %v5966_v12 = vld [vmem:[%s7880_s1 + $0x420] sm:$0xff]  }
  0xbf   :  { %5290 = vmatprep.subr.bf16.mxu1 %v5930_v17  ;;  %v5958_v17 = vld [vmem:[%s7881_s0 + $0x28c] ss:$100 sps:$4 sm:$0xff]  }
  0xc1   :  { %5227 = vmatpush3.bf16.msra.mxu0 %v5928_v14 }
  0xc2   :  { %5291 = vmatpush3.bf16.msra.mxu1 %v5931_v19  ;;  %5340 = vmatprep.subr.bf16.mxu0 %v5938_v22  ;;  %v5987_v19 = vld [vmem:[%s7880_s1 + $0x4a0] sm:$0xff]   ;;  %v5960_v22 = vld [vmem:[%s7881_s0 + $0x294] ss:$100 sps:$4 sm:$0xff]  }
  0xc3   :  { %3297 = vmatmul.mubr.bf16.gmra.mxu0 %v5892_v16  ;;  %5404 = vmatprep.subr.bf16.mxu1 %v5955_v27  ;;  %v5953_v16 = vld [vmem:[%s7881_s0 + $0x1c8] ss:$100 sps:$4 sm:$0xff]  }
  0xc4   :  { %3394 = vmatmul.mubr.bf16.gmra.mxu1 %v5893_v18  ;;  %3304 = vmatprep.mubr.bf16.mxu0 %v5898_v20  ;;  %v5974_v18 = vld [vmem:[%s7880_s1 + $0x458] sm:$0xff]  }
  0xc5   :  { %3401 = vmatprep.mubr.bf16.mxu1 %v5900_v21 }
  0xcb   :  { %3305 = vmatmul.mubr.bf16.gmra.mxu0 %v5902_v23  ;;  %v5995_v23 = vld [vmem:[%s7880_s1 + $0x4d8] sm:$0xff]  }
  0xcc   :  { %3402 = vmatmul.mubr.bf16.gmra.mxu1 %v5903_v24  ;;  %3312 = vmatprep.mubr.bf16.mxu0 %v5908_v25 }
  0xcd   :  { %3409 = vmatprep.mubr.bf16.mxu1 %v5910_v26  ;;  %v5976_v26 = vld [vmem:[%s7880_s1 + $0x418] sm:$0xff]  }
  0xd3   :  { %3313 = vmatmul.mubr.bf16.gmra.mxu0 %v5912_v28  ;;  %v5984_v28 = vld [vmem:[%s7880_s1 + $0x450] sm:$0xff]  }
  0xd4   :  { %3410 = vmatmul.mubr.bf16.gmra.mxu1 %v5913_v29  ;;  %3320 = vmatprep.mubr.bf16.mxu0 %v5920_v30 }
  0xd5   :  { %3417 = vmatprep.mubr.bf16.mxu1 %v5922_v31 }
  0xdb   :  { %3321 = vmatmul.mubr.bf16.gmra.mxu0 %v5924_v32  ;;  %v5997_v32 = vld [vmem:[%s7880_s1 + $0x498] sm:$0xff]  }
  0xdc   :  { %3418 = vmatmul.mubr.bf16.gmra.mxu1 %v5925_v33  ;;  %3458 = vmatprep.mubr.bf16.mxu0 %v5934_v34 }
  0xdd   :  { %3555 = vmatprep.mubr.bf16.mxu1 %v5937_v35  ;;  %v5998_v35 = vld [vmem:[%s7880_s1 + $0x4d0] sm:$0xff]  }
  0xe3   :  { %v4844_v43 = vpop.f32.mrf.mxu0  ;;  %3459 = vmatmul.mubr.bf16.vlgmr.msra.gmra.mxu0 %v5932_v36 }
  0xe4   :  { %v4908_v45 = vpop.f32.mrf.mxu1  ;;  %3556 = vmatmul.mubr.bf16.vlgmr.msra.gmra.mxu1 %v5935_v37  ;;  %5341 = vmatpush3.bf16.msra.mxu0 %v5939_v38 }
  0xe5   :  { %v4845_v48 = vpop.f32.mrf.mxu0  ;;  %3466 = vmatprep.mubr.bf16.mxu0 %v5940_v39  ;;  %3563 = vmatprep.mubr.bf16.mxu1 %v5942_v40  ;;  %v5962_v39 = vld [vmem:[%s7881_s0 + $0x288] ss:$100 sps:$4 sm:$0xff]   ;;  %v5986_v40 = vld [vmem:[%s7880_s1 + $0x410] sm:$0xff]  }
  0xe6   :  { %v4846_v51 = vadd.f32 %v4845_v48, %v4844_v43  ;;  %v4909_v52 = vpop.f32.mrf.mxu1  ;;  %5342 = vmatprep.subr.bf16.mxu0 %v5946_v41  ;;  %5405 = vmatpush3.bf16.msra.mxu1 %v5957_v42  ;;  %v5994_v41 = vld [vmem:[%s7880_s1 + $0x448] sm:$0xff]   ;;  %v5999_v48 = vld [vmem:[%s7880_s1 + $0x490] sm:$0xff]  }
  0xe7   :  { %v4910_v56 = vadd.f32 %v4909_v52, %v4908_v45  ;;  %v4847_v57 = vpop.f32.mrf.mxu0  ;;  %5406 = vmatprep.subr.bf16.mxu1 %v5965_v44  ;;  %v5963_v45 = vld [vmem:[%s7881_s0 + $0x290] ss:$100 sps:$4 sm:$0xff]  }
  0xe8   :  { %v2879_v60 = vadd.f32 %v4846_v51, %v6899_v46  ;;  %v4911_v61 = vpop.f32.mrf.mxu1  ;;  %5343 = vmatpush3.bf16.msra.mxu0 %v5947_v47  ;;  %v5970_v47 = vld [vmem:[%s7881_s0 + $0x354] ss:$100 sps:$4 sm:$0xff]   ;;  %v6007_v51 = vld [vmem:[%s7880_s1 + $0x4c8] sm:$0xff]  }
  0xe9   :  { %v4848_v63 = vpop.f32.mrf.mxu0  ;;  %5344 = vmatprep.subr.bf16.mxu0 %v5954_v50 }
  0xea   :  { %v6932_v1 = vadd.f32 %v4910_v56, %v2879_v60  ;;  %v4849_v2 = vadd.f32 %v4848_v63, %v4847_v57  ;;  %v4912_v3 = vpop.f32.mrf.mxu1  ;;  %5407 = vmatpush3.bf16.msra.mxu1 %v5967_v55  ;;  %v5996_v56 = vld [vmem:[%s7880_s1 + $0x408] sm:$0xff]   ;;  %v6006_v60 = vld [vmem:[%s7880_s1 + $0x440] sm:$0xff]  }
  0xeb   :  { %v4913_v5 = vadd.f32 %v4912_v3, %v4911_v61  ;;  %v4850_v6 = vpop.f32.mrf.mxu0  ;;  %3467 = vmatmul.mubr.bf16.gmra.mxu0 %v5944_v49  ;;  %5408 = vmatprep.subr.bf16.mxu1 %v5975_v59  ;;  %v6009_v61 = vld [vmem:[%s7880_s1 + $0x488] sm:$0xff]  }
  0xec   :  { %v2882_v8 = vadd.f32 %v4849_v2, %v6899_v46  ;;  %v4914_v9 = vpop.f32.mrf.mxu1  ;;  %3564 = vmatmul.mubr.bf16.gmra.mxu1 %v5945_v53  ;;  %3474 = vmatprep.mubr.bf16.mxu0 %v5948_v54  ;;  %v5973_v54 = vld [vmem:[%s7881_s0 + $0x35c] ss:$100 sps:$4 sm:$0xff]  }
  0xed   :  { %v4851_v10 = vpop.f32.mrf.mxu0  ;;  %3571 = vmatprep.mubr.bf16.mxu1 %v5950_v58  ;;  %5345 = vmatpush3.bf16.msra.mxu0 %v5956_v62 }
  0xee   :  { %v6947_v13 = vadd.f32 %v4913_v5, %v2882_v8  ;;  %v4852_v14 = vadd.f32 %v4851_v10, %v4850_v6  ;;  %v4915_v15 = vpop.f32.mrf.mxu1  ;;  %5346 = vmatprep.subr.bf16.mxu0 %v5964_v0  ;;  %5409 = vmatpush3.bf16.msra.mxu1 %v5977_v4  ;;  %v6010_v0 = vld [vmem:[%s7880_s1 + $0x4c0] sm:$0xff]   ;;  %v6018_v10 = vld [vmem:[%s7880_s1 + $0x578] sm:$0xff]  }
  0xef   :  { %v4916_v20 = vadd.f32 %v4915_v15, %v4914_v9  ;;  %v4853_v21 = vpop.f32.mrf.mxu0  ;;  %5410 = vmatprep.subr.bf16.mxu1 %v5985_v7  ;;  %v6008_v4 = vld [vmem:[%s7880_s1 + $0x400] sm:$0xff]  }
  0xf0   :  { %v2887_v24 = vadd.f32 %v4852_v14, %v6899_v46  ;;  %v4917_v25 = vpop.f32.mrf.mxu1  ;;  %v6011_v6 = vld [vmem:[%s7880_s1 + $0x480] sm:$0xff]   ;;  %v5968_v14 = vld [vmem:[%s7881_s0 + $0x350] ss:$100 sps:$4 sm:$0xff]  }
  0xf1   :  { %v4854_v27 = vpop.f32.mrf.mxu0  ;;  %5347 = vmatpush3.bf16.msra.mxu0 %v5966_v12 }
  0xf2   :  { %v6974_v29 = vadd.f32 %v4916_v20, %v2887_v24  ;;  %v4855_v30 = vadd.f32 %v4854_v27, %v4853_v21  ;;  %v4918_v31 = vpop.f32.mrf.mxu1  ;;  %5348 = vmatprep.subr.bf16.mxu0 %v5974_v18  ;;  %5411 = vmatpush3.bf16.msra.mxu1 %v5987_v19  ;;  %v5980_v18 = vld [vmem:[%s7881_s0 + $0x41c] ss:$100 sps:$4 sm:$0xff]   ;;  %v5983_v20 = vld [vmem:[%s7881_s0 + $0x424] ss:$100 sps:$4 sm:$0xff]  }
  0xf3   :  { %v4919_v33 = vadd.f32 %v4918_v31, %v4917_v25  ;;  %v4856_v34 = vpop.f32.mrf.mxu0  ;;  %3475 = vmatmul.mubr.bf16.gmra.mxu0 %v5952_v11  ;;  %5412 = vmatprep.subr.bf16.mxu1 %v5995_v23  ;;  %v6035_v24 = vld [vmem:[%s7880_s1 + $0x5f8] sm:$0xff]  }
  0xf4   :  { %v2890_v36 = vadd.f32 %v4855_v30, %v6899_v46  ;;  %v4920_v37 = vpop.f32.mrf.mxu1  ;;  %3572 = vmatmul.mubr.bf16.gmra.mxu1 %v5953_v16  ;;  %3482 = vmatprep.mubr.bf16.mxu0 %v5958_v17  ;;  %v5971_v17 = vld [vmem:[%s7881_s0 + $0x358] ss:$100 sps:$4 sm:$0xff]  }
  0xf5   :  { %v4857_v38 = vpop.f32.mrf.mxu0  ;;  %3579 = vmatprep.mubr.bf16.mxu1 %v5960_v22  ;;  %5349 = vmatpush3.bf16.msra.mxu0 %v5976_v26 }
  0xf6   :  { %v6992_v42 = vadd.f32 %v4919_v33, %v2890_v36  ;;  %v4858_v43 = vadd.f32 %v4857_v38, %v4856_v34  ;;  %v4921_v44 = vpop.f32.mrf.mxu1  ;;  %5350 = vmatprep.subr.bf16.mxu0 %v5984_v28  ;;  %5413 = vmatpush3.bf16.msra.mxu1 %v5997_v32  ;;  %v5978_v34 = vld [vmem:[%s7881_s0 + $0x418] ss:$100 sps:$4 sm:$0xff]  }
  0xf7   :  { %v4922_v49 = vadd.f32 %v4921_v44, %v4920_v37  ;;  %v4859_v50 = vpop.f32.mrf.mxu0  ;;  %5414 = vmatprep.subr.bf16.mxu1 %v5998_v35  ;;  %v5981_v37 = vld [vmem:[%s7881_s0 + $0x420] ss:$100 sps:$4 sm:$0xff]  }
  0xf8   :  { %v2895_v52 = vadd.f32 %v4858_v43, %v6899_v46  ;;  %v4923_v53 = vpop.f32.mrf.mxu1  ;;  %v5993_v43 = vld [vmem:[%s7881_s0 + $0x4ec] ss:$100 sps:$4 sm:$0xff]  }
  0xf9   :  { %v4860_v55 = vpop.f32.mrf.mxu0  ;;  %5351 = vmatpush3.bf16.msra.mxu0 %v5986_v40  ;;  %v5990_v40 = vld [vmem:[%s7881_s0 + $0x4e4] ss:$100 sps:$4 sm:$0xff]  }
  0xfa   :  { %v7013_v57 = vadd.f32 %v4922_v49, %v2895_v52  ;;  %v4861_v58 = vadd.f32 %v4860_v55, %v4859_v50  ;;  %v4924_v59 = vpop.f32.mrf.mxu1  ;;  %5352 = vmatprep.subr.bf16.mxu0 %v5994_v41  ;;  %5415 = vmatpush3.bf16.msra.mxu1 %v5999_v48 }
  0xfb   :  { %v4925_v62 = vadd.f32 %v4924_v59, %v4923_v53  ;;  %v4862_v63 = vpop.f32.mrf.mxu0  ;;  %3483 = vmatmul.mubr.bf16.gmra.mxu0 %v5962_v39  ;;  %5416 = vmatprep.subr.bf16.mxu1 %v6007_v51 }
  0xfc   :  { %v2898_v2 = vadd.f32 %v4861_v58, %v6899_v46  ;;  %v4926_v3 = vpop.f32.mrf.mxu1  ;;  %3580 = vmatmul.mubr.bf16.gmra.mxu1 %v5963_v45  ;;  %3490 = vmatprep.mubr.bf16.mxu0 %v5970_v47 }
  0xfd   :  { %v4863_v5 = vpop.f32.mrf.mxu0  ;;  %3587 = vmatprep.mubr.bf16.mxu1 %v5973_v54  ;;  %5353 = vmatpush3.bf16.msra.mxu0 %v5996_v56  ;;  %v5988_v56 = vld [vmem:[%s7881_s0 + $0x4e0] ss:$100 sps:$4 sm:$0xff]  }
  0xfe   :  { %v7031_v7 = vadd.f32 %v4925_v62, %v2898_v2  ;;  %v4864_v8 = vadd.f32 %v4863_v5, %v4862_v63  ;;  %v4927_v9 = vpop.f32.mrf.mxu1  ;;  %5354 = vmatprep.subr.bf16.mxu0 %v6006_v60  ;;  %5417 = vmatpush3.bf16.msra.mxu1 %v6009_v61  ;;  %v5991_v60 = vld [vmem:[%s7881_s0 + $0x4e8] ss:$100 sps:$4 sm:$0xff]   ;;  %v6005_v2 = vld [vmem:[%s7881_s0 + $0x5b4] ss:$100 sps:$4 sm:$0xff]  }
  0xff   :  { %v4928_v11 = vadd.f32 %v4927_v9, %v4926_v3  ;;  %v4865_v12 = vpop.f32.mrf.mxu0  ;;  %5418 = vmatprep.subr.bf16.mxu1 %v6010_v0  ;;  %v6002_v63 = vld [vmem:[%s7881_s0 + $0x5ac] ss:$100 sps:$4 sm:$0xff]  }
 0x100   :  { %v2903_v15 = vadd.f32 %v4864_v8, %v6899_v46  ;;  %v4929_v16 = vpop.f32.mrf.mxu1 }
 0x101   :  { %v4866_v19 = vpop.f32.mrf.mxu0  ;;  %5355 = vmatpush3.bf16.msra.mxu0 %v6008_v4 }
 0x102   :  { %v7049_v21 = vadd.f32 %v4928_v11, %v2903_v15  ;;  %v4867_v22 = vadd.f32 %v4866_v19, %v4865_v12  ;;  %v4930_v23 = vpop.f32.mrf.mxu1  ;;  %5419 = vmatpush3.bf16.msra.mxu1 %v6011_v6  ;;  %5468 = vmatprep.subr.bf16.mxu0 %v6018_v10  ;;  %v6003_v19 = vld [vmem:[%s7881_s0 + $0x5b0] ss:$100 sps:$4 sm:$0xff]  }
 0x103   :  { %v4931_v25 = vadd.f32 %v4930_v23, %v4929_v16  ;;  %v4868_v26 = vpop.f32.mrf.mxu0  ;;  %3491 = vmatmul.mubr.bf16.gmra.mxu0 %v5968_v14  ;;  %5532 = vmatprep.subr.bf16.mxu1 %v6035_v24  ;;  %v6000_v16 = vld [vmem:[%s7881_s0 + $0x5a8] ss:$100 sps:$4 sm:$0xff]  }
 0x104   :  { %v2906_v27 = vadd.f32 %v4867_v22, %v6899_v46  ;;  %v4932_v28 = vpop.f32.mrf.mxu1  ;;  %3588 = vmatmul.mubr.bf16.gmra.mxu1 %v5971_v17  ;;  %3498 = vmatprep.mubr.bf16.mxu0 %v5980_v18  ;;  %v6014_v23 = vld [vmem:[%s7881_s0 + $0x44] ss:$100 sps:$4 sm:$0xff]  }
 0x105   :  { %v4869_v30 = vpop.f32.mrf.mxu0  ;;  %3595 = vmatprep.mubr.bf16.mxu1 %v5983_v20 }
 0x106   :  { %v7055_v31 = vadd.f32 %v4931_v25, %v2906_v27  ;;  %v4870_v32 = vadd.f32 %v4869_v30, %v4868_v26  ;;  %v4933_v33 = vpop.f32.mrf.mxu1  ;;  %v6017_v25 = vld [vmem:[%s7881_s0 + $0x4c] ss:$100 sps:$4 sm:$0xff]  }
 0x107   :  { %v4934_v35 = vadd.f32 %v4933_v33, %v4932_v28  ;;  %v4871_v36 = vpop.f32.mrf.mxu0 }
 0x108   :  { %v2911_v38 = vadd.f32 %v4870_v32, %v6899_v46  ;;  %v4935_v39 = vpop.f32.mrf.mxu1 }
 0x109   :  { %v4872_v41 = vpop.f32.mrf.mxu0 }
 0x10a   :  { %v7070_v44 = vadd.f32 %v4934_v35, %v2911_v38  ;;  %v4873_v45 = vadd.f32 %v4872_v41, %v4871_v36  ;;  %v4936_v47 = vpop.f32.mrf.mxu1  ;;  %v6012_v36 = vld [vmem:[%s7881_s0 + $0x40] ss:$100 sps:$4 sm:$0xff]  }
 0x10b   :  { %v4937_v48 = vadd.f32 %v4936_v47, %v4935_v39  ;;  %v4874_v49 = vpop.f32.mrf.mxu0  ;;  %3499 = vmatmul.mubr.bf16.gmra.mxu0 %v5978_v34 }
 0x10c   :  { %v2914_v50 = vadd.f32 %v4873_v45, %v6899_v46  ;;  %v4938_v51 = vpop.f32.mrf.mxu1  ;;  %3596 = vmatmul.mubr.bf16.gmra.mxu1 %v5981_v37  ;;  %3506 = vmatprep.mubr.bf16.mxu0 %v5990_v40  ;;  %v6015_v40 = vld [vmem:[%s7881_s0 + $0x48] ss:$100 sps:$4 sm:$0xff]   ;;  %v6019_v45 = vld [vmem:[%s7880_s1 + $0x538] sm:$0xff]  }
 0x10d   :  { %v4875_v52 = vpop.f32.mrf.mxu0  ;;  %3603 = vmatprep.mubr.bf16.mxu1 %v5993_v43 }
 0x10e   :  { %v7073_v53 = vadd.f32 %v4937_v48, %v2914_v50  ;;  %v4876_v54 = vadd.f32 %v4875_v52, %v4874_v49  ;;  %v4939_v55 = vpop.f32.mrf.mxu1  ;;  %v6022_v49 = vld [vmem:[%s7881_s0 + $0x10c] ss:$100 sps:$4 sm:$0xff]  }
 0x10f   :  { %v4940_v58 = vadd.f32 %v4939_v55, %v4938_v51  ;;  %v4877_v59 = vpop.f32.mrf.mxu0  ;;  %v6025_v51 = vld [vmem:[%s7881_s0 + $0x114] ss:$100 sps:$4 sm:$0xff]  }
 0x110   :  { %v2919_v61 = vadd.f32 %v4876_v54, %v6899_v46  ;;  %v4941_v62 = vpop.f32.mrf.mxu1 }
 0x111   :  { %v4878_v0 = vpop.f32.mrf.mxu0 }
 0x112   :  { %v7088_v3 = vadd.f32 %v4940_v58, %v2919_v61  ;;  %v4879_v4 = vadd.f32 %v4878_v0, %v4877_v59  ;;  %v4942_v5 = vpop.f32.mrf.mxu1  ;;  %v6037_v58 = vld [vmem:[%s7880_s1 + $0x5b8] sm:$0xff]   ;;  %v6045_v61 = vld [vmem:[%s7880_s1 + $0x5f0] sm:$0xff]  }
 0x113   :  { %v4943_v6 = vadd.f32 %v4942_v5, %v4941_v62  ;;  %v4880_v8 = vpop.f32.mrf.mxu0  ;;  %3507 = vmatmul.mubr.bf16.gmra.mxu0 %v5988_v56  ;;  %v6026_v56 = vld [vmem:[%s7880_s1 + $0x570] sm:$0xff]   ;;  %v6034_v5 = vld [vmem:[%s7880_s1 + $0x568] sm:$0xff]  }
 0x114   :  { %v2922_v9 = vadd.f32 %v4879_v4, %v6899_v46  ;;  %v4944_v10 = vpop.f32.mrf.mxu1  ;;  %3604 = vmatmul.mubr.bf16.gmra.mxu1 %v5991_v60  ;;  %3514 = vmatprep.mubr.bf16.mxu0 %v6002_v63  ;;  %v6027_v0 = vld [vmem:[%s7880_s1 + $0x530] sm:$0xff]   ;;  %v6020_v4 = vld [vmem:[%s7881_s0 + $0x108] ss:$100 sps:$4 sm:$0xff]  }
 0x115   :  { %v4881_v11 = vpop.f32.mrf.mxu0  ;;  %3611 = vmatprep.mubr.bf16.mxu1 %v6005_v2 }
 0x116   :  { %v7091_v12 = vadd.f32 %v4943_v6, %v2922_v9  ;;  %v4882_v14 = vadd.f32 %v4881_v11, %v4880_v8  ;;  %v4945_v15 = vpop.f32.mrf.mxu1  ;;  %v6023_v9 = vld [vmem:[%s7881_s0 + $0x110] ss:$100 sps:$4 sm:$0xff]  }
 0x117   :  { %v4946_v17 = vadd.f32 %v4945_v15, %v4944_v10  ;;  %v4883_v18 = vpop.f32.mrf.mxu0  ;;  %v6030_v10 = vld [vmem:[%s7881_s0 + $0x1d4] ss:$100 sps:$4 sm:$0xff]  }
 0x118   :  { %v2927_v20 = vadd.f32 %v4882_v14, %v6899_v46  ;;  %v4947_v22 = vpop.f32.mrf.mxu1  ;;  %v6047_v11 = vld [vmem:[%s7880_s1 + $0x5b0] sm:$0xff]  }
 0x119   :  { %v4884_v24 = vpop.f32.mrf.mxu0 }
 0x11a   :  { %v7106_v26 = vadd.f32 %v4946_v17, %v2927_v20  ;;  %v4885_v27 = vadd.f32 %v4884_v24, %v4883_v18  ;;  %v4948_v28 = vpop.f32.mrf.mxu1  ;;  %v6055_v17 = vld [vmem:[%s7880_s1 + $0x5e8] sm:$0xff]  }
 0x11b   :  { %v4949_v30 = vadd.f32 %v4948_v28, %v4947_v22  ;;  %v4886_v32 = vpop.f32.mrf.mxu0  ;;  %3515 = vmatmul.mubr.bf16.gmra.mxu0 %v6000_v16  ;;  %v6033_v16 = vld [vmem:[%s7881_s0 + $0x1dc] ss:$100 sps:$4 sm:$0xff]   ;;  %v6036_v20 = vld [vmem:[%s7880_s1 + $0x528] sm:$0xff]  }
 0x11c   :  { %v2930_v33 = vadd.f32 %v4885_v27, %v6899_v46  ;;  %v4950_v34 = vpop.f32.mrf.mxu1  ;;  %3612 = vmatmul.mubr.bf16.gmra.mxu1 %v6003_v19  ;;  %3652 = vmatprep.mubr.bf16.mxu0 %v6014_v23  ;;  %v6044_v23 = vld [vmem:[%s7880_s1 + $0x560] sm:$0xff]  }
 0x11d   :  { %v4887_v35 = vpop.f32.mrf.mxu0  ;;  %3749 = vmatprep.mubr.bf16.mxu1 %v6017_v25 }
 0x11e   :  { %v7112_v37 = vadd.f32 %v4949_v30, %v2930_v33  ;;  %v4888_v38 = vadd.f32 %v4887_v35, %v4886_v32  ;;  %v4951_v39 = vpop.f32.mrf.mxu1  ;;  %v6065_v32 = vld [vmem:[%s7880_s1 + $0x5e0] sm:$0xff]  }
 0x11f   :  { %v4952_v41 = vadd.f32 %v4951_v39, %v4950_v34  ;;  %v4889_v43 = vpop.f32.mrf.mxu0 }
 0x120   :  { %v2935_v47 = vadd.f32 %v4888_v38, %v6899_v46  ;;  %v4953_v48 = vpop.f32.mrf.mxu1  ;;  %v6046_v38 = vld [vmem:[%s7880_s1 + $0x520] sm:$0xff]  }
 0x121   :  { %v4890_v50 = vpop.f32.mrf.mxu0 }
 0x122   :  { %v7127_v52 = vadd.f32 %v4952_v41, %v2935_v47  ;;  %v4891_v54 = vadd.f32 %v4890_v50, %v4889_v43  ;;  %v4954_v55 = vpop.f32.mrf.mxu1  ;;  %v6040_v43 = vld [vmem:[%s7881_s0 + $0x29c] ss:$100 sps:$4 sm:$0xff]  }
 0x123   :  { %v4955_v59 = vadd.f32 %v4954_v55, %v4953_v48  ;;  %v4972_v60 = vpop.f32.mrf.mxu0  ;;  %3653 = vmatmul.mubr.bf16.vlgmr.msra.gmra.mxu0 %v6012_v36  ;;  %v6028_v36 = vld [vmem:[%s7881_s0 + $0x1d0] ss:$100 sps:$4 sm:$0xff]   ;;  %v6067_v47 = vld [vmem:[%s7880_s1 + $0x5a0] sm:$0xff]   ;;  %v6075_v50 = vld [vmem:[%s7880_s1 + $0x5d8] sm:$0xff]  }
 0x124   :  { %v2938_v62 = vadd.f32 %v4891_v54, %v6899_v46  ;;  %v5036_v63 = vpop.f32.mrf.mxu1  ;;  %3750 = vmatmul.mubr.bf16.vlgmr.msra.gmra.mxu1 %v6015_v40  ;;  %5469 = vmatpush3.bf16.msra.mxu0 %v6019_v45  ;;  %v6054_v45 = vld [vmem:[%s7880_s1 + $0x558] sm:$0xff]   ;;  %v6043_v55 = vld [vmem:[%s7881_s0 + $0x2a4] ss:$100 sps:$4 sm:$0xff]  }
 0x125   :  { %v4973_v2 = vpop.f32.mrf.mxu0  ;;  %3660 = vmatprep.mubr.bf16.mxu0 %v6022_v49  ;;  %3757 = vmatprep.mubr.bf16.mxu1 %v6025_v51 }
 0x126   :  { %v7148_v6 = vadd.f32 %v4955_v59, %v2938_v62  ;;  %v4974_v46 = vadd.f32 %v4973_v2, %v4972_v60  ;;  %v5037_v8 = vpop.f32.mrf.mxu1  ;;  %5470 = vmatprep.subr.bf16.mxu0 %v6026_v56  ;;  %5533 = vmatpush3.bf16.msra.mxu1 %v6037_v58  ;;  %v6056_v58 = vld [vmem:[%s7880_s1 + $0x518] sm:$0xff]   ;;  %v6078_v2 = vld [vmem:[%s7880_s1 + $0x5d0] sm:$0xff]  }
 0x127   :  { %v5038_v14 = vadd.f32 %v5037_v8, %v5036_v63  ;;  %v4975_v15 = vpop.f32.mrf.mxu0  ;;  %5534 = vmatprep.subr.bf16.mxu1 %v6045_v61  ;;  %v6077_v62 = vld [vmem:[%s7880_s1 + $0x598] sm:$0xff]  }
 0x128   :  { %v3073_v18 = vadd.f32 %v4974_v46, %v6932_v1  ;;  %v5039_v19 = vpop.f32.mrf.mxu1  ;;  %5471 = vmatpush3.bf16.msra.mxu0 %v6027_v0  ;;  %v6057_v1 = vld [vmem:[%s7880_s1 + $0x5a8] sm:$0xff]   ;;  %v6066_v46 = vld [vmem:[%s7880_s1 + $0x510] sm:$0xff]  }
 0x129   :  { %v4976_v22 = vpop.f32.mrf.mxu0  ;;  %5472 = vmatprep.subr.bf16.mxu0 %v6034_v5 }
 0x12a   :  { %v7172_v24 = vadd.f32 %v5038_v14, %v3073_v18  ;;  %v4977_v25 = vadd.f32 %v4976_v22, %v4975_v15  ;;  %v5040_v27 = vpop.f32.mrf.mxu1  ;;  %5535 = vmatpush3.bf16.msra.mxu1 %v6047_v11  ;;  %v6041_v15 = vld [vmem:[%s7881_s0 + $0x2a0] ss:$100 sps:$4 sm:$0xff]  }
 0x12b   :  { %v5041_v28 = vadd.f32 %v5040_v27, %v5039_v19  ;;  %v4978_v30 = vpop.f32.mrf.mxu0  ;;  %3661 = vmatmul.mubr.bf16.gmra.mxu0 %v6020_v4  ;;  %5536 = vmatprep.subr.bf16.mxu1 %v6055_v17  ;;  %v6050_v19 = vld [vmem:[%s7881_s0 + $0x364] ss:$100 sps:$4 sm:$0xff]  }
 0x12c   :  { %v3076_v33 = vadd.f32 %v4977_v25, %v6947_v13  ;;  %v5042_v34 = vpop.f32.mrf.mxu1  ;;  %3758 = vmatmul.mubr.bf16.gmra.mxu1 %v6023_v9  ;;  %3668 = vmatprep.mubr.bf16.mxu0 %v6030_v10  ;;  %v6031_v13 = vld [vmem:[%s7881_s0 + $0x1d8] ss:$100 sps:$4 sm:$0xff]   ;;  %v6074_v10 = vld [vmem:[%s7880_s1 + $0x548] sm:$0xff]  }
 0x12d   :  { %v4979_v35 = vpop.f32.mrf.mxu0  ;;  %3765 = vmatprep.mubr.bf16.mxu1 %v6033_v16  ;;  %5473 = vmatpush3.bf16.msra.mxu0 %v6036_v20  ;;  %v6038_v9 = vld [vmem:[%s7881_s0 + $0x298] ss:$100 sps:$4 sm:$0xff]   ;;  %v6079_v16 = vld [vmem:[%s7880_s1 + $0x590] sm:$0xff]   ;;  %v6087_v20 = vld [vmem:[%s7880_s1 + $0x5c8] sm:$0xff]  }
 0x12e   :  { %v7187_v39 = vadd.f32 %v5041_v28, %v3076_v33  ;;  %v4980_v40 = vadd.f32 %v4979_v35, %v4978_v30  ;;  %v5043_v41 = vpop.f32.mrf.mxu1  ;;  %5474 = vmatprep.subr.bf16.mxu0 %v6044_v23  ;;  %5537 = vmatpush3.bf16.msra.mxu1 %v6057_v1  ;;  %v6053_v25 = vld [vmem:[%s7881_s0 + $0x36c] ss:$100 sps:$4 sm:$0xff]   ;;  %v6086_v28 = vld [vmem:[%s7880_s1 + $0x540] sm:$0xff]  }
 0x12f   :  { %v5044_v48 = vadd.f32 %v5043_v41, %v5042_v34  ;;  %v4981_v49 = vpop.f32.mrf.mxu0  ;;  %5538 = vmatprep.subr.bf16.mxu1 %v6065_v32  ;;  %v6076_v1 = vld [vmem:[%s7880_s1 + $0x508] sm:$0xff]  }
 0x130   :  { %v3081_v51 = vadd.f32 %v4980_v40, %v6974_v29  ;;  %v5045_v54 = vpop.f32.mrf.mxu1  ;;  %v6064_v29 = vld [vmem:[%s7880_s1 + $0x550] sm:$0xff]  }
 0x131   :  { %v4982_v56 = vpop.f32.mrf.mxu0  ;;  %5475 = vmatpush3.bf16.msra.mxu0 %v6046_v38 }
 0x132   :  { %v7211_v59 = vadd.f32 %v5044_v48, %v3081_v51  ;;  %v4983_v60 = vadd.f32 %v4982_v56, %v4981_v49  ;;  %v5046_v61 = vpop.f32.mrf.mxu1  ;;  %5476 = vmatprep.subr.bf16.mxu0 %v6054_v45  ;;  %5539 = vmatpush3.bf16.msra.mxu1 %v6067_v47  ;;  %v7279_v49 = vld [vmem:[%s7880_s1 + $0x638] sm:$0xff]  }
 0x133   :  { %v5047_v63 = vadd.f32 %v5046_v61, %v5045_v54  ;;  %v4984_v0 = vpop.f32.mrf.mxu0  ;;  %3669 = vmatmul.mubr.bf16.gmra.mxu0 %v6028_v36  ;;  %5540 = vmatprep.subr.bf16.mxu1 %v6075_v50  ;;  %v6090_v36 = vld [vmem:[%s7880_s1 + $0x5c0] sm:$0xff]   ;;  %v6051_v54 = vld [vmem:[%s7881_s0 + $0x368] ss:$100 sps:$4 sm:$0xff]   ;;  %v6063_v61 = vld [vmem:[%s7881_s0 + $0x434] ss:$100 sps:$4 sm:$0xff]  }
 0x134   :  { %v3084_v4 = vadd.f32 %v4983_v60, %v6992_v42  ;;  %v5048_v5 = vpop.f32.mrf.mxu1  ;;  %3766 = vmatmul.mubr.bf16.gmra.mxu1 %v6031_v13  ;;  %3676 = vmatprep.mubr.bf16.mxu0 %v6040_v43  ;;  %v6048_v13 = vld [vmem:[%s7881_s0 + $0x360] ss:$100 sps:$4 sm:$0xff]  }
 0x135   :  { %v4985_v8 = vpop.f32.mrf.mxu0  ;;  %3773 = vmatprep.mubr.bf16.mxu1 %v6043_v55  ;;  %5477 = vmatpush3.bf16.msra.mxu0 %v6056_v58  ;;  %v6088_v43 = vld [vmem:[%s7880_s1 + $0x500] sm:$0xff]   ;;  %v6060_v58 = vld [vmem:[%s7881_s0 + $0x42c] ss:$100 sps:$4 sm:$0xff]  }
 0x136   :  { %v7232_v11 = vadd.f32 %v5047_v63, %v3084_v4  ;;  %v4986_v42 = vadd.f32 %v4985_v8, %v4984_v0  ;;  %v5049_v14 = vpop.f32.mrf.mxu1  ;;  %5478 = vmatprep.subr.bf16.mxu0 %v6064_v29  ;;  %5541 = vmatpush3.bf16.msra.mxu1 %v6077_v62 }
 0x137   :  { %v5050_v17 = vadd.f32 %v5049_v14, %v5048_v5  ;;  %v4987_v18 = vpop.f32.mrf.mxu0  ;;  %5542 = vmatprep.subr.bf16.mxu1 %v6078_v2 }
 0x138   :  { %v3089_v22 = vadd.f32 %v4986_v42, %v7013_v57  ;;  %v5051_v23 = vpop.f32.mrf.mxu1  ;;  %v6089_v57 = vld [vmem:[%s7880_s1 + $0x588] sm:$0xff]  }
 0x139   :  { %v4988_v27 = vpop.f32.mrf.mxu0  ;;  %5479 = vmatpush3.bf16.msra.mxu0 %v6066_v46 }
 0x13a   :  { %v7256_v30 = vadd.f32 %v5050_v17, %v3089_v22  ;;  %v4989_v32 = vadd.f32 %v4988_v27, %v4987_v18  ;;  %v5052_v33 = vpop.f32.mrf.mxu1  ;;  %5480 = vmatprep.subr.bf16.mxu0 %v6074_v10  ;;  %5543 = vmatpush3.bf16.msra.mxu1 %v6079_v16  ;;  %v6058_v10 = vld [vmem:[%s7881_s0 + $0x428] ss:$100 sps:$4 sm:$0xff]   ;;  %v6070_v17 = vld [vmem:[%s7881_s0 + $0x4f4] ss:$100 sps:$4 sm:$0xff]  }
 0x13b   :  { %v5053_v34 = vadd.f32 %v5052_v33, %v5051_v23  ;;  %v4990_v35 = vpop.f32.mrf.mxu0  ;;  %3677 = vmatmul.mubr.bf16.gmra.mxu0 %v6038_v9  ;;  %5544 = vmatprep.subr.bf16.mxu1 %v6087_v20 }
 0x13c   :  { %v3092_v38 = vadd.f32 %v4989_v32, %v7031_v7  ;;  %v5054_v40 = vpop.f32.mrf.mxu1  ;;  %3774 = vmatmul.mubr.bf16.gmra.mxu1 %v6041_v15  ;;  %3684 = vmatprep.mubr.bf16.mxu0 %v6050_v19  ;;  %v6091_v7 = vld [vmem:[%s7880_s1 + $0x580] sm:$0xff]   ;;  %v6061_v15 = vld [vmem:[%s7881_s0 + $0x430] ss:$100 sps:$4 sm:$0xff]  }
 0x13d   :  { %v4991_v41 = vpop.f32.mrf.mxu0  ;;  %3781 = vmatprep.mubr.bf16.mxu1 %v6053_v25  ;;  %5481 = vmatpush3.bf16.msra.mxu0 %v6076_v1  ;;  %v6073_v19 = vld [vmem:[%s7881_s0 + $0x4fc] ss:$100 sps:$4 sm:$0xff]  }
 0x13e   :  { %v7271_v45 = vadd.f32 %v5053_v34, %v3092_v38  ;;  %v4992_v47 = vadd.f32 %v4991_v41, %v4990_v35  ;;  %v5055_v48 = vpop.f32.mrf.mxu1  ;;  %5482 = vmatprep.subr.bf16.mxu0 %v6086_v28  ;;  %5545 = vmatpush3.bf16.msra.mxu1 %v6089_v57  ;;  %v6082_v41 = vld [vmem:[%s7881_s0 + $0x5bc] ss:$100 sps:$4 sm:$0xff]  }
 0x13f   :  { %v5056_v50 = vadd.f32 %v5055_v48, %v5054_v40  ;;  %v4993_v51 = vpop.f32.mrf.mxu0  ;;  %5546 = vmatprep.subr.bf16.mxu1 %v6090_v36  ;;  %v6068_v36 = vld [vmem:[%s7881_s0 + $0x4f0] ss:$100 sps:$4 sm:$0xff]  }
 0x140   :  { %v3097_v55 = vadd.f32 %v4992_v47, %v7049_v21  ;;  %v5057_v56 = vpop.f32.mrf.mxu1 }
 0x141   :  { %v4994_v60 = vpop.f32.mrf.mxu0  ;;  %5483 = vmatpush3.bf16.msra.mxu0 %v6088_v43  ;;  %v6085_v43 = vld [vmem:[%s7881_s0 + $0x5c4] ss:$100 sps:$4 sm:$0xff]  }
 0x142   :  { %v7291_v29 = vadd.f32 %v5056_v50, %v3097_v55  ;;  %v4995_v62 = vadd.f32 %v4994_v60, %v4993_v51  ;;  %v5058_v63 = vpop.f32.mrf.mxu1  ;;  %5547 = vmatpush3.bf16.msra.mxu1 %v6091_v7  ;;  %5612 = vmatprep.subr.bf16.mxu0 %v7279_v49 }
 0x143   :  { %v5059_v0 = vadd.f32 %v5058_v63, %v5057_v56  ;;  %v4996_v21 = vpop.f32.mrf.mxu0  ;;  %3685 = vmatmul.mubr.bf16.gmra.mxu0 %v6048_v13  ;;  %5644 = vmatprep.subr.bf16.mxu1 %v7279_v49  ;;  %v6080_v63 = vld [vmem:[%s7881_s0 + $0x5b8] ss:$100 sps:$4 sm:$0xff]  }
 0x144   :  { %v3100_v2 = vadd.f32 %v4995_v62, %v7055_v31  ;;  %v5060_v4 = vpop.f32.mrf.mxu1  ;;  %3782 = vmatmul.mubr.bf16.gmra.mxu1 %v6051_v54  ;;  %3692 = vmatprep.mubr.bf16.mxu0 %v6060_v58 }
 0x145   :  { %v4997_v5 = vpop.f32.mrf.mxu0  ;;  %3789 = vmatprep.mubr.bf16.mxu1 %v6063_v61 }
 0x146   :  { %v7296_v46 = vadd.f32 %v5059_v0, %v3100_v2  ;;  %v4998_v8 = vadd.f32 %v4997_v5, %v4996_v21  ;;  %v5061_v9 = vpop.f32.mrf.mxu1  ;;  %v6094_v2 = vld [vmem:[%s7881_s0 + $0x54] ss:$100 sps:$4 sm:$0xff]   ;;  %v6097_v5 = vld [vmem:[%s7881_s0 + $0x5c] ss:$100 sps:$4 sm:$0xff]  }
 0x147   :  { %v5062_v42 = vadd.f32 %v5061_v9, %v5060_v4  ;;  %v4999_v14 = vpop.f32.mrf.mxu0 }
 0x148   :  { %v3105_v31 = vadd.f32 %v4998_v8, %v7070_v44  ;;  %v5063_v16 = vpop.f32.mrf.mxu1 }
 0x149   :  { %v5000_v18 = vpop.f32.mrf.mxu0 }
 0x14a   :  { %v7311_v20 = vadd.f32 %v5062_v42, %v3105_v31  ;;  %v5001_v22 = vadd.f32 %v5000_v18, %v4999_v14  ;;  %v5064_v23 = vpop.f32.mrf.mxu1 }
 0x14b   :  { %v5065_v25 = vadd.f32 %v5064_v23, %v5063_v16  ;;  %v5002_v27 = vpop.f32.mrf.mxu0  ;;  %3693 = vmatmul.mubr.bf16.gmra.mxu0 %v6058_v10  ;;  %v6092_v23 = vld [vmem:[%s7881_s0 + $0x50] ss:$100 sps:$4 sm:$0xff]  }
 0x14c   :  { %v3108_v1 = vadd.f32 %v5001_v22, %v7073_v53  ;;  %v5066_v44 = vpop.f32.mrf.mxu1  ;;  %3790 = vmatmul.mubr.bf16.gmra.mxu1 %v6061_v15  ;;  %3700 = vmatprep.mubr.bf16.mxu0 %v6070_v17  ;;  %v6071_v53 = vld [vmem:[%s7881_s0 + $0x4f8] ss:$100 sps:$4 sm:$0xff]  }
 0x14d   :  { %v5003_v28 = vpop.f32.mrf.mxu0  ;;  %3797 = vmatprep.mubr.bf16.mxu1 %v6073_v19 }
 0x14e   :  { %v7314_v32 = vadd.f32 %v5065_v25, %v3108_v1  ;;  %v5004_v33 = vadd.f32 %v5003_v28, %v5002_v27  ;;  %v5067_v57 = vpop.f32.mrf.mxu1  ;;  %v6104_v28 = vld [vmem:[%s7881_s0 + $0x124] ss:$100 sps:$4 sm:$0xff]  }
 0x14f   :  { %v5068_v34 = vadd.f32 %v5067_v57, %v5066_v44  ;;  %v5005_v35 = vpop.f32.mrf.mxu0  ;;  %v6101_v44 = vld [vmem:[%s7881_s0 + $0x11c] ss:$100 sps:$4 sm:$0xff]  }
 0x150   :  { %v3113_v38 = vadd.f32 %v5004_v33, %v7088_v3  ;;  %v5069_v40 = vpop.f32.mrf.mxu1 }
 0x151   :  { %v5006_v13 = vpop.f32.mrf.mxu0 }
 0x152   :  { %v7329_v47 = vadd.f32 %v5068_v34, %v3113_v38  ;;  %v5007_v48 = vadd.f32 %v5006_v13, %v5005_v35  ;;  %v5070_v7 = vpop.f32.mrf.mxu1 }
 0x153   :  { %v5071_v50 = vadd.f32 %v5070_v7, %v5069_v40  ;;  %v5008_v3 = vpop.f32.mrf.mxu0  ;;  %3701 = vmatmul.mubr.bf16.gmra.mxu0 %v6068_v36 }
 0x154   :  { %v3116_v51 = vadd.f32 %v5007_v48, %v7091_v12  ;;  %v5072_v54 = vpop.f32.mrf.mxu1  ;;  %3798 = vmatmul.mubr.bf16.gmra.mxu1 %v6071_v53  ;;  %3708 = vmatprep.mubr.bf16.mxu0 %v6082_v41  ;;  %v6083_v12 = vld [vmem:[%s7881_s0 + $0x5c0] ss:$100 sps:$4 sm:$0xff]   ;;  %v6112_v41 = vld [vmem:[%s7880_s1 + $0x628] sm:$0xff]  }
 0x155   :  { %v5009_v55 = vpop.f32.mrf.mxu0  ;;  %3805 = vmatprep.mubr.bf16.mxu1 %v6085_v43 }
 0x156   :  { %v7332_v56 = vadd.f32 %v5071_v50, %v3116_v51  ;;  %v5010_v58 = vadd.f32 %v5009_v55, %v5008_v3  ;;  %v5073_v60 = vpop.f32.mrf.mxu1  ;;  %v6099_v50 = vld [vmem:[%s7881_s0 + $0x118] ss:$100 sps:$4 sm:$0xff]   ;;  %v6108_v55 = vld [vmem:[%s7881_s0 + $0x1e4] ss:$100 sps:$4 sm:$0xff]  }
 0x157   :  { %v5074_v61 = vadd.f32 %v5073_v60, %v5072_v54  ;;  %v5011_v62 = vpop.f32.mrf.mxu0  ;;  %v6102_v54 = vld [vmem:[%s7881_s0 + $0x120] ss:$100 sps:$4 sm:$0xff]  }
 0x158   :  { %v3121_v0 = vadd.f32 %v5010_v58, %v7106_v26  ;;  %v5075_v21 = vpop.f32.mrf.mxu1  ;;  %v6111_v58 = vld [vmem:[%s7881_s0 + $0x1ec] ss:$100 sps:$4 sm:$0xff]  }
 0x159   :  { %v5012_v4 = vpop.f32.mrf.mxu0 }
 0x15a   :  { %v7347_v8 = vadd.f32 %v5074_v61, %v3121_v0  ;;  %v5013_v9 = vadd.f32 %v5012_v4, %v5011_v62  ;;  %v5076_v10 = vpop.f32.mrf.mxu1  ;;  %v6119_v62 = vld [vmem:[%s7880_s1 + $0x620] sm:$0xff]  }
 0x15b   :  { %v5077_v42 = vadd.f32 %v5076_v10, %v5075_v21  ;;  %v5014_v26 = vpop.f32.mrf.mxu0  ;;  %3709 = vmatmul.mubr.bf16.gmra.mxu0 %v6080_v63  ;;  %v6126_v10 = vld [vmem:[%s7880_s1 + $0x618] sm:$0xff]  }
 0x15c   :  { %v3124_v14 = vadd.f32 %v5013_v9, %v7112_v37  ;;  %v5078_v15 = vpop.f32.mrf.mxu1  ;;  %3806 = vmatmul.mubr.bf16.gmra.mxu1 %v6083_v12  ;;  %3846 = vmatprep.mubr.bf16.mxu0 %v6094_v2  ;;  %v6095_v37 = vld [vmem:[%s7881_s0 + $0x58] ss:$100 sps:$4 sm:$0xff]  }
 0x15d   :  { %v5015_v31 = vpop.f32.mrf.mxu0  ;;  %3943 = vmatprep.mubr.bf16.mxu1 %v6097_v5 }
 0x15e   :  { %v7350_v16 = vadd.f32 %v5077_v42, %v3124_v14  ;;  %v5016_v17 = vadd.f32 %v5015_v31, %v5014_v26  ;;  %v5079_v18 = vpop.f32.mrf.mxu1  ;;  %v6109_v31 = vld [vmem:[%s7881_s0 + $0x1e8] ss:$100 sps:$4 sm:$0xff]  }
 0x15f   :  { %v5080_v19 = vadd.f32 %v5079_v18, %v5078_v15  ;;  %v5017_v22 = vpop.f32.mrf.mxu0 }
 0x160   :  { %v3129_v25 = vadd.f32 %v5016_v17, %v7127_v52  ;;  %v5081_v27 = vpop.f32.mrf.mxu1  ;;  %v6105_v52 = vld [vmem:[%s7880_s1 + $0x630] sm:$0xff]  }
 0x161   :  { %v5018_v1 = vpop.f32.mrf.mxu0  ;;  %v6115_v17 = vld [vmem:[%s7881_s0 + $0x2ac] ss:$100 sps:$4 sm:$0xff]  }
 0x162   :  { %v7365_v33 = vadd.f32 %v5080_v19, %v3129_v25  ;;  %v5019_v57 = vadd.f32 %v5018_v1, %v5017_v22  ;;  %v5082_v34 = vpop.f32.mrf.mxu1  ;;  %v6118_v19 = vld [vmem:[%s7881_s0 + $0x2b4] ss:$100 sps:$4 sm:$0xff]  }
 0x163   :  { %v5083_v35 = vadd.f32 %v5082_v34, %v5081_v27  ;;  %v5100_v36 = vpop.f32.mrf.mxu0  ;;  %3847 = vmatmul.mubr.bf16.vlgmr.msra.gmra.mxu0 %v6092_v23 }
 0x164   :  { %v3132_v38 = vadd.f32 %v5019_v57, %v7148_v6  ;;  %v5164_v40 = vpop.f32.mrf.mxu1  ;;  %3944 = vmatmul.mubr.bf16.vlgmr.msra.gmra.mxu1 %v6095_v37  ;;  %5613 = vmatpush3.bf16.msra.mxu0 %v7279_v49 }
 0x165   :  { %v5101_v53 = vpop.f32.mrf.mxu0  ;;  %3854 = vmatprep.mubr.bf16.mxu0 %v6101_v44  ;;  %3951 = vmatprep.mubr.bf16.mxu1 %v6104_v28 }
 0x166   :  { %v7375_v13 = vadd.f32 %v5083_v35, %v3132_v38  ;;  %v5102_v43 = vadd.f32 %v5101_v53, %v5100_v36  ;;  %v5165_v48 = vpop.f32.mrf.mxu1  ;;  %5614 = vmatprep.subr.bf16.mxu0 %v6105_v52  ;;  %5652 = vmatpush3.bf16.msra.mxu1 %v7279_v49  ;;  %v6140_v35 = vld [vmem:[%s7880_s1 + $0x608] sm:$0xff]  }
 0x167   :  { %v5166_v7 = vadd.f32 %v5165_v48, %v5164_v40  ;;  %v5103_v6 = vpop.f32.mrf.mxu0  ;;  %5645 = vmatprep.subr.bf16.mxu1 %v6105_v52 }
 0x168   :  { %v3267_v3 = vadd.f32 %v5102_v43, %v7172_v24  ;;  %v5167_v51 = vpop.f32.mrf.mxu1  ;;  %5615 = vmatpush3.bf16.msra.mxu0 %v6105_v52  ;;  %v6122_v43 = vld [vmem:[%s7881_s0 + $0x374] ss:$100 sps:$4 sm:$0xff]  }
 0x169   :  { %v5104_v49 = vpop.f32.mrf.mxu0  ;;  %5616 = vmatprep.subr.bf16.mxu0 %v6112_v41 }
 0x16a   :  { %v7391_v60 = vadd.f32 %v5166_v7, %v3267_v3  ;;  %v5105_v61 = vadd.f32 %v5104_v49, %v5103_v6  ;;  %v5168_v24 = vpop.f32.mrf.mxu1  ;;  %5653 = vmatpush3.bf16.msra.mxu1 %v6105_v52  ;;  %v6125_v7 = vld [vmem:[%s7881_s0 + $0x37c] ss:$100 sps:$4 sm:$0xff]  }
 0x16b   :  { %v5169_v63 = vadd.f32 %v5168_v24, %v5167_v51  ;;  %v5106_v0 = vpop.f32.mrf.mxu0  ;;  %3855 = vmatmul.mubr.bf16.gmra.mxu0 %v6099_v50  ;;  %5646 = vmatprep.subr.bf16.mxu1 %v6112_v41 }
 0x16c   :  { %v3270_v21 = vadd.f32 %v5105_v61, %v7187_v39  ;;  %v5170_v12 = vpop.f32.mrf.mxu1  ;;  %3952 = vmatmul.mubr.bf16.gmra.mxu1 %v6102_v54  ;;  %3862 = vmatprep.mubr.bf16.mxu0 %v6108_v55  ;;  %v6106_v39 = vld [vmem:[%s7881_s0 + $0x1e0] ss:$100 sps:$4 sm:$0xff]  }
 0x16d   :  { %v5107_v2 = vpop.f32.mrf.mxu0  ;;  %3959 = vmatprep.mubr.bf16.mxu1 %v6111_v58  ;;  %5617 = vmatpush3.bf16.msra.mxu0 %v6112_v41 }
 0x16e   :  { %v7397_v4 = vadd.f32 %v5169_v63, %v3270_v21  ;;  %v5108_v5 = vadd.f32 %v5107_v2, %v5106_v0  ;;  %v5171_v9 = vpop.f32.mrf.mxu1  ;;  %5618 = vmatprep.subr.bf16.mxu0 %v6119_v62  ;;  %5654 = vmatpush3.bf16.msra.mxu1 %v6112_v41  ;;  %v6116_v41 = vld [vmem:[%s7881_s0 + $0x2b0] ss:$100 sps:$4 sm:$0xff]   ;;  %v6123_v2 = vld [vmem:[%s7881_s0 + $0x378] ss:$100 sps:$4 sm:$0xff]  }
 0x16f   :  { %v5172_v42 = vadd.f32 %v5171_v9, %v5170_v12  ;;  %v5109_v26 = vpop.f32.mrf.mxu0  ;;  %5647 = vmatprep.subr.bf16.mxu1 %v6119_v62  ;;  %v6120_v21 = vld [vmem:[%s7881_s0 + $0x370] ss:$100 sps:$4 sm:$0xff]  }
 0x170   :  { %v3275_v14 = vadd.f32 %v5108_v5, %v7211_v59  ;;  %v5173_v15 = vpop.f32.mrf.mxu1  ;;  %v6133_v59 = vld [vmem:[%s7880_s1 + $0x610] sm:$0xff]   ;;  %v6129_v5 = vld [vmem:[%s7881_s0 + $0x43c] ss:$100 sps:$4 sm:$0xff]  }
 0x171   :  { %v5110_v18 = vpop.f32.mrf.mxu0  ;;  %5619 = vmatpush3.bf16.msra.mxu0 %v6119_v62 }
 0x172   :  { %v7415_v22 = vadd.f32 %v5172_v42, %v3275_v14  ;;  %v5111_v23 = vadd.f32 %v5110_v18, %v5109_v26  ;;  %v5174_v25 = vpop.f32.mrf.mxu1  ;;  %5620 = vmatprep.subr.bf16.mxu0 %v6126_v10  ;;  %5655 = vmatpush3.bf16.msra.mxu1 %v6119_v62 }
 0x173   :  { %v5175_v27 = vadd.f32 %v5174_v25, %v5173_v15  ;;  %v5112_v37 = vpop.f32.mrf.mxu0  ;;  %3863 = vmatmul.mubr.bf16.gmra.mxu0 %v6106_v39  ;;  %5648 = vmatprep.subr.bf16.mxu1 %v6126_v10 }
 0x174   :  { %v3278_v1 = vadd.f32 %v5111_v23, %v7232_v11  ;;  %v5176_v44 = vpop.f32.mrf.mxu1  ;;  %3960 = vmatmul.mubr.bf16.gmra.mxu1 %v6109_v31  ;;  %3870 = vmatprep.mubr.bf16.mxu0 %v6115_v17  ;;  %v6113_v11 = vld [vmem:[%s7881_s0 + $0x2a8] ss:$100 sps:$4 sm:$0xff]  }
 0x175   :  { %v5113_v28 = vpop.f32.mrf.mxu0  ;;  %3967 = vmatprep.mubr.bf16.mxu1 %v6118_v19  ;;  %5621 = vmatpush3.bf16.msra.mxu0 %v6126_v10 }
 0x176   :  { %v7421_v57 = vadd.f32 %v5175_v27, %v3278_v1  ;;  %v5114_v34 = vadd.f32 %v5113_v28, %v5112_v37  ;;  %v5177_v52 = vpop.f32.mrf.mxu1  ;;  %5622 = vmatprep.subr.bf16.mxu0 %v6133_v59  ;;  %5656 = vmatpush3.bf16.msra.mxu1 %v6126_v10  ;;  %v6132_v10 = vld [vmem:[%s7881_s0 + $0x444] ss:$100 sps:$4 sm:$0xff]   ;;  %v6127_v27 = vld [vmem:[%s7881_s0 + $0x438] ss:$100 sps:$4 sm:$0xff]  }
 0x177   :  { %v5178_v36 = vadd.f32 %v5177_v52, %v5176_v44  ;;  %v5115_v38 = vpop.f32.mrf.mxu0  ;;  %5649 = vmatprep.subr.bf16.mxu1 %v6133_v59  ;;  %v6136_v44 = vld [vmem:[%s7881_s0 + $0x504] ss:$100 sps:$4 sm:$0xff]  }
 0x178   :  { %v3283_v40 = vadd.f32 %v5114_v34, %v7256_v30  ;;  %v5179_v53 = vpop.f32.mrf.mxu1  ;;  %v6147_v30 = vld [vmem:[%s7880_s1 + $0x600] sm:$0xff]   ;;  %v6139_v34 = vld [vmem:[%s7881_s0 + $0x50c] ss:$100 sps:$4 sm:$0xff]  }
 0x179   :  { %v5116_v48 = vpop.f32.mrf.mxu0  ;;  %5623 = vmatpush3.bf16.msra.mxu0 %v6133_v59 }
 0x17a   :  { %v7439_v6 = vadd.f32 %v5178_v36, %v3283_v40  ;;  %v5117_v50 = vadd.f32 %v5116_v48, %v5115_v38  ;;  %v5180_v3 = vpop.f32.mrf.mxu1  ;;  %5624 = vmatprep.subr.bf16.mxu0 %v6140_v35  ;;  %5657 = vmatpush3.bf16.msra.mxu1 %v6133_v59 }
 0x17b   :  { %v5181_v51 = vadd.f32 %v5180_v3, %v5179_v53  ;;  %v5118_v54 = vpop.f32.mrf.mxu0  ;;  %3871 = vmatmul.mubr.bf16.gmra.mxu0 %v6113_v11  ;;  %5650 = vmatprep.subr.bf16.mxu1 %v6140_v35  ;;  %v6134_v3 = vld [vmem:[%s7881_s0 + $0x500] ss:$100 sps:$4 sm:$0xff]  }
 0x17c   :  { %v3286_v55 = vadd.f32 %v5117_v50, %v7271_v45  ;;  %v5182_v49 = vpop.f32.mrf.mxu1  ;;  %3968 = vmatmul.mubr.bf16.gmra.mxu1 %v6116_v41  ;;  %3878 = vmatprep.mubr.bf16.mxu0 %v6122_v43 }
 0x17d   :  { %v5119_v58 = vpop.f32.mrf.mxu0  ;;  %3975 = vmatprep.mubr.bf16.mxu1 %v6125_v7  ;;  %5625 = vmatpush3.bf16.msra.mxu0 %v6140_v35 }
 0x17e   :  { %v7445_v61 = vadd.f32 %v5181_v51, %v3286_v55  ;;  %v5120_v24 = vadd.f32 %v5119_v58, %v5118_v54  ;;  %v5183_v62 = vpop.f32.mrf.mxu1  ;;  %5626 = vmatprep.subr.bf16.mxu0 %v6147_v30  ;;  %5658 = vmatpush3.bf16.msra.mxu1 %v6140_v35  ;;  %v6143_v54 = vld [vmem:[%s7881_s0 + $0x5cc] ss:$100 sps:$4 sm:$0xff]  }
 0x17f   :  { %v5184_v63 = vadd.f32 %v5183_v62, %v5182_v49  ;;  %v5121_v0 = vpop.f32.mrf.mxu0  ;;  %5651 = vmatprep.subr.bf16.mxu1 %v6147_v30  ;;  %v6146_v49 = vld [vmem:[%s7881_s0 + $0x5d4] ss:$100 sps:$4 sm:$0xff]  }
 0x180   :  { %v3291_v45 = vadd.f32 %v5120_v24, %v7291_v29  ;;  %v5185_v12 = vpop.f32.mrf.mxu1 }
 0x181   :  { %v5122_v9 = vpop.f32.mrf.mxu0  ;;  %5627 = vmatpush3.bf16.msra.mxu0 %v6147_v30 }
 0x182   :  { %v7460_v42 = vadd.f32 %v5184_v63, %v3291_v45  ;;  %v5123_v26 = vadd.f32 %v5122_v9, %v5121_v0  ;;  %v5186_v39 = vpop.f32.mrf.mxu1  ;;  %5659 = vmatpush3.bf16.msra.mxu1 %v6147_v30 }
 0x183   :  { %v5187_v29 = vadd.f32 %v5186_v39, %v5185_v12  ;;  %v5124_v14 = vpop.f32.mrf.mxu0  ;;  %3879 = vmatmul.mubr.bf16.gmra.mxu0 %v6120_v21 }
 0x184   :  { %v3294_v15 = vadd.f32 %v5123_v26, %v7296_v46  ;;  %v5188_v31 = vpop.f32.mrf.mxu1  ;;  %3976 = vmatmul.mubr.bf16.gmra.mxu1 %v6123_v2  ;;  %3886 = vmatprep.mubr.bf16.mxu0 %v6129_v5  ;;  %v6130_v46 = vld [vmem:[%s7881_s0 + $0x440] ss:$100 sps:$4 sm:$0xff]   ;;  %v6141_v26 = vld [vmem:[%s7881_s0 + $0x5c8] ss:$100 sps:$4 sm:$0xff]  }
 0x185   :  { %v5125_v17 = vpop.f32.mrf.mxu0  ;;  %3983 = vmatprep.mubr.bf16.mxu1 %v6132_v10 }
 0x186   :  { %v7463_v18 = vadd.f32 %v5187_v29, %v3294_v15  ;;  %v5126_v19 = vadd.f32 %v5125_v17, %v5124_v14  ;;  %v5189_v23 = vpop.f32.mrf.mxu1  ;;  %v6148_v14 = vld [vmem:[%s7881_s0 + $0x60] ss:$100 sps:$4 sm:$0xff]  }
 0x187   :  { %v5190_v25 = vadd.f32 %v5189_v23, %v5188_v31  ;;  %v5127_v59 = vpop.f32.mrf.mxu0  ;;  %v6149_v31 = vld [vmem:[%s7881_s0 + $0x380] ss:$100 sps:$4 sm:$0xff]  }
 0x188   :  { %v3299_v37 = vadd.f32 %v5126_v19, %v7311_v20  ;;  %v5191_v1 = vpop.f32.mrf.mxu1 }
 0x189   :  { %v5128_v28 = vpop.f32.mrf.mxu0 }
 0x18a   :  { %v7478_v52 = vadd.f32 %v5190_v25, %v3299_v37  ;;  %v5129_v35 = vadd.f32 %v5128_v28, %v5127_v59  ;;  %v5192_v36 = vpop.f32.mrf.mxu1 }
 0x18b   :  { %v5193_v38 = vadd.f32 %v5192_v36, %v5191_v1  ;;  %v5130_v20 = vpop.f32.mrf.mxu0  ;;  %3887 = vmatmul.mubr.bf16.gmra.mxu0 %v6127_v27 }
 0x18c   :  { %v3302_v11 = vadd.f32 %v5129_v35, %v7314_v32  ;;  %v5194_v40 = vpop.f32.mrf.mxu1  ;;  %3984 = vmatmul.mubr.bf16.gmra.mxu1 %v6130_v46  ;;  %3894 = vmatprep.mubr.bf16.mxu0 %v6136_v44  ;;  %v6137_v32 = vld [vmem:[%s7881_s0 + $0x508] ss:$100 sps:$4 sm:$0xff]  }
 0x18d   :  { %v5131_v53 = vpop.f32.mrf.mxu0  ;;  %3991 = vmatprep.mubr.bf16.mxu1 %v6139_v34  ;;  %v6150_v35 = vld [vmem:[%s7881_s0 + $0x128] ss:$100 sps:$4 sm:$0xff]  }
 0x18e   :  { %v7481_v41 = vadd.f32 %v5193_v38, %v3302_v11  ;;  %v5132_v43 = vadd.f32 %v5131_v53, %v5130_v20  ;;  %v5195_v48 = vpop.f32.mrf.mxu1  ;;  %v6152_v20 = vld [vmem:[%s7881_s0 + $0x1f0] ss:$100 sps:$4 sm:$0xff]  }
 0x18f   :  { %v5196_v7 = vadd.f32 %v5195_v48, %v5194_v40  ;;  %v5133_v50 = vpop.f32.mrf.mxu0  ;;  %v6153_v40 = vld [vmem:[%s7881_s0 + $0x510] ss:$100 sps:$4 sm:$0xff]  }
 0x190   :  { %v3307_v30 = vadd.f32 %v5132_v43, %v7329_v47  ;;  %v5197_v51 = vpop.f32.mrf.mxu1 }
 0x191   :  { %v5134_v55 = vpop.f32.mrf.mxu0 }
 0x192   :  { %v7496_v58 = vadd.f32 %v5196_v7, %v3307_v30  ;;  %v5135_v24 = vadd.f32 %v5134_v55, %v5133_v50  ;;  %v5198_v62 = vpop.f32.mrf.mxu1 }
 0x193   :  { %v5199_v63 = vadd.f32 %v5198_v62, %v5197_v51  ;;  %v5136_v47 = vpop.f32.mrf.mxu0  ;;  %3895 = vmatmul.mubr.bf16.gmra.mxu0 %v6134_v3 }
 0x194   :  { %v3310_v0 = vadd.f32 %v5135_v24, %v7332_v56  ;;  %v5200_v21 = vpop.f32.mrf.mxu1  ;;  %3992 = vmatmul.mubr.bf16.gmra.mxu1 %v6137_v32  ;;  %3902 = vmatprep.mubr.bf16.mxu0 %v6143_v54  ;;  %v6144_v56 = vld [vmem:[%s7881_s0 + $0x5d0] ss:$100 sps:$4 sm:$0xff]   ;;  %v6154_v24 = vld [vmem:[%s7881_s0 + $0x2b8] ss:$100 sps:$4 sm:$0xff]  }
 0x195   :  { %v5137_v45 = vpop.f32.mrf.mxu0  ;;  %3999 = vmatprep.mubr.bf16.mxu1 %v6146_v49 }
 0x196   :  { %v7499_v12 = vadd.f32 %v5199_v63, %v3310_v0  ;;  %v5138_v2 = vadd.f32 %v5137_v45, %v5136_v47  ;;  %v5201_v5 = vpop.f32.mrf.mxu1 }
 0x197   :  { %v5202_v9 = vadd.f32 %v5201_v5, %v5200_v21  ;;  %v5139_v10 = vpop.f32.mrf.mxu0 }
 0x198   :  { %v3315_v39 = vadd.f32 %v5138_v2, %v7347_v8  ;;  %v5203_v29 = vpop.f32.mrf.mxu1 }
 0x199   :  { %v5140_v15 = vpop.f32.mrf.mxu0 }
 0x19a   :  { %v7514_v17 = vadd.f32 %v5202_v9, %v3315_v39  ;;  %v5141_v19 = vadd.f32 %v5140_v15, %v5139_v10  ;;  %v5204_v23 = vpop.f32.mrf.mxu1 }
 0x19b   :  { %v5205_v25 = vadd.f32 %v5204_v23, %v5203_v29  ;;  %v5142_v8 = vpop.f32.mrf.mxu0  ;;  %3903 = vmatmul.mubr.bf16.gmra.mxu0 %v6141_v26 }
 0x19c   :  { %v3318_v59 = vadd.f32 %v5141_v19, %v7350_v16  ;;  %v5206_v27 = vpop.f32.mrf.mxu1  ;;  %4000 = vmatmul.mubr.bf16.gmra.mxu1 %v6144_v56  ;;  %5628 = vmatprep.mubr.bf16.mxu0 %v6148_v14  ;;  %v6151_v16 = vld [vmem:[%s7881_s0 + $0x448] ss:$100 sps:$4 sm:$0xff]  }
 0x19d   :  { %v5143_v37 = vpop.f32.mrf.mxu0  ;;  %5636 = vmatprep.mubr.bf16.mxu1 %v6149_v31 }
 0x19e   :  { %v7517_v1 = vadd.f32 %v5205_v25, %v3318_v59  ;;  %v5144_v46 = vadd.f32 %v5143_v37, %v5142_v8  ;;  %v5207_v44 = vpop.f32.mrf.mxu1 }
 0x19f   :  { %v5208_v28 = vadd.f32 %v5207_v44, %v5206_v27  ;;  %v5145_v34 = vpop.f32.mrf.mxu0 }
 0x1a0   :  { %v3323_v36 = vadd.f32 %v5144_v46, %v7365_v33  ;;  %v5209_v38 = vpop.f32.mrf.mxu1 }
 0x1a1   :  { %v5146_v11 = vpop.f32.mrf.mxu0 }
 0x1a2   :  { %v7532_v53 = vadd.f32 %v5208_v28, %v3323_v36  ;;  %v5147_v43 = vadd.f32 %v5146_v11, %v5145_v34  ;;  %v5210_v48 = vpop.f32.mrf.mxu1 }
 0x1a3   :  { %v5211_v7 = vadd.f32 %v5210_v48, %v5209_v38  ;;  %v5228_v33 = vpop.f32.mrf.mxu0  ;;  %5629 = vmatmul.mubr.bf16.vlgmr.msra.gmra.mxu0 %v6150_v35 }
 0x1a4   :  { %v3326_v50 = vadd.f32 %v5147_v43, %v7375_v13  ;;  %v5292_v3 = vpop.f32.mrf.mxu1  ;;  %5637 = vmatmul.mubr.bf16.vlgmr.msra.gmra.mxu1 %v6151_v16  ;;  %5632 = vmatprep.mubr.bf16.mxu0 %v6152_v20  ;;  %v6155_v13 = vld [vmem:[%s7881_s0 + $0x5d8] ss:$100 sps:$4 sm:$0xff]  }
 0x1a5   :  { %v5229_v30 = vpop.f32.mrf.mxu0  ;;  %5640 = vmatprep.mubr.bf16.mxu1 %v6153_v40 }
 0x1a6   :  { %v7535_v51 = vadd.f32 %v5211_v7, %v3326_v50  ;;  %v5230_v32 = vadd.f32 %v5229_v30, %v5228_v33  ;;  %v5293_v54 = vpop.f32.mrf.mxu1 }
 0x1a7   :  { %v5294_v55 = vadd.f32 %v5293_v54, %v5292_v3  ;;  %v5231_v49 = vpop.f32.mrf.mxu0 }
 0x1a8   :  { %v3461_v62 = vadd.f32 %v5230_v32, %v7391_v60  ;;  %v5295_v63 = vpop.f32.mrf.mxu1 }
 0x1a9   :  { %v5232_v47 = vpop.f32.mrf.mxu0 }
 0x1aa   :  { %v7544_v0 = vadd.f32 %v5294_v55, %v3461_v62  ;;  %v5233_v21 = vadd.f32 %v5232_v47, %v5231_v49  ;;  %v5296_v45 = vpop.f32.mrf.mxu1 }
 0x1ab   :  { %v5297_v2 = vadd.f32 %v5296_v45, %v5295_v63  ;;  %v5234_v5 = vpop.f32.mrf.mxu0  ;;  %5633 = vmatmul.mubr.bf16.gmra.mxu0 %v6154_v24 }
 0x1ac   :  { %v3464_v9 = vadd.f32 %v5233_v21, %v7397_v4  ;;  %v5298_v10 = vpop.f32.mrf.mxu1  ;;  %5641 = vmatmul.mubr.bf16.gmra.mxu1 %v6155_v13 }
 0x1ad   :  { %v5235_v26 = vpop.f32.mrf.mxu0 }
 0x1ae   :  { %v7547_v39 = vadd.f32 %v5297_v2, %v3464_v9  ;;  %v5236_v60 = vadd.f32 %v5235_v26, %v5234_v5  ;;  %v5299_v29 = vpop.f32.mrf.mxu1 }
 0x1af   :  { %v5300_v56 = vadd.f32 %v5299_v29, %v5298_v10  ;;  %v5237_v14 = vpop.f32.mrf.mxu0 }
 0x1b0   :  { %v3469_v15 = vadd.f32 %v5236_v60, %v7415_v22  ;;  %v5301_v31 = vpop.f32.mrf.mxu1 }
 0x1b1   :  { %v5238_v19 = vpop.f32.mrf.mxu0 }
 0x1b2   :  { %v7550_v23 = vadd.f32 %v5300_v56, %v3469_v15  ;;  %v5239_v25 = vadd.f32 %v5238_v19, %v5237_v14  ;;  %v5302_v8 = vpop.f32.mrf.mxu1 }
 0x1b3   :  { %v5303_v59 = vadd.f32 %v5302_v8, %v5301_v31  ;;  %v5240_v27 = vpop.f32.mrf.mxu0 }
 0x1b4   :  { %v3472_v4 = vadd.f32 %v5239_v25, %v7421_v57  ;;  %v5304_v37 = vpop.f32.mrf.mxu1 }
 0x1b5   :  { %v5241_v46 = vpop.f32.mrf.mxu0 }
 0x1b6   :  { %v7553_v44 = vadd.f32 %v5303_v59, %v3472_v4  ;;  %v5242_v28 = vadd.f32 %v5241_v46, %v5240_v27  ;;  %v5305_v34 = vpop.f32.mrf.mxu1 }
 0x1b7   :  { %v5306_v35 = vadd.f32 %v5305_v34, %v5304_v37  ;;  %v5243_v36 = vpop.f32.mrf.mxu0 }
 0x1b8   :  { %v3477_v22 = vadd.f32 %v5242_v28, %v7439_v6  ;;  %v5307_v38 = vpop.f32.mrf.mxu1 }
 0x1b9   :  { %v5244_v16 = vpop.f32.mrf.mxu0 }
 0x1ba   :  { %v7556_v20 = vadd.f32 %v5306_v35, %v3477_v22  ;;  %v5245_v11 = vadd.f32 %v5244_v16, %v5243_v36  ;;  %v5308_v40 = vpop.f32.mrf.mxu1 }
 0x1bb   :  { %v5309_v43 = vadd.f32 %v5308_v40, %v5307_v38  ;;  %v5246_v48 = vpop.f32.mrf.mxu0 }
 0x1bc   :  { %v3480_v57 = vadd.f32 %v5245_v11, %v7445_v61  ;;  %v5310_v7 = vpop.f32.mrf.mxu1 }
 0x1bd   :  { %v5247_v33 = vpop.f32.mrf.mxu0 }
 0x1be   :  { %v7559_v50 = vadd.f32 %v5309_v43, %v3480_v57  ;;  %v5248_v3 = vadd.f32 %v5247_v33, %v5246_v48  ;;  %v5311_v30 = vpop.f32.mrf.mxu1 }
 0x1bf   :  { %v5312_v32 = vadd.f32 %v5311_v30, %v5310_v7  ;;  %v5249_v54 = vpop.f32.mrf.mxu0 }
 0x1c0   :  { %v3485_v6 = vadd.f32 %v5248_v3, %v7460_v42  ;;  %v5313_v55 = vpop.f32.mrf.mxu1 }
 0x1c1   :  { %v5250_v49 = vpop.f32.mrf.mxu0 }
 0x1c2   :  { %v7562_v24 = vadd.f32 %v5312_v32, %v3485_v6  ;;  %v5251_v62 = vadd.f32 %v5250_v49, %v5249_v54  ;;  %v5314_v63 = vpop.f32.mrf.mxu1 }
 0x1c3   :  { %v5315_v13 = vadd.f32 %v5314_v63, %v5313_v55  ;;  %v5252_v47 = vpop.f32.mrf.mxu0 }
 0x1c4   :  { %v3488_v61 = vadd.f32 %v5251_v62, %v7463_v18  ;;  %v5316_v21 = vpop.f32.mrf.mxu1 }
 0x1c5   :  { %v5253_v45 = vpop.f32.mrf.mxu0 }
 0x1c6   :  { %v7565_v2 = vadd.f32 %v5315_v13, %v3488_v61  ;;  %v5254_v5 = vadd.f32 %v5253_v45, %v5252_v47  ;;  %v5317_v9 = vpop.f32.mrf.mxu1 }
 0x1c7   :  { %v5318_v10 = vadd.f32 %v5317_v9, %v5316_v21  ;;  %v5255_v26 = vpop.f32.mrf.mxu0 }
 0x1c8   :  { %v3493_v42 = vadd.f32 %v5254_v5, %v7478_v52  ;;  %v5319_v60 = vpop.f32.mrf.mxu1 }
 0x1c9   :  { %v5256_v29 = vpop.f32.mrf.mxu0 }
 0x1ca   :  { %v7568_v56 = vadd.f32 %v5318_v10, %v3493_v42  ;;  %v5257_v14 = vadd.f32 %v5256_v29, %v5255_v26  ;;  %v5320_v15 = vpop.f32.mrf.mxu1 }
 0x1cb   :  { %v5321_v31 = vadd.f32 %v5320_v15, %v5319_v60  ;;  %v5258_v19 = vpop.f32.mrf.mxu0 }
 0x1cc   :  { %v3496_v18 = vadd.f32 %v5257_v14, %v7481_v41  ;;  %v5322_v25 = vpop.f32.mrf.mxu1 }
 0x1cd   :  { %v5259_v8 = vpop.f32.mrf.mxu0 }
 0x1ce   :  { %v7571_v59 = vadd.f32 %v5321_v31, %v3496_v18  ;;  %v5260_v27 = vadd.f32 %v5259_v8, %v5258_v19  ;;  %v5323_v4 = vpop.f32.mrf.mxu1 }
 0x1cf   :  { %v5324_v37 = vadd.f32 %v5323_v4, %v5322_v25  ;;  %v5261_v46 = vpop.f32.mrf.mxu0 }
 0x1d0   :  { %v3501_v52 = vadd.f32 %v5260_v27, %v7496_v58  ;;  %v5325_v28 = vpop.f32.mrf.mxu1 }
 0x1d1   :  { %v5262_v34 = vpop.f32.mrf.mxu0 }
 0x1d2   :  { %v7574_v35 = vadd.f32 %v5324_v37, %v3501_v52  ;;  %v5263_v36 = vadd.f32 %v5262_v34, %v5261_v46  ;;  %v5326_v22 = vpop.f32.mrf.mxu1 }
 0x1d3   :  { %v5327_v38 = vadd.f32 %v5326_v22, %v5325_v28  ;;  %v5264_v16 = vpop.f32.mrf.mxu0 }
 0x1d4   :  { %v3504_v41 = vadd.f32 %v5263_v36, %v7499_v12  ;;  %v5328_v11 = vpop.f32.mrf.mxu1 }
 0x1d5   :  { %v5265_v40 = vpop.f32.mrf.mxu0 }
 0x1d6   :  { %v7577_v43 = vadd.f32 %v5327_v38, %v3504_v41  ;;  %v5266_v48 = vadd.f32 %v5265_v40, %v5264_v16  ;;  %v5329_v57 = vpop.f32.mrf.mxu1 }
 0x1d7   :  { %v5330_v7 = vadd.f32 %v5329_v57, %v5328_v11  ;;  %v5267_v33 = vpop.f32.mrf.mxu0 }
 0x1d8   :  { %v3509_v58 = vadd.f32 %v5266_v48, %v7514_v17  ;;  %v5331_v3 = vpop.f32.mrf.mxu1 }
 0x1d9   :  { %v5268_v30 = vpop.f32.mrf.mxu0 }
 0x1da   :  { %v7580_v32 = vadd.f32 %v5330_v7, %v3509_v58  ;;  %v5269_v54 = vadd.f32 %v5268_v30, %v5267_v33  ;;  %v5332_v6 = vpop.f32.mrf.mxu1 }
 0x1db   :  { %v5333_v55 = vadd.f32 %v5332_v6, %v5331_v3  ;;  %v5270_v49 = vpop.f32.mrf.mxu0 }
 0x1dc   :  { %v3512_v12 = vadd.f32 %v5269_v54, %v7517_v1  ;;  %v5334_v62 = vpop.f32.mrf.mxu1 }
 0x1dd   :  { %v5271_v63 = vpop.f32.mrf.mxu0 }
 0x1de   :  { %v7583_v13 = vadd.f32 %v5333_v55, %v3512_v12  ;;  %v5272_v47 = vadd.f32 %v5271_v63, %v5270_v49  ;;  %v5335_v61 = vpop.f32.mrf.mxu1 }
 0x1df   :  { %v5336_v21 = vadd.f32 %v5335_v61, %v5334_v62  ;;  %v5273_v45 = vpop.f32.mrf.mxu0 }
 0x1e0   :  { %v3517_v17 = vadd.f32 %v5272_v47, %v7532_v53  ;;  %v5337_v5 = vpop.f32.mrf.mxu1 }
 0x1e1   :  { %v5274_v9 = vpop.f32.mrf.mxu0 }
 0x1e2   :  { %v7586_v10 = vadd.f32 %v5336_v21, %v3517_v17  ;;  %v5275_v26 = vadd.f32 %v5274_v9, %v5273_v45  ;;  %v5338_v42 = vpop.f32.mrf.mxu1 }
 0x1e3   :  { %v5339_v60 = vadd.f32 %v5338_v42, %v5337_v5  ;;  %v5356_v29 = vpop.f32.mrf.mxu0 }
 0x1e4   :  { %v3520_v1 = vadd.f32 %v5275_v26, %v7535_v51  ;;  %v5420_v14 = vpop.f32.mrf.mxu1 }
 0x1e5   :  { %v5357_v15 = vpop.f32.mrf.mxu0 }
 0x1e6   :  { %v7589_v31 = vadd.f32 %v5339_v60, %v3520_v1  ;;  %v5358_v19 = vadd.f32 %v5357_v15, %v5356_v29  ;;  %v5421_v18 = vpop.f32.mrf.mxu1 }
 0x1e7   :  { %v5422_v25 = vadd.f32 %v5421_v18, %v5420_v14  ;;  %v5359_v8 = vpop.f32.mrf.mxu0 }
 0x1e8   :  { %v3655_v53 = vadd.f32 %v5358_v19, %v7544_v0  ;;  %v5423_v27 = vpop.f32.mrf.mxu1 }
 0x1e9   :  { %v5360_v4 = vpop.f32.mrf.mxu0 }
 0x1ea   :  { %v7592_v37 = vadd.f32 %v5422_v25, %v3655_v53  ;;  %v5361_v46 = vadd.f32 %v5360_v4, %v5359_v8  ;;  %v5424_v52 = vpop.f32.mrf.mxu1 }
 0x1eb   :  { %v5425_v28 = vadd.f32 %v5424_v52, %v5423_v27  ;;  %v5362_v34 = vpop.f32.mrf.mxu0 }
 0x1ec   :  { %v3658_v51 = vadd.f32 %v5361_v46, %v7547_v39  ;;  %v5426_v36 = vpop.f32.mrf.mxu1 }
 0x1ed   :  { %v5363_v22 = vpop.f32.mrf.mxu0 }
 0x1ee   :  { %v7595_v38 = vadd.f32 %v5425_v28, %v3658_v51  ;;  %v5364_v16 = vadd.f32 %v5363_v22, %v5362_v34  ;;  %v5427_v41 = vpop.f32.mrf.mxu1 }
 0x1ef   :  { %v5428_v11 = vadd.f32 %v5427_v41, %v5426_v36  ;;  %v5365_v40 = vpop.f32.mrf.mxu0 }
 0x1f0   :  { %v3663_v0 = vadd.f32 %v5364_v16, %v7550_v23  ;;  %v5429_v48 = vpop.f32.mrf.mxu1 }
 0x1f1   :  { %v5366_v57 = vpop.f32.mrf.mxu0 }
 0x1f2   :  { %v7598_v7 = vadd.f32 %v5428_v11, %v3663_v0  ;;  %v5367_v33 = vadd.f32 %v5366_v57, %v5365_v40  ;;  %v5430_v58 = vpop.f32.mrf.mxu1 }
 0x1f3   :  { %v5431_v3 = vadd.f32 %v5430_v58, %v5429_v48  ;;  %v5368_v30 = vpop.f32.mrf.mxu0 }
 0x1f4   :  { %v3666_v39 = vadd.f32 %v5367_v33, %v7553_v44  ;;  %v5432_v54 = vpop.f32.mrf.mxu1 }
 0x1f5   :  { %v5369_v6 = vpop.f32.mrf.mxu0 }
 0x1f6   :  { %v7601_v55 = vadd.f32 %v5431_v3, %v3666_v39  ;;  %v5370_v49 = vadd.f32 %v5369_v6, %v5368_v30  ;;  %v5433_v12 = vpop.f32.mrf.mxu1 }
 0x1f7   :  { %v5434_v62 = vadd.f32 %v5433_v12, %v5432_v54  ;;  %v5371_v63 = vpop.f32.mrf.mxu0 }
 0x1f8   :  { %v3671_v23 = vadd.f32 %v5370_v49, %v7556_v20  ;;  %v5435_v47 = vpop.f32.mrf.mxu1 }
 0x1f9   :  { %v5372_v61 = vpop.f32.mrf.mxu0 }
 0x1fa   :  { %v7604_v21 = vadd.f32 %v5434_v62, %v3671_v23  ;;  %v5373_v45 = vadd.f32 %v5372_v61, %v5371_v63  ;;  %v5436_v17 = vpop.f32.mrf.mxu1 }
 0x1fb   :  { %v5437_v5 = vadd.f32 %v5436_v17, %v5435_v47  ;;  %v5374_v9 = vpop.f32.mrf.mxu0 }
 0x1fc   :  { %v3674_v44 = vadd.f32 %v5373_v45, %v7559_v50  ;;  %v5438_v26 = vpop.f32.mrf.mxu1 }
 0x1fd   :  { %v5375_v42 = vpop.f32.mrf.mxu0 }
 0x1fe   :  { %v7607_v60 = vadd.f32 %v5437_v5, %v3674_v44  ;;  %v5376_v29 = vadd.f32 %v5375_v42, %v5374_v9  ;;  %v5439_v1 = vpop.f32.mrf.mxu1 }
 0x1ff   :  { %v5440_v14 = vadd.f32 %v5439_v1, %v5438_v26  ;;  %v5377_v15 = vpop.f32.mrf.mxu0 }
 0x200   :  { %v3679_v20 = vadd.f32 %v5376_v29, %v7562_v24  ;;  %v5441_v19 = vpop.f32.mrf.mxu1 }
 0x201   :  { %v5378_v18 = vpop.f32.mrf.mxu0 }
 0x202   :  { %v7610_v25 = vadd.f32 %v5440_v14, %v3679_v20  ;;  %v5379_v8 = vadd.f32 %v5378_v18, %v5377_v15  ;;  %v5442_v53 = vpop.f32.mrf.mxu1 }
 0x203   :  { %v5443_v27 = vadd.f32 %v5442_v53, %v5441_v19  ;;  %v5380_v4 = vpop.f32.mrf.mxu0 }
 0x204   :  { %v3682_v50 = vadd.f32 %v5379_v8, %v7565_v2  ;;  %v5444_v46 = vpop.f32.mrf.mxu1 }
 0x205   :  { %v5381_v52 = vpop.f32.mrf.mxu0 }
 0x206   :  { %v7613_v28 = vadd.f32 %v5443_v27, %v3682_v50  ;;  %v5382_v34 = vadd.f32 %v5381_v52, %v5380_v4  ;;  %v5445_v51 = vpop.f32.mrf.mxu1 }
 0x207   :  { %v5446_v36 = vadd.f32 %v5445_v51, %v5444_v46  ;;  %v5383_v22 = vpop.f32.mrf.mxu0 }
 0x208   :  { %v3687_v24 = vadd.f32 %v5382_v34, %v7568_v56  ;;  %v5447_v16 = vpop.f32.mrf.mxu1 }
 0x209   :  { %v5384_v41 = vpop.f32.mrf.mxu0 }
 0x20a   :  { %v7616_v11 = vadd.f32 %v5446_v36, %v3687_v24  ;;  %v5385_v40 = vadd.f32 %v5384_v41, %v5383_v22  ;;  %v5448_v0 = vpop.f32.mrf.mxu1 }
 0x20b   :  { %v5449_v48 = vadd.f32 %v5448_v0, %v5447_v16  ;;  %v5386_v57 = vpop.f32.mrf.mxu0 }
 0x20c   :  { %v3690_v2 = vadd.f32 %v5385_v40, %v7571_v59  ;;  %v5450_v33 = vpop.f32.mrf.mxu1 }
 0x20d   :  { %v5387_v58 = vpop.f32.mrf.mxu0 }
 0x20e   :  { %v7619_v3 = vadd.f32 %v5449_v48, %v3690_v2  ;;  %v5388_v30 = vadd.f32 %v5387_v58, %v5386_v57  ;;  %v5451_v39 = vpop.f32.mrf.mxu1 }
 0x20f   :  { %v5452_v54 = vadd.f32 %v5451_v39, %v5450_v33  ;;  %v5389_v6 = vpop.f32.mrf.mxu0 }
 0x210   :  { %v3695_v56 = vadd.f32 %v5388_v30, %v7574_v35  ;;  %v5453_v49 = vpop.f32.mrf.mxu1 }
 0x211   :  { %v5390_v12 = vpop.f32.mrf.mxu0 }
 0x212   :  { %v7622_v62 = vadd.f32 %v5452_v54, %v3695_v56  ;;  %v5391_v63 = vadd.f32 %v5390_v12, %v5389_v6  ;;  %v5454_v23 = vpop.f32.mrf.mxu1 }
 0x213   :  { %v5455_v47 = vadd.f32 %v5454_v23, %v5453_v49  ;;  %v5392_v61 = vpop.f32.mrf.mxu0 }
 0x214   :  { %7886 = vst [vmem:[#allocation2_spill] sm:$0xff] %v7622_v62  ;;  %v3698_v59 = vadd.f32 %v5391_v63, %v7577_v43  ;;  %v5456_v45 = vpop.f32.mrf.mxu1 }
 0x215   :  { %v5393_v17 = vpop.f32.mrf.mxu0 }
 0x216   :  { %v7625_v5 = vadd.f32 %v5455_v47, %v3698_v59  ;;  %v5394_v9 = vadd.f32 %v5393_v17, %v5392_v61  ;;  %v5457_v44 = vpop.f32.mrf.mxu1 }
 0x217   :  { %v5458_v26 = vadd.f32 %v5457_v44, %v5456_v45  ;;  %v5395_v42 = vpop.f32.mrf.mxu0 }
 0x218   :  { %7887 = vst [vmem:[#allocation3_spill] sm:$0xff] %v7625_v5  ;;  %v3703_v35 = vadd.f32 %v5394_v9, %v7580_v32  ;;  %v5459_v29 = vpop.f32.mrf.mxu1 }
 0x219   :  { %v5396_v1 = vpop.f32.mrf.mxu0 }
 0x21a   :  { %v7628_v14 = vadd.f32 %v5458_v26, %v3703_v35  ;;  %v5397_v15 = vadd.f32 %v5396_v1, %v5395_v42  ;;  %v5460_v20 = vpop.f32.mrf.mxu1 }
 0x21b   :  { %v5461_v19 = vadd.f32 %v5460_v20, %v5459_v29  ;;  %v5398_v18 = vpop.f32.mrf.mxu0 }
 0x21c   :  { %7888 = vst [vmem:[#allocation4_spill] sm:$0xff] %v7628_v14  ;;  %v3706_v43 = vadd.f32 %v5397_v15, %v7583_v13  ;;  %v5462_v8 = vpop.f32.mrf.mxu1 }
 0x21d   :  { %v5399_v53 = vpop.f32.mrf.mxu0 }
 0x21e   :  { %v7631_v27 = vadd.f32 %v5461_v19, %v3706_v43  ;;  %v5400_v4 = vadd.f32 %v5399_v53, %v5398_v18  ;;  %v5463_v50 = vpop.f32.mrf.mxu1 }
 0x21f   :  { %v5464_v46 = vadd.f32 %v5463_v50, %v5462_v8  ;;  %v5401_v52 = vpop.f32.mrf.mxu0 }
 0x220   :  { %7889 = vst [vmem:[#allocation5_spill] sm:$0xff] %v7631_v27  ;;  %v3711_v32 = vadd.f32 %v5400_v4, %v7586_v10  ;;  %v5465_v34 = vpop.f32.mrf.mxu1 }
 0x221   :  { %v5402_v51 = vpop.f32.mrf.mxu0 }
 0x222   :  { %v7634_v36 = vadd.f32 %v5464_v46, %v3711_v32  ;;  %v5403_v22 = vadd.f32 %v5402_v51, %v5401_v52  ;;  %v5466_v24 = vpop.f32.mrf.mxu1 }
 0x223   :  { %v5467_v16 = vadd.f32 %v5466_v24, %v5465_v34  ;;  %v5484_v41 = vpop.f32.mrf.mxu0 }
 0x224   :  { %7890 = vst [vmem:[#allocation6_spill] sm:$0xff] %v7634_v36  ;;  %v3714_v13 = vadd.f32 %v5403_v22, %v7589_v31  ;;  %v7637_v40 = vpop.f32.mrf.mxu1 }
 0x225   :  { %v5485_v0 = vpop.f32.mrf.mxu0 }
 0x226   :  { %v7639_v48 = vadd.f32 %v5467_v16, %v3714_v13  ;;  %v5486_v57 = vadd.f32 %v5485_v0, %v5484_v41  ;;  %v5549_v2 = vpop.f32.mrf.mxu1 }
 0x227   :  { %v5487_v33 = vpop.f32.mrf.mxu0 }
 0x228   :  { %7891 = vst [vmem:[#allocation7_spill] sm:$0xff] %v7639_v48  ;;  %v7642_v10 = vadd.f32 %v5486_v57, %v7592_v37  ;;  %v7644_v58 = vpop.f32.mrf.mxu1 }
 0x229   :  { %v5488_v30 = vpop.f32.mrf.mxu0 }
 0x22a   :  { %v7646_v39 = vpop.f32.mrf.mxu1 }
 0x22b   :  { %v5490_v54 = vpop.f32.mrf.mxu0 }
 0x22c   :  { %v7648_v6 = vpop.f32.mrf.mxu1 }
 0x22d   :  { %v5491_v31 = vpop.f32.mrf.mxu0 }
 0x22e   :  { %v5555_v56 = vpop.f32.mrf.mxu1 }
 0x22f   :  { %v5493_v49 = vpop.f32.mrf.mxu0 }
 0x230   :  { %v7650_v12 = vpop.f32.mrf.mxu1 }
 0x231   :  { %v5494_v63 = vpop.f32.mrf.mxu0 }
 0x232   :  { %v7652_v23 = vpop.f32.mrf.mxu1 }
 0x233   :  { %v5496_v47 = vpop.f32.mrf.mxu0 }
 0x234   :  { %v7654_v61 = vpop.f32.mrf.mxu1 }
 0x235   :  { %v5497_v37 = vpop.f32.mrf.mxu0 }
 0x236   :  { %v5561_v59 = vpop.f32.mrf.mxu1 }
 0x237   :  { %v5499_v45 = vpop.f32.mrf.mxu0 }
 0x238   :  { %v7656_v17 = vpop.f32.mrf.mxu1 }
 0x239   :  { %v5500_v9 = vpop.f32.mrf.mxu0 }
 0x23a   :  { %v7658_v44 = vpop.f32.mrf.mxu1 }
 0x23b   :  { %v5502_v26 = vpop.f32.mrf.mxu0 }
 0x23c   :  { %v7660_v42 = vpop.f32.mrf.mxu1 }
 0x23d   :  { %v5503_v35 = vpop.f32.mrf.mxu0 }
 0x23e   :  { %v7662_v29 = vpop.f32.mrf.mxu1 }
 0x23f   :  { %v5505_v1 = vpop.f32.mrf.mxu0 }
 0x240   :  { %v7664_v15 = vpop.f32.mrf.mxu1 }
 0x241   :  { %v5506_v20 = vpop.f32.mrf.mxu0 }
 0x242   :  { %v7666_v19 = vpop.f32.mrf.mxu1 }
 0x243   :  { %v7668_v18 = vpop.f32.mrf.mxu0 }
 0x244   :  { %v7670_v43 = vpop.f32.mrf.mxu1 }
 0x245   :  { %v7672_v8 = vpop.f32.mrf.mxu0 }
 0x246   :  { %v7674_v53 = vpop.f32.mrf.mxu1 }
 0x247   :  { %v7676_v4 = vpop.f32.mrf.mxu0 }
 0x248   :  { %v7678_v50 = vpop.f32.mrf.mxu1 }
 0x249   :  { %v7680_v46 = vpop.f32.mrf.mxu0 }
 0x24a   :  { %v7682_v52 = vpop.f32.mrf.mxu1 }
 0x24b   :  { %v7684_v32 = vpop.f32.mrf.mxu0 }
 0x24c   :  { %v7686_v34 = vpop.f32.mrf.mxu1 }
 0x24d   :  { %7892 = vst [vmem:[#allocation8_spill] sm:$0xff] %v7686_v34  ;;  %v7688_v51 = vpop.f32.mrf.mxu0 }
 0x24e   :  { %v7690_v22 = vpop.f32.mrf.mxu1 }
 0x24f   :  { %7893 = vst [vmem:[#allocation9_spill] sm:$0xff] %v7690_v22  ;;  %v7692_v24 = vpop.f32.mrf.mxu0 }
 0x250   :  { %v7694_v16 = vpop.f32.mrf.mxu1 }
 0x251   :  { %7894 = vst [vmem:[#allocation10_spill] sm:$0xff] %v7694_v16  ;;  %v7696_v41 = vpop.f32.mrf.mxu0 }
 0x252   :  { %7895 = vst [vmem:[#allocation11_spill] sm:$0xff] %v7696_v41  ;;  %v7698_v13 = vpop.f32.mrf.mxu1 }
 0x253   :  { %7896 = vst [vmem:[#allocation12_spill] sm:$0xff] %v7698_v13  ;;  %v7700_v0 = vpop.f32.mrf.mxu0 }
 0x254   :  { %7897 = vst [vmem:[#allocation13_spill] sm:$0xff] %v7700_v0  ;;  %v7702_v57 = vpop.f32.mrf.mxu1 }
 0x255   :  { %7898 = vst [vmem:[#allocation14_spill] sm:$0xff] %v7702_v57  ;;  %v7704_v48 = vpop.f32.mrf.mxu0 }
 0x256   :  { %7899 = vst [vmem:[#allocation15_spill] sm:$0xff] %v7704_v48  ;;  %v7706_v36 = vpop.f32.mrf.mxu1  ;;  %v5489_v48 = vadd.f32 %v5488_v30, %v5487_v33  ;;  %v5556_v33 = vadd.f32 %v5555_v56, %v7648_v6 }
 0x257   :  { %7900 = vst [vmem:[#allocation16_spill] sm:$0xff] %v7706_v36  ;;  %v7708_v27 = vpop.f32.mrf.mxu0  ;;  %v5492_v36 = vadd.f32 %v5491_v31, %v5490_v54  ;;  %v5559_v31 = vadd.f32 %v7652_v23, %v7650_v12 }
 0x258   :  { %7901 = vst [vmem:[#allocation17_spill] sm:$0xff] %v7708_v27  ;;  %v7710_v14 = vpop.f32.mrf.mxu1 }
 0x259   :  { %7902 = vst [vmem:[#allocation18_spill] sm:$0xff] %v7710_v14  ;;  %v7712_v5 = vpop.f32.mrf.mxu0  ;;  %v5550_v14 = vadd.f32 %v5549_v2, %v7637_v40 }
 0x25a   :  { %7903 = vst [vmem:[#allocation19_spill] sm:$0xff] %v7712_v5  ;;  %v7714_v22 = vpop.f32.mrf.mxu1  ;;  %v5495_v5 = vadd.f32 %v5494_v63, %v5493_v49  ;;  %v5507_v63 = vadd.f32 %v5506_v20, %v5505_v1 }
 0x25b   :  { %7904 = vst [vmem:[#allocation20_spill] sm:$0xff] %v7714_v22  ;;  %v7716_v16 = vpop.f32.mrf.mxu0  ;;  %v5498_v22 = vadd.f32 %v5497_v37, %v5496_v47  ;;  %v3946_v40 = vadd.f32 %v5550_v14, %v7642_v10  ;;  %v5565_v47 = vadd.f32 %v7658_v44, %v7656_v17  ;;  %v5568_v37 = vadd.f32 %v7662_v29, %v7660_v42 }
 0x25c   :  { %7905 = vst [vmem:[#allocation21_spill] sm:$0xff] %v7716_v16  ;;  %v7718_v34 = vpop.f32.mrf.mxu1  ;;  %v3860_v54 = vadd.f32 %v5495_v5, %v7601_v55  ;;  %v5571_v17 = vadd.f32 %v7666_v19, %v7664_v15 }
 0x25d   :  { %7906 = vst [vmem:[#allocation22_spill] sm:$0xff] %v7718_v34  ;;  %v7720_v13 = vpop.f32.mrf.mxu0  ;;  %v3852_v34 = vadd.f32 %v5489_v48, %v7595_v38  ;;  %v3865_v49 = vadd.f32 %v5498_v22, %v7604_v21  ;;  %v5562_v38 = vadd.f32 %v5561_v59, %v7654_v61 }
 0x25e   :  { %v7722_v0 = vpop.f32.mrf.mxu1  ;;  %v3957_v5 = vadd.f32 %v5559_v31, %v3860_v54  ;;  %v7911_v54 = vld [vmem:[#allocation8_spill] sm:$0xff]  ;;  %v7912_v31 = vld [vmem:[#allocation9_spill] sm:$0xff] }
 0x25f   :  { %7907 = vst [vmem:[#allocation23_spill] sm:$0xff] %v7722_v0  ;;  %v7724_v57 = vpop.f32.mrf.mxu0  ;;  %v5553_v0 = vadd.f32 %v7646_v39, %v7644_v58  ;;  %v5501_v58 = vadd.f32 %v5500_v9, %v5499_v45  ;;  %v5504_v39 = vadd.f32 %v5503_v35, %v5502_v26  ;;  %v3962_v21 = vadd.f32 %v5562_v38, %v3865_v49  ;;  %v7914_v49 = vld [vmem:[#allocation15_spill] sm:$0xff] }
 0x260   :  { %7908 = vst [vmem:[#allocation24_spill] sm:$0xff] %v7724_v57  ;;  %v7726_v62 = vpop.f32.mrf.mxu1  ;;  %v3857_v57 = vadd.f32 %v5492_v36, %v7598_v7  ;;  %v5510_v45 = vadd.f32 %v7672_v8, %v7668_v18 }
 0x261   :  { %v7729_v27 = vpop.f32.mrf.mxu0  ;;  %v3949_v56 = vadd.f32 %v5553_v0, %v3852_v34  ;;  %v3868_v23 = vadd.f32 %v5501_v58, %v7607_v60  ;;  %v3873_v61 = vadd.f32 %v5504_v39, %v7610_v25  ;;  %v3876_v60 = vadd.f32 %v5507_v63, %v7613_v28  ;;  %v7916_v63 = vld [vmem:[#allocation10_spill] sm:$0xff] }
 0x262   :  { %v7731_v41 = vpop.f32.mrf.mxu1  ;;  %v3954_v36 = vadd.f32 %v5556_v33, %v3857_v57  ;;  %v5513_v25 = vadd.f32 %v7680_v46, %v7676_v4  ;;  %v5516_v28 = vadd.f32 %v7688_v51, %v7684_v32  ;;  %v3881_v19 = vadd.f32 %v5510_v45, %v7616_v11  ;;  %v7909_v32 = vld [vmem:[#allocation11_spill] sm:$0xff] }
 0x263   :  { %v5630_v16 = vpop.f32.mrf.mxu0  ;;  %v3970_v18 = vadd.f32 %v5568_v37, %v3873_v61  ;;  %v3965_v15 = vadd.f32 %v5565_v47, %v3868_v23  ;;  %v5574_v4 = vadd.f32 %v7674_v53, %v7670_v43  ;;  %v5519_v51 = vadd.f32 %v7909_v32, %v7692_v24  ;;  %v7919_v23 = vld [vmem:[#allocation19_spill] sm:$0xff]  ;;  %v7926_v32 = vld [vmem:[#allocation20_spill] sm:$0xff] }
 0x264   :  { %v7738_v30 = vpop.f32.mrf.mxu1  ;;  %v7750_v55 = vadd.f32 %v5630_v16, %v3954_v36  ;;  %v3884_v22 = vadd.f32 %v5513_v25, %v7619_v3  ;;  %v5577_v16 = vadd.f32 %v7682_v52, %v7678_v50  ;;  %v3973_v57 = vadd.f32 %v5571_v17, %v3876_v60  ;;  %v7913_v52 = vld [vmem:[#allocation13_spill] sm:$0xff]  ;;  %v7915_v36 = vld [vmem:[#allocation3_spill] sm:$0xff]  ;;  %v7920_v17 = vld [vmem:[#allocation4_spill] sm:$0xff] }
 0x265   :  { %v4042_v2 = vpop.f32.mrf.mxu0  ;;  %v5580_v50 = vadd.f32 %v7912_v31, %v7911_v54  ;;  %v5522_v24 = vadd.f32 %v7914_v49, %v7913_v52  ;;  %v3978_v38 = vadd.f32 %v5574_v4, %v3881_v19  ;;  %v7930_v52 = vld [vmem:[#allocation6_spill] sm:$0xff] }
 0x266   :  { %v4074_v48 = vpop.f32.mrf.mxu1  ;;  %v7746_v6 = vadd.f32 %v4042_v2, %v3946_v40  ;;  %v4107_v29 = vmax.f32 %v7750_v55, 0.0  ;;  %v7910_v2 = vld [vmem:[#allocation2_spill] sm:$0xff] }
 0x267   :  { %v5631_v7 = vpop.f32.mrf.mxu0  ;;  %v3889_v3 = vadd.f32 %v5516_v28, %v7910_v2  ;;  %v7813_v37 = vadd.f32 %v4074_v48, %v3978_v38  ;;  %v3897_v25 = vadd.f32 %v5522_v24, %v7920_v17 }
 0x268   :  { %v7748_v14 = vpop.f32.mrf.mxu1  ;;  %v4105_v9 = vmax.f32 %v7746_v6, 0.0  ;;  %v7763_v26 = vadd.f32 %v5631_v7, %v3957_v5 }
 0x269   :  { %v4045_v10 = vpop.f32.mrf.mxu0 }
 0x26a   :  { %v7752_v12 = vadd.f32 %v4045_v10, %v3949_v56  ;;  %v4077_v44 = vpop.f32.mrf.mxu1  ;;  %v4108_v46 = vmax.f32 %v7763_v26, 0.0  ;;  %v3892_v56 = vadd.f32 %v5519_v51, %v7915_v36  ;;  %v7917_v10 = vld [vmem:[#allocation12_spill] sm:$0xff] }
 0x26b   :  { %v5634_v59 = vpop.f32.mrf.mxu0  ;;  %v5583_v5 = vadd.f32 %v7917_v10, %v7916_v63 }
 0x26c   :  { %v4106_v35 = vmax.f32 %v7752_v12, 0.0  ;;  %v5642_v0 = vpop.f32.mrf.mxu1  ;;  %v7791_v11 = vadd.f32 %v5634_v59, %v3970_v18  ;;  %v3981_v59 = vadd.f32 %v5577_v16, %v3884_v22  ;;  %v3986_v18 = vadd.f32 %v5580_v50, %v3889_v3  ;;  %v7925_v16 = vld [vmem:[#allocation18_spill] sm:$0xff] }
 0x26d   :  { %v4058_v42 = vpop.f32.mrf.mxu0  ;;  %v5589_v51 = vadd.f32 %v7926_v32, %v7925_v16  ;;  %v4113_v3 = vmax.f32 %v7813_v37, 0.0 }
 0x26e   :  { %v4121_v1 = vadd.f32 %v4106_v35, %v4105_v9  ;;  %v7776_v20 = vadd.f32 %v4058_v42, %v3962_v21  ;;  %v7918_v21 = vld [vmem:[#allocation17_spill] sm:$0xff]  ;;  %v4090_v61 = vpop.f32.mrf.mxu1  ;;  %v4111_v45 = vmax.f32 %v7791_v11, 0.0  ;;  %v7921_v42 = vld [vmem:[#allocation14_spill] sm:$0xff]  ;;  %v4078_v19 = vadd.f32 %v4077_v44, %v3981_v59  ;;  %v7927_v11 = vld [vmem:[#allocation24_spill] sm:$0xff] }
 0x26f   :  { %v5635_v8 = vpop.f32.mrf.mxu0  ;;  %v5525_v47 = vadd.f32 %v7919_v23, %v7918_v21  ;;  %v4083_v2 = vadd.f32 %v7738_v30, %v3986_v18  ;;  %v7929_v44 = vld [vmem:[#allocation23_spill] sm:$0xff] }
 0x270   :  { %v4122_v34 = vadd.f32 %v4121_v1, %v4107_v29  ;;  %v4109_v43 = vmax.f32 %v7776_v20, 0.0  ;;  %v7805_v39 = vadd.f32 %v5635_v8, %v3973_v57  ;;  %v7922_v1 = vld [vmem:[#allocation16_spill] sm:$0xff]  ;;  %v7923_v8 = vld [vmem:[#allocation21_spill] sm:$0xff]  ;;  %v3989_v57 = vadd.f32 %v5583_v5, %v3892_v56  ;;  %v7931_v56 = vld [vmem:[#allocation7_spill] sm:$0xff] }
 0x271   :  { %v4061_v33 = vpop.f32.mrf.mxu0  ;;  %v5586_v28 = vadd.f32 %v7922_v1, %v7921_v42  ;;  %v4114_v38 = vmax.f32 %v4078_v19, 0.0  ;;  %v4115_v63 = vmax.f32 %v4083_v2, 0.0 }
 0x272   :  { %v4123_v53 = vadd.f32 %v4122_v34, %v4108_v46  ;;  %v7796_v40 = vadd.f32 %v4061_v33, %v3965_v15  ;;  %v5528_v15 = vadd.f32 %v7720_v13, %v7923_v8  ;;  %v4112_v4 = vmax.f32 %v7805_v39, 0.0  ;;  %v7924_v34 = vld [vmem:[#allocation5_spill] sm:$0xff]  ;;  %v5643_v33 = vpop.f32.mrf.mxu1  ;;  %v7928_v13 = vld [vmem:[#allocation22_spill] sm:$0xff] }
 0x273   :  { %v3900_v22 = vadd.f32 %v5525_v47, %v7924_v34  ;;  %v5592_v31 = vadd.f32 %v7929_v44, %v7928_v13  ;;  %v3994_v50 = vadd.f32 %v5586_v28, %v3897_v25  ;;  %v4086_v24 = vadd.f32 %v7748_v14, %v3989_v57 }
 0x274   :  { %v4124_v58 = vadd.f32 %v4123_v53, %v4109_v43  ;;  %v4110_v7 = vmax.f32 %v7796_v40, 0.0  ;;  %v5531_v53 = vadd.f32 %v7729_v27, %v7927_v11  ;;  %v3905_v49 = vadd.f32 %v5528_v15, %v7930_v52  ;;  %v4093_v27 = vpop.f32.mrf.mxu1 }
 0x275   :  { %v5595_v39 = vadd.f32 %v7731_v41, %v7726_v62  ;;  %v3997_v36 = vadd.f32 %v5589_v51, %v3900_v22  ;;  %v4091_v10 = vadd.f32 %v4090_v61, %v3994_v50  ;;  %v4116_v21 = vmax.f32 %v4086_v24, 0.0 }
 0x276   :  { %v4125_v60 = vadd.f32 %v4124_v58, %v4110_v7  ;;  %v3908_v30 = vadd.f32 %v5531_v53, %v7931_v56  ;;  %v4002_v23 = vadd.f32 %v5592_v31, %v3905_v49 }
 0x277   :  { %v4094_v47 = vadd.f32 %v4093_v27, %v3997_v36 }
 0x278   :  { %v4126_v48 = vadd.f32 %v4125_v60, %v4111_v45  ;;  %v4099_v59 = vadd.f32 %v5642_v0, %v4002_v23  ;;  %v4117_v60 = vmax.f32 %v4091_v10, 0.0  ;;  %v4005_v17 = vadd.f32 %v5595_v39, %v3908_v30 }
 0x279   :  { %v4118_v42 = vmax.f32 %v4094_v47, 0.0 }
 0x27a   :  { %v4127_v54 = vadd.f32 %v4126_v48, %v4112_v4  ;;  %v4102_v25 = vadd.f32 %v5643_v33, %v4005_v17  ;;  %v4119_v28 = vmax.f32 %v4099_v59, 0.0 }
 0x27c   :  { %v4128_v58 = vadd.f32 %v4127_v54, %v4113_v3  ;;  %v4120_v41 = vmax.f32 %v4102_v25, 0.0 }
 0x27e   :  { %v4129_v5 = vadd.f32 %v4128_v58, %v4114_v38 }
 0x280   :  { %v4130_v37 = vadd.f32 %v4129_v5, %v4115_v63 }
 0x282   :  { %v4131_v14 = vadd.f32 %v4130_v37, %v4116_v21 }
 0x284   :  { %v4132_v1 = vadd.f32 %v4131_v14, %v4117_v60 }
 0x286   :  { %v4133_v62 = vadd.f32 %v4132_v1, %v4118_v42 }
 0x288   :  { %v4134_v18 = vadd.f32 %v4133_v62, %v4119_v28 }
 0x28a   :  { %v4135_v8 = vadd.f32 %v4134_v18, %v4120_v41 }
 0x28c   :  { %v4136_v15 = vrot.slane %v4135_v8, 4 }
 0x28e   :  { %v4137_v19 = vadd.f32 %v4136_v15, %v4135_v8 }
 0x290   :  { %v4138_v61 = vrot.slane %v4137_v19, 2 }
 0x292   :  { %v4139_v48 = vadd.f32 %v4138_v61, %v4137_v19 }
 0x294   :  { %v4140_v34 = vrot.slane %v4139_v48, 1 }
 0x296   :  { %v4141_v22 = vadd.f32 %v4140_v34, %v4139_v48 }
 0x298   :  { %v4143_v16 = vmul.f32 0.0078125, %v4141_v22 }
 0x29a   :  { %v4144_v0 = vsub.f32 %v4105_v9, %v4143_v16  ;;  %v4145_v32 = vsub.f32 %v4106_v35, %v4143_v16  ;;  %v4146_v51 = vsub.f32 %v4107_v29, %v4143_v16  ;;  %v4147_v57 = vsub.f32 %v4108_v46, %v4143_v16 }
 0x29b   :  { %v4148_v33 = vsub.f32 %v4109_v43, %v4143_v16  ;;  %v4149_v11 = vsub.f32 %v4110_v7, %v4143_v16  ;;  %v4150_v53 = vsub.f32 %v4111_v45, %v4143_v16  ;;  %v4151_v2 = vsub.f32 %v4112_v4, %v4143_v16 }
 0x29c   :  { %v4152_v54 = vsub.f32 %v4113_v3, %v4143_v16  ;;  %v4153_v6 = vsub.f32 %v4114_v38, %v4143_v16  ;;  %v4154_v9 = vsub.f32 %v4115_v63, %v4143_v16  ;;  %v4155_v13 = vsub.f32 %v4116_v21, %v4143_v16 }
 0x29d   :  { %v4156_v12 = vsub.f32 %v4117_v60, %v4143_v16  ;;  %v4157_v35 = vsub.f32 %v4118_v42, %v4143_v16  ;;  %v4158_v44 = vsub.f32 %v4119_v28, %v4143_v16  ;;  %v4159_v55 = vsub.f32 %v4120_v41, %v4143_v16 }
 0x29e   :  { %v4160_v29 = vmul.f32 %v4144_v0, %v4144_v0  ;;  %v4161_v31 = vmul.f32 %v4145_v32, %v4145_v32  ;;  %v4162_v26 = vmul.f32 %v4146_v51, %v4146_v51  ;;  %v4163_v50 = vmul.f32 %v4147_v57, %v4147_v57 }
 0x29f   :  { %v4164_v43 = vmul.f32 %v4148_v33, %v4148_v33  ;;  %v4165_v40 = vmul.f32 %v4149_v11, %v4149_v11  ;;  %v4166_v45 = vmul.f32 %v4150_v53, %v4150_v53  ;;  %v4167_v3 = vmul.f32 %v4151_v2, %v4151_v2 }
 0x2a0   :  { %v4176_v46 = vadd.f32 %v4161_v31, %v4160_v29  ;;  %v4168_v24 = vmul.f32 %v4152_v54, %v4152_v54  ;;  %v4169_v58 = vmul.f32 %v4153_v6, %v4153_v6  ;;  %v4170_v36 = vmul.f32 %v4154_v9, %v4154_v9  ;;  %v4747_v29 = vld [vmem:[%s7883_s3] ss:$0 sm:$0xff] }
 0x2a1   :  { %v4171_v56 = vmul.f32 %v4155_v13, %v4155_v13  ;;  %v4172_v63 = vmul.f32 %v4156_v12, %v4156_v12  ;;  %v4173_v5 = vmul.f32 %v4157_v35, %v4157_v35  ;;  %v4174_v23 = vmul.f32 %v4158_v44, %v4158_v44 }
 0x2a2   :  { %v4177_v20 = vadd.f32 %v4176_v46, %v4162_v26  ;;  %v4175_v37 = vmul.f32 %v4159_v55, %v4159_v55 }
 0x2a4   :  { %v4178_v52 = vadd.f32 %v4177_v20, %v4163_v50 }
 0x2a6   :  { %v4179_v7 = vadd.f32 %v4178_v52, %v4164_v43 }
 0x2a8   :  { %v4180_v4 = vadd.f32 %v4179_v7, %v4165_v40  ;;  %v4748_v7 = vld [vmem:[%s7884_s4] ss:$0 sm:$0xff] }
 0x2aa   :  { %v4181_v49 = vadd.f32 %v4180_v4, %v4166_v45 }
 0x2ac   :  { %v4182_v38 = vadd.f32 %v4181_v49, %v4167_v3 }
 0x2ae   :  { %v4183_v39 = vadd.f32 %v4182_v38, %v4168_v24 }
 0x2b0   :  { %v4184_v27 = vadd.f32 %v4183_v39, %v4169_v58 }
 0x2b2   :  { %v4185_v30 = vadd.f32 %v4184_v27, %v4170_v36 }
 0x2b4   :  { %v4186_v10 = vadd.f32 %v4185_v30, %v4171_v56 }
 0x2b6   :  { %v4187_v21 = vadd.f32 %v4186_v10, %v4172_v63 }
 0x2b8   :  { %v4188_v47 = vadd.f32 %v4187_v21, %v4173_v5 }
 0x2ba   :  { %v4189_v59 = vadd.f32 %v4188_v47, %v4174_v23 }
 0x2bc   :  { %v4190_v60 = vadd.f32 %v4189_v59, %v4175_v37 }
 0x2be   :  { %v4191_v17 = vrot.slane %v4190_v60, 4 }
 0x2c0   :  { %v4192_v14 = vadd.f32 %v4191_v17, %v4190_v60 }
 0x2c2   :  { %v4193_v25 = vrot.slane %v4192_v14, 2 }
 0x2c4   :  { %v4194_v42 = vadd.f32 %v4193_v25, %v4192_v14 }
 0x2c6   :  { %v4195_v1 = vrot.slane %v4194_v42, 1 }
 0x2c8   :  { %v4196_v28 = vadd.f32 %v4195_v1, %v4194_v42 }
 0x2ca   :  { %v4197_v62 = vmul.f32 0.0078125, %v4196_v28 }
 0x2cc   :  { %v4198_v41 = vadd.f32 1e-05, %v4197_v62 }
 0x2ce   :  { %6156 = vrsqrt.f32 %v4198_v41 }
 0x2db   :  { %v6157_v18 = vpop.eup %6156 }
 0x2dc   :  { %v4200_v8 = vmul.f32 %v6157_v18, %v4144_v0  ;;  %v4201_v15 = vmul.f32 %v6157_v18, %v4145_v32  ;;  %v4202_v19 = vmul.f32 %v6157_v18, %v4146_v51  ;;  %v4203_v61 = vmul.f32 %v6157_v18, %v4147_v57 }
 0x2dd   :  { %v4204_v48 = vmul.f32 %v6157_v18, %v4148_v33  ;;  %v4205_v34 = vmul.f32 %v6157_v18, %v4149_v11  ;;  %v4206_v22 = vmul.f32 %v6157_v18, %v4150_v53  ;;  %v4207_v16 = vmul.f32 %v6157_v18, %v4151_v2 }
 0x2de   :  { %v4208_v31 = vmul.f32 %v6157_v18, %v4152_v54  ;;  %v4209_v26 = vmul.f32 %v6157_v18, %v4153_v6  ;;  %v4210_v46 = vmul.f32 %v6157_v18, %v4154_v9  ;;  %v4211_v50 = vmul.f32 %v6157_v18, %v4155_v13 }
 0x2df   :  { %v4212_v20 = vmul.f32 %v6157_v18, %v4156_v12  ;;  %v4213_v43 = vmul.f32 %v6157_v18, %v4157_v35  ;;  %v4214_v52 = vmul.f32 %v6157_v18, %v4158_v44  ;;  %v4215_v40 = vmul.f32 %v6157_v18, %v4159_v55 }
 0x2e0   :  { %v4223_v0 = vmul.f32 %v4747_v29, %v4200_v8  ;;  %v4224_v32 = vmul.f32 %v4747_v29, %v4201_v15  ;;  %v4225_v51 = vmul.f32 %v4747_v29, %v4202_v19  ;;  %v4226_v57 = vmul.f32 %v4747_v29, %v4203_v61 }
 0x2e1   :  { %v4227_v33 = vmul.f32 %v4747_v29, %v4204_v48  ;;  %v4228_v11 = vmul.f32 %v4747_v29, %v4205_v34  ;;  %v4229_v53 = vmul.f32 %v4747_v29, %v4206_v22  ;;  %v4230_v2 = vmul.f32 %v4747_v29, %v4207_v16 }
 0x2e2   :  { %v4231_v54 = vmul.f32 %v4747_v29, %v4208_v31  ;;  %v4232_v6 = vmul.f32 %v4747_v29, %v4209_v26  ;;  %v4233_v9 = vmul.f32 %v4747_v29, %v4210_v46  ;;  %v4234_v13 = vmul.f32 %v4747_v29, %v4211_v50 }
 0x2e3   :  { %v4235_v12 = vmul.f32 %v4747_v29, %v4212_v20  ;;  %v4236_v35 = vmul.f32 %v4747_v29, %v4213_v43  ;;  %v4237_v44 = vmul.f32 %v4747_v29, %v4214_v52  ;;  %v4238_v55 = vmul.f32 %v4747_v29, %v4215_v40 }
 0x2e4   :  { %v4246_v45 = vadd.f32 %v4748_v7, %v4223_v0  ;;  %v4247_v4 = vadd.f32 %v4748_v7, %v4224_v32  ;;  %v4248_v3 = vadd.f32 %v4748_v7, %v4225_v51  ;;  %v4249_v49 = vadd.f32 %v4748_v7, %v4226_v57 }
 0x2e5   :  { %v4250_v24 = vadd.f32 %v4748_v7, %v4227_v33  ;;  %v4251_v38 = vadd.f32 %v4748_v7, %v4228_v11  ;;  %v4252_v58 = vadd.f32 %v4748_v7, %v4229_v53  ;;  %v4253_v39 = vadd.f32 %v4748_v7, %v4230_v2 }
 0x2e6   :  { %v4254_v36 = vadd.f32 %v4748_v7, %v4231_v54  ;;  %v4255_v27 = vadd.f32 %v4748_v7, %v4232_v6  ;;  %v4256_v56 = vadd.f32 %v4748_v7, %v4233_v9  ;;  %v4257_v30 = vadd.f32 %v4748_v7, %v4234_v13 }
 0x2e7   :  { %v4258_v63 = vadd.f32 %v4748_v7, %v4235_v12  ;;  %v4259_v10 = vadd.f32 %v4748_v7, %v4236_v35  ;;  %v4260_v5 = vadd.f32 %v4748_v7, %v4237_v44  ;;  %v4261_v21 = vadd.f32 %v4748_v7, %v4238_v55 }
 0x2e8   :  { %v4784_v23 = vpack.c.bf16 %v4247_v4, %v4246_v45  ;;  %v4789_v47 = vpack.c.bf16 %v4249_v49, %v4248_v3  ;;  %v4794_v37 = vpack.c.bf16 %v4251_v38, %v4250_v24  ;;  %v4799_v59 = vpack.c.bf16 %v4253_v39, %v4252_v58 }
 0x2e9   :  { %v4804_v60 = vpack.c.bf16 %v4255_v27, %v4254_v36  ;;  %v4809_v17 = vpack.c.bf16 %v4257_v30, %v4256_v56  ;;  %v4814_v14 = vpack.c.bf16 %v4259_v10, %v4258_v63  ;;  %v4819_v25 = vpack.c.bf16 %v4261_v21, %v4260_v5 }
 0x2ea   :  { %4785 = vst [vmem:[%s7885_s5] sm:$0xff] %v4784_v23   ;;  %4821 = vst [vmem:[%s7885_s5 + $0x8] sm:$0xff] %v4789_v47  }
 0x2eb   :  { %4822 = vst [vmem:[%s7885_s5 + $0x10] sm:$0xff] %v4794_v37   ;;  %4823 = vst [vmem:[%s7885_s5 + $0x18] sm:$0xff] %v4799_v59  }
 0x2ec   :  { %4824 = vst [vmem:[%s7885_s5 + $0x20] sm:$0xff] %v4804_v60   ;;  %4825 = vst [vmem:[%s7885_s5 + $0x28] sm:$0xff] %v4809_v17  }
 0x2ed   :  { %4826 = vst [vmem:[%s7885_s5 + $0x30] sm:$0xff] %v4814_v14   ;;  %4827 = vst [vmem:[%s7885_s5 + $0x38] sm:$0xff] %v4819_v25  }

// kernel: critic_forward.6
= control target key start
LH: loop header
LB: loop body
LE: loop exit
PB: predicated region body
PF: predicated region fallthrough
CT: control target
= control target key end

     0   :  { %s4561_s1 = inlined_call_operand.vmem [shape: bf16[3200,128], index: 1, kind: input, shape index: {}]   ;;  %s4562_s0 = inlined_call_operand.vmem [shape: bf16[32,3200], index: 0, kind: input, shape index: {}]   ;;  %s4563_s2 = inlined_call_operand.vmem [shape: f32[1,128], index: 2, kind: input, shape index: {}]   ;;  %s4564_s3 = inlined_call_operand.vmem [shape: f32[1,128], index: 3, kind: input, shape index: {}]   ;;  %s4565_s4 = inlined_call_operand.vmem [shape: f32[1,128], index: 4, kind: input, shape index: {}]   ;;  %s4566_s5 = inlined_call_operand.vmem [shape: bf16[32,128], index: 5, kind: output, shape index: {}]  }
   0x1   :  { %v3292_v0 = vld [vmem:[%s4561_s1 + $0x78] sm:$0xff]   ;;  %v3296_v4 = vld [vmem:[%s4561_s1 + $0x70] sm:$0xff]   ;;  %v3300_v8 = vld [vmem:[%s4561_s1 + $0x68] sm:$0xff]  }
   0x2   :  { %v3293_v1 = vld [vmem:[%s4561_s1 + $0x38] sm:$0xff]   ;;  %2926 = vmatprep.subr.bf16.mxu0 %v3292_v0  ;;  %v3297_v5 = vld [vmem:[%s4561_s1 + $0x30] sm:$0xff]   ;;  %v3301_v9 = vld [vmem:[%s4561_s1 + $0x28] sm:$0xff]  }
   0x3   :  { %v3294_v2 = vld [vmem:[%s4561_s1 + $0xf8] sm:$0xff]   ;;  %2927 = vmatpush3.bf16.msra.mxu0 %v3293_v1  ;;  %v3298_v6 = vld [vmem:[%s4561_s1 + $0xf0] sm:$0xff]   ;;  %v3302_v10 = vld [vmem:[%s4561_s1 + $0xe8] sm:$0xff]  }
   0x4   :  { %v3295_v3 = vld [vmem:[%s4561_s1 + $0xb8] sm:$0xff]   ;;  %2954 = vmatprep.subr.bf16.mxu1 %v3294_v2  ;;  %2928 = vmatprep.subr.bf16.mxu0 %v3296_v4  ;;  %v3299_v7 = vld [vmem:[%s4561_s1 + $0xb0] sm:$0xff]   ;;  %v3303_v11 = vld [vmem:[%s4561_s1 + $0xa8] sm:$0xff]  }
   0x5   :  { %2955 = vmatpush3.bf16.msra.mxu1 %v3295_v3  ;;  %v3304_v12 = vld [vmem:[%s4561_s1 + $0x60] sm:$0xff]   ;;  %v3308_v16 = vld [vmem:[%s4561_s1 + $0x58] sm:$0xff]   ;;  %v3312_v20 = vld [vmem:[%s4561_s1 + $0x50] sm:$0xff]  }
   0x6   :  { %2956 = vmatprep.subr.bf16.mxu1 %v3298_v6  ;;  %v3305_v13 = vld [vmem:[%s4561_s1 + $0x20] sm:$0xff]   ;;  %v3309_v17 = vld [vmem:[%s4561_s1 + $0x18] sm:$0xff]   ;;  %v3313_v21 = vld [vmem:[%s4561_s1 + $0x10] sm:$0xff]  }
   0x7   :  { %2929 = vmatpush3.bf16.msra.mxu0 %v3297_v5  ;;  %v3306_v14 = vld [vmem:[%s4561_s1 + $0xe0] sm:$0xff]   ;;  %v3310_v18 = vld [vmem:[%s4561_s1 + $0xd8] sm:$0xff]   ;;  %v3314_v22 = vld [vmem:[%s4561_s1 + $0xd0] sm:$0xff]  }
   0x8   :  { %2930 = vmatprep.subr.bf16.mxu0 %v3300_v8  ;;  %v3307_v15 = vld [vmem:[%s4561_s1 + $0xa0] sm:$0xff]   ;;  %v3311_v19 = vld [vmem:[%s4561_s1 + $0x98] sm:$0xff]   ;;  %v3315_v23 = vld [vmem:[%s4561_s1 + $0x90] sm:$0xff]  }
   0x9   :  { %2957 = vmatpush3.bf16.msra.mxu1 %v3299_v7  ;;  %v3316_v24 = vld [vmem:[%s4561_s1 + $0x48] sm:$0xff]   ;;  %v3320_v28 = vld [vmem:[%s4561_s1 + $0x40] sm:$0xff]   ;;  %v3327_v34 = vld [vmem:[%s4561_s1 + $0x178] sm:$0xff]  }
   0xa   :  { %2958 = vmatprep.subr.bf16.mxu1 %v3302_v10  ;;  %v3317_v25 = vld [vmem:[%s4561_s1 + $0x8] sm:$0xff]   ;;  %v3321_v29 = vld [vmem:[%s4561_s1] sm:$0xff]   ;;  %v3331_v37 = vld [vmem:[%s4561_s1 + $0x138] sm:$0xff]  }
   0xb   :  { %2931 = vmatpush3.bf16.msra.mxu0 %v3301_v9  ;;  %v3318_v26 = vld [vmem:[%s4561_s1 + $0xc8] sm:$0xff]   ;;  %v3322_v30 = vld [vmem:[%s4561_s1 + $0xc0] sm:$0xff]   ;;  %v3332_v38 = vld [vmem:[%s4561_s1 + $0x1f8] sm:$0xff]  }
   0xc   :  { %2932 = vmatprep.subr.bf16.mxu0 %v3304_v12  ;;  %v3319_v27 = vld [vmem:[%s4561_s1 + $0x88] sm:$0xff]   ;;  %v3323_v31 = vld [vmem:[%s4562_s0] ss:$100 sps:$4 sm:$0xff]   ;;  %v3333_v39 = vld [vmem:[%s4561_s1 + $0x1b8] sm:$0xff]  }
   0xd   :  { %2959 = vmatpush3.bf16.msra.mxu1 %v3303_v11  ;;  %v3325_v32 = vld [vmem:[%s4562_s0 + $0x4] ss:$100 sps:$4 sm:$0xff]   ;;  %v3330_v36 = vld [vmem:[%s4562_s0 + $0xc] ss:$100 sps:$4 sm:$0xff]   ;;  %v3346_v52 = vld [vmem:[%s4561_s1 + $0x158] sm:$0xff]  }
   0xe   :  { %2960 = vmatprep.subr.bf16.mxu1 %v3306_v14  ;;  %v3326_v33 = vld [vmem:[%s4561_s1 + $0x80] sm:$0xff]   ;;  %1964 = vmatprep.mubr.bf16.mxu0 %v3325_v32  ;;  %v3328_v35 = vld [vmem:[%s4562_s0 + $0x8] ss:$100 sps:$4 sm:$0xff]   ;;  %v3334_v40 = vld [vmem:[%s4561_s1 + $0x170] sm:$0xff]  }
   0xf   :  { %2933 = vmatpush3.bf16.msra.mxu0 %v3305_v13  ;;  %2013 = vmatprep.mubr.bf16.mxu1 %v3330_v36  ;;  %v3335_v41 = vld [vmem:[%s4561_s1 + $0x130] sm:$0xff]   ;;  %v3338_v44 = vld [vmem:[%s4561_s1 + $0x168] sm:$0xff]   ;;  %v3342_v48 = vld [vmem:[%s4561_s1 + $0x160] sm:$0xff]  }
  0x10   :  { %2934 = vmatprep.subr.bf16.mxu0 %v3308_v16  ;;  %v3336_v42 = vld [vmem:[%s4561_s1 + $0x1f0] sm:$0xff]   ;;  %v3339_v45 = vld [vmem:[%s4561_s1 + $0x128] sm:$0xff]   ;;  %v3343_v49 = vld [vmem:[%s4561_s1 + $0x120] sm:$0xff]  }
  0x11   :  { %2961 = vmatpush3.bf16.msra.mxu1 %v3307_v15  ;;  %v3337_v43 = vld [vmem:[%s4561_s1 + $0x1b0] sm:$0xff]   ;;  %v3340_v46 = vld [vmem:[%s4561_s1 + $0x1e8] sm:$0xff]   ;;  %v3344_v50 = vld [vmem:[%s4561_s1 + $0x1e0] sm:$0xff]  }
  0x12   :  { %2962 = vmatprep.subr.bf16.mxu1 %v3310_v18  ;;  %v3341_v47 = vld [vmem:[%s4561_s1 + $0x1a8] sm:$0xff]   ;;  %v3345_v51 = vld [vmem:[%s4561_s1 + $0x1a0] sm:$0xff]   ;;  %v3347_v53 = vld [vmem:[%s4561_s1 + $0x118] sm:$0xff]  }
  0x13   :  { %2935 = vmatpush3.bf16.msra.mxu0 %v3309_v17  ;;  %v3348_v54 = vld [vmem:[%s4562_s0 + $0xcc] ss:$100 sps:$4 sm:$0xff]   ;;  %v3350_v55 = vld [vmem:[%s4561_s1 + $0x1d8] sm:$0xff]   ;;  %v3364_v4 = vld [vmem:[%s4561_s1 + $0x140] sm:$0xff]  }
  0x14   :  { %2936 = vmatprep.subr.bf16.mxu0 %v3312_v20  ;;  %v3351_v56 = vld [vmem:[%s4562_s0 + $0xc8] ss:$100 sps:$4 sm:$0xff]   ;;  %v3352_v57 = vld [vmem:[%s4561_s1 + $0x198] sm:$0xff]   ;;  %v3355_v59 = vld [vmem:[%s4561_s1 + $0x150] sm:$0xff]  }
  0x15   :  { %2963 = vmatpush3.bf16.msra.mxu1 %v3311_v19  ;;  %v3353_v58 = vld [vmem:[%s4562_s0 + $0xd4] ss:$100 sps:$4 sm:$0xff]   ;;  %v3360_v0 = vld [vmem:[%s4561_s1 + $0x148] sm:$0xff]   ;;  %v3365_v5 = vld [vmem:[%s4561_s1 + $0x100] sm:$0xff]  }
  0x16   :  { %2964 = vmatprep.subr.bf16.mxu1 %v3314_v22  ;;  %v3356_v60 = vld [vmem:[%s4562_s0 + $0xd0] ss:$100 sps:$4 sm:$0xff]   ;;  %v3361_v1 = vld [vmem:[%s4561_s1 + $0x108] sm:$0xff]   ;;  %v3366_v6 = vld [vmem:[%s4561_s1 + $0x1c0] sm:$0xff]  }
  0x17   :  { %2937 = vmatpush3.bf16.msra.mxu0 %v3313_v21  ;;  %v3357_v61 = vld [vmem:[%s4561_s1 + $0x110] sm:$0xff]   ;;  %v3362_v2 = vld [vmem:[%s4561_s1 + $0x1c8] sm:$0xff]   ;;  %v3370_v9 = vld [vmem:[%s4561_s1 + $0x180] sm:$0xff]  }
  0x18   :  { %2938 = vmatprep.subr.bf16.mxu0 %v3316_v24  ;;  %v3358_v62 = vld [vmem:[%s4561_s1 + $0x1d0] sm:$0xff]   ;;  %v3363_v3 = vld [vmem:[%s4561_s1 + $0x188] sm:$0xff]   ;;  %v3371_v10 = vld [vmem:[%s4561_s1 + $0x278] sm:$0xff]  }
  0x19   :  { %2965 = vmatpush3.bf16.msra.mxu1 %v3315_v23  ;;  %v3359_v63 = vld [vmem:[%s4561_s1 + $0x190] sm:$0xff]   ;;  %v3372_v11 = vld [vmem:[%s4562_s0 + $0x18] ss:$100 sps:$4 sm:$0xff]   ;;  %v3385_v22 = vld [vmem:[%s4561_s1 + $0x268] sm:$0xff]  }
  0x1a   :  { %2966 = vmatprep.subr.bf16.mxu1 %v3318_v26  ;;  %v3367_v7 = vld [vmem:[%s4562_s0 + $0x10] ss:$100 sps:$4 sm:$0xff]   ;;  %v3374_v12 = vld [vmem:[%s4562_s0 + $0x1c] ss:$100 sps:$4 sm:$0xff]   ;;  %v3386_v23 = vld [vmem:[%s4562_s0 + $0xe4] ss:$100 sps:$4 sm:$0xff]  }
  0x1b   :  { %2939 = vmatpush3.bf16.msra.mxu0 %v3317_v25  ;;  %v3369_v8 = vld [vmem:[%s4562_s0 + $0x14] ss:$100 sps:$4 sm:$0xff]   ;;  %v3381_v19 = vld [vmem:[%s4562_s0 + $0xdc] ss:$100 sps:$4 sm:$0xff]   ;;  %v3388_v24 = vld [vmem:[%s4561_s1 + $0x228] sm:$0xff]  }
  0x1c   :  { %2940 = vmatprep.subr.bf16.mxu0 %v3320_v28  ;;  %v3375_v13 = vld [vmem:[%s4561_s1 + $0x238] sm:$0xff]   ;;  %v3378_v16 = vld [vmem:[%s4561_s1 + $0x270] sm:$0xff]   ;;  %v3389_v25 = vld [vmem:[%s4562_s0 + $0xe0] ss:$100 sps:$4 sm:$0xff]  }
  0x1d   :  { %2967 = vmatpush3.bf16.msra.mxu1 %v3319_v27  ;;  %v3376_v14 = vld [vmem:[%s4561_s1 + $0x2f8] sm:$0xff]   ;;  %v3379_v17 = vld [vmem:[%s4561_s1 + $0x230] sm:$0xff]   ;;  %v3390_v26 = vld [vmem:[%s4561_s1 + $0x2e8] sm:$0xff]  }
  0x1e   :  { %2968 = vmatprep.subr.bf16.mxu1 %v3322_v30  ;;  %v3377_v15 = vld [vmem:[%s4561_s1 + $0x2b8] sm:$0xff]   ;;  %v3380_v18 = vld [vmem:[%s4561_s1 + $0x2f0] sm:$0xff]   ;;  %v3391_v27 = vld [vmem:[%s4561_s1 + $0x2a8] sm:$0xff]  }
  0x1f   :  { %2941 = vmatpush3.bf16.msra.mxu0 %v3321_v29  ;;  %v3383_v20 = vld [vmem:[%s4561_s1 + $0x2b0] sm:$0xff]   ;;  %v3384_v21 = vld [vmem:[%s4562_s0 + $0xd8] ss:$100 sps:$4 sm:$0xff]   ;;  %v3392_v28 = vld [vmem:[%s4561_s1 + $0x260] sm:$0xff]  }
  0x20   :  { %2982 = vmatprep.subr.bf16.mxu0 %v3327_v34  ;;  %v3393_v29 = vld [vmem:[%s4561_s1 + $0x220] sm:$0xff]   ;;  %v3396_v32 = vld [vmem:[%s4561_s1 + $0x258] sm:$0xff]   ;;  %v3400_v36 = vld [vmem:[%s4561_s1 + $0x250] sm:$0xff]  }
  0x21   :  { %2969 = vmatpush3.bf16.msra.mxu1 %v3326_v33  ;;  %v3394_v30 = vld [vmem:[%s4561_s1 + $0x2e0] sm:$0xff]   ;;  %v3397_v33 = vld [vmem:[%s4561_s1 + $0x218] sm:$0xff]  }
  0x22   :  { %1965 = vmatmul.mubr.bf16.vlgmr.msra.gmra.mxu0 %v3323_v31  ;;  %3010 = vmatprep.subr.bf16.mxu1 %v3332_v38  ;;  %v3395_v31 = vld [vmem:[%s4561_s1 + $0x2a0] sm:$0xff]   ;;  %v3398_v34 = vld [vmem:[%s4561_s1 + $0x2d8] sm:$0xff]   ;;  %v3402_v38 = vld [vmem:[%s4561_s1 + $0x2d0] sm:$0xff]  }
  0x23   :  { %2983 = vmatpush3.bf16.msra.mxu0 %v3331_v37  ;;  %1972 = vmatprep.mubr.bf16.mxu0 %v3348_v54  ;;  %v3401_v37 = vld [vmem:[%s4561_s1 + $0x210] sm:$0xff]   ;;  %v3420_v54 = vld [vmem:[%s4561_s1 + $0x3f8] sm:$0xff]  }
  0x24   :  { %2014 = vmatmul.mubr.bf16.vlgmr.msra.gmra.mxu1 %v3328_v35  ;;  %2984 = vmatprep.subr.bf16.mxu0 %v3334_v40  ;;  %v3399_v35 = vld [vmem:[%s4561_s1 + $0x298] sm:$0xff]   ;;  %v3404_v40 = vld [vmem:[%s4561_s1 + $0x248] sm:$0xff]  }
  0x25   :  { %3011 = vmatpush3.bf16.msra.mxu1 %v3333_v39  ;;  %2021 = vmatprep.mubr.bf16.mxu1 %v3353_v58  ;;  %v3403_v39 = vld [vmem:[%s4561_s1 + $0x290] sm:$0xff]  }
  0x26   :  { %3012 = vmatprep.subr.bf16.mxu1 %v3336_v42  ;;  %v3406_v42 = vld [vmem:[%s4561_s1 + $0x2c8] sm:$0xff]   ;;  %v3424_v58 = vld [vmem:[%s4561_s1 + $0x3f0] sm:$0xff]  }
  0x27   :  { %2985 = vmatpush3.bf16.msra.mxu0 %v3335_v41  ;;  %v3405_v41 = vld [vmem:[%s4561_s1 + $0x208] sm:$0xff]  }
  0x28   :  { %2986 = vmatprep.subr.bf16.mxu0 %v3338_v44  ;;  %v3408_v44 = vld [vmem:[%s4561_s1 + $0x240] sm:$0xff]  }
  0x29   :  { %3013 = vmatpush3.bf16.msra.mxu1 %v3337_v43  ;;  %v3407_v43 = vld [vmem:[%s4561_s1 + $0x288] sm:$0xff]  }
  0x2a   :  { %3014 = vmatprep.subr.bf16.mxu1 %v3340_v46  ;;  %1973 = vmatmul.mubr.bf16.gmra.mxu0 %v3351_v56  ;;  %v3410_v46 = vld [vmem:[%s4561_s1 + $0x2c0] sm:$0xff]   ;;  %v3422_v56 = vld [vmem:[%s4561_s1 + $0x370] sm:$0xff]  }
  0x2b   :  { %2987 = vmatpush3.bf16.msra.mxu0 %v3339_v45  ;;  %2062 = vmatprep.mubr.bf16.mxu0 %v3369_v8  ;;  %v3409_v45 = vld [vmem:[%s4561_s1 + $0x200] sm:$0xff]   ;;  %v3440_v8 = vld [vmem:[%s4561_s1 + $0x358] sm:$0xff]  }
  0x2c   :  { %2988 = vmatprep.subr.bf16.mxu0 %v3342_v48  ;;  %2022 = vmatmul.mubr.bf16.gmra.mxu1 %v3356_v60  ;;  %v3413_v48 = vld [vmem:[%s4562_s0 + $0x24] ss:$100 sps:$4 sm:$0xff]   ;;  %v3427_v60 = vld [vmem:[%s4561_s1 + $0x3b0] sm:$0xff]  }
  0x2d   :  { %3015 = vmatpush3.bf16.msra.mxu1 %v3341_v47  ;;  %2111 = vmatprep.mubr.bf16.mxu1 %v3374_v12  ;;  %v3411_v47 = vld [vmem:[%s4562_s0 + $0x20] ss:$100 sps:$4 sm:$0xff]   ;;  %v3444_v12 = vld [vmem:[%s4561_s1 + $0x350] sm:$0xff]  }
  0x2e   :  { %3016 = vmatprep.subr.bf16.mxu1 %v3344_v50  ;;  %v3415_v50 = vld [vmem:[%s4561_s1 + $0x378] sm:$0xff]  }
  0x2f   :  { %2989 = vmatpush3.bf16.msra.mxu0 %v3343_v49  ;;  %v3414_v49 = vld [vmem:[%s4561_s1 + $0x280] sm:$0xff]  }
  0x30   :  { %2990 = vmatprep.subr.bf16.mxu0 %v3346_v52  ;;  %v3418_v52 = vld [vmem:[%s4562_s0 + $0x2c] ss:$100 sps:$4 sm:$0xff]  }
  0x31   :  { %3017 = vmatpush3.bf16.msra.mxu1 %v3345_v51  ;;  %v3416_v51 = vld [vmem:[%s4562_s0 + $0x28] ss:$100 sps:$4 sm:$0xff]  }
  0x32   :  { %3018 = vmatprep.subr.bf16.mxu1 %v3350_v55  ;;  %v3421_v55 = vld [vmem:[%s4561_s1 + $0x3b8] sm:$0xff]  }
  0x33   :  { %2991 = vmatpush3.bf16.msra.mxu0 %v3347_v53  ;;  %v3419_v53 = vld [vmem:[%s4561_s1 + $0x338] sm:$0xff]  }
  0x34   :  { %2992 = vmatprep.subr.bf16.mxu0 %v3355_v59  ;;  %v3425_v59 = vld [vmem:[%s4562_s0 + $0xec] ss:$100 sps:$4 sm:$0xff]  }
  0x35   :  { %3019 = vmatpush3.bf16.msra.mxu1 %v3352_v57  ;;  %v3423_v57 = vld [vmem:[%s4561_s1 + $0x330] sm:$0xff]  }
  0x36   :  { %3020 = vmatprep.subr.bf16.mxu1 %v3358_v62  ;;  %v3429_v62 = vld [vmem:[%s4561_s1 + $0x368] sm:$0xff]  }
  0x37   :  { %2993 = vmatpush3.bf16.msra.mxu0 %v3357_v61  ;;  %v3428_v61 = vld [vmem:[%s4562_s0 + $0xe8] ss:$100 sps:$4 sm:$0xff]  }
  0x38   :  { %2994 = vmatprep.subr.bf16.mxu0 %v3360_v0  ;;  %v3432_v0 = vld [vmem:[%s4561_s1 + $0x328] sm:$0xff]  }
  0x39   :  { %3021 = vmatpush3.bf16.msra.mxu1 %v3359_v63  ;;  %v3430_v63 = vld [vmem:[%s4562_s0 + $0xf4] ss:$100 sps:$4 sm:$0xff]  }
  0x3a   :  { %3022 = vmatprep.subr.bf16.mxu1 %v3362_v2  ;;  %v3434_v2 = vld [vmem:[%s4561_s1 + $0x3e8] sm:$0xff]  }
  0x3b   :  { %2995 = vmatpush3.bf16.msra.mxu0 %v3361_v1  ;;  %v3433_v1 = vld [vmem:[%s4562_s0 + $0xf0] ss:$100 sps:$4 sm:$0xff]  }
  0x3c   :  { %2996 = vmatprep.subr.bf16.mxu0 %v3364_v4  ;;  %v3436_v4 = vld [vmem:[%s4561_s1 + $0x360] sm:$0xff]  }
  0x3d   :  { %3023 = vmatpush3.bf16.msra.mxu1 %v3363_v3  ;;  %v3435_v3 = vld [vmem:[%s4561_s1 + $0x3a8] sm:$0xff]  }
  0x3e   :  { %3024 = vmatprep.subr.bf16.mxu1 %v3366_v6  ;;  %v3438_v6 = vld [vmem:[%s4561_s1 + $0x3e0] sm:$0xff]  }
  0x3f   :  { %2997 = vmatpush3.bf16.msra.mxu0 %v3365_v5  ;;  %v3437_v5 = vld [vmem:[%s4561_s1 + $0x320] sm:$0xff]  }
  0x40   :  { %3038 = vmatprep.subr.bf16.mxu0 %v3371_v10  ;;  %v3442_v10 = vld [vmem:[%s4561_s1 + $0x3d8] sm:$0xff]  }
  0x41   :  { %3025 = vmatpush3.bf16.msra.mxu1 %v3370_v9  ;;  %v3441_v9 = vld [vmem:[%s4561_s1 + $0x318] sm:$0xff]  }
  0x42   :  { %2063 = vmatmul.mubr.bf16.vlgmr.msra.gmra.mxu0 %v3367_v7  ;;  %3066 = vmatprep.subr.bf16.mxu1 %v3376_v14  ;;  %v3439_v7 = vld [vmem:[%s4561_s1 + $0x3a0] sm:$0xff]   ;;  %v3446_v14 = vld [vmem:[%s4561_s1 + $0x3d0] sm:$0xff]  }
  0x43   :  { %3039 = vmatpush3.bf16.msra.mxu0 %v3375_v13  ;;  %2070 = vmatprep.mubr.bf16.mxu0 %v3381_v19  ;;  %v3445_v13 = vld [vmem:[%s4561_s1 + $0x310] sm:$0xff]   ;;  %v3451_v19 = vld [vmem:[%s4561_s1 + $0x388] sm:$0xff]  }
  0x44   :  { %2112 = vmatmul.mubr.bf16.vlgmr.msra.gmra.mxu1 %v3372_v11  ;;  %3040 = vmatprep.subr.bf16.mxu0 %v3378_v16  ;;  %v3443_v11 = vld [vmem:[%s4561_s1 + $0x398] sm:$0xff]   ;;  %v3448_v16 = vld [vmem:[%s4561_s1 + $0x348] sm:$0xff]  }
  0x45   :  { %3067 = vmatpush3.bf16.msra.mxu1 %v3377_v15  ;;  %2119 = vmatprep.mubr.bf16.mxu1 %v3386_v23  ;;  %v3447_v15 = vld [vmem:[%s4561_s1 + $0x390] sm:$0xff]  }
  0x46   :  { %3068 = vmatprep.subr.bf16.mxu1 %v3380_v18  ;;  %v3450_v18 = vld [vmem:[%s4561_s1 + $0x3c8] sm:$0xff]   ;;  %v3455_v23 = vld [vmem:[%s4562_s0 + $0x30] ss:$100 sps:$4 sm:$0xff]  }
  0x47   :  { %3041 = vmatpush3.bf16.msra.mxu0 %v3379_v17  ;;  %v3449_v17 = vld [vmem:[%s4561_s1 + $0x308] sm:$0xff]  }
  0x48   :  { %3042 = vmatprep.subr.bf16.mxu0 %v3385_v22  ;;  %v3454_v22 = vld [vmem:[%s4561_s1 + $0x3c0] sm:$0xff]  }
  0x49   :  { %3069 = vmatpush3.bf16.msra.mxu1 %v3383_v20  ;;  %v3452_v20 = vld [vmem:[%s4561_s1 + $0x340] sm:$0xff]  }
  0x4a   :  { %2071 = vmatmul.mubr.bf16.gmra.mxu0 %v3384_v21  ;;  %3070 = vmatprep.subr.bf16.mxu1 %v3390_v26  ;;  %v3453_v21 = vld [vmem:[%s4561_s1 + $0x300] sm:$0xff]   ;;  %v3459_v26 = vld [vmem:[%s4561_s1 + $0x478] sm:$0xff]  }
  0x4b   :  { %3043 = vmatpush3.bf16.msra.mxu0 %v3388_v24  ;;  %2160 = vmatprep.mubr.bf16.mxu0 %v3413_v48  ;;  %v3457_v24 = vld [vmem:[%s4562_s0 + $0x34] ss:$100 sps:$4 sm:$0xff]  }
  0x4c   :  { %2120 = vmatmul.mubr.bf16.gmra.mxu1 %v3389_v25  ;;  %3044 = vmatprep.subr.bf16.mxu0 %v3392_v28  ;;  %v3458_v25 = vld [vmem:[%s4561_s1 + $0x380] sm:$0xff]   ;;  %v3484_v48 = vld [vmem:[%s4561_s1 + $0x458] sm:$0xff]  }
  0x4d   :  { %3071 = vmatpush3.bf16.msra.mxu1 %v3391_v27  ;;  %2209 = vmatprep.mubr.bf16.mxu1 %v3418_v52  ;;  %v3460_v27 = vld [vmem:[%s4562_s0 + $0x38] ss:$100 sps:$4 sm:$0xff]   ;;  %v3488_v52 = vld [vmem:[%s4561_s1 + $0x450] sm:$0xff]  }
  0x4e   :  { %3072 = vmatprep.subr.bf16.mxu1 %v3394_v30  ;;  %v3462_v28 = vld [vmem:[%s4562_s0 + $0x3c] ss:$100 sps:$4 sm:$0xff]  }
  0x4f   :  { %3045 = vmatpush3.bf16.msra.mxu0 %v3393_v29  ;;  %v3463_v29 = vld [vmem:[%s4561_s1 + $0x438] sm:$0xff]  }
  0x50   :  { %3046 = vmatprep.subr.bf16.mxu0 %v3396_v32  ;;  %v3464_v30 = vld [vmem:[%s4561_s1 + $0x4f8] sm:$0xff]   ;;  %v3466_v32 = vld [vmem:[%s4561_s1 + $0x470] sm:$0xff]  }
  0x51   :  { %3073 = vmatpush3.bf16.msra.mxu1 %v3395_v31  ;;  %v3465_v31 = vld [vmem:[%s4561_s1 + $0x4b8] sm:$0xff]  }
  0x52   :  { %3074 = vmatprep.subr.bf16.mxu1 %v3398_v34  ;;  %v3468_v34 = vld [vmem:[%s4561_s1 + $0x4f0] sm:$0xff]  }
  0x53   :  { %3047 = vmatpush3.bf16.msra.mxu0 %v3397_v33  ;;  %v3467_v33 = vld [vmem:[%s4561_s1 + $0x430] sm:$0xff]  }
  0x54   :  { %3048 = vmatprep.subr.bf16.mxu0 %v3400_v36  ;;  %v3471_v36 = vld [vmem:[%s4561_s1 + $0x4b0] sm:$0xff]  }
  0x55   :  { %3075 = vmatpush3.bf16.msra.mxu1 %v3399_v35  ;;  %v3469_v35 = vld [vmem:[%s4562_s0 + $0xfc] ss:$100 sps:$4 sm:$0xff]  }
  0x56   :  { %3076 = vmatprep.subr.bf16.mxu1 %v3402_v38  ;;  %v3473_v38 = vld [vmem:[%s4561_s1 + $0x468] sm:$0xff]  }
  0x57   :  { %3049 = vmatpush3.bf16.msra.mxu0 %v3401_v37  ;;  %v3472_v37 = vld [vmem:[%s4562_s0 + $0xf8] ss:$100 sps:$4 sm:$0xff]  }
  0x58   :  { %3050 = vmatprep.subr.bf16.mxu0 %v3404_v40  ;;  %v3476_v40 = vld [vmem:[%s4561_s1 + $0x428] sm:$0xff]  }
  0x59   :  { %3077 = vmatpush3.bf16.msra.mxu1 %v3403_v39  ;;  %v3474_v39 = vld [vmem:[%s4562_s0 + $0x104] ss:$100 sps:$4 sm:$0xff]  }
  0x5a   :  { %3078 = vmatprep.subr.bf16.mxu1 %v3406_v42  ;;  %v3478_v42 = vld [vmem:[%s4561_s1 + $0x4e8] sm:$0xff]  }
  0x5b   :  { %3051 = vmatpush3.bf16.msra.mxu0 %v3405_v41  ;;  %v3477_v41 = vld [vmem:[%s4562_s0 + $0x100] ss:$100 sps:$4 sm:$0xff]  }
  0x5c   :  { %3052 = vmatprep.subr.bf16.mxu0 %v3408_v44  ;;  %v3480_v44 = vld [vmem:[%s4561_s1 + $0x460] sm:$0xff]  }
  0x5d   :  { %3079 = vmatpush3.bf16.msra.mxu1 %v3407_v43  ;;  %v3479_v43 = vld [vmem:[%s4561_s1 + $0x4a8] sm:$0xff]  }
  0x5e   :  { %3080 = vmatprep.subr.bf16.mxu1 %v3410_v46  ;;  %v3482_v46 = vld [vmem:[%s4561_s1 + $0x4e0] sm:$0xff]  }
  0x5f   :  { %3053 = vmatpush3.bf16.msra.mxu0 %v3409_v45  ;;  %v3481_v45 = vld [vmem:[%s4561_s1 + $0x420] sm:$0xff]  }
  0x60   :  { %3094 = vmatprep.subr.bf16.mxu0 %v3415_v50  ;;  %v3486_v50 = vld [vmem:[%s4561_s1 + $0x4d8] sm:$0xff]  }
  0x61   :  { %3081 = vmatpush3.bf16.msra.mxu1 %v3414_v49  ;;  %v3485_v49 = vld [vmem:[%s4561_s1 + $0x418] sm:$0xff]  }
  0x62   :  { %2161 = vmatmul.mubr.bf16.vlgmr.msra.gmra.mxu0 %v3411_v47  ;;  %3122 = vmatprep.subr.bf16.mxu1 %v3420_v54  ;;  %v3483_v47 = vld [vmem:[%s4561_s1 + $0x4a0] sm:$0xff]   ;;  %v3490_v54 = vld [vmem:[%s4561_s1 + $0x4d0] sm:$0xff]  }
  0x63   :  { %3095 = vmatpush3.bf16.msra.mxu0 %v3419_v53  ;;  %2168 = vmatprep.mubr.bf16.mxu0 %v3425_v59  ;;  %v3489_v53 = vld [vmem:[%s4561_s1 + $0x410] sm:$0xff]   ;;  %v3495_v59 = vld [vmem:[%s4561_s1 + $0x488] sm:$0xff]  }
  0x64   :  { %2210 = vmatmul.mubr.bf16.vlgmr.msra.gmra.mxu1 %v3416_v51  ;;  %3096 = vmatprep.subr.bf16.mxu0 %v3422_v56  ;;  %v3487_v51 = vld [vmem:[%s4561_s1 + $0x498] sm:$0xff]   ;;  %v3492_v56 = vld [vmem:[%s4561_s1 + $0x448] sm:$0xff]  }
  0x65   :  { %3123 = vmatpush3.bf16.msra.mxu1 %v3421_v55  ;;  %2217 = vmatprep.mubr.bf16.mxu1 %v3430_v63  ;;  %v3491_v55 = vld [vmem:[%s4561_s1 + $0x490] sm:$0xff]   ;;  %v3499_v63 = vld [vmem:[%s4562_s0 + $0x40] ss:$100 sps:$4 sm:$0xff]  }
  0x66   :  { %3124 = vmatprep.subr.bf16.mxu1 %v3424_v58  ;;  %v3494_v58 = vld [vmem:[%s4561_s1 + $0x4c8] sm:$0xff]  }
  0x67   :  { %3097 = vmatpush3.bf16.msra.mxu0 %v3423_v57  ;;  %v3493_v57 = vld [vmem:[%s4561_s1 + $0x408] sm:$0xff]  }
  0x68   :  { %3098 = vmatprep.subr.bf16.mxu0 %v3429_v62  ;;  %v3498_v62 = vld [vmem:[%s4561_s1 + $0x4c0] sm:$0xff]  }
  0x69   :  { %3125 = vmatpush3.bf16.msra.mxu1 %v3427_v60  ;;  %v3496_v60 = vld [vmem:[%s4561_s1 + $0x440] sm:$0xff]  }
  0x6a   :  { %2169 = vmatmul.mubr.bf16.gmra.mxu0 %v3428_v61  ;;  %3126 = vmatprep.subr.bf16.mxu1 %v3434_v2  ;;  %v3497_v61 = vld [vmem:[%s4561_s1 + $0x400] sm:$0xff]   ;;  %v3503_v2 = vld [vmem:[%s4561_s1 + $0x578] sm:$0xff]  }
  0x6b   :  { %3099 = vmatpush3.bf16.msra.mxu0 %v3432_v0  ;;  %2258 = vmatprep.mubr.bf16.mxu0 %v3457_v24  ;;  %v3501_v0 = vld [vmem:[%s4562_s0 + $0x44] ss:$100 sps:$4 sm:$0xff]   ;;  %v3528_v24 = vld [vmem:[%s4561_s1 + $0x558] sm:$0xff]  }
  0x6c   :  { %2218 = vmatmul.mubr.bf16.gmra.mxu1 %v3433_v1  ;;  %3100 = vmatprep.subr.bf16.mxu0 %v3436_v4  ;;  %v3502_v1 = vld [vmem:[%s4561_s1 + $0x480] sm:$0xff]   ;;  %v3506_v4 = vld [vmem:[%s4562_s0 + $0x4c] ss:$100 sps:$4 sm:$0xff]  }
  0x6d   :  { %3127 = vmatpush3.bf16.msra.mxu1 %v3435_v3  ;;  %2307 = vmatprep.mubr.bf16.mxu1 %v3462_v28  ;;  %v3504_v3 = vld [vmem:[%s4562_s0 + $0x48] ss:$100 sps:$4 sm:$0xff]   ;;  %v3532_v28 = vld [vmem:[%s4561_s1 + $0x550] sm:$0xff]  }
  0x6e   :  { %3128 = vmatprep.subr.bf16.mxu1 %v3438_v6  ;;  %v3508_v6 = vld [vmem:[%s4561_s1 + $0x5f8] sm:$0xff]  }
  0x6f   :  { %3101 = vmatpush3.bf16.msra.mxu0 %v3437_v5  ;;  %v3507_v5 = vld [vmem:[%s4561_s1 + $0x538] sm:$0xff]  }
  0x70   :  { %3102 = vmatprep.subr.bf16.mxu0 %v3440_v8  ;;  %v3510_v8 = vld [vmem:[%s4561_s1 + $0x570] sm:$0xff]  }
  0x71   :  { %3129 = vmatpush3.bf16.msra.mxu1 %v3439_v7  ;;  %v3509_v7 = vld [vmem:[%s4561_s1 + $0x5b8] sm:$0xff]  }
  0x72   :  { %3130 = vmatprep.subr.bf16.mxu1 %v3442_v10  ;;  %v3512_v10 = vld [vmem:[%s4561_s1 + $0x5f0] sm:$0xff]  }
  0x73   :  { %3103 = vmatpush3.bf16.msra.mxu0 %v3441_v9  ;;  %v3511_v9 = vld [vmem:[%s4561_s1 + $0x530] sm:$0xff]  }
  0x74   :  { %3104 = vmatprep.subr.bf16.mxu0 %v3444_v12  ;;  %v3515_v12 = vld [vmem:[%s4561_s1 + $0x5b0] sm:$0xff]  }
  0x75   :  { %3131 = vmatpush3.bf16.msra.mxu1 %v3443_v11  ;;  %v3513_v11 = vld [vmem:[%s4562_s0 + $0x10c] ss:$100 sps:$4 sm:$0xff]  }
  0x76   :  { %3132 = vmatprep.subr.bf16.mxu1 %v3446_v14  ;;  %v3517_v14 = vld [vmem:[%s4561_s1 + $0x568] sm:$0xff]  }
  0x77   :  { %3105 = vmatpush3.bf16.msra.mxu0 %v3445_v13  ;;  %v3516_v13 = vld [vmem:[%s4562_s0 + $0x108] ss:$100 sps:$4 sm:$0xff]  }
  0x78   :  { %3106 = vmatprep.subr.bf16.mxu0 %v3448_v16  ;;  %v3520_v16 = vld [vmem:[%s4561_s1 + $0x528] sm:$0xff]  }
  0x79   :  { %3133 = vmatpush3.bf16.msra.mxu1 %v3447_v15  ;;  %v3518_v15 = vld [vmem:[%s4562_s0 + $0x114] ss:$100 sps:$4 sm:$0xff]  }
  0x7a   :  { %3134 = vmatprep.subr.bf16.mxu1 %v3450_v18  ;;  %v3522_v18 = vld [vmem:[%s4561_s1 + $0x5e8] sm:$0xff]  }
  0x7b   :  { %3107 = vmatpush3.bf16.msra.mxu0 %v3449_v17  ;;  %v3521_v17 = vld [vmem:[%s4562_s0 + $0x110] ss:$100 sps:$4 sm:$0xff]  }
  0x7c   :  { %3108 = vmatprep.subr.bf16.mxu0 %v3452_v20  ;;  %v3524_v20 = vld [vmem:[%s4561_s1 + $0x560] sm:$0xff]  }
  0x7d   :  { %3135 = vmatpush3.bf16.msra.mxu1 %v3451_v19  ;;  %v3523_v19 = vld [vmem:[%s4561_s1 + $0x5a8] sm:$0xff]  }
  0x7e   :  { %3136 = vmatprep.subr.bf16.mxu1 %v3454_v22  ;;  %v3526_v22 = vld [vmem:[%s4561_s1 + $0x5e0] sm:$0xff]  }
  0x7f   :  { %3109 = vmatpush3.bf16.msra.mxu0 %v3453_v21  ;;  %v3525_v21 = vld [vmem:[%s4561_s1 + $0x520] sm:$0xff]  }
  0x80   :  { %3150 = vmatprep.subr.bf16.mxu0 %v3459_v26  ;;  %v3530_v26 = vld [vmem:[%s4561_s1 + $0x5d8] sm:$0xff]  }
  0x81   :  { %3137 = vmatpush3.bf16.msra.mxu1 %v3458_v25  ;;  %v3529_v25 = vld [vmem:[%s4561_s1 + $0x518] sm:$0xff]  }
  0x82   :  { %2259 = vmatmul.mubr.bf16.vlgmr.msra.gmra.mxu0 %v3455_v23  ;;  %3178 = vmatprep.subr.bf16.mxu1 %v3464_v30  ;;  %v3527_v23 = vld [vmem:[%s4561_s1 + $0x5a0] sm:$0xff]   ;;  %v3534_v30 = vld [vmem:[%s4561_s1 + $0x5d0] sm:$0xff]  }
  0x83   :  { %3151 = vmatpush3.bf16.msra.mxu0 %v3463_v29  ;;  %2266 = vmatprep.mubr.bf16.mxu0 %v3469_v35  ;;  %v3533_v29 = vld [vmem:[%s4561_s1 + $0x510] sm:$0xff]   ;;  %v3539_v35 = vld [vmem:[%s4561_s1 + $0x588] sm:$0xff]  }
  0x84   :  { %2308 = vmatmul.mubr.bf16.vlgmr.msra.gmra.mxu1 %v3460_v27  ;;  %3152 = vmatprep.subr.bf16.mxu0 %v3466_v32  ;;  %v3531_v27 = vld [vmem:[%s4561_s1 + $0x598] sm:$0xff]   ;;  %v3536_v32 = vld [vmem:[%s4561_s1 + $0x548] sm:$0xff]  }
  0x85   :  { %3179 = vmatpush3.bf16.msra.mxu1 %v3465_v31  ;;  %2315 = vmatprep.mubr.bf16.mxu1 %v3474_v39  ;;  %v3535_v31 = vld [vmem:[%s4561_s1 + $0x590] sm:$0xff]  }
  0x86   :  { %3180 = vmatprep.subr.bf16.mxu1 %v3468_v34  ;;  %v3538_v34 = vld [vmem:[%s4561_s1 + $0x5c8] sm:$0xff]   ;;  %v3543_v39 = vld [vmem:[%s4562_s0 + $0x50] ss:$100 sps:$4 sm:$0xff]  }
  0x87   :  { %3153 = vmatpush3.bf16.msra.mxu0 %v3467_v33  ;;  %v3537_v33 = vld [vmem:[%s4561_s1 + $0x508] sm:$0xff]  }
  0x88   :  { %3154 = vmatprep.subr.bf16.mxu0 %v3473_v38  ;;  %v3542_v38 = vld [vmem:[%s4561_s1 + $0x5c0] sm:$0xff]  }
  0x89   :  { %3181 = vmatpush3.bf16.msra.mxu1 %v3471_v36  ;;  %v3540_v36 = vld [vmem:[%s4561_s1 + $0x540] sm:$0xff]  }
  0x8a   :  { %2267 = vmatmul.mubr.bf16.gmra.mxu0 %v3472_v37  ;;  %3182 = vmatprep.subr.bf16.mxu1 %v3478_v42  ;;  %v3541_v37 = vld [vmem:[%s4561_s1 + $0x500] sm:$0xff]   ;;  %v3547_v42 = vld [vmem:[%s4561_s1 + $0x638] sm:$0xff]  }
  0x8b   :  { %3155 = vmatpush3.bf16.msra.mxu0 %v3476_v40  ;;  %2356 = vmatprep.mubr.bf16.mxu0 %v3501_v0  ;;  %v3545_v40 = vld [vmem:[%s4562_s0 + $0x54] ss:$100 sps:$4 sm:$0xff]  }
  0x8c   :  { %2316 = vmatmul.mubr.bf16.gmra.mxu1 %v3477_v41  ;;  %3156 = vmatprep.subr.bf16.mxu0 %v3480_v44  ;;  %v3546_v41 = vld [vmem:[%s4561_s1 + $0x580] sm:$0xff]  }
  0x8d   :  { %3183 = vmatpush3.bf16.msra.mxu1 %v3479_v43  ;;  %2405 = vmatprep.mubr.bf16.mxu1 %v3506_v4  ;;  %v3548_v43 = vld [vmem:[%s4562_s0 + $0x58] ss:$100 sps:$4 sm:$0xff]  }
  0x8e   :  { %3184 = vmatprep.subr.bf16.mxu1 %v3482_v46  ;;  %v3550_v44 = vld [vmem:[%s4562_s0 + $0x5c] ss:$100 sps:$4 sm:$0xff]  }
  0x8f   :  { %3157 = vmatpush3.bf16.msra.mxu0 %v3481_v45  ;;  %v3551_v45 = vld [vmem:[%s4561_s1 + $0x630] sm:$0xff]   ;;  %v3552_v46 = vld [vmem:[%s4562_s0 + $0x11c] ss:$100 sps:$4 sm:$0xff]  }
  0x90   :  { %3158 = vmatprep.subr.bf16.mxu0 %v3484_v48  ;;  %v3555_v48 = vld [vmem:[%s4561_s1 + $0x628] sm:$0xff]  }
  0x91   :  { %3185 = vmatpush3.bf16.msra.mxu1 %v3483_v47  ;;  %v3554_v47 = vld [vmem:[%s4562_s0 + $0x118] ss:$100 sps:$4 sm:$0xff]  }
  0x92   :  { %3186 = vmatprep.subr.bf16.mxu1 %v3486_v50 }
  0x93   :  { %3159 = vmatpush3.bf16.msra.mxu0 %v3485_v49  ;;  %v3556_v49 = vld [vmem:[%s4562_s0 + $0x124] ss:$100 sps:$4 sm:$0xff]  }
  0x94   :  { %3160 = vmatprep.subr.bf16.mxu0 %v3488_v52  ;;  %v3558_v52 = vld [vmem:[%s4562_s0 + $0x120] ss:$100 sps:$4 sm:$0xff]  }
  0x95   :  { %3187 = vmatpush3.bf16.msra.mxu1 %v3487_v51  ;;  %v3559_v51 = vld [vmem:[%s4561_s1 + $0x620] sm:$0xff]  }
  0x96   :  { %3188 = vmatprep.subr.bf16.mxu1 %v3490_v54 }
  0x97   :  { %3161 = vmatpush3.bf16.msra.mxu0 %v3489_v53 }
  0x98   :  { %3162 = vmatprep.subr.bf16.mxu0 %v3492_v56  ;;  %v3560_v56 = vld [vmem:[%s4561_s1 + $0x618] sm:$0xff]  }
  0x99   :  { %3189 = vmatpush3.bf16.msra.mxu1 %v3491_v55 }
  0x9a   :  { %3190 = vmatprep.subr.bf16.mxu1 %v3494_v58  ;;  %v3564_v58 = vld [vmem:[%s4562_s0 + $0x60] ss:$100 sps:$4 sm:$0xff]  }
  0x9b   :  { %3163 = vmatpush3.bf16.msra.mxu0 %v3493_v57 }
  0x9c   :  { %3164 = vmatprep.subr.bf16.mxu0 %v3496_v60 }
  0x9d   :  { %3191 = vmatpush3.bf16.msra.mxu1 %v3495_v59 }
  0x9e   :  { %3192 = vmatprep.subr.bf16.mxu1 %v3498_v62  ;;  %v4339_v62 = vld [vmem:[%s4563_s2] ss:$0 sm:$0xff] }
  0x9f   :  { %3165 = vmatpush3.bf16.msra.mxu0 %v3497_v61 }
  0xa0   :  { %3206 = vmatprep.subr.bf16.mxu0 %v3503_v2  ;;  %v3561_v2 = vld [vmem:[%s4561_s1 + $0x610] sm:$0xff]  }
  0xa1   :  { %3193 = vmatpush3.bf16.msra.mxu1 %v3502_v1 }
  0xa2   :  { %2357 = vmatmul.mubr.bf16.vlgmr.msra.gmra.mxu0 %v3499_v63  ;;  %3234 = vmatprep.subr.bf16.mxu1 %v3508_v6 }
  0xa3   :  { %3207 = vmatpush3.bf16.msra.mxu0 %v3507_v5  ;;  %2364 = vmatprep.mubr.bf16.mxu0 %v3513_v11  ;;  %v3565_v11 = vld [vmem:[%s4562_s0 + $0x128] ss:$100 sps:$4 sm:$0xff]  }
  0xa4   :  { %2406 = vmatmul.mubr.bf16.vlgmr.msra.gmra.mxu1 %v3504_v3  ;;  %3208 = vmatprep.subr.bf16.mxu0 %v3510_v8  ;;  %v3562_v8 = vld [vmem:[%s4561_s1 + $0x608] sm:$0xff]  }
  0xa5   :  { %3235 = vmatpush3.bf16.msra.mxu1 %v3509_v7  ;;  %2413 = vmatprep.mubr.bf16.mxu1 %v3518_v15 }
  0xa6   :  { %3236 = vmatprep.subr.bf16.mxu1 %v3512_v10 }
  0xa7   :  { %3209 = vmatpush3.bf16.msra.mxu0 %v3511_v9  ;;  %v3563_v9 = vld [vmem:[%s4561_s1 + $0x600] sm:$0xff]  }
  0xa8   :  { %3210 = vmatprep.subr.bf16.mxu0 %v3517_v14 }
  0xa9   :  { %3237 = vmatpush3.bf16.msra.mxu1 %v3515_v12 }
  0xaa   :  { %2365 = vmatmul.mubr.bf16.gmra.mxu0 %v3516_v13  ;;  %3238 = vmatprep.subr.bf16.mxu1 %v3522_v18 }
  0xab   :  { %3211 = vmatpush3.bf16.msra.mxu0 %v3520_v16  ;;  %2454 = vmatprep.mubr.bf16.mxu0 %v3545_v40 }
  0xac   :  { %2414 = vmatmul.mubr.bf16.gmra.mxu1 %v3521_v17  ;;  %3212 = vmatprep.subr.bf16.mxu0 %v3524_v20 }
  0xad   :  { %3239 = vmatpush3.bf16.msra.mxu1 %v3523_v19  ;;  %2503 = vmatprep.mubr.bf16.mxu1 %v3550_v44 }
  0xae   :  { %3240 = vmatprep.subr.bf16.mxu1 %v3526_v22 }
  0xaf   :  { %3213 = vmatpush3.bf16.msra.mxu0 %v3525_v21 }
  0xb0   :  { %3214 = vmatprep.subr.bf16.mxu0 %v3528_v24 }
  0xb1   :  { %3241 = vmatpush3.bf16.msra.mxu1 %v3527_v23 }
  0xb2   :  { %3242 = vmatprep.subr.bf16.mxu1 %v3530_v26 }
  0xb3   :  { %3215 = vmatpush3.bf16.msra.mxu0 %v3529_v25 }
  0xb4   :  { %3216 = vmatprep.subr.bf16.mxu0 %v3532_v28 }
  0xb5   :  { %3243 = vmatpush3.bf16.msra.mxu1 %v3531_v27 }
  0xb6   :  { %3244 = vmatprep.subr.bf16.mxu1 %v3534_v30 }
  0xb7   :  { %3217 = vmatpush3.bf16.msra.mxu0 %v3533_v29 }
  0xb8   :  { %3218 = vmatprep.subr.bf16.mxu0 %v3536_v32 }
  0xb9   :  { %3245 = vmatpush3.bf16.msra.mxu1 %v3535_v31 }
  0xba   :  { %3246 = vmatprep.subr.bf16.mxu1 %v3538_v34 }
  0xbb   :  { %3219 = vmatpush3.bf16.msra.mxu0 %v3537_v33 }
  0xbc   :  { %3220 = vmatprep.subr.bf16.mxu0 %v3540_v36 }
  0xbd   :  { %3247 = vmatpush3.bf16.msra.mxu1 %v3539_v35 }
  0xbe   :  { %3248 = vmatprep.subr.bf16.mxu1 %v3542_v38 }
  0xbf   :  { %3221 = vmatpush3.bf16.msra.mxu0 %v3541_v37 }
  0xc0   :  { %3272 = vmatprep.subr.bf16.mxu0 %v3547_v42 }
  0xc1   :  { %3249 = vmatpush3.bf16.msra.mxu1 %v3546_v41 }
  0xc2   :  { %2455 = vmatmul.mubr.bf16.vlgmr.msra.gmra.mxu0 %v3543_v39 }
  0xc3   :  { %3273 = vmatpush3.bf16.msra.mxu0 %v3547_v42  ;;  %2462 = vmatprep.mubr.bf16.mxu0 %v3552_v46 }
  0xc4   :  { %2504 = vmatmul.mubr.bf16.vlgmr.msra.gmra.mxu1 %v3548_v43  ;;  %3274 = vmatprep.subr.bf16.mxu0 %v3551_v45 }
  0xc5   :  { %2511 = vmatprep.mubr.bf16.mxu1 %v3556_v49 }
  0xc7   :  { %3275 = vmatpush3.bf16.msra.mxu0 %v3551_v45 }
  0xc8   :  { %3276 = vmatprep.subr.bf16.mxu0 %v3555_v48 }
  0xca   :  { %2463 = vmatmul.mubr.bf16.gmra.mxu0 %v3554_v47 }
  0xcb   :  { %3277 = vmatpush3.bf16.msra.mxu0 %v3555_v48  ;;  %3288 = vmatprep.mubr.bf16.mxu0 %v3564_v58 }
  0xcc   :  { %3278 = vmatprep.subr.bf16.mxu0 %v3559_v51  ;;  %2512 = vmatmul.mubr.bf16.gmra.mxu1 %v3558_v52 }
  0xcf   :  { %3279 = vmatpush3.bf16.msra.mxu0 %v3559_v51 }
  0xd0   :  { %3280 = vmatprep.subr.bf16.mxu0 %v3560_v56 }
  0xd3   :  { %3281 = vmatpush3.bf16.msra.mxu0 %v3560_v56 }
  0xd4   :  { %3282 = vmatprep.subr.bf16.mxu0 %v3561_v2 }
  0xd7   :  { %3283 = vmatpush3.bf16.msra.mxu0 %v3561_v2 }
  0xd8   :  { %3284 = vmatprep.subr.bf16.mxu0 %v3562_v8 }
  0xdb   :  { %3285 = vmatpush3.bf16.msra.mxu0 %v3562_v8 }
  0xdc   :  { %3286 = vmatprep.subr.bf16.mxu0 %v3563_v9 }
  0xdf   :  { %3287 = vmatpush3.bf16.msra.mxu0 %v3563_v9 }
  0xe2   :  { %v2942_v50 = vpop.f32.mrf.mxu0  ;;  %3289 = vmatmul.mubr.bf16.vlgmr.msra.gmra.mxu0 %v3565_v11 }
  0xe4   :  { %v2943_v53 = vpop.f32.mrf.mxu0  ;;  %v2970_v55 = vpop.f32.mrf.mxu1 }
  0xe5   :  { %v2944_v54 = vadd.f32 %v2943_v53, %v2942_v50 }
  0xe6   :  { %v2945_v57 = vpop.f32.mrf.mxu0  ;;  %v2971_v59 = vpop.f32.mrf.mxu1 }
  0xe7   :  { %v2972_v60 = vadd.f32 %v2971_v59, %v2970_v55  ;;  %v1967_v1 = vadd.f32 %v2944_v54, %v4339_v62 }
  0xe8   :  { %v2946_v61 = vpop.f32.mrf.mxu0  ;;  %v2973_v0 = vpop.f32.mrf.mxu1 }
  0xe9   :  { %v2947_v63 = vadd.f32 %v2946_v61, %v2945_v57  ;;  %v2016_v5 = vadd.f32 %v2972_v60, %v1967_v1 }
  0xea   :  { %v2974_v4 = vpop.f32.mrf.mxu1  ;;  %v2948_v10 = vpop.f32.mrf.mxu0 }
  0xeb   :  { %v1970_v3 = vadd.f32 %v2947_v63, %v4339_v62  ;;  %v2975_v6 = vadd.f32 %v2974_v4, %v2973_v0 }
  0xec   :  { %v2949_v12 = vpop.f32.mrf.mxu0  ;;  %v2976_v14 = vpop.f32.mrf.mxu1 }
  0xed   :  { %v4346_v7 = vadd.f32 %v2975_v6, %v1970_v3  ;;  %v2950_v13 = vadd.f32 %v2949_v12, %v2948_v10 }
  0xee   :  { %v2951_v15 = vpop.f32.mrf.mxu0  ;;  %v2977_v17 = vpop.f32.mrf.mxu1 }
  0xef   :  { %v1975_v16 = vadd.f32 %v2950_v13, %v4339_v62  ;;  %v2978_v19 = vadd.f32 %v2977_v17, %v2976_v14 }
  0xf0   :  { %v2952_v18 = vpop.f32.mrf.mxu0  ;;  %v4364_v26 = vpop.f32.mrf.mxu1 }
  0xf1   :  { %v4358_v20 = vadd.f32 %v2952_v18, %v2951_v15  ;;  %v4360_v21 = vadd.f32 %v2978_v19, %v1975_v16 }
  0xf2   :  { %v4366_v27 = vpop.f32.mrf.mxu1 }
 0x102   :  { %v2998_v22 = vpop.f32.mrf.mxu0 }
 0x104   :  { %v2999_v23 = vpop.f32.mrf.mxu0  ;;  %v4368_v28 = vpop.f32.mrf.mxu1 }
 0x105   :  { %v3000_v24 = vadd.f32 %v2999_v23, %v2998_v22 }
 0x106   :  { %v4370_v29 = vpop.f32.mrf.mxu0  ;;  %v4372_v30 = vpop.f32.mrf.mxu1 }
 0x107   :  { %v4362_v25 = vadd.f32 %v3000_v24, %v2016_v5 }
 0x108   :  { %v3002_v31 = vpop.f32.mrf.mxu0  ;;  %v4374_v32 = vpop.f32.mrf.mxu1 }
 0x10a   :  { %v4376_v33 = vpop.f32.mrf.mxu0  ;;  %v4378_v34 = vpop.f32.mrf.mxu1 }
 0x10c   :  { %v3005_v35 = vpop.f32.mrf.mxu0  ;;  %v4380_v36 = vpop.f32.mrf.mxu1 }
 0x10e   :  { %v3007_v37 = vpop.f32.mrf.mxu0  ;;  %v4382_v38 = vpop.f32.mrf.mxu1 }
 0x110   :  { %v3008_v39 = vpop.f32.mrf.mxu0  ;;  %v4384_v40 = vpop.f32.mrf.mxu1 }
 0x112   :  { %v4388_v42 = vpop.f32.mrf.mxu1 }
 0x122   :  { %v4386_v41 = vpop.f32.mrf.mxu0 }
 0x124   :  { %v4390_v43 = vpop.f32.mrf.mxu0  ;;  %v4392_v44 = vpop.f32.mrf.mxu1 }
 0x126   :  { %v4394_v45 = vpop.f32.mrf.mxu0  ;;  %v4396_v46 = vpop.f32.mrf.mxu1 }
 0x128   :  { %v3058_v47 = vpop.f32.mrf.mxu0  ;;  %v4398_v48 = vpop.f32.mrf.mxu1 }
 0x12a   :  { %v3060_v49 = vpop.f32.mrf.mxu0  ;;  %v4400_v50 = vpop.f32.mrf.mxu1 }
 0x12c   :  { %v3061_v51 = vpop.f32.mrf.mxu0  ;;  %v4402_v52 = vpop.f32.mrf.mxu1 }
 0x12e   :  { %v3063_v53 = vpop.f32.mrf.mxu0  ;;  %v4404_v54 = vpop.f32.mrf.mxu1 }
 0x130   :  { %v3064_v55 = vpop.f32.mrf.mxu0  ;;  %v4406_v56 = vpop.f32.mrf.mxu1 }
 0x132   :  { %v4410_v58 = vpop.f32.mrf.mxu1 }
 0x142   :  { %v4408_v57 = vpop.f32.mrf.mxu0 }
 0x144   :  { %v4412_v59 = vpop.f32.mrf.mxu0  ;;  %v4414_v60 = vpop.f32.mrf.mxu1 }
 0x146   :  { %v4416_v61 = vpop.f32.mrf.mxu0  ;;  %v4418_v63 = vpop.f32.mrf.mxu1 }
 0x148   :  { %v4420_v0 = vpop.f32.mrf.mxu0  ;;  %v4422_v1 = vpop.f32.mrf.mxu1 }
 0x14a   :  { %v4424_v2 = vpop.f32.mrf.mxu0  ;;  %v4426_v3 = vpop.f32.mrf.mxu1 }
 0x14c   :  { %v4428_v4 = vpop.f32.mrf.mxu0  ;;  %v4430_v5 = vpop.f32.mrf.mxu1 }
 0x14e   :  { %v4432_v6 = vpop.f32.mrf.mxu0  ;;  %v4434_v8 = vpop.f32.mrf.mxu1 }
 0x150   :  { %v3120_v9 = vpop.f32.mrf.mxu0  ;;  %v4436_v10 = vpop.f32.mrf.mxu1 }
 0x151   :  { %4567 = vst [vmem:[#allocation2_spill] sm:$0xff] %v4436_v10 }
 0x152   :  { %v4440_v12 = vpop.f32.mrf.mxu1 }
 0x153   :  { %4568 = vst [vmem:[#allocation3_spill] sm:$0xff] %v4440_v12 }
 0x162   :  { %v4438_v11 = vpop.f32.mrf.mxu0 }
 0x164   :  { %v4442_v13 = vpop.f32.mrf.mxu0  ;;  %v4444_v14 = vpop.f32.mrf.mxu1 }
 0x165   :  { %4569 = vst [vmem:[#allocation4_spill] sm:$0xff] %v4444_v14 }
 0x166   :  { %v4446_v15 = vpop.f32.mrf.mxu0  ;;  %v4448_v16 = vpop.f32.mrf.mxu1 }
 0x167   :  { %4570 = vst [vmem:[#allocation5_spill] sm:$0xff] %v4446_v15  ;;  %4571 = vst [vmem:[#allocation6_spill] sm:$0xff] %v4448_v16 }
 0x168   :  { %v4450_v17 = vpop.f32.mrf.mxu0  ;;  %v4452_v18 = vpop.f32.mrf.mxu1 }
 0x169   :  { %4572 = vst [vmem:[#allocation7_spill] sm:$0xff] %v4450_v17  ;;  %4573 = vst [vmem:[#allocation8_spill] sm:$0xff] %v4452_v18  ;;  %v1978_v18 = vadd.f32 %v4358_v20, %v4339_v62  ;;  %v3031_v62 = vadd.f32 %v4378_v34, %v4374_v32  ;;  %v3062_v32 = vadd.f32 %v3061_v51, %v3060_v49 }
 0x16a   :  { %v4454_v19 = vpop.f32.mrf.mxu0  ;;  %v4456_v22 = vpop.f32.mrf.mxu1  ;;  %v3115_v49 = vadd.f32 %v4420_v0, %v4416_v61 }
 0x16b   :  { %4574 = vst [vmem:[#allocation9_spill] sm:$0xff] %v4456_v22  ;;  %v2981_v22 = vadd.f32 %v4366_v27, %v4364_v26 }
 0x16c   :  { %v4458_v23 = vpop.f32.mrf.mxu0  ;;  %v4460_v24 = vpop.f32.mrf.mxu1 }
 0x16d   :  { %4575 = vst [vmem:[#allocation10_spill] sm:$0xff] %v4458_v23  ;;  %4576 = vst [vmem:[#allocation11_spill] sm:$0xff] %v4460_v24  ;;  %v3003_v24 = vadd.f32 %v3002_v31, %v4370_v29  ;;  %v3034_v29 = vadd.f32 %v4382_v38, %v4380_v36  ;;  %v3056_v31 = vadd.f32 %v4390_v43, %v4386_v41 }
 0x16e   :  { %v4462_v12 = vpop.f32.mrf.mxu0  ;;  %v4464_v10 = vpop.f32.mrf.mxu1  ;;  %v3084_v36 = vadd.f32 %v4396_v46, %v4392_v44  ;;  %v3112_v43 = vadd.f32 %v4412_v59, %v4408_v57 }
 0x16f   :  { %4577 = vst [vmem:[#allocation12_spill] sm:$0xff] %v4462_v12  ;;  %4578 = vst [vmem:[#allocation13_spill] sm:$0xff] %v4464_v10  ;;  %v3006_v10 = vadd.f32 %v3005_v35, %v4376_v33  ;;  %v3065_v35 = vadd.f32 %v3064_v55, %v3063_v53  ;;  %v3121_v53 = vadd.f32 %v3120_v9, %v4432_v6  ;;  %v4583_v6 = vld [vmem:[#allocation2_spill] sm:$0xff]  ;;  %v4584_v9 = vld [vmem:[#allocation3_spill] sm:$0xff] }
 0x170   :  { %v4466_v14 = vpop.f32.mrf.mxu0  ;;  %v4468_v15 = vpop.f32.mrf.mxu1  ;;  %v3140_v55 = vadd.f32 %v4418_v63, %v4414_v60  ;;  %v4586_v60 = vld [vmem:[#allocation7_spill] sm:$0xff] }
 0x171   :  { %4579 = vst [vmem:[#allocation14_spill] sm:$0xff] %v4466_v14  ;;  %4580 = vst [vmem:[#allocation15_spill] sm:$0xff] %v4468_v15  ;;  %v3009_v14 = vadd.f32 %v3008_v39, %v3007_v37  ;;  %v3028_v15 = vadd.f32 %v4372_v30, %v4368_v28  ;;  %v2073_v27 = vadd.f32 %v3006_v10, %v4360_v21 }
 0x172   :  { %v4472_v17 = vpop.f32.mrf.mxu1  ;;  %v3037_v28 = vadd.f32 %v4388_v42, %v4384_v40  ;;  %v3087_v40 = vadd.f32 %v4400_v50, %v4398_v48  ;;  %v3118_v48 = vadd.f32 %v4428_v4, %v4424_v2  ;;  %v3168_v2 = vadd.f32 %v4442_v13, %v4438_v11  ;;  %v4590_v11 = vld [vmem:[#allocation4_spill] sm:$0xff]  ;;  %v4591_v13 = vld [vmem:[#allocation6_spill] sm:$0xff] }
 0x173   :  { %4582 = vst [vmem:[#allocation17_spill] sm:$0xff] %v4472_v17  ;;  %v2068_v17 = vadd.f32 %v3003_v24, %v4346_v7  ;;  %v3059_v7 = vadd.f32 %v3058_v47, %v4394_v45  ;;  %v2114_v30 = vadd.f32 %v3028_v15, %v4362_v25  ;;  %v2122_v21 = vadd.f32 %v3034_v29, %v2073_v27 }
 0x174   :  { %v3090_v25 = vadd.f32 %v4404_v54, %v4402_v52  ;;  %v3093_v47 = vadd.f32 %v4410_v58, %v4406_v56  ;;  %v3143_v56 = vadd.f32 %v4426_v3, %v4422_v1  ;;  %v3149_v15 = vadd.f32 %v4584_v9, %v4583_v6 }
 0x175   :  { %v2117_v34 = vadd.f32 %v3031_v62, %v2068_v17  ;;  %v2163_v10 = vadd.f32 %v3056_v31, %v2114_v30  ;;  %v2171_v42 = vadd.f32 %v3062_v32, %v2122_v21  ;;  %v3196_v31 = vadd.f32 %v4591_v13, %v4590_v11  ;;  %v4593_v30 = vld [vmem:[#allocation9_spill] sm:$0xff] }
 0x176   :  { %v4595_v21 = vld [vmem:[#allocation13_spill] sm:$0xff] }
 0x177   :  { %v2166_v41 = vadd.f32 %v3059_v7, %v2117_v34  ;;  %v2212_v51 = vadd.f32 %v3084_v36, %v2163_v10  ;;  %v2220_v52 = vadd.f32 %v3090_v25, %v2171_v42  ;;  %v4592_v7 = vld [vmem:[#allocation8_spill] sm:$0xff] }
 0x178   :  { %v4589_v24 = vld [vmem:[#allocation14_spill] sm:$0xff]  ;;  %v3199_v32 = vadd.f32 %v4593_v30, %v4592_v7 }
 0x179   :  { %v2215_v50 = vadd.f32 %v3087_v40, %v2166_v41  ;;  %v2261_v54 = vadd.f32 %v3112_v43, %v2212_v51  ;;  %v2269_v0 = vadd.f32 %v3118_v48, %v2220_v52  ;;  %v4597_v41 = vld [vmem:[#allocation15_spill] sm:$0xff] }
 0x17a   :  { %v4598_v40 = vld [vmem:[#allocation17_spill] sm:$0xff] }
 0x17b   :  { %v2264_v59 = vadd.f32 %v3115_v49, %v2215_v50  ;;  %v2310_v17 = vadd.f32 %v3140_v55, %v2261_v54  ;;  %v3205_v42 = vadd.f32 %v4598_v40, %v4597_v41 }
 0x17d   :  { %v2313_v3 = vadd.f32 %v3143_v56, %v2264_v59  ;;  %v2359_v29 = vadd.f32 %v3168_v2, %v2310_v17 }
 0x182   :  { %v4470_v16 = vpop.f32.mrf.mxu0 }
 0x183   :  { %4581 = vst [vmem:[#allocation16_spill] sm:$0xff] %v4470_v16  ;;  %v2027_v16 = vadd.f32 %v2981_v22, %v1978_v18  ;;  %v4587_v18 = vld [vmem:[#allocation10_spill] sm:$0xff]  ;;  %v4588_v22 = vld [vmem:[#allocation12_spill] sm:$0xff] }
 0x184   :  { %v4479_v23 = vpop.f32.mrf.mxu0  ;;  %v4481_v12 = vpop.f32.mrf.mxu1  ;;  %v3174_v1 = vadd.f32 %v4587_v18, %v4454_v19  ;;  %v3177_v62 = vadd.f32 %v4589_v24, %v4588_v22 }
 0x185   :  { %v2076_v33 = vadd.f32 %v3009_v14, %v2027_v16  ;;  %v3146_v14 = vadd.f32 %v4434_v8, %v4430_v5  ;;  %v4585_v16 = vld [vmem:[#allocation5_spill] sm:$0xff] }
 0x186   :  { %v4489_v20 = vpop.f32.mrf.mxu0  ;;  %v4491_v26 = vpop.f32.mrf.mxu1  ;;  %v3171_v63 = vadd.f32 %v4586_v60, %v4585_v16 }
 0x187   :  { %v2125_v38 = vadd.f32 %v3037_v28, %v2076_v33  ;;  %v2318_v8 = vadd.f32 %v3146_v14, %v2269_v0 }
 0x188   :  { %v3226_v37 = vpop.f32.mrf.mxu0  ;;  %v4502_v39 = vpop.f32.mrf.mxu1  ;;  %v2362_v28 = vadd.f32 %v3171_v63, %v2313_v3 }
 0x189   :  { %v2174_v45 = vadd.f32 %v3065_v35, %v2125_v38  ;;  %v2367_v34 = vadd.f32 %v3174_v1, %v2318_v8  ;;  %v4594_v35 = vld [vmem:[#allocation11_spill] sm:$0xff] }
 0x18a   :  { %v3228_v44 = vpop.f32.mrf.mxu0  ;;  %v3254_v46 = vpop.f32.mrf.mxu1  ;;  %v3202_v19 = vadd.f32 %v4595_v21, %v4594_v35  ;;  %v4596_v10 = vld [vmem:[#allocation16_spill] sm:$0xff]  ;;  %v2411_v51 = vadd.f32 %v3199_v32, %v2362_v28 }
 0x18b   :  { %v2223_v57 = vadd.f32 %v3093_v47, %v2174_v45  ;;  %v3224_v36 = vadd.f32 %v4479_v23, %v4596_v10  ;;  %v2408_v45 = vadd.f32 %v3196_v31, %v2359_v29  ;;  %v3227_v47 = vadd.f32 %v3226_v37, %v4489_v20 }
 0x18c   :  { %v3229_v58 = vpop.f32.mrf.mxu0  ;;  %v3256_v61 = vpop.f32.mrf.mxu1  ;;  %v2416_v48 = vadd.f32 %v3202_v19, %v2367_v34  ;;  %v3255_v59 = vadd.f32 %v3254_v46, %v4502_v39 }
 0x18d   :  { %v2272_v4 = vadd.f32 %v3121_v53, %v2223_v57  ;;  %v3230_v49 = vadd.f32 %v3229_v58, %v3228_v44  ;;  %v2457_v50 = vadd.f32 %v3224_v36, %v2408_v45  ;;  %v3252_v53 = vadd.f32 %v4491_v26, %v4481_v12 }
 0x18e   :  { %v3231_v27 = vpop.f32.mrf.mxu0  ;;  %v3257_v5 = vpop.f32.mrf.mxu1  ;;  %v2460_v57 = vadd.f32 %v3227_v47, %v2411_v51  ;;  %v2906_v51 = vld [vmem:[%s4565_s4] ss:$0 sm:$0xff] }
 0x18f   :  { %v2321_v33 = vadd.f32 %v3149_v15, %v2272_v4  ;;  %v2465_v56 = vadd.f32 %v3230_v49, %v2416_v48  ;;  %v3258_v0 = vadd.f32 %v3257_v5, %v3256_v61  ;;  %v2506_v20 = vadd.f32 %v3252_v53, %v2457_v50 }
 0x190   :  { %v3232_v25 = vpop.f32.mrf.mxu0  ;;  %v3259_v43 = vpop.f32.mrf.mxu1  ;;  %v2509_v6 = vadd.f32 %v3255_v59, %v2460_v57 }
 0x191   :  { %v2370_v38 = vadd.f32 %v3177_v62, %v2321_v33  ;;  %v3233_v52 = vadd.f32 %v3232_v25, %v3231_v27  ;;  %v2514_v44 = vadd.f32 %v3258_v0, %v2465_v56  ;;  %v2905_v25 = vld [vmem:[%s4564_s3] ss:$0 sm:$0xff] }
 0x192   :  { %v3260_v55 = vpop.f32.mrf.mxu1 }
 0x193   :  { %v2419_v54 = vadd.f32 %v3205_v42, %v2370_v38  ;;  %v3261_v4 = vadd.f32 %v3260_v55, %v3259_v43 }
 0x195   :  { %v2468_v2 = vadd.f32 %v3233_v52, %v2419_v54 }
 0x197   :  { %v2517_v12 = vadd.f32 %v3261_v4, %v2468_v2 }
 0x1a2   :  { %v3290_v23 = vpop.f32.mrf.mxu0 }
 0x1a3   :  { %v2563_v15 = vadd.f32 %v3290_v23, %v2514_v44 }
 0x1a4   :  { %v2554_v14 = vpop.f32.mrf.mxu0 }
 0x1a5   :  { %v2555_v58 = vadd.f32 %v2554_v14, %v2506_v20  ;;  %v2571_v17 = vmax.f32 %v2563_v15, 0.0 }
 0x1a6   :  { %v3291_v37 = vpop.f32.mrf.mxu0 }
 0x1a7   :  { %v2569_v16 = vmax.f32 %v2555_v58, 0.0  ;;  %v2566_v60 = vadd.f32 %v3291_v37, %v2517_v12 }
 0x1a8   :  { %v2557_v9 = vpop.f32.mrf.mxu0 }
 0x1a9   :  { %v2558_v26 = vadd.f32 %v2557_v9, %v2509_v6  ;;  %v2572_v39 = vmax.f32 %v2566_v60, 0.0 }
 0x1ab   :  { %v2570_v63 = vmax.f32 %v2558_v26, 0.0 }
 0x1ad   :  { %v2573_v18 = vadd.f32 %v2570_v63, %v2569_v16 }
 0x1af   :  { %v2574_v46 = vadd.f32 %v2573_v18, %v2571_v17 }
 0x1b1   :  { %v2575_v61 = vadd.f32 %v2574_v46, %v2572_v39 }
 0x1b3   :  { %v2576_v1 = vrot.slane %v2575_v61, 4 }
 0x1b5   :  { %v2577_v3 = vadd.f32 %v2576_v1, %v2575_v61 }
 0x1b7   :  { %v2578_v22 = vrot.slane %v2577_v3, 2 }
 0x1b9   :  { %v2579_v24 = vadd.f32 %v2578_v22, %v2577_v3 }
 0x1bb   :  { %v2580_v62 = vrot.slane %v2579_v24, 1 }
 0x1bd   :  { %v2581_v27 = vadd.f32 %v2580_v62, %v2579_v24 }
 0x1bf   :  { %v2583_v5 = vmul.f32 0.03125, %v2581_v27 }
 0x1c1   :  { %v2584_v8 = vsub.f32 %v2569_v16, %v2583_v5  ;;  %v2585_v29 = vsub.f32 %v2570_v63, %v2583_v5  ;;  %v2586_v11 = vsub.f32 %v2571_v17, %v2583_v5  ;;  %v2587_v13 = vsub.f32 %v2572_v39, %v2583_v5 }
 0x1c3   :  { %v2588_v31 = vmul.f32 %v2584_v8, %v2584_v8  ;;  %v2589_v33 = vmul.f32 %v2585_v29, %v2585_v29  ;;  %v2590_v28 = vmul.f32 %v2586_v11, %v2586_v11  ;;  %v2591_v30 = vmul.f32 %v2587_v13, %v2587_v13 }
 0x1c5   :  { %v2592_v7 = vadd.f32 %v2589_v33, %v2588_v31 }
 0x1c7   :  { %v2593_v32 = vadd.f32 %v2592_v7, %v2590_v28 }
 0x1c9   :  { %v2594_v34 = vadd.f32 %v2593_v32, %v2591_v30 }
 0x1cb   :  { %v2595_v35 = vrot.slane %v2594_v34, 4 }
 0x1cd   :  { %v2596_v21 = vadd.f32 %v2595_v35, %v2594_v34 }
 0x1cf   :  { %v2597_v19 = vrot.slane %v2596_v21, 2 }
 0x1d1   :  { %v2598_v10 = vadd.f32 %v2597_v19, %v2596_v21 }
 0x1d3   :  { %v2599_v36 = vrot.slane %v2598_v10, 1 }
 0x1d5   :  { %v2600_v38 = vadd.f32 %v2599_v36, %v2598_v10 }
 0x1d7   :  { %v2601_v41 = vmul.f32 0.03125, %v2600_v38 }
 0x1d9   :  { %v2602_v40 = vadd.f32 1e-05, %v2601_v41 }
 0x1db   :  { %3566 = vrsqrt.f32 %v2602_v40 }
 0x1e8   :  { %v3567_v42 = vpop.eup %3566 }
 0x1e9   :  { %v2604_v43 = vmul.f32 %v3567_v42, %v2584_v8  ;;  %v2605_v45 = vmul.f32 %v3567_v42, %v2585_v29  ;;  %v2606_v47 = vmul.f32 %v3567_v42, %v2586_v11  ;;  %v2607_v49 = vmul.f32 %v3567_v42, %v2587_v13 }
 0x1eb   :  { %v2615_v48 = vmul.f32 %v2905_v25, %v2604_v43  ;;  %v2616_v50 = vmul.f32 %v2905_v25, %v2605_v45  ;;  %v2617_v53 = vmul.f32 %v2905_v25, %v2606_v47  ;;  %v2618_v52 = vmul.f32 %v2905_v25, %v2607_v49 }
 0x1ed   :  { %v2626_v54 = vadd.f32 %v2906_v51, %v2615_v48  ;;  %v2627_v55 = vadd.f32 %v2906_v51, %v2616_v50  ;;  %v2628_v23 = vadd.f32 %v2906_v51, %v2617_v53  ;;  %v2629_v57 = vadd.f32 %v2906_v51, %v2618_v52 }
 0x1ef   :  { %v2918_v59 = vpack.c.bf16 %v2627_v55, %v2626_v54  ;;  %v2923_v56 = vpack.c.bf16 %v2629_v57, %v2628_v23 }
 0x1f1   :  { %2919 = vst [vmem:[%s4566_s5] sm:$0xff] %v2918_v59   ;;  %2925 = vst [vmem:[%s4566_s5 + $0x8] sm:$0xff] %v2923_v56  }

// kernel: critic_forward.7
= control target key start
LH: loop header
LB: loop body
LE: loop exit
PB: predicated region body
PF: predicated region fallthrough
CT: control target
= control target key end

     0   :  { %v2918_v21 = vmov 1966171168   ;;  %v218_v23 = vlaneseq  ;;  %vm2920_vm0 = vmmov 0   ;;  %vm921_vm1 = vcmask 1041408   ;;  %s3720_s2 = inlined_call_operand.vmem [shape: bf16[1152,128], index: 2, kind: input, shape index: {}]   ;;  %s3721_s0 = inlined_call_operand.vmem [shape: bf16[2,1152], index: 0, kind: input, shape index: {}]   ;;  %s3722_s6 = inlined_call_operand.vmem [shape: bf16[128,256], index: 6, kind: input, shape index: {}]   ;;  %s3723_s3 = inlined_call_operand.vmem [shape: f32[1,128], index: 3, kind: input, shape index: {}]   ;;  %s3724_s4 = inlined_call_operand.vmem [shape: f32[1,128], index: 4, kind: input, shape index: {}]   ;;  %s3725_s5 = inlined_call_operand.vmem [shape: f32[1,128], index: 5, kind: input, shape index: {}]   ;;  %s3726_s10 = inlined_call_operand.vmem [shape: bf16[256,512], index: 10, kind: input, shape index: {}]   ;;  %s3727_s13 = inlined_call_operand.vmem [shape: bf16[128,128], index: 13, kind: input, shape index: {}]   ;;  %s3728_s12 = inlined_call_operand.vmem [shape: bf16[512,128], index: 12, kind: input, shape index: {}]   ;;  %s3729_s7 = inlined_call_operand.vmem [shape: f32[1,256], index: 7, kind: input, shape index: {}]   ;;  %s3730_s8 = inlined_call_operand.vmem [shape: f32[1,256], index: 8, kind: input, shape index: {}]   ;;  %s3731_s9 = inlined_call_operand.vmem [shape: f32[1,256], index: 9, kind: input, shape index: {}]   ;;  %s3732_s1 = inlined_call_operand.vmem [shape: bf16[2,128], index: 1, kind: input, shape index: {}]   ;;  %s3733_s15 = inlined_call_operand.vmem [shape: bf16[128,1], index: 15, kind: input, shape index: {}]   ;;  %s3734_s11 = inlined_call_operand.vmem [shape: f32[1,512], index: 11, kind: input, shape index: {}]   ;;  %s3735_s16 = inlined_call_operand.<no memory space> [shape: f32[1,1], index: 16, kind: input, shape index: {}]   ;;  %s3736_s14 = inlined_call_operand.vmem [shape: f32[1,128], index: 14, kind: input, shape index: {}]   ;;  %s3737_s17 = inlined_call_operand.vmem [shape: f32[2,1], index: 17, kind: output, shape index: {}]  }
   0x1   :  { %3740 = sst [smem:[#allocation3_spill]] %s3720_s2  ;;  %v216_v22 = vunpack.c.l.s4 %v2918_v21  ;;  %vm2236_vm2 = vcmask 1024  }
   0x2   :  { %3741 = sst [smem:[#allocation4_spill]] %s3721_s0  ;;  %v3087_v29 = vshrl.u32 %v218_v23, 7 }
   0x3   :  { %s3742_s26 = sld [smem:[#allocation3_spill]]  ;;  %v217_v28 = vunpack.c.0.s8 %v216_v22 }
   0x4   :  { %s3743_s19 = sld [smem:[#allocation4_spill]] }
   0x5   :  { %v3102_v34 = vsub.s32 %v217_v28, %v3087_v29 }
   0x9   :  { %v2671_v0 = vld [vmem:[%s3742_s26 + $0x78] sm:$0xff]   ;;  %v2675_v4 = vld [vmem:[%s3742_s26 + $0x70] sm:$0xff]   ;;  %v2679_v8 = vld [vmem:[%s3742_s26 + $0x68] sm:$0xff]  }
   0xa   :  { %v2672_v1 = vld [vmem:[%s3742_s26 + $0x38] sm:$0xff]   ;;  %2448 = vmatprep.subr.bf16.mxu0 %v2671_v0  ;;  %v2676_v5 = vld [vmem:[%s3742_s26 + $0x30] sm:$0xff]   ;;  %v2680_v9 = vld [vmem:[%s3742_s26 + $0x28] sm:$0xff]  }
   0xb   :  { %v2673_v2 = vld [vmem:[%s3742_s26 + $0xf8] sm:$0xff]   ;;  %2449 = vmatpush3.bf16.msra.mxu0 %v2672_v1  ;;  %v2677_v6 = vld [vmem:[%s3742_s26 + $0xf0] sm:$0xff]   ;;  %v2681_v10 = vld [vmem:[%s3742_s26 + $0xe8] sm:$0xff]  }
   0xc   :  { %v2674_v3 = vld [vmem:[%s3742_s26 + $0xb8] sm:$0xff]   ;;  %2470 = vmatprep.subr.bf16.mxu1 %v2673_v2  ;;  %2450 = vmatprep.subr.bf16.mxu0 %v2675_v4  ;;  %v2678_v7 = vld [vmem:[%s3742_s26 + $0xb0] sm:$0xff]   ;;  %v2682_v11 = vld [vmem:[%s3742_s26 + $0xa8] sm:$0xff]  }
   0xd   :  { %2471 = vmatpush3.bf16.msra.mxu1 %v2674_v3  ;;  %v2683_v12 = vld [vmem:[%s3742_s26 + $0x60] sm:$0xff]   ;;  %v2687_v16 = vld [vmem:[%s3742_s26 + $0x58] sm:$0xff]   ;;  %v2691_v20 = vld [vmem:[%s3742_s26 + $0x50] sm:$0xff]  }
   0xe   :  { %2472 = vmatprep.subr.bf16.mxu1 %v2677_v6  ;;  %v2684_v13 = vld [vmem:[%s3742_s26 + $0x20] sm:$0xff]   ;;  %v2688_v17 = vld [vmem:[%s3742_s26 + $0x18] sm:$0xff]   ;;  %v2692_v24 = vld [vmem:[%s3742_s26 + $0x10] sm:$0xff]  }
   0xf   :  { %2451 = vmatpush3.bf16.msra.mxu0 %v2676_v5  ;;  %v2685_v14 = vld [vmem:[%s3742_s26 + $0xe0] sm:$0xff]   ;;  %v2689_v18 = vld [vmem:[%s3742_s26 + $0xd8] sm:$0xff]   ;;  %v2693_v25 = vld [vmem:[%s3742_s26 + $0xd0] sm:$0xff]  }
  0x10   :  { %2452 = vmatprep.subr.bf16.mxu0 %v2679_v8  ;;  %v2686_v15 = vld [vmem:[%s3742_s26 + $0xa0] sm:$0xff]   ;;  %v2690_v19 = vld [vmem:[%s3742_s26 + $0x98] sm:$0xff]   ;;  %v2694_v26 = vld [vmem:[%s3742_s26 + $0x90] sm:$0xff]  }
  0x11   :  { %2473 = vmatpush3.bf16.msra.mxu1 %v2678_v7  ;;  %v2695_v27 = vld [vmem:[%s3742_s26 + $0x48] sm:$0xff]   ;;  %v2699_v33 = vld [vmem:[%s3742_s26 + $0x40] sm:$0xff]   ;;  %v2704_v41 = vld [vmem:[%s3742_s26 + $0x178] sm:$0xff]  }
  0x12   :  { %2474 = vmatprep.subr.bf16.mxu1 %v2681_v10  ;;  %v2696_v30 = vld [vmem:[%s3742_s26 + $0x8] sm:$0xff]   ;;  %v2700_v35 = vld [vmem:[%s3742_s26] sm:$0xff]   ;;  %v2706_v45 = vld [vmem:[%s3742_s26 + $0x1f8] sm:$0xff]  }
  0x13   :  { %2453 = vmatpush3.bf16.msra.mxu0 %v2680_v9  ;;  %v2697_v31 = vld [vmem:[%s3742_s26 + $0xc8] sm:$0xff]   ;;  %v2701_v36 = vld [vmem:[%s3742_s26 + $0xc0] sm:$0xff]   ;;  %v2705_v47 = vld [vmem:[%s3742_s26 + $0x138] sm:$0xff]  }
  0x14   :  { %2454 = vmatprep.subr.bf16.mxu0 %v2683_v12  ;;  %v2698_v32 = vld [vmem:[%s3742_s26 + $0x88] sm:$0xff]   ;;  %v59_v37 = vld [vmem:[%s3743_s19] sm:$0xff]  ;;  %v2708_v50 = vld [vmem:[%s3742_s26 + $0x170] sm:$0xff]  }
  0x15   :  { %2475 = vmatpush3.bf16.msra.mxu1 %v2682_v11  ;;  %v214_v38 = vcombine.high %v59_v37, %v59_v37  ;;  %v221_v39 = vrot.slane %v59_v37, %v3102_v34  ;;  %v2703_v40 = vld [vmem:[%s3742_s26 + $0x80] sm:$0xff]   ;;  %v2707_v52 = vld [vmem:[%s3742_s26 + $0x1b8] sm:$0xff]   ;;  %v2710_v54 = vld [vmem:[%s3742_s26 + $0x1f0] sm:$0xff]  }
  0x16   :  { %2476 = vmatprep.subr.bf16.mxu1 %v2685_v14  ;;  %v2709_v55 = vld [vmem:[%s3742_s26 + $0x130] sm:$0xff]   ;;  %v2712_v57 = vld [vmem:[%s3742_s26 + $0x168] sm:$0xff]   ;;  %v2716_v61 = vld [vmem:[%s3742_s26 + $0x160] sm:$0xff]  }
  0x17   :  { %2455 = vmatpush3.bf16.msra.mxu0 %v2684_v13  ;;  %v229_v42 = vcombine.high %v221_v39, %v221_v39  ;;  %v237_v43 = vrot.slane %v221_v39, %v3102_v34  ;;  %v3122_v44 = vrot.slane %v214_v38, %v3102_v34  ;;  %v2711_v58 = vld [vmem:[%s3742_s26 + $0x1b0] sm:$0xff]   ;;  %v2714_v59 = vld [vmem:[%s3742_s26 + $0x1e8] sm:$0xff]   ;;  %v2718_v63 = vld [vmem:[%s3742_s26 + $0x1e0] sm:$0xff]  }
  0x18   :  { %2456 = vmatprep.subr.bf16.mxu0 %v2687_v16  ;;  %v2713_v60 = vld [vmem:[%s3742_s26 + $0x128] sm:$0xff]   ;;  %v2717_v0 = vld [vmem:[%s3742_s26 + $0x120] sm:$0xff]   ;;  %v2720_v1 = vld [vmem:[%s3742_s26 + $0x158] sm:$0xff]  }
  0x19   :  { %2477 = vmatpush3.bf16.msra.mxu1 %v2686_v15  ;;  %v251_v46 = vrot.slane %v229_v42, %v3102_v34  ;;  %v230_v48 = vcombine.high %v3122_v44, %v3122_v44  ;;  %v259_v49 = vcombine.high %v237_v43, %v237_v43  ;;  %v2715_v62 = vld [vmem:[%s3742_s26 + $0x1a8] sm:$0xff]   ;;  %v2719_v2 = vld [vmem:[%s3742_s26 + $0x1a0] sm:$0xff]   ;;  %v2722_v3 = vld [vmem:[%s3742_s26 + $0x1d8] sm:$0xff]  }
  0x1a   :  { %2478 = vmatprep.subr.bf16.mxu1 %v2689_v18  ;;  %v2721_v4 = vld [vmem:[%s3742_s26 + $0x118] sm:$0xff]   ;;  %v2724_v5 = vld [vmem:[%s3742_s26 + $0x150] sm:$0xff]   ;;  %v2728_v9 = vld [vmem:[%s3742_s26 + $0x148] sm:$0xff]  }
  0x1b   :  { %2457 = vmatpush3.bf16.msra.mxu0 %v2688_v17  ;;  %750 = vmatprep.mubr.bf16.mxu0 %v251_v46  ;;  %v261_v51 = vcombine.high %v251_v46, %v251_v46  ;;  %v258_v53 = vrot.slane %v230_v48, %v3102_v34  ;;  %v2723_v6 = vld [vmem:[%s3742_s26 + $0x198] sm:$0xff]   ;;  %v2726_v7 = vld [vmem:[%s3742_s26 + $0x1d0] sm:$0xff]   ;;  %v2730_v11 = vld [vmem:[%s3742_s26 + $0x1c8] sm:$0xff]   ;;  %v244_v17 = vrot.slane %v3122_v44, %v3102_v34  ;;  %v2921_v48 = vmov 0  }
  0x1c   :  { %2458 = vmatprep.subr.bf16.mxu0 %v2691_v20  ;;  %v2725_v8 = vld [vmem:[%s3742_s26 + $0x110] sm:$0xff]   ;;  %v2729_v12 = vld [vmem:[%s3742_s26 + $0x108] sm:$0xff]   ;;  %v2732_v13 = vld [vmem:[%s3742_s26 + $0x140] sm:$0xff]   ;;  %v2919_v20 = vmov 0.0  }
  0x1d   :  { %2479 = vmatpush3.bf16.msra.mxu1 %v2690_v19  ;;  %790 = vmatprep.mubr.bf16.mxu1 %v261_v51  ;;  %v262_v56 = vcombine.high %v258_v53, %v258_v53  ;;  %v2727_v10 = vld [vmem:[%s3742_s26 + $0x190] sm:$0xff]   ;;  %v2731_v14 = vld [vmem:[%s3742_s26 + $0x188] sm:$0xff]   ;;  %v2734_v15 = vld [vmem:[%s3742_s26 + $0x1c0] sm:$0xff]   ;;  %v260_v21 = vcombine.high %v244_v17, %v244_v17 }
  0x1e   :  { %2480 = vmatprep.subr.bf16.mxu1 %v2693_v25  ;;  %v2733_v16 = vld [vmem:[%s3742_s26 + $0x100] sm:$0xff]   ;;  %v2736_v19 = vld [vmem:[%s3742_s26 + $0x238] sm:$0xff]   ;;  %v2737_v22 = vld [vmem:[%s3742_s26 + $0x230] sm:$0xff]  }
  0x1f   :  { %2459 = vmatpush3.bf16.msra.mxu0 %v2692_v24  ;;  %v2735_v18 = vld [vmem:[%s3742_s26 + $0x180] sm:$0xff]   ;;  %v2243_v23 = vld.sshfl [vmem:[%s3743_s19 + $0x8] sm:$0x1 pattern:$0x75316420]  ;;  %v2741_v28 = vld [vmem:[%s3742_s26 + $0x210] sm:$0xff]  }
  0x20   :  { %2460 = vmatprep.subr.bf16.mxu0 %v2695_v27  ;;  %v276_v24 = vrot.slane %v2243_v23, %v3102_v34  ;;  %v2738_v25 = vld [vmem:[%s3742_s26 + $0x228] sm:$0xff]   ;;  %v2740_v27 = vld [vmem:[%s3742_s26 + $0x218] sm:$0xff]  }
  0x21   :  { %2481 = vmatpush3.bf16.msra.mxu1 %v2694_v26  ;;  %v2739_v26 = vld [vmem:[%s3742_s26 + $0x220] sm:$0xff]   ;;  %v2750_v37 = vld [vmem:[%s3722_s6 + $0x50] ss:$8 sps:$4 sm:$0xff]   ;;  %v2764_v44 = vld [vmem:[%s3722_s6 + $0x14] ss:$8 sps:$4 sm:$0xff]  }
  0x22   :  { %2482 = vmatprep.subr.bf16.mxu1 %v2697_v31  ;;  %v2743_v31 = vld [vmem:[%s3742_s26 + $0x200] sm:$0xff]  }
  0x23   :  { %2461 = vmatpush3.bf16.msra.mxu0 %v2696_v30  ;;  %v2742_v30 = vld [vmem:[%s3742_s26 + $0x208] sm:$0xff]  }
  0x24   :  { %2462 = vmatprep.subr.bf16.mxu0 %v2699_v33  ;;  %v2744_v33 = vld [vmem:[%s3722_s6 + $0x70] ss:$8 sps:$4 sm:$0xff]   ;;  %v2749_v34 = vld [vmem:[%s3722_s6 + $0x64] ss:$8 sps:$4 sm:$0xff]   ;;  %v2753_v39 = vld [vmem:[%s3722_s6 + $0x40] ss:$8 sps:$4 sm:$0xff]  }
  0x25   :  { %2483 = vmatpush3.bf16.msra.mxu1 %v2698_v32  ;;  %v2746_v32 = vld [vmem:[%s3722_s6 + $0x74] ss:$8 sps:$4 sm:$0xff]   ;;  %v2755_v38 = vld [vmem:[%s3722_s6 + $0x44] ss:$8 sps:$4 sm:$0xff]   ;;  %v2765_v46 = vld [vmem:[%s3722_s6] ss:$8 sps:$4 sm:$0xff]  }
  0x26   :  { %2484 = vmatprep.subr.bf16.mxu1 %v2701_v36  ;;  %v2752_v36 = vld [vmem:[%s3722_s6 + $0x54] ss:$8 sps:$4 sm:$0xff]   ;;  %v2761_v42 = vld [vmem:[%s3722_s6 + $0x24] ss:$8 sps:$4 sm:$0xff]  }
  0x27   :  { %2463 = vmatpush3.bf16.msra.mxu0 %v2700_v35  ;;  %v2747_v35 = vld [vmem:[%s3722_s6 + $0x60] ss:$8 sps:$4 sm:$0xff]  }
  0x28   :  { %2492 = vmatprep.subr.bf16.mxu0 %v2704_v41  ;;  %v2756_v41 = vld [vmem:[%s3722_s6 + $0x30] ss:$8 sps:$4 sm:$0xff]  }
  0x29   :  { %2485 = vmatpush3.bf16.msra.mxu1 %v2703_v40  ;;  %v2758_v40 = vld [vmem:[%s3722_s6 + $0x34] ss:$8 sps:$4 sm:$0xff]  }
  0x2a   :  { %2514 = vmatprep.subr.bf16.mxu1 %v2706_v45  ;;  %751 = vmatmul.mubr.bf16.vlgmr.msra.gmra.mxu0 %v237_v43  ;;  %v2759_v43 = vld [vmem:[%s3722_s6 + $0x20] ss:$8 sps:$4 sm:$0xff]   ;;  %v2762_v45 = vld [vmem:[%s3722_s6 + $0x10] ss:$8 sps:$4 sm:$0xff]  }
  0x2b   :  { %2493 = vmatpush3.bf16.msra.mxu0 %v2705_v47  ;;  %830 = vmatprep.mubr.bf16.mxu0 %v258_v53  ;;  %v2767_v47 = vld [vmem:[%s3722_s6 + $0x4] ss:$8 sps:$4 sm:$0xff]  }
  0x2c   :  { %791 = vmatmul.mubr.bf16.vlgmr.msra.gmra.mxu1 %v259_v49  ;;  %2494 = vmatprep.subr.bf16.mxu0 %v2708_v50 }
  0x2d   :  { %2515 = vmatpush3.bf16.msra.mxu1 %v2707_v52  ;;  %870 = vmatprep.mubr.bf16.mxu1 %v262_v56 }
  0x2e   :  { %2516 = vmatprep.subr.bf16.mxu1 %v2710_v54 }
  0x2f   :  { %2495 = vmatpush3.bf16.msra.mxu0 %v2709_v55 }
  0x30   :  { %2496 = vmatprep.subr.bf16.mxu0 %v2712_v57 }
  0x31   :  { %2517 = vmatpush3.bf16.msra.mxu1 %v2711_v58 }
  0x32   :  { %2518 = vmatprep.subr.bf16.mxu1 %v2714_v59 }
  0x33   :  { %2497 = vmatpush3.bf16.msra.mxu0 %v2713_v60 }
  0x34   :  { %2498 = vmatprep.subr.bf16.mxu0 %v2716_v61 }
  0x35   :  { %2519 = vmatpush3.bf16.msra.mxu1 %v2715_v62 }
  0x36   :  { %2520 = vmatprep.subr.bf16.mxu1 %v2718_v63 }
  0x37   :  { %2499 = vmatpush3.bf16.msra.mxu0 %v2717_v0 }
  0x38   :  { %2500 = vmatprep.subr.bf16.mxu0 %v2720_v1 }
  0x39   :  { %2521 = vmatpush3.bf16.msra.mxu1 %v2719_v2  ;;  %v2242_v2 = vld [vmem:[%s3723_s3] ss:$0 sm:$0xff] }
  0x3a   :  { %2522 = vmatprep.subr.bf16.mxu1 %v2722_v3 }
  0x3b   :  { %2501 = vmatpush3.bf16.msra.mxu0 %v2721_v4 }
  0x3c   :  { %2502 = vmatprep.subr.bf16.mxu0 %v2724_v5 }
  0x3d   :  { %2523 = vmatpush3.bf16.msra.mxu1 %v2723_v6 }
  0x3e   :  { %2524 = vmatprep.subr.bf16.mxu1 %v2726_v7 }
  0x3f   :  { %2503 = vmatpush3.bf16.msra.mxu0 %v2725_v8 }
  0x40   :  { %2504 = vmatprep.subr.bf16.mxu0 %v2728_v9 }
  0x41   :  { %2525 = vmatpush3.bf16.msra.mxu1 %v2727_v10 }
  0x42   :  { %2526 = vmatprep.subr.bf16.mxu1 %v2730_v11 }
  0x43   :  { %2505 = vmatpush3.bf16.msra.mxu0 %v2729_v12 }
  0x44   :  { %2506 = vmatprep.subr.bf16.mxu0 %v2732_v13 }
  0x45   :  { %2527 = vmatpush3.bf16.msra.mxu1 %v2731_v14 }
  0x46   :  { %2528 = vmatprep.subr.bf16.mxu1 %v2734_v15 }
  0x47   :  { %2507 = vmatpush3.bf16.msra.mxu0 %v2733_v16 }
  0x48   :  { %2607 = vmatprep.subr.bf16.mxu0 %v2919_v20 }
  0x49   :  { %2529 = vmatpush3.bf16.msra.mxu1 %v2735_v18 }
  0x4a   :  { %831 = vmatmul.mubr.bf16.vlgmr.msra.gmra.mxu0 %v244_v17  ;;  %1067 = vmatprep.subr.bf16.mxu1 %v2746_v32 }
  0x4b   :  { %2608 = vmatpush3.bf16.msra.mxu0 %v2736_v19  ;;  %2623 = vmatprep.mubr.msk.bf16.mxu0 %vm2920_vm0, %v2919_v20 }
  0x4c   :  { %871 = vmatmul.mubr.bf16.vlgmr.msra.gmra.mxu1 %v260_v21  ;;  %2609 = vmatprep.subr.bf16.mxu0 %v2919_v20 }
  0x4d   :  { %1068 = vmatpush1.bf16.msra.mxu1 %v2744_v33  ;;  %1099 = vmatprep.mubr.bf16.mxu1 %v2921_v48  ;;  %v2776_v48 = vld [vmem:[%s3726_s10 + $0xc4] ss:$16 sps:$4 sm:$0xff]  }
  0x4e   :  { %1069 = vmatprep.subr.bf16.mxu1 %v2749_v34 }
  0x4f   :  { %2610 = vmatpush3.bf16.msra.mxu0 %v2737_v22 }
  0x50   :  { %2611 = vmatprep.subr.bf16.mxu0 %v2919_v20 }
  0x51   :  { %1070 = vmatpush1.bf16.msra.mxu1 %v2747_v35 }
  0x52   :  { %1071 = vmatprep.subr.bf16.mxu1 %v2752_v36 }
  0x53   :  { %2612 = vmatpush3.bf16.msra.mxu0 %v2738_v25 }
  0x54   :  { %2613 = vmatprep.subr.bf16.mxu0 %v2919_v20 }
  0x55   :  { %1072 = vmatpush1.bf16.msra.mxu1 %v2750_v37 }
  0x56   :  { %1073 = vmatprep.subr.bf16.mxu1 %v2755_v38  ;;  %v2316_v38 = vld [vmem:[%s3724_s4] ss:$0 sm:$0xff] }
  0x57   :  { %2614 = vmatpush3.bf16.msra.mxu0 %v2739_v26 }
  0x58   :  { %2615 = vmatprep.subr.bf16.mxu0 %v2919_v20 }
  0x59   :  { %1074 = vmatpush1.bf16.msra.mxu1 %v2753_v39 }
  0x5a   :  { %1075 = vmatprep.subr.bf16.mxu1 %v2758_v40  ;;  %v2317_v40 = vld [vmem:[%s3725_s5] ss:$0 sm:$0xff] }
  0x5b   :  { %2616 = vmatpush3.bf16.msra.mxu0 %v2740_v27 }
  0x5c   :  { %2617 = vmatprep.subr.bf16.mxu0 %v2919_v20 }
  0x5d   :  { %1076 = vmatpush1.bf16.msra.mxu1 %v2756_v41 }
  0x5e   :  { %1077 = vmatprep.subr.bf16.mxu1 %v2761_v42 }
  0x5f   :  { %2618 = vmatpush3.bf16.msra.mxu0 %v2741_v28 }
  0x60   :  { %2619 = vmatprep.subr.bf16.mxu0 %v2919_v20 }
  0x61   :  { %1078 = vmatpush1.bf16.msra.mxu1 %v2759_v43 }
  0x62   :  { %1079 = vmatprep.subr.bf16.mxu1 %v2764_v44  ;;  %v2770_v44 = vld [vmem:[%s3726_s10 + $0xe4] ss:$16 sps:$4 sm:$0xff]  }
  0x63   :  { %2620 = vmatpush3.bf16.msra.mxu0 %v2742_v30 }
  0x64   :  { %2621 = vmatprep.subr.bf16.mxu0 %v2919_v20 }
  0x65   :  { %1080 = vmatpush1.bf16.msra.mxu1 %v2762_v45  ;;  %v2768_v45 = vld [vmem:[%s3726_s10 + $0xe0] ss:$16 sps:$4 sm:$0xff]  }
  0x66   :  { %1081 = vmatprep.subr.bf16.mxu1 %v2767_v47  ;;  %v2773_v47 = vld [vmem:[%s3726_s10 + $0xec] ss:$16 sps:$4 sm:$0xff]  }
  0x67   :  { %2622 = vmatpush3.bf16.msra.mxu0 %v2743_v31 }
  0x68   :  { %1588 = vmatprep.subr.bf16.mxu0 %v2770_v44  ;;  %v2858_v44 = vld [vmem:[%s3726_s10 + $0x100] ss:$16 sps:$4 sm:$0xff]  }
  0x69   :  { %1082 = vmatpush1.bf16.msra.mxu1 %v2765_v46  ;;  %v2771_v46 = vld [vmem:[%s3726_s10 + $0xe8] ss:$16 sps:$4 sm:$0xff]  }
  0x6a   :  { %2624 = vmatmul.mubr.bf16.vlgmr.msra.gmra.mxu0 %v276_v24  ;;  %1629 = vmatprep.subr.bf16.mxu1 %v2773_v47  ;;  %v3517_v47 = vsub.s32 0, %v3087_v29 }
  0x6b   :  { %1589 = vmatpush1.bf16.msra.mxu0 %v2768_v45  ;;  %v2861_v45 = vld [vmem:[%s3726_s10 + $0x108] ss:$16 sps:$4 sm:$0xff]  }
  0x6c   :  { %1590 = vmatprep.subr.bf16.mxu0 %v2776_v48  ;;  %v975_v48 = vld [vmem:[%s3729_s7] sm:$0x3] }
  0xea   :  { %v2464_v49 = vpop.f32.mrf.mxu0 }
  0xec   :  { %v2465_v50 = vpop.f32.mrf.mxu0  ;;  %v2486_v51 = vpop.f32.mrf.mxu1 }
  0xed   :  { %v2466_v1 = vadd.f32 %v2465_v50, %v2464_v49  ;;  %v2779_v49 = vld [vmem:[%s3726_s10 + $0xcc] ss:$16 sps:$4 sm:$0xff]   ;;  %v2774_v50 = vld [vmem:[%s3726_s10 + $0xc0] ss:$16 sps:$4 sm:$0xff]  }
  0xee   :  { %v2467_v52 = vpop.f32.mrf.mxu0  ;;  %v2487_v53 = vpop.f32.mrf.mxu1  ;;  %1591 = vmatpush1.bf16.msra.mxu0 %v2774_v50  ;;  %v980_v50 = vrot.slane %v975_v48, %v3517_v47 }
  0xef   :  { %v753_v3 = vadd.f32 %v2466_v1, %v2242_v2  ;;  %v2488_v4 = vadd.f32 %v2487_v53, %v2486_v51  ;;  %v2777_v51 = vld [vmem:[%s3726_s10 + $0xc8] ss:$16 sps:$4 sm:$0xff]   ;;  %v2782_v52 = vld [vmem:[%s3726_s10 + $0xa4] ss:$16 sps:$4 sm:$0xff]   ;;  %v2785_v53 = vld [vmem:[%s3726_s10 + $0xac] ss:$16 sps:$4 sm:$0xff]  }
  0xf0   :  { %v2468_v54 = vpop.f32.mrf.mxu0  ;;  %v2489_v55 = vpop.f32.mrf.mxu1  ;;  %1592 = vmatprep.subr.bf16.mxu0 %v2782_v52  ;;  %v2803_v1 = vld [vmem:[%s3726_s10 + $0x4c] ss:$16 sps:$4 sm:$0xff]   ;;  %v2798_v2 = vld [vmem:[%s3726_s10 + $0x40] ss:$16 sps:$4 sm:$0xff]  }
  0xf1   :  { %v793_v6 = vadd.f32 %v2488_v4, %v753_v3  ;;  %v2780_v54 = vld [vmem:[%s3726_s10 + $0xa0] ss:$16 sps:$4 sm:$0xff]   ;;  %v2783_v55 = vld [vmem:[%s3726_s10 + $0xa8] ss:$16 sps:$4 sm:$0xff]   ;;  %v2806_v4 = vld [vmem:[%s3726_s10 + $0x24] ss:$16 sps:$4 sm:$0xff]  }
  0xf2   :  { %v2490_v56 = vpop.f32.mrf.mxu1  ;;  %1593 = vmatpush1.bf16.msra.mxu0 %v2780_v54  ;;  %v2801_v3 = vld [vmem:[%s3726_s10 + $0x48] ss:$16 sps:$4 sm:$0xff]  }
  0xf3   :  { %v2788_v56 = vld [vmem:[%s3726_s10 + $0x84] ss:$16 sps:$4 sm:$0xff]  }
  0xf4   :  { %1594 = vmatprep.subr.bf16.mxu0 %v2788_v56 }
 0x10a   :  { %v2508_v57 = vpop.f32.mrf.mxu0 }
 0x10c   :  { %v2509_v58 = vpop.f32.mrf.mxu0  ;;  %v2530_v59 = vpop.f32.mrf.mxu1 }
 0x10d   :  { %v2510_v5 = vadd.f32 %v2509_v58, %v2508_v57  ;;  %v2791_v57 = vld [vmem:[%s3726_s10 + $0x8c] ss:$16 sps:$4 sm:$0xff]   ;;  %v2786_v58 = vld [vmem:[%s3726_s10 + $0x80] ss:$16 sps:$4 sm:$0xff]  }
 0x10e   :  { %v2511_v60 = vpop.f32.mrf.mxu0  ;;  %v2531_v61 = vpop.f32.mrf.mxu1  ;;  %1595 = vmatpush1.bf16.msra.mxu0 %v2786_v58 }
 0x10f   :  { %v833_v7 = vadd.f32 %v2510_v5, %v793_v6  ;;  %v2532_v8 = vadd.f32 %v2531_v61, %v2530_v59  ;;  %v2789_v59 = vld [vmem:[%s3726_s10 + $0x88] ss:$16 sps:$4 sm:$0xff]   ;;  %v2794_v60 = vld [vmem:[%s3726_s10 + $0x64] ss:$16 sps:$4 sm:$0xff]   ;;  %v2797_v61 = vld [vmem:[%s3726_s10 + $0x6c] ss:$16 sps:$4 sm:$0xff]  }
 0x110   :  { %v2512_v62 = vpop.f32.mrf.mxu0  ;;  %v2533_v63 = vpop.f32.mrf.mxu1  ;;  %1596 = vmatprep.subr.bf16.mxu0 %v2794_v60  ;;  %v2809_v5 = vld [vmem:[%s3726_s10 + $0x2c] ss:$16 sps:$4 sm:$0xff]   ;;  %v2804_v6 = vld [vmem:[%s3726_s10 + $0x20] ss:$16 sps:$4 sm:$0xff]  }
 0x111   :  { %v873_v9 = vadd.f32 %v2532_v8, %v833_v7  ;;  %v2792_v62 = vld [vmem:[%s3726_s10 + $0x60] ss:$16 sps:$4 sm:$0xff]   ;;  %v2795_v63 = vld [vmem:[%s3726_s10 + $0x68] ss:$16 sps:$4 sm:$0xff]   ;;  %v2812_v8 = vld [vmem:[%s3726_s10 + $0x4] ss:$16 sps:$4 sm:$0xff]  }
 0x112   :  { %v2534_v0 = vpop.f32.mrf.mxu1  ;;  %1597 = vmatpush1.bf16.msra.mxu0 %v2792_v62  ;;  %v2807_v7 = vld [vmem:[%s3726_s10 + $0x28] ss:$16 sps:$4 sm:$0xff]  }
 0x113   :  { %v2800_v0 = vld [vmem:[%s3726_s10 + $0x44] ss:$16 sps:$4 sm:$0xff]  }
 0x114   :  { %1598 = vmatprep.subr.bf16.mxu0 %v2800_v0 }
 0x116   :  { %1599 = vmatpush1.bf16.msra.mxu0 %v2798_v2 }
 0x117   :  { %1600 = vmatprep.subr.bf16.mxu0 %v2806_v4 }
 0x11a   :  { %1601 = vmatpush1.bf16.msra.mxu0 %v2804_v6 }
 0x11b   :  { %1602 = vmatprep.subr.bf16.mxu0 %v2812_v8 }
 0x12a   :  { %v912_v10 = vpop.f32.mrf.mxu0 }
 0x12b   :  { %v913_v11 = vadd.f32 %v912_v10, %v873_v9  ;;  %v2815_v9 = vld [vmem:[%s3726_s10 + $0xc] ss:$16 sps:$4 sm:$0xff]   ;;  %v2810_v10 = vld [vmem:[%s3726_s10] ss:$16 sps:$4 sm:$0xff]  }
 0x12c   :  { %v2625_v12 = vpop.f32.mrf.mxu0  ;;  %1603 = vmatpush1.bf16.msra.mxu0 %v2810_v10 }
 0x12d   :  { %v918_v13 = vmax.f32 %v913_v11, 0.0  ;;  %v2813_v11 = vld [vmem:[%s3726_s10 + $0x8] ss:$16 sps:$4 sm:$0xff]   ;;  %v2818_v12 = vld [vmem:[%s3726_s10 + $0x1e4] ss:$16 sps:$4 sm:$0xff]  }
 0x12e   :  { %v915_v14 = vpop.f32.mrf.mxu0  ;;  %1604 = vmatprep.subr.bf16.mxu0 %v2818_v12 }
 0x12f   :  { %v922_v15 = vsel %vm921_vm1, %v918_v13, 0.0  ;;  %v2816_v14 = vld [vmem:[%s3726_s10 + $0x1e0] ss:$16 sps:$4 sm:$0xff]  }
 0x130   :  { %v923_v16 = vrot.slane %v922_v15, 4  ;;  %v2626_v17 = vpop.f32.mrf.mxu0  ;;  %1605 = vmatpush2.bf16.msra.mxu0 %v2816_v14 }
 0x131   :  { %v2827_v17 = vld [vmem:[%s3726_s10 + $0x1cc] ss:$16 sps:$4 sm:$0xff]  }
 0x132   :  { %v924_v18 = vadd.f32 %v923_v16, %v922_v15  ;;  %v2819_v15 = vld [vmem:[%s3726_s10 + $0x1e8] ss:$16 sps:$4 sm:$0xff]   ;;  %v2824_v16 = vld [vmem:[%s3726_s10 + $0x1c4] ss:$16 sps:$4 sm:$0xff]  }
 0x133   :  { %1606 = vmatprep.subr.bf16.mxu0 %v2824_v16 }
 0x134   :  { %v925_v19 = vrot.slane %v924_v18, 2 }
 0x136   :  { %v926_v21 = vadd.f32 %v925_v19, %v924_v18  ;;  %v2822_v18 = vld [vmem:[%s3726_s10 + $0x1c0] ss:$16 sps:$4 sm:$0xff]   ;;  %v2825_v19 = vld [vmem:[%s3726_s10 + $0x1c8] ss:$16 sps:$4 sm:$0xff]  }
 0x137   :  { %1607 = vmatpush2.bf16.msra.mxu0 %v2822_v18 }
 0x138   :  { %v927_v22 = vrot.slane %v926_v21, 1 }
 0x13a   :  { %v928_v23 = vadd.f32 %v927_v22, %v926_v21  ;;  %v2830_v21 = vld [vmem:[%s3726_s10 + $0x1a4] ss:$16 sps:$4 sm:$0xff]   ;;  %v2833_v22 = vld [vmem:[%s3726_s10 + $0x1ac] ss:$16 sps:$4 sm:$0xff]  }
 0x13b   :  { %1608 = vmatprep.subr.bf16.mxu0 %v2830_v21 }
 0x13c   :  { %v930_v24 = vmul.f32 0.5, %v928_v23  ;;  %v2828_v23 = vld [vmem:[%s3726_s10 + $0x1a0] ss:$16 sps:$4 sm:$0xff]  }
 0x13d   :  { %1609 = vmatpush2.bf16.msra.mxu0 %v2828_v23 }
 0x13e   :  { %v931_v25 = vsub.f32 %v918_v13, %v930_v24  ;;  %v2821_v13 = vld [vmem:[%s3726_s10 + $0x1ec] ss:$16 sps:$4 sm:$0xff]   ;;  %v2831_v24 = vld [vmem:[%s3726_s10 + $0x1a8] ss:$16 sps:$4 sm:$0xff]  }
 0x140   :  { %v932_v26 = vmul.f32 %v931_v25, %v931_v25 }
 0x142   :  { %v933_v27 = vsel %vm921_vm1, %v932_v26, 0.0  ;;  %v2839_v26 = vld [vmem:[%s3726_s10 + $0x18c] ss:$16 sps:$4 sm:$0xff]  }
 0x143   :  { %v934_v28 = vrot.slane %v933_v27, 4 }
 0x145   :  { %v935_v30 = vadd.f32 %v934_v28, %v933_v27  ;;  %v2834_v27 = vld [vmem:[%s3726_s10 + $0x180] ss:$16 sps:$4 sm:$0xff]   ;;  %v2837_v28 = vld [vmem:[%s3726_s10 + $0x188] ss:$16 sps:$4 sm:$0xff]  }
 0x147   :  { %v936_v31 = vrot.slane %v935_v30, 2 }
 0x149   :  { %v937_v32 = vadd.f32 %v936_v31, %v935_v30  ;;  %v2842_v30 = vld [vmem:[%s3726_s10 + $0x164] ss:$16 sps:$4 sm:$0xff]   ;;  %v2845_v31 = vld [vmem:[%s3726_s10 + $0x16c] ss:$16 sps:$4 sm:$0xff]  }
 0x14b   :  { %v938_v33 = vrot.slane %v937_v32, 1 }
 0x14d   :  { %v939_v34 = vadd.f32 %v938_v33, %v937_v32  ;;  %v2840_v32 = vld [vmem:[%s3726_s10 + $0x160] ss:$16 sps:$4 sm:$0xff]   ;;  %v2843_v33 = vld [vmem:[%s3726_s10 + $0x168] ss:$16 sps:$4 sm:$0xff]  }
 0x14f   :  { %v940_v35 = vmul.f32 0.5, %v939_v34  ;;  %v2848_v34 = vld [vmem:[%s3726_s10 + $0x144] ss:$16 sps:$4 sm:$0xff]  }
 0x151   :  { %v941_v36 = vadd.f32 1e-05, %v940_v35  ;;  %v2851_v35 = vld [vmem:[%s3726_s10 + $0x14c] ss:$16 sps:$4 sm:$0xff]  }
 0x153   :  { %2912 = vrsqrt.f32 %v941_v36  ;;  %v2846_v36 = vld [vmem:[%s3726_s10 + $0x140] ss:$16 sps:$4 sm:$0xff]  }
 0x160   :  { %v2913_v37 = vpop.eup %2912 }
 0x161   :  { %v943_v39 = vmul.f32 %v2913_v37, %v931_v25  ;;  %v2836_v25 = vld [vmem:[%s3726_s10 + $0x184] ss:$16 sps:$4 sm:$0xff]   ;;  %v2849_v37 = vld [vmem:[%s3726_s10 + $0x148] ss:$16 sps:$4 sm:$0xff]  }
 0x162   :  { %1610 = vmatprep.subr.bf16.mxu0 %v2836_v25 }
 0x163   :  { %v950_v41 = vmul.f32 %v2316_v38, %v943_v39  ;;  %1611 = vmatpush2.bf16.msra.mxu0 %v2834_v27  ;;  %v2854_v38 = vld [vmem:[%s3726_s10 + $0x124] ss:$16 sps:$4 sm:$0xff]   ;;  %v2857_v39 = vld [vmem:[%s3726_s10 + $0x12c] ss:$16 sps:$4 sm:$0xff]  }
 0x164   :  { %1612 = vmatprep.subr.bf16.mxu0 %v2842_v30 }
 0x165   :  { %v957_v42 = vadd.f32 %v2317_v40, %v950_v41  ;;  %v2852_v40 = vld [vmem:[%s3726_s10 + $0x120] ss:$16 sps:$4 sm:$0xff]   ;;  %v2855_v41 = vld [vmem:[%s3726_s10 + $0x128] ss:$16 sps:$4 sm:$0xff]  }
 0x167   :  { %v958_v43 = vpack.c.bf16 %v957_v42, %v957_v42  ;;  %1613 = vmatpush2.bf16.msra.mxu0 %v2840_v32  ;;  %v2860_v42 = vld [vmem:[%s3726_s10 + $0x104] ss:$16 sps:$4 sm:$0xff]  }
 0x168   :  { %1614 = vmatprep.subr.bf16.mxu0 %v2848_v34 }
 0x169   :  { %1100 = vmatmul.mubr.bf16.vlgmr.msra.gmra.mxu1 %v958_v43  ;;  %v2863_v43 = vld [vmem:[%s3726_s10 + $0x10c] ss:$16 sps:$4 sm:$0xff]  }
 0x16a   :  { %1630 = vmatpush1.bf16.msra.mxu1 %v2771_v46  ;;  %v2872_v46 = vld [vmem:[%s3728_s12 + $0x78] sm:$0xff]  }
 0x16b   :  { %1631 = vmatprep.subr.bf16.mxu1 %v2779_v49  ;;  %1615 = vmatpush2.bf16.msra.mxu0 %v2846_v36  ;;  %v3523_v49 = vsub.s32 1, %v3087_v29  ;;  %v1110_v36 = vld [vmem:[%s3730_s8] sm:$0x3] }
 0x16c   :  { %1616 = vmatprep.subr.bf16.mxu0 %v2854_v38  ;;  %v1111_v38 = vld [vmem:[%s3731_s9] sm:$0x3] }
 0x16e   :  { %1632 = vmatpush1.bf16.msra.mxu1 %v2777_v51  ;;  %v984_v51 = vrot.slane %v975_v48, %v3523_v49 }
 0x16f   :  { %1633 = vmatprep.subr.bf16.mxu1 %v2785_v53  ;;  %1617 = vmatpush2.bf16.msra.mxu0 %v2852_v40 }
 0x170   :  { %1618 = vmatprep.subr.bf16.mxu0 %v2860_v42 }
 0x172   :  { %1634 = vmatpush1.bf16.msra.mxu1 %v2783_v55 }
 0x173   :  { %1635 = vmatprep.subr.bf16.mxu1 %v2791_v57  ;;  %1619 = vmatpush2.bf16.msra.mxu0 %v2858_v44 }
 0x174   :  { %2627 = vmatprep.subr.bf16.mxu0 %v2919_v20 }
 0x176   :  { %1636 = vmatpush1.bf16.msra.mxu1 %v2789_v59 }
 0x177   :  { %1637 = vmatprep.subr.bf16.mxu1 %v2797_v61 }
 0x17a   :  { %1638 = vmatpush1.bf16.msra.mxu1 %v2795_v63 }
 0x17b   :  { %1639 = vmatprep.subr.bf16.mxu1 %v2803_v1 }
 0x17e   :  { %1640 = vmatpush1.bf16.msra.mxu1 %v2801_v3 }
 0x17f   :  { %1641 = vmatprep.subr.bf16.mxu1 %v2809_v5 }
 0x182   :  { %1642 = vmatpush1.bf16.msra.mxu1 %v2807_v7 }
 0x183   :  { %1643 = vmatprep.subr.bf16.mxu1 %v2815_v9 }
 0x186   :  { %1644 = vmatpush1.bf16.msra.mxu1 %v2813_v11 }
 0x187   :  { %1645 = vmatprep.subr.bf16.mxu1 %v2821_v13 }
 0x18a   :  { %1646 = vmatpush2.bf16.msra.mxu1 %v2819_v15 }
 0x18b   :  { %1647 = vmatprep.subr.bf16.mxu1 %v2827_v17 }
 0x18e   :  { %1648 = vmatpush2.bf16.msra.mxu1 %v2825_v19 }
 0x18f   :  { %1649 = vmatprep.subr.bf16.mxu1 %v2833_v22 }
 0x192   :  { %1650 = vmatpush2.bf16.msra.mxu1 %v2831_v24 }
 0x193   :  { %1651 = vmatprep.subr.bf16.mxu1 %v2839_v26 }
 0x196   :  { %1652 = vmatpush2.bf16.msra.mxu1 %v2837_v28 }
 0x197   :  { %1653 = vmatprep.subr.bf16.mxu1 %v2845_v31 }
 0x19a   :  { %1654 = vmatpush2.bf16.msra.mxu1 %v2843_v33 }
 0x19b   :  { %1655 = vmatprep.subr.bf16.mxu1 %v2851_v35 }
 0x19e   :  { %1656 = vmatpush2.bf16.msra.mxu1 %v2849_v37  ;;  %v1158_v37 = vrot.slane %v1110_v36, %v3517_v47 }
 0x19f   :  { %1657 = vmatprep.subr.bf16.mxu1 %v2857_v39 }
 0x1a2   :  { %1658 = vmatpush2.bf16.msra.mxu1 %v2855_v41  ;;  %v1162_v41 = vrot.slane %v1110_v36, %v3523_v49 }
 0x1a3   :  { %1659 = vmatprep.subr.bf16.mxu1 %v2863_v43  ;;  %v1171_v43 = vrot.slane %v1111_v38, %v3517_v47 }
 0x1a6   :  { %1660 = vmatpush2.bf16.msra.mxu1 %v2861_v45 }
 0x1a7   :  { %2554 = vmatprep.subr.bf16.mxu1 %v2872_v46  ;;  %v1175_v46 = vrot.slane %v1111_v38, %v3523_v49 }
 0x229   :  { %v1101_v52 = vpop.f32.mrf.mxu1 }
 0x22a   :  { %v1102_v53 = vadd.f32 %v1101_v52, %v980_v50 }
 0x22b   :  { %v1103_v54 = vpop.f32.mrf.mxu1 }
 0x22c   :  { %v1108_v55 = vmax.f32 %v1102_v53, 0.0  ;;  %v1104_v56 = vadd.f32 %v1103_v54, %v984_v51  ;;  %v2864_v53 = vld [vmem:[%s3727_s13 + $0x38] sm:$0xff]  }
 0x22d   :  { %v1105_v57 = vpop.f32.mrf.mxu1 }
 0x22e   :  { %v1112_v58 = vsel %vm921_vm1, %v1108_v55, 0.0  ;;  %v1109_v59 = vmax.f32 %v1104_v56, 0.0  ;;  %v2876_v56 = vld [vmem:[%s3728_s12 + $0x70] sm:$0xff]  }
 0x22f   :  { %v1113_v60 = vrot.slane %v1112_v58, 4  ;;  %v1106_v61 = vpop.f32.mrf.mxu1  ;;  %v2865_v57 = vld [vmem:[%s3727_s13 + $0x30] sm:$0xff]  }
 0x230   :  { %v1119_v62 = vsel %vm921_vm1, %v1109_v59, 0.0  ;;  %v2882_v61 = vld [vmem:[%s3728_s12 + $0x28] sm:$0xff]  }
 0x231   :  { %v1114_v63 = vadd.f32 %v1113_v60, %v1112_v58  ;;  %v1120_v0 = vrot.slane %v1119_v62, 4  ;;  %v2878_v58 = vld [vmem:[%s3728_s12 + $0x30] sm:$0xff]   ;;  %v2866_v60 = vld [vmem:[%s3727_s13 + $0x28] sm:$0xff]  }
 0x233   :  { %v1115_v1 = vrot.slane %v1114_v63, 2  ;;  %v1121_v2 = vadd.f32 %v1120_v0, %v1119_v62  ;;  %v2884_v62 = vld [vmem:[%s3728_s12 + $0x60] sm:$0xff]  }
 0x234   :  { %v2886_v0 = vld [vmem:[%s3728_s12 + $0x20] sm:$0xff]  }
 0x235   :  { %v1116_v3 = vadd.f32 %v1115_v1, %v1114_v63  ;;  %v1122_v4 = vrot.slane %v1121_v2, 2  ;;  %v2867_v63 = vld [vmem:[%s3727_s13 + $0x20] sm:$0xff]   ;;  %v2888_v1 = vld [vmem:[%s3728_s12 + $0x58] sm:$0xff]  }
 0x237   :  { %v1117_v5 = vrot.slane %v1116_v3, 1  ;;  %v1123_v6 = vadd.f32 %v1122_v4, %v1121_v2  ;;  %v2868_v2 = vld [vmem:[%s3727_s13 + $0x18] sm:$0xff]   ;;  %v2892_v4 = vld [vmem:[%s3728_s12 + $0x50] sm:$0xff]  }
 0x239   :  { %v1118_v7 = vadd.f32 %v1117_v5, %v1116_v3  ;;  %v1124_v8 = vrot.slane %v1123_v6, 1  ;;  %v2890_v3 = vld [vmem:[%s3728_s12 + $0x18] sm:$0xff]   ;;  %v2869_v5 = vld [vmem:[%s3727_s13 + $0x10] sm:$0xff]  }
 0x23b   :  { %v1126_v9 = vmul.f32 0.5, %v1118_v7  ;;  %v1125_v10 = vadd.f32 %v1124_v8, %v1123_v6  ;;  %v2894_v6 = vld [vmem:[%s3728_s12 + $0x10] sm:$0xff]   ;;  %v2870_v7 = vld [vmem:[%s3727_s13 + $0x8] sm:$0xff]   ;;  %v2871_v8 = vld [vmem:[%s3727_s13] sm:$0xff]  }
 0x23d   :  { %v1128_v11 = vsub.f32 %v1108_v55, %v1126_v9  ;;  %v1127_v12 = vmul.f32 0.5, %v1125_v10  ;;  %v2874_v55 = vld [vmem:[%s3728_s12 + $0x38] sm:$0xff]   ;;  %v1738_v10 = vld [vmem:[%s3732_s1] sm:$0x1] }
 0x23e   :  { %v2873_v9 = vld [vmem:[%s3728_s12 + $0xf8] sm:$0xff]  }
 0x23f   :  { %v1130_v13 = vmul.f32 %v1128_v11, %v1128_v11  ;;  %v1129_v14 = vsub.f32 %v1109_v59, %v1127_v12  ;;  %v2880_v59 = vld [vmem:[%s3728_s12 + $0x68] sm:$0xff]   ;;  %v2877_v12 = vld [vmem:[%s3728_s12 + $0xf0] sm:$0xff]  }
 0x241   :  { %v1132_v15 = vsel %vm921_vm1, %v1130_v13, 0.0  ;;  %v1131_v16 = vmul.f32 %v1129_v14, %v1129_v14  ;;  %v2879_v13 = vld [vmem:[%s3728_s12 + $0xb0] sm:$0xff]  }
 0x242   :  { %v1133_v17 = vrot.slane %v1132_v15, 4 }
 0x243   :  { %v1139_v18 = vsel %vm921_vm1, %v1131_v16, 0.0  ;;  %v2885_v16 = vld [vmem:[%s3728_s12 + $0xe0] sm:$0xff]  }
 0x244   :  { %v1134_v19 = vadd.f32 %v1133_v17, %v1132_v15  ;;  %v1140_v21 = vrot.slane %v1139_v18, 4  ;;  %v2883_v15 = vld [vmem:[%s3728_s12 + $0xa8] sm:$0xff]   ;;  %v2887_v17 = vld [vmem:[%s3728_s12 + $0xa0] sm:$0xff]  }
 0x246   :  { %v1135_v22 = vrot.slane %v1134_v19, 2  ;;  %v1141_v23 = vadd.f32 %v1140_v21, %v1139_v18  ;;  %v2889_v18 = vld [vmem:[%s3728_s12 + $0xd8] sm:$0xff]   ;;  %v2893_v21 = vld [vmem:[%s3728_s12 + $0xd0] sm:$0xff]  }
 0x248   :  { %v1136_v24 = vadd.f32 %v1135_v22, %v1134_v19  ;;  %v1142_v25 = vrot.slane %v1141_v23, 2  ;;  %v2891_v19 = vld [vmem:[%s3728_s12 + $0x98] sm:$0xff]   ;;  %v2895_v22 = vld [vmem:[%s3728_s12 + $0x90] sm:$0xff]  }
 0x24a   :  { %v1137_v26 = vrot.slane %v1136_v24, 1  ;;  %v1143_v27 = vadd.f32 %v1142_v25, %v1141_v23  ;;  %v2896_v23 = vld [vmem:[%s3728_s12 + $0x48] sm:$0xff]  }
 0x24b   :  { %v2898_v25 = vld [vmem:[%s3728_s12 + $0x8] sm:$0xff]  }
 0x24c   :  { %v1138_v28 = vadd.f32 %v1137_v26, %v1136_v24  ;;  %v1144_v30 = vrot.slane %v1143_v27, 1  ;;  %v2897_v24 = vld [vmem:[%s3728_s12 + $0xc8] sm:$0xff]  }
 0x24d   :  { %v2899_v26 = vld [vmem:[%s3728_s12 + $0x88] sm:$0xff]  }
 0x24e   :  { %v1146_v31 = vmul.f32 0.5, %v1138_v28  ;;  %v1145_v32 = vadd.f32 %v1144_v30, %v1143_v27  ;;  %v2900_v27 = vld [vmem:[%s3728_s12 + $0x40] sm:$0xff]  }
 0x24f   :  { %v2901_v28 = vld [vmem:[%s3728_s12 + $0xc0] sm:$0xff]  }
 0x250   :  { %v1148_v33 = vadd.f32 1e-05, %v1146_v31  ;;  %v1147_v34 = vmul.f32 0.5, %v1145_v32  ;;  %v2902_v30 = vld [vmem:[%s3728_s12] sm:$0xff]   ;;  %v1258_v32 = vsub.s32 2, %v3087_v29 }
 0x251   :  { %v2903_v31 = vld [vmem:[%s3728_s12 + $0x80] sm:$0xff]  }
 0x252   :  { %2914 = vrsqrt.f32 %v1148_v33  ;;  %v1149_v35 = vadd.f32 1e-05, %v1147_v34  ;;  %v1246_v33 = vld [vmem:[%s3734_s11] sm:$0xf]  ;;  %v1262_v34 = vsub.s32 3, %v3087_v29  ;;  %v2904_v29 = vld [vmem:[%s3733_s15 + $0x38] sm:$0xff]  }
 0x253   :  { %v1259_v36 = vrot.slane %v1246_v33, %v1258_v32 }
 0x254   :  { %2916 = vrsqrt.f32 %v1149_v35  ;;  %v1251_v35 = vrot.slane %v1246_v33, %v3517_v47  ;;  %v1263_v38 = vrot.slane %v1246_v33, %v1262_v34 }
 0x25f   :  { %v2915_v39 = vpop.eup %2914 }
 0x260   :  { %v1152_v40 = vmul.f32 %v2915_v39, %v1128_v11  ;;  %v2875_v11 = vld [vmem:[%s3728_s12 + $0xb8] sm:$0xff]  }
 0x261   :  { %v2917_v42 = vpop.eup %2916 }
 0x262   :  { %v1165_v44 = vmul.f32 %v1158_v37, %v1152_v40  ;;  %v1153_v45 = vmul.f32 %v2917_v42, %v1129_v14  ;;  %v2881_v14 = vld [vmem:[%s3728_s12 + $0xe8] sm:$0xff]   ;;  %v1255_v37 = vrot.slane %v1246_v33, %v3523_v49 }
 0x264   :  { %v1166_v48 = vmul.f32 %v1162_v41, %v1153_v45  ;;  %v1178_v50 = vadd.f32 %v1171_v43, %v1165_v44 }
 0x266   :  { %v1179_v51 = vadd.f32 %v1175_v46, %v1166_v48  ;;  %v1180_v54 = vpack.c.bf16 %v1178_v50, %v1178_v50 }
 0x268   :  { %v1181_v52 = vpack.c.bf16 %v1179_v51, %v1179_v51 }
 0x26a   :  { %1620 = vmatprep.mubr.bf16.mxu0 %v1181_v52  ;;  %1661 = vmatprep.mubr.bf16.mxu1 %v1181_v52 }
 0x26b   :  { %1621 = vmatmul.mubr.bf16.vlgmr.msra.gmra.mxu0 %v1180_v54  ;;  %1662 = vmatmul.mubr.bf16.vlgmr.msra.gmra.mxu1 %v1180_v54 }
 0x26c   :  { %2628 = vmatpush3.bf16.msra.mxu0 %v2864_v53  ;;  %2643 = vmatprep.mubr.msk.bf16.mxu0 %vm2920_vm0, %v2919_v20 }
 0x26d   :  { %2629 = vmatprep.subr.bf16.mxu0 %v2919_v20  ;;  %2555 = vmatpush3.bf16.msra.mxu1 %v2874_v55  ;;  %v2905_v55 = vld [vmem:[%s3733_s15 + $0x30] sm:$0xff]  }
 0x26e   :  { %2556 = vmatprep.subr.bf16.mxu1 %v2876_v56  ;;  %v2906_v56 = vld [vmem:[%s3733_s15 + $0x28] sm:$0xff]  }
 0x270   :  { %2630 = vmatpush3.bf16.msra.mxu0 %v2865_v57  ;;  %v2907_v57 = vld [vmem:[%s3733_s15 + $0x20] sm:$0xff]  }
 0x271   :  { %2631 = vmatprep.subr.bf16.mxu0 %v2919_v20  ;;  %2557 = vmatpush3.bf16.msra.mxu1 %v2878_v58 }
 0x272   :  { %2558 = vmatprep.subr.bf16.mxu1 %v2880_v59 }
 0x274   :  { %2632 = vmatpush3.bf16.msra.mxu0 %v2866_v60 }
 0x275   :  { %2633 = vmatprep.subr.bf16.mxu0 %v2919_v20  ;;  %2559 = vmatpush3.bf16.msra.mxu1 %v2882_v61 }
 0x276   :  { %2560 = vmatprep.subr.bf16.mxu1 %v2884_v62  ;;  %v2908_v62 = vld [vmem:[%s3733_s15 + $0x18] sm:$0xff]  }
 0x278   :  { %2634 = vmatpush3.bf16.msra.mxu0 %v2867_v63  ;;  %v2909_v63 = vld [vmem:[%s3733_s15 + $0x10] sm:$0xff]  }
 0x279   :  { %2635 = vmatprep.subr.bf16.mxu0 %v2919_v20  ;;  %2561 = vmatpush3.bf16.msra.mxu1 %v2886_v0  ;;  %v2910_v0 = vld [vmem:[%s3733_s15 + $0x8] sm:$0xff]  }
 0x27a   :  { %2562 = vmatprep.subr.bf16.mxu1 %v2888_v1  ;;  %v2911_v1 = vld [vmem:[%s3733_s15] sm:$0xff]  }
 0x27c   :  { %2636 = vmatpush3.bf16.msra.mxu0 %v2868_v2  ;;  %v22_v2 = vstv %s3735_s16 }
 0x27d   :  { %2637 = vmatprep.subr.bf16.mxu0 %v2919_v20  ;;  %2563 = vmatpush3.bf16.msra.mxu1 %v2890_v3  ;;  %23 = vst [vmem:[#allocation2] sm:$0x1] %v22_v2 }
 0x27e   :  { %2564 = vmatprep.subr.bf16.mxu1 %v2892_v4 }
 0x280   :  { %2638 = vmatpush3.bf16.msra.mxu0 %v2869_v5 }
 0x281   :  { %2639 = vmatprep.subr.bf16.mxu0 %v2919_v20  ;;  %2565 = vmatpush3.bf16.msra.mxu1 %v2894_v6 }
 0x282   :  { %2566 = vmatprep.subr.bf16.mxu1 %v2896_v23 }
 0x284   :  { %2640 = vmatpush3.bf16.msra.mxu0 %v2870_v7 }
 0x285   :  { %2641 = vmatprep.subr.bf16.mxu0 %v2919_v20  ;;  %2567 = vmatpush3.bf16.msra.mxu1 %v2898_v25 }
 0x286   :  { %2568 = vmatprep.subr.bf16.mxu1 %v2900_v27 }
 0x288   :  { %2642 = vmatpush3.bf16.msra.mxu0 %v2871_v8 }
 0x289   :  { %2576 = vmatprep.subr.bf16.mxu0 %v2873_v9  ;;  %2569 = vmatpush3.bf16.msra.mxu1 %v2902_v30 }
 0x28a   :  { %2647 = vmatprep.subr.bf16.mxu1 %v2919_v20 }
 0x28b   :  { %2644 = vmatmul.mubr.bf16.vlgmr.msra.gmra.mxu0 %v1738_v10 }
 0x28c   :  { %2577 = vmatpush3.bf16.msra.mxu0 %v2875_v11 }
 0x28d   :  { %2578 = vmatprep.subr.bf16.mxu0 %v2877_v12 }
 0x290   :  { %2579 = vmatpush3.bf16.msra.mxu0 %v2879_v13 }
 0x291   :  { %2580 = vmatprep.subr.bf16.mxu0 %v2881_v14 }
 0x294   :  { %2581 = vmatpush3.bf16.msra.mxu0 %v2883_v15 }
 0x295   :  { %2582 = vmatprep.subr.bf16.mxu0 %v2885_v16 }
 0x298   :  { %2583 = vmatpush3.bf16.msra.mxu0 %v2887_v17 }
 0x299   :  { %2584 = vmatprep.subr.bf16.mxu0 %v2889_v18  ;;  %v2439_v18 = vld [vmem:[#allocation2] ss:$0 sm:$0xff] }
 0x29c   :  { %2585 = vmatpush3.bf16.msra.mxu0 %v2891_v19 }
 0x29d   :  { %2586 = vmatprep.subr.bf16.mxu0 %v2893_v21 }
 0x2a0   :  { %2587 = vmatpush3.bf16.msra.mxu0 %v2895_v22 }
 0x2a1   :  { %2588 = vmatprep.subr.bf16.mxu0 %v2897_v24 }
 0x2a4   :  { %2589 = vmatpush3.bf16.msra.mxu0 %v2899_v26 }
 0x2a5   :  { %2590 = vmatprep.subr.bf16.mxu0 %v2901_v28 }
 0x2a8   :  { %2591 = vmatpush3.bf16.msra.mxu0 %v2903_v31 }
 0x32b   :  { %v1622_v39 = vpop.f32.mrf.mxu0  ;;  %v1663_v40 = vpop.f32.mrf.mxu1 }
 0x32c   :  { %v1623_v41 = vadd.f32 %v1622_v39, %v1251_v35  ;;  %v1664_v42 = vadd.f32 %v1663_v40, %v1259_v36 }
 0x32d   :  { %v1624_v43 = vpop.f32.mrf.mxu0  ;;  %v1665_v44 = vpop.f32.mrf.mxu1 }
 0x32e   :  { %v1625_v45 = vadd.f32 %v1624_v43, %v1255_v37  ;;  %v1666_v46 = vadd.f32 %v1665_v44, %v1263_v38  ;;  %v1670_v47 = vpack.c.bf16 %v1623_v41, %v1623_v41  ;;  %v1672_v53 = vpack.c.bf16 %v1664_v42, %v1664_v42 }
 0x32f   :  { %v1626_v48 = vpop.f32.mrf.mxu0  ;;  %v1667_v50 = vpop.f32.mrf.mxu1 }
 0x330   :  { %v1671_v51 = vpack.c.bf16 %v1625_v45, %v1625_v45  ;;  %v1673_v52 = vpack.c.bf16 %v1666_v46, %v1666_v46 }
 0x331   :  { %v1627_v49 = vpop.f32.mrf.mxu0  ;;  %v1668_v54 = vpop.f32.mrf.mxu1 }
 0x332   :  { %2067 = vmatprep.mubr.bf16.mxu1 %v1671_v51  ;;  %2107 = vmatprep.mubr.bf16.mxu0 %v1673_v52 }
 0x333   :  { %2068 = vmatmul.mubr.bf16.vlgmr.msra.gmra.mxu1 %v1670_v47  ;;  %2108 = vmatmul.mubr.bf16.vlgmr.msra.gmra.mxu0 %v1672_v53 }
 0x334   :  { %2648 = vmatpush3.bf16.msra.mxu1 %v2904_v29  ;;  %2663 = vmatprep.mubr.msk.bf16.mxu1 %vm2920_vm0, %v2919_v20 }
 0x335   :  { %2649 = vmatprep.subr.bf16.mxu1 %v2919_v20 }
 0x338   :  { %2650 = vmatpush3.bf16.msra.mxu1 %v2905_v55 }
 0x339   :  { %2651 = vmatprep.subr.bf16.mxu1 %v2919_v20 }
 0x33c   :  { %2652 = vmatpush3.bf16.msra.mxu1 %v2906_v56 }
 0x33d   :  { %2653 = vmatprep.subr.bf16.mxu1 %v2919_v20 }
 0x340   :  { %2654 = vmatpush3.bf16.msra.mxu1 %v2907_v57 }
 0x341   :  { %2655 = vmatprep.subr.bf16.mxu1 %v2919_v20 }
 0x344   :  { %2656 = vmatpush3.bf16.msra.mxu1 %v2908_v62 }
 0x345   :  { %2657 = vmatprep.subr.bf16.mxu1 %v2919_v20 }
 0x348   :  { %2658 = vmatpush3.bf16.msra.mxu1 %v2909_v63 }
 0x349   :  { %2659 = vmatprep.subr.bf16.mxu1 %v2919_v20 }
 0x34b   :  { %v1837_v58 = vpop.f32.mrf.mxu0 }
 0x34c   :  { %2660 = vmatpush3.bf16.msra.mxu1 %v2910_v0 }
 0x34d   :  { %v2645_v59 = vpop.f32.mrf.mxu0  ;;  %2661 = vmatprep.subr.bf16.mxu1 %v2919_v20  ;;  %v2438_v20 = vld [vmem:[%s3736_s14] ss:$0 sm:$0xff] }
 0x34f   :  { %v1840_v60 = vpop.f32.mrf.mxu0 }
 0x350   :  { %2662 = vmatpush3.bf16.msra.mxu1 %v2911_v1 }
 0x351   :  { %v2646_v61 = vpop.f32.mrf.mxu0 }
 0x3f3   :  { %v2570_v3 = vpop.f32.mrf.mxu1  ;;  %v2592_v4 = vpop.f32.mrf.mxu0 }
 0x3f5   :  { %v2571_v5 = vpop.f32.mrf.mxu1  ;;  %v2593_v6 = vpop.f32.mrf.mxu0 }
 0x3f6   :  { %v2572_v7 = vadd.f32 %v2571_v5, %v2570_v3  ;;  %v2594_v11 = vadd.f32 %v2593_v6, %v2592_v4 }
 0x3f7   :  { %v2573_v8 = vpop.f32.mrf.mxu1  ;;  %v2595_v9 = vpop.f32.mrf.mxu0 }
 0x3f8   :  { %v2070_v10 = vadd.f32 %v2572_v7, %v1837_v58 }
 0x3f9   :  { %v2574_v12 = vpop.f32.mrf.mxu1  ;;  %v2596_v13 = vpop.f32.mrf.mxu0 }
 0x3fa   :  { %v2110_v14 = vadd.f32 %v2594_v11, %v2070_v10 }
 0x3fc   :  { %v2122_v15 = vadd.f32 %v2438_v20, %v2110_v14 }
 0x3fe   :  { %v2123_v16 = vmax.f32 %v2122_v15, 0.0 }
 0x400   :  { %v2124_v17 = vpack.c.bf16 %v2123_v16, %v2123_v16 }
 0x402   :  { %2664 = vmatmul.mubr.bf16.vlgmr.msra.gmra.mxu1 %v2124_v17 }
 0x4c2   :  { %v2230_v19 = vpop.f32.mrf.mxu1 }
 0x4c3   :  { %v2231_v21 = vadd.f32 %v2439_v18, %v2230_v19 }
 0x4c4   :  { %v2665_v22 = vpop.f32.mrf.mxu1 }
 0x4c5   :  { %2237 = vst.msk [vmem:[%s3737_s17] sm:$0x3] %vm2236_vm2, %v2231_v21 }
 0x4c6   :  { %v2233_v23 = vpop.f32.mrf.mxu1 }
 0x4c8   :  { %v2666_v24 = vpop.f32.mrf.mxu1 }

</bundles_post_ra>
